<compile_context>
chip_gen: v7x
topology: tpu7x:2x2x1
jax: 0.10.0
libtpu: 0.0.40
codegen_flags: <defaults>
</compile_context>

<pallas_src>
import functools

import jax
import jax.numpy as jnp
from jax import lax
from jax.experimental import pallas as pl
from jax.experimental.pallas import tpu as pltpu

COMPUTE_DTYPE = jnp.bfloat16      # MXU operand dtype (accumulation/epilogue stay f32)
VMEM_LIMIT = 32 * 1024 * 1024     # explicit scoped-VMEM limit (safe on v5e/v6e/v7x)


def _round_up(x, m):
    return ((x + m - 1) // m) * m


# --------------------------------------------------------------------------
# Kernel 1: fused 1x1-conv (matmul) * scale + bias + activation
#   used for the three MSIB input 1x1 convs (+ folded BatchNorm, SiLU).
# --------------------------------------------------------------------------
def _mm_kernel(x_ref, w_ref, s_ref, b_ref, o_ref, *, act):
    y = jnp.dot(x_ref[...], w_ref[...], preferred_element_type=jnp.float32)
    y = y * s_ref[...] + b_ref[...]
    if act == "relu":
        y = jnp.maximum(y, 0.0)
    elif act == "silu":
        y = y * jax.nn.sigmoid(y)
    o_ref[...] = y.astype(o_ref.dtype)


def matmul_bn_act(x, w, scale, bias, act="none", out_dtype=jnp.float32,
                  max_tile_m=1024):
    M, K = x.shape
    _, N = w.shape
    # pick one big tile (multiple of 8); pad M instead of shrinking the tile
    Mp = _round_up(M, 8)
    if Mp <= max_tile_m:
        tile_m = Mp
    else:
        tile_m = max_tile_m
        Mp = _round_up(M, tile_m)
    if Mp != M:
        x = jnp.pad(x, ((0, Mp - M), (0, 0)))
    scale2 = jnp.reshape(scale, (1, N)).astype(jnp.float32)
    bias2 = jnp.reshape(bias, (1, N)).astype(jnp.float32)
    out = pl.pallas_call(
        functools.partial(_mm_kernel, act=act),
        out_shape=jax.ShapeDtypeStruct((Mp, N), out_dtype),
        grid_spec=pltpu.PrefetchScalarGridSpec(
            num_scalar_prefetch=0,
            grid=(Mp // tile_m,),
            in_specs=[
                pl.BlockSpec((tile_m, K), lambda i: (i, 0)),
                pl.BlockSpec((K, N), lambda i: (0, 0)),
                pl.BlockSpec((1, N), lambda i: (0, 0)),
                pl.BlockSpec((1, N), lambda i: (0, 0)),
            ],
            out_specs=pl.BlockSpec((tile_m, N), lambda i: (i, 0)),
        ),
        compiler_params=pltpu.CompilerParams(
            dimension_semantics=("parallel",),
            vmem_limit_bytes=VMEM_LIMIT),
    )(x.astype(COMPUTE_DTYPE), w.astype(COMPUTE_DTYPE), scale2, bias2)
    return out[:M] if Mp != M else out


# --------------------------------------------------------------------------
# Kernel 2: fused MSIB tail.
#   Conv3d(3,3,3,pad=1) on the depth-3 stack  +  BN3d  +  LeakyReLU(0.1)
#   +  residual add  +  MaxPool3d(3,1,1) + AvgPool3d(3,1,1)   ... per batch.
#   Depth is folded into channels (3*C); the 3x3 spatial im2col is done
#   in-kernel with shifted slices of the VMEM-resident padded slab.
# --------------------------------------------------------------------------
def _msib_conv3d_kernel(xp_ref, w_ref, sb_ref, o_ref):
    _, Hp, Wp, C3 = xp_ref.shape
    H, W = Hp - 2, Wp - 2
    C = C3 // 3
    x = xp_ref[0]                                        # (Hp, Wp, 3C) f32

    acc = jnp.zeros((H * W, C3), jnp.float32)
    for kh in range(3):
        for kw in range(3):
            patch = lax.slice(x, (kh, kw, 0), (kh + H, kw + W, C3))
            patch = patch.reshape(H * W, C3).astype(COMPUTE_DTYPE)
            acc = acc + jnp.dot(patch, w_ref[kh * 3 + kw],
                                preferred_element_type=jnp.float32)

    y = acc * sb_ref[0] + sb_ref[1]                      # folded BN3d + conv bias
    y = jnp.where(y > 0, y, 0.1 * y)                     # LeakyReLU(0.1) as in reference

    xf = lax.slice(x, (1, 1, 0), (1 + H, 1 + W, C3)).reshape(H * W, C3)
    z = y + xf                                           # residual (f32)

    z0 = lax.slice(z, (0, 0), (H * W, C))                # depth 0
    z1 = lax.slice(z, (0, C), (H * W, 2 * C))            # depth 1
    z2 = lax.slice(z, (0, 2 * C), (H * W, 3 * C))        # depth 2
    out = jnp.maximum(jnp.maximum(z0, z1), z2) + (z0 + z1 + z2) * (1.0 / 3.0)
    o_ref[0] = out.reshape(H, W, C).astype(o_ref.dtype)


def msib_conv3d_fused(xp, wbig, sb):
    B, Hp, Wp, C3 = xp.shape
    H, W = Hp - 2, Wp - 2
    C = C3 // 3
    return pl.pallas_call(
        _msib_conv3d_kernel,
        out_shape=jax.ShapeDtypeStruct((B, H, W, C), jnp.float32),
        grid_spec=pltpu.PrefetchScalarGridSpec(
            num_scalar_prefetch=0,
            grid=(B,),
            in_specs=[
                pl.BlockSpec((1, Hp, Wp, C3), lambda b: (b, 0, 0, 0)),
                pl.BlockSpec((9, C3, C3), lambda b: (0, 0, 0)),
                pl.BlockSpec((2, 1, C3), lambda b: (0, 0, 0)),
            ],
            out_specs=pl.BlockSpec((1, H, W, C), lambda b: (b, 0, 0, 0)),
        ),
        compiler_params=pltpu.CompilerParams(
            dimension_semantics=("parallel",),
            vmem_limit_bytes=VMEM_LIMIT),
    )(xp, wbig, sb)


# --------------------------------------------------------------------------
# Kernel 3: fused AGFB + DESFB, one grid step per batch element.
#   conv1/conv2 -> sigmoid gates -> conv3/conv4 (BN+ReLU) -> weighted fuse +
#   SiLU -> conv5 -> second fuse + SiLU -> conv6 -> global max/avg pool ->
#   desfb conv1/conv2 -> sigmoid + 2-way softmax -> weighted sum ->
#   desfb conv3 (BN+ReLU).  Everything stays VMEM-resident.
# --------------------------------------------------------------------------
def _agfb_desfb_kernel(x1_ref, sem_ref, wA_ref, wB_ref, vec_ref, wg_ref, o_ref):
    f32 = jnp.float32
    cd = COMPUTE_DTYPE
    x1 = x1_ref[0]                        # (HW, C1) bf16
    sem = sem_ref[0]                      # (HW, C1) bf16
    wc1, wc2 = wA_ref[0], wA_ref[1]       # (C1, half) bf16
    wc3, wc4, wc5, wc6, wd1, wd2, wd3 = [wB_ref[i] for i in range(7)]
    s3, b3 = vec_ref[0], vec_ref[1]       # (1, half) f32
    s4v, b4 = vec_ref[2], vec_ref[3]
    b5, b6 = vec_ref[4], vec_ref[5]
    sd3, bd3 = vec_ref[6], vec_ref[7]

    # ---- AGFB ----
    e1 = jnp.dot(x1, wc1, preferred_element_type=f32)        # conv1 (no bias)
    s1 = jnp.dot(sem, wc2, preferred_element_type=f32)       # conv2 (no bias)
    e1_sig = jax.nn.sigmoid(e1)
    s1_sig = jax.nn.sigmoid(s1)

    e3 = jnp.maximum(jnp.dot(e1.astype(cd), wc3, preferred_element_type=f32) * s3 + b3, 0.0)
    s4 = jnp.maximum(jnp.dot(s1.astype(cd), wc4, preferred_element_type=f32) * s4v + b4, 0.0)

    w10, w11, w12 = wg_ref[0, 0], wg_ref[0, 1], wg_ref[0, 2]
    w20, w21, w22 = wg_ref[1, 0], wg_ref[1, 1], wg_ref[1, 2]

    g1 = w10 * e3 + w11 * (e3 * e1_sig) + w12 * ((1.0 - e1_sig) * s1_sig * s4)
    g1 = g1 * jax.nn.sigmoid(g1)                             # SiLU
    e_out = jnp.dot(g1.astype(cd), wc5, preferred_element_type=f32) + b5

    g2 = w20 * s4 + w21 * (s4 * s1_sig) + w22 * ((1.0 - s1_sig) * e1_sig * e_out)
    g2 = g2 * jax.nn.sigmoid(g2)
    s_out = jnp.dot(g2.astype(cd), wc6, preferred_element_type=f32) + b6

    # ---- DESFB ----
    mx = jnp.max(e_out, axis=0, keepdims=True)               # AdaptiveMaxPool2d(1)
    av = jnp.mean(s_out, axis=0, keepdims=True)              # AdaptiveAvgPool2d(1)
    ew = jax.nn.sigmoid(jnp.dot(mx.astype(cd), wd1, preferred_element_type=f32))
    sw = jax.nn.sigmoid(jnp.dot(av.astype(cd), wd2, preferred_element_type=f32))
    m = jnp.maximum(ew, sw)                                  # softmax over the pair
    ee = jnp.exp(ew - m)
    es = jnp.exp(sw - m)
    inv = 1.0 / (ee + es)
    comb = e_out * (ee * inv) + s_out * (es * inv)           # (HW, half)

    out = jnp.maximum(
        jnp.dot(comb.astype(cd), wd3, preferred_element_type=f32) * sd3 + bd3, 0.0)
    o_ref[0] = out.astype(o_ref.dtype)


def agfb_desfb_fused(x1_rows, sem_rows, wA, wB, vec, wg):
    B, HW, C1 = x1_rows.shape
    half = wA.shape[2]
    return pl.pallas_call(
        _agfb_desfb_kernel,
        out_shape=jax.ShapeDtypeStruct((B, HW, half), jnp.float32),
        grid_spec=pltpu.PrefetchScalarGridSpec(
            num_scalar_prefetch=0,
            grid=(B,),
            in_specs=[
                pl.BlockSpec((1, HW, C1), lambda b: (b, 0, 0)),
                pl.BlockSpec((1, HW, C1), lambda b: (b, 0, 0)),
                pl.BlockSpec((2, C1, half), lambda b: (0, 0, 0)),
                pl.BlockSpec((7, half, half), lambda b: (0, 0, 0)),
                pl.BlockSpec((8, 1, half), lambda b: (0, 0, 0)),
                pl.BlockSpec(memory_space=pltpu.MemorySpace.SMEM),
            ],
            out_specs=pl.BlockSpec((1, HW, half), lambda b: (b, 0, 0)),
        ),
        compiler_params=pltpu.CompilerParams(
            dimension_semantics=("parallel",),
            vmem_limit_bytes=VMEM_LIMIT),
    )(x1_rows, sem_rows, wA, wB, vec, wg)


# --------------------------------------------------------------------------
# Plain-JAX glue: interpolation (gathers) and parameter / BN-fold setup
# --------------------------------------------------------------------------
def nearest_resize(x, h_out, w_out):
    # PyTorch F.interpolate(mode='nearest'): src = floor(dst * in / out)
    _, H, W, _ = x.shape
    hi = (jnp.arange(h_out) * H) // h_out
    wi = (jnp.arange(w_out) * W) // w_out
    return x[:, hi][:, :, wi]


def upsample_bilinear_x2(x):
    # PyTorch bilinear, align_corners=False, scale_factor=2.  x: (B, H, W, C)
    _, H, W, _ = x.shape

    def idx_lam(out_size, in_size):
        scale = in_size / out_size
        d = jnp.arange(out_size, dtype=jnp.float32)
        src = (d + 0.5) * scale - 0.5
        src = jnp.maximum(src, 0.0)
        i0 = jnp.minimum(jnp.floor(src).astype(jnp.int32), in_size - 1)
        i1 = jnp.minimum(i0 + 1, in_size - 1)
        lam = src - i0.astype(jnp.float32)
        return i0, i1, lam

    h0, h1, lh = idx_lam(2 * H, H)
    w0, w1, lw = idx_lam(2 * W, W)
    xr = x[:, h0] * (1.0 - lh)[None, :, None, None] + x[:, h1] * lh[None, :, None, None]
    out = xr[:, :, w0] * (1.0 - lw)[None, None, :, None] + xr[:, :, w1] * lw[None, None, :, None]
    return out


def fold_bn(gamma, beta, mean, var, eps=1e-5):
    scale = gamma / jnp.sqrt(var + eps)
    bias = beta - mean * scale
    return scale, bias


def init_params(key, x1_ch, x2_ch, x3_ch, x4_ch):
    half = x1_ch // 2
    keys = iter(jax.random.split(key, 64))

    def conv_w(cin, cout):
        return jax.random.normal(next(keys), (cin, cout), jnp.float32) / jnp.sqrt(float(cin))

    def bn(c):
        gamma = 1.0 + 0.1 * jax.random.normal(next(keys), (c,), jnp.float32)
        beta = 0.1 * jax.random.normal(next(keys), (c,), jnp.float32)
        mean = 0.1 * jax.random.normal(next(keys), (c,), jnp.float32)
        var = 1.0 + 0.1 * jax.random.uniform(next(keys), (c,), jnp.float32)
        return fold_bn(gamma, beta, mean, var)

    P = {}
    # MSIB
    P["msib_c1_w"], P["msib_c1_sb"] = conv_w(x2_ch, x1_ch), bn(x1_ch)
    P["msib_c2_w"], P["msib_c2_sb"] = conv_w(x3_ch, x1_ch), bn(x1_ch)
    P["msib_c3_w"], P["msib_c3_sb"] = conv_w(x4_ch, x1_ch), bn(x1_ch)
    P["msib_c3d_w"] = 0.05 * jax.random.normal(next(keys), (x1_ch, x1_ch, 3, 3, 3), jnp.float32)
    P["msib_c3d_b"] = 0.1 * jax.random.normal(next(keys), (x1_ch,), jnp.float32)
    P["msib_bn3d_sb"] = bn(x1_ch)
    # AGFB
    P["agfb_c1_w"] = conv_w(x1_ch, half)
    P["agfb_c2_w"] = conv_w(x1_ch, half)
    P["agfb_c3_w"], P["agfb_c3_sb"] = conv_w(half, half), bn(half)
    P["agfb_c4_w"], P["agfb_c4_sb"] = conv_w(half, half), bn(half)
    P["agfb_c5_w"], P["agfb_c5_b"] = conv_w(half, half), 0.1 * jax.random.normal(next(keys), (half,), jnp.float32)
    P["agfb_c6_w"], P["agfb_c6_b"] = conv_w(half, half), 0.1 * jax.random.normal(next(keys), (half,), jnp.float32)
    P["agfb_w1"] = jnp.ones((3,), jnp.float32)
    P["agfb_w2"] = jnp.ones((3,), jnp.float32)
    # DESFB
    P["desfb_c1_w"] = conv_w(half, half)
    P["desfb_c2_w"] = conv_w(half, half)
    P["desfb_c3_w"], P["desfb_c3_sb"] = conv_w(half, half), bn(half)
    return P


def _to_rows(x):  # NCHW -> (B*H*W, C)
    B, C, H, W = x.shape
    return jnp.transpose(x, (0, 2, 3, 1)).reshape(B * H * W, C), (B, H, W)


def serm_forward(P, x1, x2, x3, x4):
    B, C1, H1, W1 = x1.shape
    half = C1 // 2
    C = C1  # MSIB out channels == x1_ch
    cd = COMPUTE_DTYPE

    # -------------------- MSIB: three 1x1 convs (+BN+SiLU) --------------------
    x2r, (_, H2, W2) = _to_rows(x2)
    x3r, (_, H3, W3) = _to_rows(x3)
    x4r, (_, H4, W4) = _to_rows(x4)
    a2 = matmul_bn_act(x2r, P["msib_c1_w"], *P["msib_c1_sb"], act="silu").reshape(B, H2, W2, C)
    a3 = matmul_bn_act(x3r, P["msib_c2_w"], *P["msib_c2_sb"], act="silu").reshape(B, H3, W3, C)
    a4 = matmul_bn_act(x4r, P["msib_c3_w"], *P["msib_c3_sb"], act="silu").reshape(B, H4, W4, C)
    a3u = nearest_resize(a3, H2, W2)
    a4u = nearest_resize(a4, H2, W2)

    # depth axis folded into channels: x_big[..., d*C + c] == x_fuse[:, d, ..., c]
    x_big = jnp.concatenate([a2, a3u, a4u], axis=-1)            # (B, H2, W2, 3C)
    xp = jnp.pad(x_big, ((0, 0), (1, 1), (1, 1), (0, 0)))        # spatial pad=1

    # block-structured weights implementing Conv3d(3,3,3, padding=1) on depth 3:
    #   wbig[kh, kw, din*C + ci, d*C + co] = w3d[co, ci, din-d+1, kh, kw]   (else 0)
    w = P["msib_c3d_w"]                                          # (Cout, Cin, kd, kh, kw)
    wbig = jnp.zeros((3, 3, 3 * C, 3 * C), jnp.float32)
    for d in range(3):
        for din in range(3):
            kd = din - d + 1
            if 0 <= kd <= 2:
                wbig = wbig.at[:, :, din * C:(din + 1) * C, d * C:(d + 1) * C].set(
                    jnp.transpose(w[:, :, kd], (2, 3, 1, 0)))    # (kh, kw, ci, co)
    wbig = wbig.reshape(9, 3 * C, 3 * C).astype(cd)
    s3d, b3d = P["msib_bn3d_sb"]
    bias_total = P["msib_c3d_b"] * s3d + b3d                     # conv bias folded into BN bias
    sb = jnp.stack([jnp.tile(s3d, 3), jnp.tile(bias_total, 3)]).reshape(2, 1, 3 * C).astype(jnp.float32)

    # fused: conv3d + BN3d + LeakyReLU(0.1) + residual + max/avg depth pool
    sem = msib_conv3d_fused(xp, wbig, sb)                        # (B, H2, W2, C) f32

    # bilinear x2 upsample (align_corners=False)
    sem_up = upsample_bilinear_x2(sem)                           # (B, H1, W1, C)

    # -------------------- fused AGFB + DESFB --------------------
    x1_rows = jnp.transpose(x1, (0, 2, 3, 1)).reshape(B, H1 * W1, C1).astype(cd)
    sem_rows = sem_up.reshape(B, H1 * W1, C1).astype(cd)
    wA = jnp.stack([P["agfb_c1_w"], P["agfb_c2_w"]]).astype(cd)                       # (2, C1, half)
    wB = jnp.stack([P["agfb_c3_w"], P["agfb_c4_w"], P["agfb_c5_w"], P["agfb_c6_w"],
                    P["desfb_c1_w"], P["desfb_c2_w"], P["desfb_c3_w"]]).astype(cd)    # (7, half, half)
    sc3, bb3 = P["agfb_c3_sb"]
    sc4, bb4 = P["agfb_c4_sb"]
    scd3, bbd3 = P["desfb_c3_sb"]
    vec = jnp.stack([sc3, bb3, sc4, bb4, P["agfb_c5_b"], P["agfb_c6_b"],
                     scd3, bbd3]).reshape(8, 1, half).astype(jnp.float32)
    eps = 1e-4
    w1n = P["agfb_w1"] / (jnp.sum(P["agfb_w1"]) + eps)
    w2n = P["agfb_w2"] / (jnp.sum(P["agfb_w2"]) + eps)
    wg = jnp.stack([w1n, w2n]).astype(jnp.float32)                                    # (2, 3) -> SMEM

    out = agfb_desfb_fused(x1_rows, sem_rows, wA, wB, vec, wg)   # (B, H1*W1, half) f32
    out = out.reshape(B, H1, W1, half)
    return jnp.transpose(out, (0, 3, 1, 2))                      # NCHW


if __name__ == "__main__":
    key = jax.random.PRNGKey(0)
    x1_ch, x2_ch, x3_ch, x4_ch = 16, 24, 32, 40
    B = 2
    k1, k2, k3, k4, kp = jax.random.split(key, 5)
    x1 = jax.random.normal(k1, (B, x1_ch, 16, 16), jnp.float32)
    x2 = jax.random.normal(k2, (B, x2_ch, 8, 8), jnp.float32)
    x3 = jax.random.normal(k3, (B, x3_ch, 4, 4), jnp.float32)
    x4 = jax.random.normal(k4, (B, x4_ch, 2, 2), jnp.float32)
    P = init_params(kp, x1_ch, x2_ch, x3_ch, x4_ch)

    out = jax.jit(serm_forward)(P, x1, x2, x3, x4)
    out = jax.block_until_ready(out)
    assert out.shape == (B, x1_ch // 2, 16, 16), out.shape
    assert bool(jnp.all(jnp.isfinite(out)))
    print("KERNEL_OK")
</pallas_src>

<mosaic_0001>
module attributes {stable_mosaic.version = 11 : i64} {
  func.func @_mm_kernel(%arg0: i32, %arg1: memref<32x32xbf16, #tpu.memory_space<vmem>>, %arg2: memref<32x16xbf16, #tpu.memory_space<vmem>>, %arg3: memref<1x16xf32, #tpu.memory_space<vmem>>, %arg4: memref<1x16xf32, #tpu.memory_space<vmem>>, %arg5: memref<32x16xf32, #tpu.memory_space<vmem>>) attributes {dimension_semantics = [#tpu.dimension_semantics<parallel>], iteration_bounds = array<i64: 1>, scalar_prefetch = 0 : i64, scratch_operands = 0 : i64, tpu.core_type = #tpu.core_type<tc>, window_params = [{transform_indices = @transform_0, window_bounds = array<i64: 32, 32>}, {pipeline_mode = #tpu.pipeline_mode<synchronous>, transform_indices = @transform_1, window_bounds = array<i64: 32, 16>}, {pipeline_mode = #tpu.pipeline_mode<synchronous>, transform_indices = @transform_2, window_bounds = array<i64: 1, 16>}, {pipeline_mode = #tpu.pipeline_mode<synchronous>, transform_indices = @transform_3, window_bounds = array<i64: 1, 16>}, {transform_indices = @transform_4, window_bounds = array<i64: 32, 16>}]} {
    %c0 = arith.constant 0 : index
    %c0_0 = arith.constant 0 : index
    %0 = vector.load %arg1[%c0, %c0_0] : memref<32x32xbf16, #tpu.memory_space<vmem>>, vector<32x32xbf16>
    %c0_1 = arith.constant 0 : index
    %c0_2 = arith.constant 0 : index
    %1 = vector.load %arg2[%c0_1, %c0_2] : memref<32x16xbf16, #tpu.memory_space<vmem>>, vector<32x16xbf16>
    %cst = arith.constant dense<0.000000e+00> : vector<32x16xf32>
    %2 = tpu.matmul %0, %1, %cst {dimension_numbers = #tpu.dot_dimension_numbers<[1], [0], [0], [1], [0, 0, 1, 1], [], []>} : vector<32x32xbf16>, vector<32x16xbf16>, vector<32x16xf32> -> vector<32x16xf32>
    %c0_3 = arith.constant 0 : index
    %c0_4 = arith.constant 0 : index
    %3 = vector.load %arg3[%c0_3, %c0_4] : memref<1x16xf32, #tpu.memory_space<vmem>>, vector<1x16xf32>
    %4 = vector.broadcast %3 : vector<1x16xf32> to vector<32x16xf32>
    %5 = arith.mulf %2, %4 : vector<32x16xf32>
    %c0_5 = arith.constant 0 : index
    %c0_6 = arith.constant 0 : index
    %6 = vector.load %arg4[%c0_5, %c0_6] : memref<1x16xf32, #tpu.memory_space<vmem>>, vector<1x16xf32>
    %7 = vector.broadcast %6 : vector<1x16xf32> to vector<32x16xf32>
    %8 = arith.addf %5, %7 : vector<32x16xf32>
    %9 = arith.negf %8 : vector<32x16xf32>
    %10 = math.exp %9 : vector<32x16xf32>
    %cst_7 = arith.constant 1.000000e+00 : f32
    %11 = vector.broadcast %cst_7 : f32 to vector<32x16xf32>
    %12 = arith.addf %11, %10 : vector<32x16xf32>
    %13 = arith.divf %11, %12 : vector<32x16xf32>
    %14 = arith.mulf %8, %13 : vector<32x16xf32>
    %c0_8 = arith.constant 0 : index
    %c0_9 = arith.constant 0 : index
    %15 = vector.load %arg5[%c0_8, %c0_9] : memref<32x16xf32, #tpu.memory_space<vmem>>, vector<32x16xf32>
    tpu.vector_store %arg5[%c0_8, %c0_9], %14 {strides = array<i32>} : memref<32x16xf32, #tpu.memory_space<vmem>>, vector<32x16xf32>,
    return
  }
  func.func @transform_0(%arg0: i32) -> (i32, i32) {
    %c0_i32 = arith.constant 0 : i32
    %c0_i32_0 = arith.constant 0 : i32
    return %arg0, %c0_i32 : i32, i32
  }
  func.func @transform_1(%arg0: i32) -> (i32, i32) {
    %c0_i32 = arith.constant 0 : i32
    %c0_i32_0 = arith.constant 0 : i32
    %c0_i32_1 = arith.constant 0 : i32
    return %c0_i32, %c0_i32_0 : i32, i32
  }
  func.func @transform_2(%arg0: i32) -> (i32, i32) {
    %c0_i32 = arith.constant 0 : i32
    %c0_i32_0 = arith.constant 0 : i32
    %c0_i32_1 = arith.constant 0 : i32
    return %c0_i32, %c0_i32_0 : i32, i32
  }
  func.func @transform_3(%arg0: i32) -> (i32, i32) {
    %c0_i32 = arith.constant 0 : i32
    %c0_i32_0 = arith.constant 0 : i32
    %c0_i32_1 = arith.constant 0 : i32
    return %c0_i32, %c0_i32_0 : i32, i32
  }
  func.func @transform_4(%arg0: i32) -> (i32, i32) {
    %c0_i32 = arith.constant 0 : i32
    %c0_i32_0 = arith.constant 0 : i32
    return %arg0, %c0_i32 : i32, i32
  }
}

module attributes {stable_mosaic.version = 11 : i64} {
  func.func @_mm_kernel(%arg0: i32, %arg1: memref<8x40xbf16, #tpu.memory_space<vmem>>, %arg2: memref<40x16xbf16, #tpu.memory_space<vmem>>, %arg3: memref<1x16xf32, #tpu.memory_space<vmem>>, %arg4: memref<1x16xf32, #tpu.memory_space<vmem>>, %arg5: memref<8x16xf32, #tpu.memory_space<vmem>>) attributes {dimension_semantics = [#tpu.dimension_semantics<parallel>], iteration_bounds = array<i64: 1>, scalar_prefetch = 0 : i64, scratch_operands = 0 : i64, tpu.core_type = #tpu.core_type<tc>, window_params = [{transform_indices = @transform_0, window_bounds = array<i64: 8, 40>}, {pipeline_mode = #tpu.pipeline_mode<synchronous>, transform_indices = @transform_1, window_bounds = array<i64: 40, 16>}, {pipeline_mode = #tpu.pipeline_mode<synchronous>, transform_indices = @transform_2, window_bounds = array<i64: 1, 16>}, {pipeline_mode = #tpu.pipeline_mode<synchronous>, transform_indices = @transform_3, window_bounds = array<i64: 1, 16>}, {transform_indices = @transform_4, window_bounds = array<i64: 8, 16>}]} {
    %c0 = arith.constant 0 : index
    %c0_0 = arith.constant 0 : index
    %0 = vector.load %arg1[%c0, %c0_0] : memref<8x40xbf16, #tpu.memory_space<vmem>>, vector<8x40xbf16>
    %c0_1 = arith.constant 0 : index
    %c0_2 = arith.constant 0 : index
    %1 = vector.load %arg2[%c0_1, %c0_2] : memref<40x16xbf16, #tpu.memory_space<vmem>>, vector<40x16xbf16>
    %cst = arith.constant dense<0.000000e+00> : vector<8x16xf32>
    %2 = tpu.matmul %0, %1, %cst {dimension_numbers = #tpu.dot_dimension_numbers<[1], [0], [0], [1], [0, 0, 1, 1], [], []>} : vector<8x40xbf16>, vector<40x16xbf16>, vector<8x16xf32> -> vector<8x16xf32>
    %c0_3 = arith.constant 0 : index
    %c0_4 = arith.constant 0 : index
    %3 = vector.load %arg3[%c0_3, %c0_4] : memref<1x16xf32, #tpu.memory_space<vmem>>, vector<1x16xf32>
    %4 = vector.broadcast %3 : vector<1x16xf32> to vector<8x16xf32>
    %5 = arith.mulf %2, %4 : vector<8x16xf32>
    %c0_5 = arith.constant 0 : index
    %c0_6 = arith.constant 0 : index
    %6 = vector.load %arg4[%c0_5, %c0_6] : memref<1x16xf32, #tpu.memory_space<vmem>>, vector<1x16xf32>
    %7 = vector.broadcast %6 : vector<1x16xf32> to vector<8x16xf32>
    %8 = arith.addf %5, %7 : vector<8x16xf32>
    %9 = arith.negf %8 : vector<8x16xf32>
    %10 = math.exp %9 : vector<8x16xf32>
    %cst_7 = arith.constant 1.000000e+00 : f32
    %11 = vector.broadcast %cst_7 : f32 to vector<8x16xf32>
    %12 = arith.addf %11, %10 : vector<8x16xf32>
    %13 = arith.divf %11, %12 : vector<8x16xf32>
    %14 = arith.mulf %8, %13 : vector<8x16xf32>
    %c0_8 = arith.constant 0 : index
    %c0_9 = arith.constant 0 : index
    %15 = vector.load %arg5[%c0_8, %c0_9] : memref<8x16xf32, #tpu.memory_space<vmem>>, vector<8x16xf32>
    tpu.vector_store %arg5[%c0_8, %c0_9], %14 {strides = array<i32>} : memref<8x16xf32, #tpu.memory_space<vmem>>, vector<8x16xf32>,
    return
  }
  func.func @transform_0(%arg0: i32) -> (i32, i32) {
    %c0_i32 = arith.constant 0 : i32
    %c0_i32_0 = arith.constant 0 : i32
    return %arg0, %c0_i32 : i32, i32
  }
  func.func @transform_1(%arg0: i32) -> (i32, i32) {
    %c0_i32 = arith.constant 0 : i32
    %c0_i32_0 = arith.constant 0 : i32
    %c0_i32_1 = arith.constant 0 : i32
    return %c0_i32, %c0_i32_0 : i32, i32
  }
  func.func @transform_2(%arg0: i32) -> (i32, i32) {
    %c0_i32 = arith.constant 0 : i32
    %c0_i32_0 = arith.constant 0 : i32
    %c0_i32_1 = arith.constant 0 : i32
    return %c0_i32, %c0_i32_0 : i32, i32
  }
  func.func @transform_3(%arg0: i32) -> (i32, i32) {
    %c0_i32 = arith.constant 0 : i32
    %c0_i32_0 = arith.constant 0 : i32
    %c0_i32_1 = arith.constant 0 : i32
    return %c0_i32, %c0_i32_0 : i32, i32
  }
  func.func @transform_4(%arg0: i32) -> (i32, i32) {
    %c0_i32 = arith.constant 0 : i32
    %c0_i32_0 = arith.constant 0 : i32
    return %arg0, %c0_i32 : i32, i32
  }
}

module attributes {stable_mosaic.version = 11 : i64} {
  func.func @_mm_kernel(%arg0: i32, %arg1: memref<128x24xbf16, #tpu.memory_space<vmem>>, %arg2: memref<24x16xbf16, #tpu.memory_space<vmem>>, %arg3: memref<1x16xf32, #tpu.memory_space<vmem>>, %arg4: memref<1x16xf32, #tpu.memory_space<vmem>>, %arg5: memref<128x16xf32, #tpu.memory_space<vmem>>) attributes {dimension_semantics = [#tpu.dimension_semantics<parallel>], iteration_bounds = array<i64: 1>, scalar_prefetch = 0 : i64, scratch_operands = 0 : i64, tpu.core_type = #tpu.core_type<tc>, window_params = [{transform_indices = @transform_0, window_bounds = array<i64: 128, 24>}, {pipeline_mode = #tpu.pipeline_mode<synchronous>, transform_indices = @transform_1, window_bounds = array<i64: 24, 16>}, {pipeline_mode = #tpu.pipeline_mode<synchronous>, transform_indices = @transform_2, window_bounds = array<i64: 1, 16>}, {pipeline_mode = #tpu.pipeline_mode<synchronous>, transform_indices = @transform_3, window_bounds = array<i64: 1, 16>}, {transform_indices = @transform_4, window_bounds = array<i64: 128, 16>}]} {
    %c0 = arith.constant 0 : index
    %c0_0 = arith.constant 0 : index
    %0 = vector.load %arg1[%c0, %c0_0] : memref<128x24xbf16, #tpu.memory_space<vmem>>, vector<128x24xbf16>
    %c0_1 = arith.constant 0 : index
    %c0_2 = arith.constant 0 : index
    %1 = vector.load %arg2[%c0_1, %c0_2] : memref<24x16xbf16, #tpu.memory_space<vmem>>, vector<24x16xbf16>
    %cst = arith.constant dense<0.000000e+00> : vector<128x16xf32>
    %2 = tpu.matmul %0, %1, %cst {dimension_numbers = #tpu.dot_dimension_numbers<[1], [0], [0], [1], [0, 0, 1, 1], [], []>} : vector<128x24xbf16>, vector<24x16xbf16>, vector<128x16xf32> -> vector<128x16xf32>
    %c0_3 = arith.constant 0 : index
    %c0_4 = arith.constant 0 : index
    %3 = vector.load %arg3[%c0_3, %c0_4] : memref<1x16xf32, #tpu.memory_space<vmem>>, vector<1x16xf32>
    %4 = vector.broadcast %3 : vector<1x16xf32> to vector<128x16xf32>
    %5 = arith.mulf %2, %4 : vector<128x16xf32>
    %c0_5 = arith.constant 0 : index
    %c0_6 = arith.constant 0 : index
    %6 = vector.load %arg4[%c0_5, %c0_6] : memref<1x16xf32, #tpu.memory_space<vmem>>, vector<1x16xf32>
    %7 = vector.broadcast %6 : vector<1x16xf32> to vector<128x16xf32>
    %8 = arith.addf %5, %7 : vector<128x16xf32>
    %9 = arith.negf %8 : vector<128x16xf32>
    %10 = math.exp %9 : vector<128x16xf32>
    %cst_7 = arith.constant 1.000000e+00 : f32
    %11 = vector.broadcast %cst_7 : f32 to vector<128x16xf32>
    %12 = arith.addf %11, %10 : vector<128x16xf32>
    %13 = arith.divf %11, %12 : vector<128x16xf32>
    %14 = arith.mulf %8, %13 : vector<128x16xf32>
    %c0_8 = arith.constant 0 : index
    %c0_9 = arith.constant 0 : index
    %15 = vector.load %arg5[%c0_8, %c0_9] : memref<128x16xf32, #tpu.memory_space<vmem>>, vector<128x16xf32>
    tpu.vector_store %arg5[%c0_8, %c0_9], %14 {strides = array<i32>} : memref<128x16xf32, #tpu.memory_space<vmem>>, vector<128x16xf32>,
    return
  }
  func.func @transform_0(%arg0: i32) -> (i32, i32) {
    %c0_i32 = arith.constant 0 : i32
    %c0_i32_0 = arith.constant 0 : i32
    return %arg0, %c0_i32 : i32, i32
  }
  func.func @transform_1(%arg0: i32) -> (i32, i32) {
    %c0_i32 = arith.constant 0 : i32
    %c0_i32_0 = arith.constant 0 : i32
    %c0_i32_1 = arith.constant 0 : i32
    return %c0_i32, %c0_i32_0 : i32, i32
  }
  func.func @transform_2(%arg0: i32) -> (i32, i32) {
    %c0_i32 = arith.constant 0 : i32
    %c0_i32_0 = arith.constant 0 : i32
    %c0_i32_1 = arith.constant 0 : i32
    return %c0_i32, %c0_i32_0 : i32, i32
  }
  func.func @transform_3(%arg0: i32) -> (i32, i32) {
    %c0_i32 = arith.constant 0 : i32
    %c0_i32_0 = arith.constant 0 : i32
    %c0_i32_1 = arith.constant 0 : i32
    return %c0_i32, %c0_i32_0 : i32, i32
  }
  func.func @transform_4(%arg0: i32) -> (i32, i32) {
    %c0_i32 = arith.constant 0 : i32
    %c0_i32_0 = arith.constant 0 : i32
    return %arg0, %c0_i32 : i32, i32
  }
}

module attributes {stable_mosaic.version = 11 : i64} {
  func.func @_msib_conv3d_kernel(%arg0: i32, %arg1: memref<1x10x10x48xf32, #tpu.memory_space<vmem>>, %arg2: memref<9x48x48xbf16, #tpu.memory_space<vmem>>, %arg3: memref<2x1x48xf32, #tpu.memory_space<vmem>>, %arg4: memref<1x8x8x16xf32, #tpu.memory_space<vmem>>) attributes {dimension_semantics = [#tpu.dimension_semantics<parallel>], iteration_bounds = array<i64: 2>, scalar_prefetch = 0 : i64, scratch_operands = 0 : i64, tpu.core_type = #tpu.core_type<tc>, window_params = [{transform_indices = @transform_0, window_bounds = array<i64: 1, 10, 10, 48>}, {pipeline_mode = #tpu.pipeline_mode<synchronous>, transform_indices = @transform_1, window_bounds = array<i64: 9, 48, 48>}, {pipeline_mode = #tpu.pipeline_mode<synchronous>, transform_indices = @transform_2, window_bounds = array<i64: 2, 1, 48>}, {transform_indices = @transform_3, window_bounds = array<i64: 1, 8, 8, 16>}]} {
    %c0 = arith.constant 0 : index
    %c0_0 = arith.constant 0 : index
    %c0_1 = arith.constant 0 : index
    %c0_2 = arith.constant 0 : index
    %0 = vector.load %arg1[%c0, %c0_0, %c0_1, %c0_2] : memref<1x10x10x48xf32, #tpu.memory_space<vmem>>, vector<1x10x10x48xf32>
    %1 = vector.shape_cast %0 : vector<1x10x10x48xf32> to vector<10x10x48xf32>
    %cst = arith.constant 0.000000e+00 : f32
    %2 = vector.broadcast %cst : f32 to vector<64x48xf32>
    %3 = vector.extract_strided_slice %1 {offsets = [0, 0, 0], sizes = [8, 8, 48], strides = [1, 1, 1]} : vector<10x10x48xf32> to vector<8x8x48xf32>
    %4 = vector.shape_cast %3 : vector<8x8x48xf32> to vector<64x48xf32>
    %5 = arith.truncf %4 : vector<64x48xf32> to vector<64x48xbf16>
    %c0_3 = arith.constant 0 : index
    %c0_4 = arith.constant 0 : index
    %c0_5 = arith.constant 0 : index
    %6 = vector.load %arg2[%c0_3, %c0_4, %c0_5] : memref<9x48x48xbf16, #tpu.memory_space<vmem>>, vector<1x48x48xbf16>
    %7 = vector.shape_cast %6 : vector<1x48x48xbf16> to vector<48x48xbf16>
    %cst_6 = arith.constant dense<0.000000e+00> : vector<64x48xf32>
    %8 = tpu.matmul %5, %7, %cst_6 {dimension_numbers = #tpu.dot_dimension_numbers<[1], [0], [0], [1], [0, 0, 1, 1], [], []>} : vector<64x48xbf16>, vector<48x48xbf16>, vector<64x48xf32> -> vector<64x48xf32>
    %9 = arith.addf %2, %8 : vector<64x48xf32>
    %10 = vector.extract_strided_slice %1 {offsets = [0, 1, 0], sizes = [8, 8, 48], strides = [1, 1, 1]} : vector<10x10x48xf32> to vector<8x8x48xf32>
    %11 = vector.shape_cast %10 : vector<8x8x48xf32> to vector<64x48xf32>
    %12 = arith.truncf %11 : vector<64x48xf32> to vector<64x48xbf16>
    %c1 = arith.constant 1 : index
    %c0_7 = arith.constant 0 : index
    %c0_8 = arith.constant 0 : index
    %13 = vector.load %arg2[%c1, %c0_7, %c0_8] : memref<9x48x48xbf16, #tpu.memory_space<vmem>>, vector<1x48x48xbf16>
    %14 = vector.shape_cast %13 : vector<1x48x48xbf16> to vector<48x48xbf16>
    %cst_9 = arith.constant dense<0.000000e+00> : vector<64x48xf32>
    %15 = tpu.matmul %12, %14, %cst_9 {dimension_numbers = #tpu.dot_dimension_numbers<[1], [0], [0], [1], [0, 0, 1, 1], [], []>} : vector<64x48xbf16>, vector<48x48xbf16>, vector<64x48xf32> -> vector<64x48xf32>
    %16 = arith.addf %9, %15 : vector<64x48xf32>
    %17 = vector.extract_strided_slice %1 {offsets = [0, 2, 0], sizes = [8, 8, 48], strides = [1, 1, 1]} : vector<10x10x48xf32> to vector<8x8x48xf32>
    %18 = vector.shape_cast %17 : vector<8x8x48xf32> to vector<64x48xf32>
    %19 = arith.truncf %18 : vector<64x48xf32> to vector<64x48xbf16>
    %c2 = arith.constant 2 : index
    %c0_10 = arith.constant 0 : index
    %c0_11 = arith.constant 0 : index
    %20 = vector.load %arg2[%c2, %c0_10, %c0_11] : memref<9x48x48xbf16, #tpu.memory_space<vmem>>, vector<1x48x48xbf16>
    %21 = vector.shape_cast %20 : vector<1x48x48xbf16> to vector<48x48xbf16>
    %cst_12 = arith.constant dense<0.000000e+00> : vector<64x48xf32>
    %22 = tpu.matmul %19, %21, %cst_12 {dimension_numbers = #tpu.dot_dimension_numbers<[1], [0], [0], [1], [0, 0, 1, 1], [], []>} : vector<64x48xbf16>, vector<48x48xbf16>, vector<64x48xf32> -> vector<64x48xf32>
    %23 = arith.addf %16, %22 : vector<64x48xf32>
    %24 = vector.extract_strided_slice %1 {offsets = [1, 0, 0], sizes = [8, 8, 48], strides = [1, 1, 1]} : vector<10x10x48xf32> to vector<8x8x48xf32>
    %25 = vector.shape_cast %24 : vector<8x8x48xf32> to vector<64x48xf32>
    %26 = arith.truncf %25 : vector<64x48xf32> to vector<64x48xbf16>
    %c3 = arith.constant 3 : index
    %c0_13 = arith.constant 0 : index
    %c0_14 = arith.constant 0 : index
    %27 = vector.load %arg2[%c3, %c0_13, %c0_14] : memref<9x48x48xbf16, #tpu.memory_space<vmem>>, vector<1x48x48xbf16>
    %28 = vector.shape_cast %27 : vector<1x48x48xbf16> to vector<48x48xbf16>
    %cst_15 = arith.constant dense<0.000000e+00> : vector<64x48xf32>
    %29 = tpu.matmul %26, %28, %cst_15 {dimension_numbers = #tpu.dot_dimension_numbers<[1], [0], [0], [1], [0, 0, 1, 1], [], []>} : vector<64x48xbf16>, vector<48x48xbf16>, vector<64x48xf32> -> vector<64x48xf32>
    %30 = arith.addf %23, %29 : vector<64x48xf32>
    %31 = vector.extract_strided_slice %1 {offsets = [1, 1, 0], sizes = [8, 8, 48], strides = [1, 1, 1]} : vector<10x10x48xf32> to vector<8x8x48xf32>
    %32 = vector.shape_cast %31 : vector<8x8x48xf32> to vector<64x48xf32>
    %33 = arith.truncf %32 : vector<64x48xf32> to vector<64x48xbf16>
    %c4 = arith.constant 4 : index
    %c0_16 = arith.constant 0 : index
    %c0_17 = arith.constant 0 : index
    %34 = vector.load %arg2[%c4, %c0_16, %c0_17] : memref<9x48x48xbf16, #tpu.memory_space<vmem>>, vector<1x48x48xbf16>
    %35 = vector.shape_cast %34 : vector<1x48x48xbf16> to vector<48x48xbf16>
    %cst_18 = arith.constant dense<0.000000e+00> : vector<64x48xf32>
    %36 = tpu.matmul %33, %35, %cst_18 {dimension_numbers = #tpu.dot_dimension_numbers<[1], [0], [0], [1], [0, 0, 1, 1], [], []>} : vector<64x48xbf16>, vector<48x48xbf16>, vector<64x48xf32> -> vector<64x48xf32>
    %37 = arith.addf %30, %36 : vector<64x48xf32>
    %38 = vector.extract_strided_slice %1 {offsets = [1, 2, 0], sizes = [8, 8, 48], strides = [1, 1, 1]} : vector<10x10x48xf32> to vector<8x8x48xf32>
    %39 = vector.shape_cast %38 : vector<8x8x48xf32> to vector<64x48xf32>
    %40 = arith.truncf %39 : vector<64x48xf32> to vector<64x48xbf16>
    %c5 = arith.constant 5 : index
    %c0_19 = arith.constant 0 : index
    %c0_20 = arith.constant 0 : index
    %41 = vector.load %arg2[%c5, %c0_19, %c0_20] : memref<9x48x48xbf16, #tpu.memory_space<vmem>>, vector<1x48x48xbf16>
    %42 = vector.shape_cast %41 : vector<1x48x48xbf16> to vector<48x48xbf16>
    %cst_21 = arith.constant dense<0.000000e+00> : vector<64x48xf32>
    %43 = tpu.matmul %40, %42, %cst_21 {dimension_numbers = #tpu.dot_dimension_numbers<[1], [0], [0], [1], [0, 0, 1, 1], [], []>} : vector<64x48xbf16>, vector<48x48xbf16>, vector<64x48xf32> -> vector<64x48xf32>
    %44 = arith.addf %37, %43 : vector<64x48xf32>
    %45 = vector.extract_strided_slice %1 {offsets = [2, 0, 0], sizes = [8, 8, 48], strides = [1, 1, 1]} : vector<10x10x48xf32> to vector<8x8x48xf32>
    %46 = vector.shape_cast %45 : vector<8x8x48xf32> to vector<64x48xf32>
    %47 = arith.truncf %46 : vector<64x48xf32> to vector<64x48xbf16>
    %c6 = arith.constant 6 : index
    %c0_22 = arith.constant 0 : index
    %c0_23 = arith.constant 0 : index
    %48 = vector.load %arg2[%c6, %c0_22, %c0_23] : memref<9x48x48xbf16, #tpu.memory_space<vmem>>, vector<1x48x48xbf16>
    %49 = vector.shape_cast %48 : vector<1x48x48xbf16> to vector<48x48xbf16>
    %cst_24 = arith.constant dense<0.000000e+00> : vector<64x48xf32>
    %50 = tpu.matmul %47, %49, %cst_24 {dimension_numbers = #tpu.dot_dimension_numbers<[1], [0], [0], [1], [0, 0, 1, 1], [], []>} : vector<64x48xbf16>, vector<48x48xbf16>, vector<64x48xf32> -> vector<64x48xf32>
    %51 = arith.addf %44, %50 : vector<64x48xf32>
    %52 = vector.extract_strided_slice %1 {offsets = [2, 1, 0], sizes = [8, 8, 48], strides = [1, 1, 1]} : vector<10x10x48xf32> to vector<8x8x48xf32>
    %53 = vector.shape_cast %52 : vector<8x8x48xf32> to vector<64x48xf32>
    %54 = arith.truncf %53 : vector<64x48xf32> to vector<64x48xbf16>
    %c7 = arith.constant 7 : index
    %c0_25 = arith.constant 0 : index
    %c0_26 = arith.constant 0 : index
    %55 = vector.load %arg2[%c7, %c0_25, %c0_26] : memref<9x48x48xbf16, #tpu.memory_space<vmem>>, vector<1x48x48xbf16>
    %56 = vector.shape_cast %55 : vector<1x48x48xbf16> to vector<48x48xbf16>
    %cst_27 = arith.constant dense<0.000000e+00> : vector<64x48xf32>
    %57 = tpu.matmul %54, %56, %cst_27 {dimension_numbers = #tpu.dot_dimension_numbers<[1], [0], [0], [1], [0, 0, 1, 1], [], []>} : vector<64x48xbf16>, vector<48x48xbf16>, vector<64x48xf32> -> vector<64x48xf32>
    %58 = arith.addf %51, %57 : vector<64x48xf32>
    %59 = vector.extract_strided_slice %1 {offsets = [2, 2, 0], sizes = [8, 8, 48], strides = [1, 1, 1]} : vector<10x10x48xf32> to vector<8x8x48xf32>
    %60 = vector.shape_cast %59 : vector<8x8x48xf32> to vector<64x48xf32>
    %61 = arith.truncf %60 : vector<64x48xf32> to vector<64x48xbf16>
    %c8 = arith.constant 8 : index
    %c0_28 = arith.constant 0 : index
    %c0_29 = arith.constant 0 : index
    %62 = vector.load %arg2[%c8, %c0_28, %c0_29] : memref<9x48x48xbf16, #tpu.memory_space<vmem>>, vector<1x48x48xbf16>
    %63 = vector.shape_cast %62 : vector<1x48x48xbf16> to vector<48x48xbf16>
    %cst_30 = arith.constant dense<0.000000e+00> : vector<64x48xf32>
    %64 = tpu.matmul %61, %63, %cst_30 {dimension_numbers = #tpu.dot_dimension_numbers<[1], [0], [0], [1], [0, 0, 1, 1], [], []>} : vector<64x48xbf16>, vector<48x48xbf16>, vector<64x48xf32> -> vector<64x48xf32>
    %65 = arith.addf %58, %64 : vector<64x48xf32>
    %c0_31 = arith.constant 0 : index
    %c0_32 = arith.constant 0 : index
    %c0_33 = arith.constant 0 : index
    %66 = vector.load %arg3[%c0_31, %c0_32, %c0_33] : memref<2x1x48xf32, #tpu.memory_space<vmem>>, vector<1x1x48xf32>
    %67 = vector.shape_cast %66 : vector<1x1x48xf32> to vector<1x48xf32>
    %68 = vector.broadcast %67 : vector<1x48xf32> to vector<64x48xf32>
    %69 = arith.mulf %65, %68 : vector<64x48xf32>
    %c1_34 = arith.constant 1 : index
    %c0_35 = arith.constant 0 : index
    %c0_36 = arith.constant 0 : index
    %70 = vector.load %arg3[%c1_34, %c0_35, %c0_36] : memref<2x1x48xf32, #tpu.memory_space<vmem>>, vector<1x1x48xf32>
    %71 = vector.shape_cast %70 : vector<1x1x48xf32> to vector<1x48xf32>
    %72 = vector.broadcast %71 : vector<1x48xf32> to vector<64x48xf32>
    %73 = arith.addf %69, %72 : vector<64x48xf32>
    %cst_37 = arith.constant 0.000000e+00 : f32
    %74 = vector.broadcast %cst_37 : f32 to vector<64x48xf32>
    %75 = arith.cmpf ogt, %73, %74 : vector<64x48xf32>
    %cst_38 = arith.constant 1.000000e-01 : f32
    %76 = vector.broadcast %cst_38 : f32 to vector<64x48xf32>
    %77 = arith.mulf %76, %73 : vector<64x48xf32>
    %78 = arith.select %75, %73, %77 : vector<64x48xi1>, vector<64x48xf32>
    %79 = vector.extract_strided_slice %1 {offsets = [1, 1, 0], sizes = [8, 8, 48], strides = [1, 1, 1]} : vector<10x10x48xf32> to vector<8x8x48xf32>
    %80 = vector.shape_cast %79 : vector<8x8x48xf32> to vector<64x48xf32>
    %81 = arith.addf %78, %80 : vector<64x48xf32>
    %82 = vector.extract_strided_slice %81 {offsets = [0, 0], sizes = [64, 16], strides = [1, 1]} : vector<64x48xf32> to vector<64x16xf32>
    %83 = vector.extract_strided_slice %81 {offsets = [0, 16], sizes = [64, 16], strides = [1, 1]} : vector<64x48xf32> to vector<64x16xf32>
    %84 = vector.extract_strided_slice %81 {offsets = [0, 32], sizes = [64, 16], strides = [1, 1]} : vector<64x48xf32> to vector<64x16xf32>
    %85 = arith.maximumf %82, %83 : vector<64x16xf32>
    %86 = arith.maximumf %85, %84 : vector<64x16xf32>
    %87 = arith.addf %82, %83 : vector<64x16xf32>
    %88 = arith.addf %87, %84 : vector<64x16xf32>
    %cst_39 = arith.constant 0.333333343 : f32
    %89 = vector.broadcast %cst_39 : f32 to vector<64x16xf32>
    %90 = arith.mulf %88, %89 : vector<64x16xf32>
    %91 = arith.addf %86, %90 : vector<64x16xf32>
    %92 = vector.shape_cast %91 : vector<64x16xf32> to vector<8x8x16xf32>
    %c0_40 = arith.constant 0 : index
    %c0_41 = arith.constant 0 : index
    %c0_42 = arith.constant 0 : index
    %c0_43 = arith.constant 0 : index
    %93 = vector.load %arg4[%c0_40, %c0_41, %c0_42, %c0_43] : memref<1x8x8x16xf32, #tpu.memory_space<vmem>>, vector<1x8x8x16xf32>
    %94 = vector.shape_cast %93 : vector<1x8x8x16xf32> to vector<8x8x16xf32>
    %95 = vector.shape_cast %92 : vector<8x8x16xf32> to vector<1x8x8x16xf32>
    tpu.vector_store %arg4[%c0_40, %c0_41, %c0_42, %c0_43], %95 {strides = array<i32>} : memref<1x8x8x16xf32, #tpu.memory_space<vmem>>, vector<1x8x8x16xf32>,
    return
  }
  func.func @transform_0(%arg0: i32) -> (i32, i32, i32, i32) {
    %c0_i32 = arith.constant 0 : i32
    %c0_i32_0 = arith.constant 0 : i32
    %c0_i32_1 = arith.constant 0 : i32
    %c0_i32_2 = arith.constant 0 : i32
    return %arg0, %c0_i32, %c0_i32_0, %c0_i32_1 : i32, i32, i32, i32
  }
  func.func @transform_1(%arg0: i32) -> (i32, i32, i32) {
    %c0_i32 = arith.constant 0 : i32
    %c0_i32_0 = arith.constant 0 : i32
    %c0_i32_1 = arith.constant 0 : i32
    %c0_i32_2 = arith.constant 0 : i32
    return %c0_i32, %c0_i32_0, %c0_i32_1 : i32, i32, i32
  }
  func.func @transform_2(%arg0: i32) -> (i32, i32, i32) {
    %c0_i32 = arith.constant 0 : i32
    %c0_i32_0 = arith.constant 0 : i32
    %c0_i32_1 = arith.constant 0 : i32
    %c0_i32_2 = arith.constant 0 : i32
    return %c0_i32, %c0_i32_0, %c0_i32_1 : i32, i32, i32
  }
  func.func @transform_3(%arg0: i32) -> (i32, i32, i32, i32) {
    %c0_i32 = arith.constant 0 : i32
    %c0_i32_0 = arith.constant 0 : i32
    %c0_i32_1 = arith.constant 0 : i32
    %c0_i32_2 = arith.constant 0 : i32
    return %arg0, %c0_i32, %c0_i32_0, %c0_i32_1 : i32, i32, i32, i32
  }
}

module attributes {stable_mosaic.version = 11 : i64} {
  func.func @_agfb_desfb_kernel(%arg0: i32, %arg1: memref<1x256x16xbf16, #tpu.memory_space<vmem>>, %arg2: memref<1x256x16xbf16, #tpu.memory_space<vmem>>, %arg3: memref<2x16x8xbf16, #tpu.memory_space<vmem>>, %arg4: memref<7x8x8xbf16, #tpu.memory_space<vmem>>, %arg5: memref<8x1x8xf32, #tpu.memory_space<vmem>>, %arg6: memref<2x3xf32, #tpu.memory_space<smem>>, %arg7: memref<1x256x8xf32, #tpu.memory_space<vmem>>) attributes {dimension_semantics = [#tpu.dimension_semantics<parallel>], iteration_bounds = array<i64: 2>, scalar_prefetch = 0 : i64, scratch_operands = 0 : i64, tpu.core_type = #tpu.core_type<tc>, window_params = [{transform_indices = @transform_0, window_bounds = array<i64: 1, 256, 16>}, {transform_indices = @transform_1, window_bounds = array<i64: 1, 256, 16>}, {pipeline_mode = #tpu.pipeline_mode<synchronous>, transform_indices = @transform_2, window_bounds = array<i64: 2, 16, 8>}, {pipeline_mode = #tpu.pipeline_mode<synchronous>, transform_indices = @transform_3, window_bounds = array<i64: 7, 8, 8>}, {pipeline_mode = #tpu.pipeline_mode<synchronous>, transform_indices = @transform_4, window_bounds = array<i64: 8, 1, 8>}, {transform_indices = @transform_5, window_bounds = array<i64: 2, 3>}, {transform_indices = @transform_6, window_bounds = array<i64: 1, 256, 8>}]} {
    %c0 = arith.constant 0 : index
    %c0_0 = arith.constant 0 : index
    %c0_1 = arith.constant 0 : index
    %0 = vector.load %arg1[%c0, %c0_0, %c0_1] : memref<1x256x16xbf16, #tpu.memory_space<vmem>>, vector<1x256x16xbf16>
    %1 = vector.shape_cast %0 : vector<1x256x16xbf16> to vector<256x16xbf16>
    %c0_2 = arith.constant 0 : index
    %c0_3 = arith.constant 0 : index
    %c0_4 = arith.constant 0 : index
    %2 = vector.load %arg2[%c0_2, %c0_3, %c0_4] : memref<1x256x16xbf16, #tpu.memory_space<vmem>>, vector<1x256x16xbf16>
    %3 = vector.shape_cast %2 : vector<1x256x16xbf16> to vector<256x16xbf16>
    %c0_5 = arith.constant 0 : index
    %c0_6 = arith.constant 0 : index
    %c0_7 = arith.constant 0 : index
    %4 = vector.load %arg3[%c0_5, %c0_6, %c0_7] : memref<2x16x8xbf16, #tpu.memory_space<vmem>>, vector<1x16x8xbf16>
    %5 = vector.shape_cast %4 : vector<1x16x8xbf16> to vector<16x8xbf16>
    %c1 = arith.constant 1 : index
    %c0_8 = arith.constant 0 : index
    %c0_9 = arith.constant 0 : index
    %6 = vector.load %arg3[%c1, %c0_8, %c0_9] : memref<2x16x8xbf16, #tpu.memory_space<vmem>>, vector<1x16x8xbf16>
    %7 = vector.shape_cast %6 : vector<1x16x8xbf16> to vector<16x8xbf16>
    %c0_10 = arith.constant 0 : index
    %c0_11 = arith.constant 0 : index
    %c0_12 = arith.constant 0 : index
    %8 = vector.load %arg4[%c0_10, %c0_11, %c0_12] : memref<7x8x8xbf16, #tpu.memory_space<vmem>>, vector<1x8x8xbf16>
    %9 = vector.shape_cast %8 : vector<1x8x8xbf16> to vector<8x8xbf16>
    %c1_13 = arith.constant 1 : index
    %c0_14 = arith.constant 0 : index
    %c0_15 = arith.constant 0 : index
    %10 = vector.load %arg4[%c1_13, %c0_14, %c0_15] : memref<7x8x8xbf16, #tpu.memory_space<vmem>>, vector<1x8x8xbf16>
    %11 = vector.shape_cast %10 : vector<1x8x8xbf16> to vector<8x8xbf16>
    %c2 = arith.constant 2 : index
    %c0_16 = arith.constant 0 : index
    %c0_17 = arith.constant 0 : index
    %12 = vector.load %arg4[%c2, %c0_16, %c0_17] : memref<7x8x8xbf16, #tpu.memory_space<vmem>>, vector<1x8x8xbf16>
    %13 = vector.shape_cast %12 : vector<1x8x8xbf16> to vector<8x8xbf16>
    %c3 = arith.constant 3 : index
    %c0_18 = arith.constant 0 : index
    %c0_19 = arith.constant 0 : index
    %14 = vector.load %arg4[%c3, %c0_18, %c0_19] : memref<7x8x8xbf16, #tpu.memory_space<vmem>>, vector<1x8x8xbf16>
    %15 = vector.shape_cast %14 : vector<1x8x8xbf16> to vector<8x8xbf16>
    %c4 = arith.constant 4 : index
    %c0_20 = arith.constant 0 : index
    %c0_21 = arith.constant 0 : index
    %16 = vector.load %arg4[%c4, %c0_20, %c0_21] : memref<7x8x8xbf16, #tpu.memory_space<vmem>>, vector<1x8x8xbf16>
    %17 = vector.shape_cast %16 : vector<1x8x8xbf16> to vector<8x8xbf16>
    %c5 = arith.constant 5 : index
    %c0_22 = arith.constant 0 : index
    %c0_23 = arith.constant 0 : index
    %18 = vector.load %arg4[%c5, %c0_22, %c0_23] : memref<7x8x8xbf16, #tpu.memory_space<vmem>>, vector<1x8x8xbf16>
    %19 = vector.shape_cast %18 : vector<1x8x8xbf16> to vector<8x8xbf16>
    %c6 = arith.constant 6 : index
    %c0_24 = arith.constant 0 : index
    %c0_25 = arith.constant 0 : index
    %20 = vector.load %arg4[%c6, %c0_24, %c0_25] : memref<7x8x8xbf16, #tpu.memory_space<vmem>>, vector<1x8x8xbf16>
    %21 = vector.shape_cast %20 : vector<1x8x8xbf16> to vector<8x8xbf16>
    %c0_26 = arith.constant 0 : index
    %c0_27 = arith.constant 0 : index
    %c0_28 = arith.constant 0 : index
    %22 = vector.load %arg5[%c0_26, %c0_27, %c0_28] : memref<8x1x8xf32, #tpu.memory_space<vmem>>, vector<1x1x8xf32>
    %23 = vector.shape_cast %22 : vector<1x1x8xf32> to vector<1x8xf32>
    %c1_29 = arith.constant 1 : index
    %c0_30 = arith.constant 0 : index
    %c0_31 = arith.constant 0 : index
    %24 = vector.load %arg5[%c1_29, %c0_30, %c0_31] : memref<8x1x8xf32, #tpu.memory_space<vmem>>, vector<1x1x8xf32>
    %25 = vector.shape_cast %24 : vector<1x1x8xf32> to vector<1x8xf32>
    %c2_32 = arith.constant 2 : index
    %c0_33 = arith.constant 0 : index
    %c0_34 = arith.constant 0 : index
    %26 = vector.load %arg5[%c2_32, %c0_33, %c0_34] : memref<8x1x8xf32, #tpu.memory_space<vmem>>, vector<1x1x8xf32>
    %27 = vector.shape_cast %26 : vector<1x1x8xf32> to vector<1x8xf32>
    %c3_35 = arith.constant 3 : index
    %c0_36 = arith.constant 0 : index
    %c0_37 = arith.constant 0 : index
    %28 = vector.load %arg5[%c3_35, %c0_36, %c0_37] : memref<8x1x8xf32, #tpu.memory_space<vmem>>, vector<1x1x8xf32>
    %29 = vector.shape_cast %28 : vector<1x1x8xf32> to vector<1x8xf32>
    %c4_38 = arith.constant 4 : index
    %c0_39 = arith.constant 0 : index
    %c0_40 = arith.constant 0 : index
    %30 = vector.load %arg5[%c4_38, %c0_39, %c0_40] : memref<8x1x8xf32, #tpu.memory_space<vmem>>, vector<1x1x8xf32>
    %31 = vector.shape_cast %30 : vector<1x1x8xf32> to vector<1x8xf32>
    %c5_41 = arith.constant 5 : index
    %c0_42 = arith.constant 0 : index
    %c0_43 = arith.constant 0 : index
    %32 = vector.load %arg5[%c5_41, %c0_42, %c0_43] : memref<8x1x8xf32, #tpu.memory_space<vmem>>, vector<1x1x8xf32>
    %33 = vector.shape_cast %32 : vector<1x1x8xf32> to vector<1x8xf32>
    %c6_44 = arith.constant 6 : index
    %c0_45 = arith.constant 0 : index
    %c0_46 = arith.constant 0 : index
    %34 = vector.load %arg5[%c6_44, %c0_45, %c0_46] : memref<8x1x8xf32, #tpu.memory_space<vmem>>, vector<1x1x8xf32>
    %35 = vector.shape_cast %34 : vector<1x1x8xf32> to vector<1x8xf32>
    %c7 = arith.constant 7 : index
    %c0_47 = arith.constant 0 : index
    %c0_48 = arith.constant 0 : index
    %36 = vector.load %arg5[%c7, %c0_47, %c0_48] : memref<8x1x8xf32, #tpu.memory_space<vmem>>, vector<1x1x8xf32>
    %37 = vector.shape_cast %36 : vector<1x1x8xf32> to vector<1x8xf32>
    %cst = arith.constant dense<0.000000e+00> : vector<256x8xf32>
    %38 = tpu.matmul %1, %5, %cst {dimension_numbers = #tpu.dot_dimension_numbers<[1], [0], [0], [1], [0, 0, 1, 1], [], []>} : vector<256x16xbf16>, vector<16x8xbf16>, vector<256x8xf32> -> vector<256x8xf32>
    %cst_49 = arith.constant dense<0.000000e+00> : vector<256x8xf32>
    %39 = tpu.matmul %3, %7, %cst_49 {dimension_numbers = #tpu.dot_dimension_numbers<[1], [0], [0], [1], [0, 0, 1, 1], [], []>} : vector<256x16xbf16>, vector<16x8xbf16>, vector<256x8xf32> -> vector<256x8xf32>
    %40 = arith.negf %38 : vector<256x8xf32>
    %41 = math.exp %40 : vector<256x8xf32>
    %cst_50 = arith.constant 1.000000e+00 : f32
    %42 = vector.broadcast %cst_50 : f32 to vector<256x8xf32>
    %43 = arith.addf %42, %41 : vector<256x8xf32>
    %44 = arith.divf %42, %43 : vector<256x8xf32>
    %45 = arith.negf %39 : vector<256x8xf32>
    %46 = math.exp %45 : vector<256x8xf32>
    %cst_51 = arith.constant 1.000000e+00 : f32
    %47 = vector.broadcast %cst_51 : f32 to vector<256x8xf32>
    %48 = arith.addf %47, %46 : vector<256x8xf32>
    %49 = arith.divf %47, %48 : vector<256x8xf32>
    %50 = arith.truncf %38 : vector<256x8xf32> to vector<256x8xbf16>
    %cst_52 = arith.constant dense<0.000000e+00> : vector<256x8xf32>
    %51 = tpu.matmul %50, %9, %cst_52 {dimension_numbers = #tpu.dot_dimension_numbers<[1], [0], [0], [1], [0, 0, 1, 1], [], []>} : vector<256x8xbf16>, vector<8x8xbf16>, vector<256x8xf32> -> vector<256x8xf32>
    %52 = vector.broadcast %23 : vector<1x8xf32> to vector<256x8xf32>
    %53 = arith.mulf %51, %52 : vector<256x8xf32>
    %54 = vector.broadcast %25 : vector<1x8xf32> to vector<256x8xf32>
    %55 = arith.addf %53, %54 : vector<256x8xf32>
    %cst_53 = arith.constant 0.000000e+00 : f32
    %56 = vector.broadcast %cst_53 : f32 to vector<256x8xf32>
    %57 = arith.maximumf %55, %56 : vector<256x8xf32>
    %58 = arith.truncf %39 : vector<256x8xf32> to vector<256x8xbf16>
    %cst_54 = arith.constant dense<0.000000e+00> : vector<256x8xf32>
    %59 = tpu.matmul %58, %11, %cst_54 {dimension_numbers = #tpu.dot_dimension_numbers<[1], [0], [0], [1], [0, 0, 1, 1], [], []>} : vector<256x8xbf16>, vector<8x8xbf16>, vector<256x8xf32> -> vector<256x8xf32>
    %60 = vector.broadcast %27 : vector<1x8xf32> to vector<256x8xf32>
    %61 = arith.mulf %59, %60 : vector<256x8xf32>
    %62 = vector.broadcast %29 : vector<1x8xf32> to vector<256x8xf32>
    %63 = arith.addf %61, %62 : vector<256x8xf32>
    %cst_55 = arith.constant 0.000000e+00 : f32
    %64 = vector.broadcast %cst_55 : f32 to vector<256x8xf32>
    %65 = arith.maximumf %63, %64 : vector<256x8xf32>
    %c0_56 = arith.constant 0 : index
    %c0_57 = arith.constant 0 : index
    %66 = memref.load %arg6[%c0_56, %c0_57] : memref<2x3xf32, #tpu.memory_space<smem>>
    %c0_58 = arith.constant 0 : index
    %c1_59 = arith.constant 1 : index
    %67 = memref.load %arg6[%c0_58, %c1_59] : memref<2x3xf32, #tpu.memory_space<smem>>
    %c0_60 = arith.constant 0 : index
    %c2_61 = arith.constant 2 : index
    %68 = memref.load %arg6[%c0_60, %c2_61] : memref<2x3xf32, #tpu.memory_space<smem>>
    %c1_62 = arith.constant 1 : index
    %c0_63 = arith.constant 0 : index
    %69 = memref.load %arg6[%c1_62, %c0_63] : memref<2x3xf32, #tpu.memory_space<smem>>
    %c1_64 = arith.constant 1 : index
    %c1_65 = arith.constant 1 : index
    %70 = memref.load %arg6[%c1_64, %c1_65] : memref<2x3xf32, #tpu.memory_space<smem>>
    %c1_66 = arith.constant 1 : index
    %c2_67 = arith.constant 2 : index
    %71 = memref.load %arg6[%c1_66, %c2_67] : memref<2x3xf32, #tpu.memory_space<smem>>
    %72 = vector.broadcast %66 : f32 to vector<256x8xf32>
    %73 = arith.mulf %72, %57 : vector<256x8xf32>
    %74 = arith.mulf %57, %44 : vector<256x8xf32>
    %75 = vector.broadcast %67 : f32 to vector<256x8xf32>
    %76 = arith.mulf %75, %74 : vector<256x8xf32>
    %77 = arith.addf %73, %76 : vector<256x8xf32>
    %cst_68 = arith.constant 1.000000e+00 : f32
    %78 = vector.broadcast %cst_68 : f32 to vector<256x8xf32>
    %79 = arith.subf %78, %44 : vector<256x8xf32>
    %80 = arith.mulf %79, %49 : vector<256x8xf32>
    %81 = arith.mulf %80, %65 : vector<256x8xf32>
    %82 = vector.broadcast %68 : f32 to vector<256x8xf32>
    %83 = arith.mulf %82, %81 : vector<256x8xf32>
    %84 = arith.addf %77, %83 : vector<256x8xf32>
    %85 = arith.negf %84 : vector<256x8xf32>
    %86 = math.exp %85 : vector<256x8xf32>
    %cst_69 = arith.constant 1.000000e+00 : f32
    %87 = vector.broadcast %cst_69 : f32 to vector<256x8xf32>
    %88 = arith.addf %87, %86 : vector<256x8xf32>
    %89 = arith.divf %87, %88 : vector<256x8xf32>
    %90 = arith.mulf %84, %89 : vector<256x8xf32>
    %91 = arith.truncf %90 : vector<256x8xf32> to vector<256x8xbf16>
    %cst_70 = arith.constant dense<0.000000e+00> : vector<256x8xf32>
    %92 = tpu.matmul %91, %13, %cst_70 {dimension_numbers = #tpu.dot_dimension_numbers<[1], [0], [0], [1], [0, 0, 1, 1], [], []>} : vector<256x8xbf16>, vector<8x8xbf16>, vector<256x8xf32> -> vector<256x8xf32>
    %93 = vector.broadcast %31 : vector<1x8xf32> to vector<256x8xf32>
    %94 = arith.addf %92, %93 : vector<256x8xf32>
    %95 = vector.broadcast %69 : f32 to vector<256x8xf32>
    %96 = arith.mulf %95, %65 : vector<256x8xf32>
    %97 = arith.mulf %65, %49 : vector<256x8xf32>
    %98 = vector.broadcast %70 : f32 to vector<256x8xf32>
    %99 = arith.mulf %98, %97 : vector<256x8xf32>
    %100 = arith.addf %96, %99 : vector<256x8xf32>
    %cst_71 = arith.constant 1.000000e+00 : f32
    %101 = vector.broadcast %cst_71 : f32 to vector<256x8xf32>
    %102 = arith.subf %101, %49 : vector<256x8xf32>
    %103 = arith.mulf %102, %44 : vector<256x8xf32>
    %104 = arith.mulf %103, %94 : vector<256x8xf32>
    %105 = vector.broadcast %71 : f32 to vector<256x8xf32>
    %106 = arith.mulf %105, %104 : vector<256x8xf32>
    %107 = arith.addf %100, %106 : vector<256x8xf32>
    %108 = arith.negf %107 : vector<256x8xf32>
    %109 = math.exp %108 : vector<256x8xf32>
    %cst_72 = arith.constant 1.000000e+00 : f32
    %110 = vector.broadcast %cst_72 : f32 to vector<256x8xf32>
    %111 = arith.addf %110, %109 : vector<256x8xf32>
    %112 = arith.divf %110, %111 : vector<256x8xf32>
    %113 = arith.mulf %107, %112 : vector<256x8xf32>
    %114 = arith.truncf %113 : vector<256x8xf32> to vector<256x8xbf16>
    %cst_73 = arith.constant dense<0.000000e+00> : vector<256x8xf32>
    %115 = tpu.matmul %114, %15, %cst_73 {dimension_numbers = #tpu.dot_dimension_numbers<[1], [0], [0], [1], [0, 0, 1, 1], [], []>} : vector<256x8xbf16>, vector<8x8xbf16>, vector<256x8xf32> -> vector<256x8xf32>
    %116 = vector.broadcast %33 : vector<1x8xf32> to vector<256x8xf32>
    %117 = arith.addf %115, %116 : vector<256x8xf32>
    %cst_74 = arith.constant dense<0xFF800000> : vector<8xf32>
    %118 = vector.multi_reduction <maximumf>, %94, %cst_74 [0] : vector<256x8xf32> to vector<8xf32>
    %119 = vector.shape_cast %118 : vector<8xf32> to vector<1x8xf32>
    %cst_75 = arith.constant dense<0.000000e+00> : vector<8xf32>
    %120 = vector.multi_reduction <add>, %117, %cst_75 [0] : vector<256x8xf32> to vector<8xf32>
    %121 = vector.shape_cast %120 : vector<8xf32> to vector<1x8xf32>
    %cst_76 = arith.constant 2.560000e+02 : f32
    %122 = vector.broadcast %cst_76 : f32 to vector<1x8xf32>
    %123 = arith.divf %121, %122 : vector<1x8xf32>
    %124 = arith.truncf %119 : vector<1x8xf32> to vector<1x8xbf16>
    %cst_77 = arith.constant dense<0.000000e+00> : vector<1x8xf32>
    %125 = tpu.matmul %124, %17, %cst_77 {dimension_numbers = #tpu.dot_dimension_numbers<[1], [0], [0], [1], [0, 0, 1, 1], [], []>} : vector<1x8xbf16>, vector<8x8xbf16>, vector<1x8xf32> -> vector<1x8xf32>
    %126 = arith.negf %125 : vector<1x8xf32>
    %127 = math.exp %126 : vector<1x8xf32>
    %cst_78 = arith.constant 1.000000e+00 : f32
    %128 = vector.broadcast %cst_78 : f32 to vector<1x8xf32>
    %129 = arith.addf %128, %127 : vector<1x8xf32>
    %130 = arith.divf %128, %129 : vector<1x8xf32>
    %131 = arith.truncf %123 : vector<1x8xf32> to vector<1x8xbf16>
    %cst_79 = arith.constant dense<0.000000e+00> : vector<1x8xf32>
    %132 = tpu.matmul %131, %19, %cst_79 {dimension_numbers = #tpu.dot_dimension_numbers<[1], [0], [0], [1], [0, 0, 1, 1], [], []>} : vector<1x8xbf16>, vector<8x8xbf16>, vector<1x8xf32> -> vector<1x8xf32>
    %133 = arith.negf %132 : vector<1x8xf32>
    %134 = math.exp %133 : vector<1x8xf32>
    %cst_80 = arith.constant 1.000000e+00 : f32
    %135 = vector.broadcast %cst_80 : f32 to vector<1x8xf32>
    %136 = arith.addf %135, %134 : vector<1x8xf32>
    %137 = arith.divf %135, %136 : vector<1x8xf32>
    %138 = arith.maximumf %130, %137 : vector<1x8xf32>
    %139 = arith.subf %130, %138 : vector<1x8xf32>
    %140 = math.exp %139 : vector<1x8xf32>
    %141 = arith.subf %137, %138 : vector<1x8xf32>
    %142 = math.exp %141 : vector<1x8xf32>
    %143 = arith.addf %140, %142 : vector<1x8xf32>
    %cst_81 = arith.constant 1.000000e+00 : f32
    %144 = vector.broadcast %cst_81 : f32 to vector<1x8xf32>
    %145 = arith.divf %144, %143 : vector<1x8xf32>
    %146 = arith.mulf %140, %145 : vector<1x8xf32>
    %147 = vector.broadcast %146 : vector<1x8xf32> to vector<256x8xf32>
    %148 = arith.mulf %94, %147 : vector<256x8xf32>
    %149 = arith.mulf %142, %145 : vector<1x8xf32>
    %150 = vector.broadcast %149 : vector<1x8xf32> to vector<256x8xf32>
    %151 = arith.mulf %117, %150 : vector<256x8xf32>
    %152 = arith.addf %148, %151 : vector<256x8xf32>
    %153 = arith.truncf %152 : vector<256x8xf32> to vector<256x8xbf16>
    %cst_82 = arith.constant dense<0.000000e+00> : vector<256x8xf32>
    %154 = tpu.matmul %153, %21, %cst_82 {dimension_numbers = #tpu.dot_dimension_numbers<[1], [0], [0], [1], [0, 0, 1, 1], [], []>} : vector<256x8xbf16>, vector<8x8xbf16>, vector<256x8xf32> -> vector<256x8xf32>
    %155 = vector.broadcast %35 : vector<1x8xf32> to vector<256x8xf32>
    %156 = arith.mulf %154, %155 : vector<256x8xf32>
    %157 = vector.broadcast %37 : vector<1x8xf32> to vector<256x8xf32>
    %158 = arith.addf %156, %157 : vector<256x8xf32>
    %cst_83 = arith.constant 0.000000e+00 : f32
    %159 = vector.broadcast %cst_83 : f32 to vector<256x8xf32>
    %160 = arith.maximumf %158, %159 : vector<256x8xf32>
    %c0_84 = arith.constant 0 : index
    %c0_85 = arith.constant 0 : index
    %c0_86 = arith.constant 0 : index
    %161 = vector.load %arg7[%c0_84, %c0_85, %c0_86] : memref<1x256x8xf32, #tpu.memory_space<vmem>>, vector<1x256x8xf32>
    %162 = vector.shape_cast %161 : vector<1x256x8xf32> to vector<256x8xf32>
    %163 = vector.shape_cast %160 : vector<256x8xf32> to vector<1x256x8xf32>
    tpu.vector_store %arg7[%c0_84, %c0_85, %c0_86], %163 {strides = array<i32>} : memref<1x256x8xf32, #tpu.memory_space<vmem>>, vector<1x256x8xf32>,
    return
  }
  func.func @transform_0(%arg0: i32) -> (i32, i32, i32) {
    %c0_i32 = arith.constant 0 : i32
    %c0_i32_0 = arith.constant 0 : i32
    %c0_i32_1 = arith.constant 0 : i32
    return %arg0, %c0_i32, %c0_i32_0 : i32, i32, i32
  }
  func.func @transform_1(%arg0: i32) -> (i32, i32, i32) {
    %c0_i32 = arith.constant 0 : i32
    %c0_i32_0 = arith.constant 0 : i32
    %c0_i32_1 = arith.constant 0 : i32
    return %arg0, %c0_i32, %c0_i32_0 : i32, i32, i32
  }
  func.func @transform_2(%arg0: i32) -> (i32, i32, i32) {
    %c0_i32 = arith.constant 0 : i32
    %c0_i32_0 = arith.constant 0 : i32
    %c0_i32_1 = arith.constant 0 : i32
    %c0_i32_2 = arith.constant 0 : i32
    return %c0_i32, %c0_i32_0, %c0_i32_1 : i32, i32, i32
  }
  func.func @transform_3(%arg0: i32) -> (i32, i32, i32) {
    %c0_i32 = arith.constant 0 : i32
    %c0_i32_0 = arith.constant 0 : i32
    %c0_i32_1 = arith.constant 0 : i32
    %c0_i32_2 = arith.constant 0 : i32
    return %c0_i32, %c0_i32_0, %c0_i32_1 : i32, i32, i32
  }
  func.func @transform_4(%arg0: i32) -> (i32, i32, i32) {
    %c0_i32 = arith.constant 0 : i32
    %c0_i32_0 = arith.constant 0 : i32
    %c0_i32_1 = arith.constant 0 : i32
    %c0_i32_2 = arith.constant 0 : i32
    return %c0_i32, %c0_i32_0, %c0_i32_1 : i32, i32, i32
  }
  func.func @transform_5(%arg0: i32) -> (i32, i32) {
    %c0_i32 = arith.constant 0 : i32
    %c0_i32_0 = arith.constant 0 : i32
    %c0_i32_1 = arith.constant 0 : i32
    return %c0_i32, %c0_i32_0 : i32, i32
  }
  func.func @transform_6(%arg0: i32) -> (i32, i32, i32) {
    %c0_i32 = arith.constant 0 : i32
    %c0_i32_0 = arith.constant 0 : i32
    %c0_i32_1 = arith.constant 0 : i32
    return %arg0, %c0_i32, %c0_i32_0 : i32, i32, i32
  }
}

</mosaic_0001>

<bundles_post_ra>
// kernel: serm_forward.6
= control target key start
LH: loop header
LB: loop body
LE: loop exit
PB: predicated region body
PF: predicated region fallthrough
CT: control target
= control target key end

     0   :  { %vm48_vm0 = vcmask 261120   ;;  %vm154_vm1 = vcmask 130048   ;;  %s262_s1 = inlined_call_operand.vmem [shape: bf16[32,16], index: 1, kind: input, shape index: {}]   ;;  %s263_s0 = inlined_call_operand.vmem [shape: bf16[32,32], index: 0, kind: input, shape index: {}]   ;;  %s264_s2 = inlined_call_operand.vmem [shape: f32[1,16], index: 2, kind: input, shape index: {}]   ;;  %s265_s3 = inlined_call_operand.vmem [shape: f32[1,16], index: 3, kind: input, shape index: {}]   ;;  %s266_s4 = inlined_call_operand.vmem [shape: f32[32,16], index: 4, kind: output, shape index: {}]  }
   0x1   :  { %v187_v0 = vld [vmem:[%s262_s1] sm:$0xff]   ;;  %v188_v1 = vld [vmem:[%s262_s1 + $0x8] sm:$0xff]  }
   0x2   :  { %179 = vmatprep.subr.bf16.mxu0 %v187_v0  ;;  %v189_v2 = vld [vmem:[%s263_s0] sm:$0xff]   ;;  %v190_v3 = vld [vmem:[%s263_s0 + $0x8] sm:$0xff]  }
   0x3   :  { %180 = vmatpush3.bf16.msra.mxu0 %v187_v0  ;;  %183 = vmatprep.mubr.msk.bf16.mxu0 %vm48_vm0, %v189_v2  ;;  %v169_v4 = vld [vmem:[%s264_s2] ss:$0 sm:$0xff] }
   0x4   :  { %181 = vmatprep.subr.bf16.mxu0 %v188_v1  ;;  %v170_v6 = vld [vmem:[%s265_s3] ss:$0 sm:$0xff] }
   0x7   :  { %182 = vmatpush3.bf16.msra.mxu0 %v188_v1 }
   0xa   :  { %184 = vmatmul.mubr.msk.bf16.vlgmr.msra.gmra.mrb[0].mxu0 %vm48_vm0, %v190_v3 }
  0xdd   :  { %v185_v5 = vpop.f32.mrb[0].mxu0 }
  0xde   :  { %v113_v7 = vmul.f32 %v185_v5, %v169_v4  ;;  %v89_v8 = vpop.f32.mrb[1].mxu0 }
  0xdf   :  { %v111_v9 = vmul.f32 %v169_v4, %v89_v8  ;;  %v186_v10 = vpop.f32.mrb[2].mxu0 }
  0xe0   :  { %v124_v11 = vadd.f32 %v170_v6, %v113_v7  ;;  %v114_v12 = vmul.f32 %v186_v10, %v169_v4  ;;  %v92_v13 = vpop.f32.mrb[3].mxu0 }
  0xe1   :  { %v122_v14 = vadd.f32 %v170_v6, %v111_v9  ;;  %v112_v15 = vmul.f32 %v169_v4, %v92_v13 }
  0xe2   :  { %v173_v16 = vmul.f32 -1.442695, %v124_v11  ;;  %v125_v17 = vadd.f32 %v170_v6, %v114_v12 }
  0xe3   :  { %v171_v18 = vmul.f32 -1.442695, %v122_v14  ;;  %v123_v19 = vadd.f32 %v170_v6, %v112_v15 }
  0xe4   :  { %191 = vpow2.f32 %v173_v16  ;;  %v174_v20 = vmul.f32 -1.442695, %v125_v17 }
  0xe5   :  { %193 = vpow2.f32 %v171_v18  ;;  %v172_v21 = vmul.f32 -1.442695, %v123_v19 }
  0xe6   :  { %195 = vpow2.f32 %v174_v20 }
  0xe7   :  { %197 = vpow2.f32 %v172_v21 }
  0xee   :  { %v192_v22 = vpop.eup %191 }
  0xef   :  { %v194_v23 = vpop.eup %193  ;;  %v140_v24 = vadd.f32 1.0, %v192_v22 }
  0xf0   :  { %v196_v25 = vpop.eup %195  ;;  %v138_v26 = vadd.f32 1.0, %v194_v23 }
  0xf1   :  { %v198_v27 = vpop.eup %197  ;;  %199 = vrcp.f32 %v140_v24  ;;  %v141_v28 = vadd.f32 1.0, %v196_v25 }
  0xf2   :  { %201 = vrcp.f32 %v138_v26  ;;  %v139_v29 = vadd.f32 1.0, %v198_v27 }
  0xf3   :  { %203 = vrcp.f32 %v141_v28 }
  0xf4   :  { %205 = vrcp.f32 %v139_v29 }
  0xfb   :  { %v200_v30 = vpop.eup %199 }
  0xfc   :  { %v202_v31 = vpop.eup %201  ;;  %v152_v32 = vmul.f32 %v200_v30, %v124_v11 }
  0xfd   :  { %v204_v33 = vpop.eup %203  ;;  %v150_v34 = vmul.f32 %v202_v31, %v122_v14 }
  0xfe   :  { %v206_v35 = vpop.eup %205  ;;  %157 = vst.msk [vmem:[%s266_s4 + $0x10] sm:$0xff] %vm154_vm1, %v152_v32  ;;  %v153_v36 = vmul.f32 %v204_v33, %v125_v17 }
  0xff   :  { %155 = vst.msk [vmem:[%s266_s4] sm:$0xff] %vm154_vm1, %v150_v34  ;;  %v151_v37 = vmul.f32 %v206_v35, %v123_v19 }
 0x100   :  { %158 = vst.msk [vmem:[%s266_s4 + $0x18] sm:$0xff] %vm154_vm1, %v153_v36 }
 0x101   :  { %156 = vst.msk [vmem:[%s266_s4 + $0x8] sm:$0xff] %vm154_vm1, %v151_v37 }

// kernel: serm_forward.7
= control target key start
LH: loop header
LB: loop body
LE: loop exit
PB: predicated region body
PF: predicated region fallthrough
CT: control target
= control target key end

     0   :  { %v146_v0 = vmov 0.0   ;;  %vm147_vm0 = vmmov 0   ;;  %vm43_vm1 = vcmask 1043456   ;;  %vm39_vm2 = vcmask 326656   ;;  %s194_s1 = inlined_call_operand.vmem [shape: bf16[40,16], index: 1, kind: input, shape index: {}]   ;;  %s195_s0 = inlined_call_operand.vmem [shape: bf16[8,40], index: 0, kind: input, shape index: {}]   ;;  %s196_s2 = inlined_call_operand.vmem [shape: f32[1,16], index: 2, kind: input, shape index: {}]   ;;  %s197_s3 = inlined_call_operand.vmem [shape: f32[1,16], index: 3, kind: input, shape index: {}]   ;;  %s198_s4 = inlined_call_operand.vmem [shape: f32[8,16], index: 4, kind: output, shape index: {}]  }
   0x1   :  { %127 = vmatprep.subr.bf16.mxu0 %v146_v0  ;;  %v139_v1 = vld [vmem:[%s194_s1] sm:$0xff]   ;;  %133 = vmatprep.mubr.msk.bf16.mxu0 %vm147_vm0, %v146_v0  ;;  %v140_v2 = vld [vmem:[%s194_s1 + $0x8] sm:$0xff]   ;;  %v141_v3 = vld [vmem:[%s194_s1 + $0x10] ss:$0 sps:$4 sm:$0xff]   ;;  %vm110_vm3 = vcmask 130048  }
   0x2   :  { %128 = vmatpush3.bf16.msra.mxu0 %v139_v1  ;;  %v45_v4 = vsel %vm43_vm1, %v141_v3, 0  ;;  %v18_v5 = vld [vmem:[%s195_s0] sm:$0xf] }
   0x3   :  { %129 = vmatprep.subr.bf16.mxu0 %v146_v0  ;;  %v120_v6 = vld [vmem:[%s196_s2] ss:$0 sm:$0xff] }
   0x4   :  { %v121_v8 = vld [vmem:[%s197_s3] ss:$0 sm:$0xff] }
   0x6   :  { %130 = vmatpush3.bf16.msra.mxu0 %v140_v2 }
   0x7   :  { %131 = vmatprep.subr.bf16.mxu0 %v146_v0 }
   0xa   :  { %132 = vmatpush3.bf16.msra.mxu0 %v45_v4 }
   0xd   :  { %134 = vmatmul.mubr.msk.bf16.vlgmr.msra.gmra.mrb[0].mxu0 %vm39_vm2, %v18_v5 }
  0xe0   :  { %v81_v7 = vpop.f32.mrb[0].mxu0 }
  0xe1   :  { %v94_v9 = vmul.f32 %v120_v6, %v81_v7  ;;  %v135_v10 = vpop.f32.mrb[1].mxu0 }
  0xe2   :  { %v84_v11 = vpop.f32.mrb[2].mxu0 }
  0xe3   :  { %v102_v12 = vadd.f32 %v121_v8, %v94_v9  ;;  %v136_v13 = vpop.f32.mrb[3].mxu0 }
  0xe5   :  { %v122_v14 = vmul.f32 -1.442695, %v102_v12 }
  0xe7   :  { %142 = vpow2.f32 %v122_v14 }
  0xf1   :  { %v143_v15 = vpop.eup %142 }
  0xf2   :  { %v106_v16 = vadd.f32 1.0, %v143_v15 }
  0xf4   :  { %144 = vrcp.f32 %v106_v16 }
  0xfe   :  { %v145_v17 = vpop.eup %144 }
  0xff   :  { %v109_v18 = vmul.f32 %v145_v17, %v102_v12 }
 0x101   :  { %111 = vst.msk [vmem:[%s198_s4] sm:$0xff] %vm110_vm3, %v109_v18 }

// kernel: tile.17
= control target key start
LH: loop header
LB: loop body
LE: loop exit
PB: predicated region body
PF: predicated region fallthrough
CT: control target
= control target key end

     0   :  { %s22_s0 = inlined_call_operand.vmem [shape: f32[16], index: 0, kind: input, shape index: {}]   ;;  %s23_s1 = inlined_call_operand.vmem [shape: f32[3,16], index: 1, kind: output, shape index: {}]  }
   0x1   :  { %v4_v0 = vld [vmem:[%s22_s0] ss:$0 sm:$0xff] }
   0x2   :  { %5 = vst [vmem:[%s23_s1] sm:$0xf] %v4_v0 }

// kernel: tile.19
= control target key start
LH: loop header
LB: loop body
LE: loop exit
PB: predicated region body
PF: predicated region fallthrough
CT: control target
= control target key end

     0   :  { %vm7_vm0 = vcmask 130048   ;;  %s30_s8 = smov 16   ;;  %vm13_vm1 = vcmask 392448   ;;  %vm19_vm2 = vcmask 261248   ;;  %s47_s0 = inlined_call_operand.vmem [shape: f32[3,16], index: 0, kind: input, shape index: {}]   ;;  %s48_s1 = inlined_call_operand.vmem [shape: f32[1,48], index: 1, kind: output, shape index: {}]  }
   0x1   :  { %v4_v0 = vld [vmem:[%s47_s0] sm:$0xf]  ;;  %s29_s0 = smov 32  }
   0x2   :  { %5 = vst [vmem:[#allocation1] sm:$0xf] %v4_v0 }
   0x9   :  { %v10_v1 = vld [vmem:[#allocation1 + $0x2] sm:$0x1]   ;;  %v6_v2 = vld [vmem:[#allocation1] sm:$0x1]   ;;  %v16_v3 = vld [vmem:[#allocation1 + $0x1] sm:$0x1]  }
   0xa   :  { %11 = vrot.lane.b32.xlu0 %v10_v1, %s29_s0  ;;  %8 = vst.msk [vmem:[#allocation0] sm:$0x1] %vm7_vm0, %v6_v2  }
   0xe   :  { %17 = vrot.lane.b32.xlu0 %v16_v3, %s30_s8 }
  0x7c   :  { %v12_v4 = vpop.permute.xlu0 %11  }
  0x7d   :  { %14 = vst.msk [vmem:[#allocation0] sm:$0x1] %vm13_vm1, %v12_v4  }
  0x80   :  { %v18_v5 = vpop.permute.xlu0 %17  }
  0x81   :  { %20 = vst.msk [vmem:[#allocation0] sm:$0x1] %vm19_vm2, %v18_v5  }
  0x88   :  { %v24_v6 = vld [vmem:[#allocation0] sm:$0x1] }
  0x89   :  { %26 = vst [vmem:[%s48_s1] sm:$0x1] %v24_v6 }

// kernel: serm_forward.5
= control target key start
LH: loop header
LB: loop body
LE: loop exit
PB: predicated region body
PF: predicated region fallthrough
CT: control target
= control target key end

     0   :  { %vm111_vm0 = vcmask 1043456   ;;  %vm86_vm1 = vcmask 195584   ;;  %vm370_vm2 = vcmask 130048   ;;  %s770_s1 = inlined_call_operand.vmem [shape: bf16[24,16], index: 1, kind: input, shape index: {}]   ;;  %s771_s0 = inlined_call_operand.vmem [shape: bf16[128,24], index: 0, kind: input, shape index: {}]   ;;  %s772_s2 = inlined_call_operand.vmem [shape: f32[1,16], index: 2, kind: input, shape index: {}]   ;;  %s773_s3 = inlined_call_operand.vmem [shape: f32[1,16], index: 3, kind: input, shape index: {}]   ;;  %s774_s4 = inlined_call_operand.vmem [shape: f32[128,16], index: 4, kind: output, shape index: {}]  }
   0x1   :  { %v463_v0 = vld [vmem:[%s770_s1] sm:$0xff]   ;;  %v464_v1 = vld [vmem:[%s770_s1 + $0x8] ss:$0 sps:$4 sm:$0xff]   ;;  %v469_v7 = vld [vmem:[%s771_s0 + $0x10] sm:$0xff]  }
   0x2   :  { %437 = vmatprep.subr.bf16.mxu0 %v463_v0  ;;  %457 = vmatprep.subr.bf16.mxu1 %v463_v0  ;;  %v465_v2 = vld [vmem:[%s771_s0] sm:$0xff]   ;;  %v113_v4 = vsel %vm111_vm0, %v464_v1, 0  ;;  %v467_v5 = vld [vmem:[%s771_s0 + $0x8] sm:$0xff]   ;;  %v470_v8 = vld [vmem:[%s771_s0 + $0x30] sm:$0xff]  }
   0x3   :  { %438 = vmatpush3.bf16.msra.mxu0 %v463_v0  ;;  %459 = vmatpush3.bf16.msra.mxu1 %v463_v0  ;;  %v466_v3 = vld [vmem:[%s771_s0 + $0x20] sm:$0xff]   ;;  %v468_v6 = vld [vmem:[%s771_s0 + $0x28] sm:$0xff]   ;;  %v471_v9 = vld [vmem:[%s771_s0 + $0x18] sm:$0xff]  }
   0x4   :  { %461 = vmatprep.subr.msk.bf16.mxu0 %vm111_vm0, %v464_v1  ;;  %462 = vmatprep.subr.msk.bf16.mxu1 %vm111_vm0, %v464_v1  ;;  %v472_v10 = vld [vmem:[%s771_s0 + $0x38] sm:$0xff]   ;;  %v603_v11 = vld [vmem:[%s772_s2] ss:$0 sm:$0xff] }
   0x5   :  { %441 = vmatprep.mubr.msk.bf16.mxu0 %vm86_vm1, %v465_v2  ;;  %449 = vmatprep.mubr.msk.bf16.mxu1 %vm86_vm1, %v466_v3  ;;  %v608_v13 = vld [vmem:[%s773_s3] ss:$0 sm:$0xff] }
   0x7   :  { %440 = vmatpush3.bf16.msra.mxu0 %v113_v4  ;;  %460 = vmatpush3.bf16.msra.mxu1 %v113_v4 }
   0xa   :  { %442 = vmatmul.mubr.msk.bf16.vlgmr.msra.gmra.mrb[0].mxu0 %vm86_vm1, %v467_v5  ;;  %450 = vmatmul.mubr.msk.bf16.vlgmr.msra.gmra.mrb[0].mxu1 %vm86_vm1, %v468_v6 }
   0xb   :  { %445 = vmatprep.mubr.msk.bf16.mxu0 %vm86_vm1, %v469_v7  ;;  %453 = vmatprep.mubr.msk.bf16.mxu1 %vm86_vm1, %v470_v8 }
  0x12   :  { %446 = vmatmul.mubr.msk.bf16.gmra.mrb[4].mxu0 %vm86_vm1, %v471_v9  ;;  %454 = vmatmul.mubr.msk.bf16.gmra.mrb[4].mxu1 %vm86_vm1, %v472_v10 }
  0xdd   :  { %v443_v12 = vpop.f32.mrb[0].mxu0  ;;  %v451_v14 = vpop.f32.mrb[0].mxu1 }
  0xde   :  { %v221_v15 = vmul.f32 %v443_v12, %v603_v11  ;;  %v229_v16 = vmul.f32 %v451_v14, %v603_v11  ;;  %v149_v17 = vpop.f32.mrb[1].mxu0  ;;  %v181_v18 = vpop.f32.mrb[1].mxu1 }
  0xdf   :  { %v219_v19 = vmul.f32 %v603_v11, %v149_v17  ;;  %v227_v20 = vmul.f32 %v603_v11, %v181_v18  ;;  %v444_v21 = vpop.f32.mrb[2].mxu0  ;;  %v452_v22 = vpop.f32.mrb[2].mxu1 }
  0xe0   :  { %v615_v23 = vadd.f32 %v608_v13, %v221_v15  ;;  %v618_v24 = vadd.f32 %v608_v13, %v229_v16  ;;  %v222_v25 = vmul.f32 %v444_v21, %v603_v11  ;;  %v230_v26 = vmul.f32 %v452_v22, %v603_v11  ;;  %v152_v27 = vpop.f32.mrb[3].mxu0  ;;  %v184_v28 = vpop.f32.mrb[3].mxu1 }
  0xe1   :  { %v623_v29 = vadd.f32 %v608_v13, %v219_v19  ;;  %v626_v30 = vadd.f32 %v608_v13, %v227_v20  ;;  %v220_v31 = vmul.f32 %v603_v11, %v152_v27  ;;  %v228_v32 = vmul.f32 %v603_v11, %v184_v28 }
  0xe2   :  { %v413_v33 = vmul.f32 -1.442695, %v615_v23  ;;  %v421_v34 = vmul.f32 -1.442695, %v618_v24  ;;  %v633_v35 = vadd.f32 %v608_v13, %v222_v25  ;;  %v636_v36 = vadd.f32 %v608_v13, %v230_v26 }
  0xe3   :  { %v411_v37 = vmul.f32 -1.442695, %v623_v29  ;;  %v419_v38 = vmul.f32 -1.442695, %v626_v30  ;;  %v641_v39 = vadd.f32 %v608_v13, %v220_v31  ;;  %v644_v40 = vadd.f32 %v608_v13, %v228_v32 }
  0xe4   :  { %473 = vpow2.f32 %v413_v33  ;;  %v414_v41 = vmul.f32 -1.442695, %v633_v35  ;;  %v422_v42 = vmul.f32 -1.442695, %v636_v36 }
  0xe5   :  { %475 = vpow2.f32 %v421_v34  ;;  %v447_v43 = vpop.f32.mrb[4].mxu0  ;;  %v455_v44 = vpop.f32.mrb[4].mxu1  ;;  %v412_v45 = vmul.f32 -1.442695, %v641_v39  ;;  %v420_v50 = vmul.f32 -1.442695, %v644_v40 }
  0xe6   :  { %477 = vpow2.f32 %v411_v37  ;;  %v225_v46 = vmul.f32 %v447_v43, %v603_v11  ;;  %v233_v47 = vmul.f32 %v455_v44, %v603_v11  ;;  %v165_v48 = vpop.f32.mrb[5].mxu0  ;;  %v197_v49 = vpop.f32.mrb[5].mxu1 }
  0xe7   :  { %479 = vpow2.f32 %v419_v38  ;;  %v223_v51 = vmul.f32 %v603_v11, %v165_v48  ;;  %v231_v52 = vmul.f32 %v603_v11, %v197_v49  ;;  %v448_v53 = vpop.f32.mrb[6].mxu0  ;;  %v456_v54 = vpop.f32.mrb[6].mxu1 }
  0xe8   :  { %481 = vpow2.f32 %v414_v41  ;;  %v655_v55 = vadd.f32 %v608_v13, %v225_v46  ;;  %v658_v56 = vadd.f32 %v608_v13, %v233_v47  ;;  %v226_v57 = vmul.f32 %v448_v53, %v603_v11  ;;  %v168_v58 = vpop.f32.mrb[7].mxu0  ;;  %v200_v59 = vpop.f32.mrb[7].mxu1 }
  0xe9   :  { %483 = vpow2.f32 %v422_v42  ;;  %v662_v60 = vadd.f32 %v608_v13, %v223_v51  ;;  %v665_v61 = vadd.f32 %v608_v13, %v231_v52  ;;  %v234_v15 = vmul.f32 %v456_v54, %v603_v11 }
  0xea   :  { %485 = vpow2.f32 %v412_v45  ;;  %v417_v62 = vmul.f32 -1.442695, %v655_v55  ;;  %v425_v63 = vmul.f32 -1.442695, %v658_v56  ;;  %v670_v0 = vadd.f32 %v608_v13, %v226_v57 }
  0xeb   :  { %487 = vpow2.f32 %v420_v50  ;;  %v415_v1 = vmul.f32 -1.442695, %v662_v60  ;;  %v423_v2 = vmul.f32 -1.442695, %v665_v61  ;;  %v224_v18 = vmul.f32 %v603_v11, %v168_v58 }
  0xec   :  { %489 = vpow2.f32 %v417_v62  ;;  %v418_v3 = vmul.f32 -1.442695, %v670_v0  ;;  %v232_v21 = vmul.f32 %v603_v11, %v200_v59  ;;  %v679_v28 = vadd.f32 %v608_v13, %v234_v15 }
  0xed   :  { %491 = vpow2.f32 %v425_v63  ;;  %v682_v33 = vadd.f32 %v608_v13, %v224_v18 }
  0xee   :  { %v474_v4 = vpop.eup %473  ;;  %493 = vpow2.f32 %v415_v1  ;;  %v685_v11 = vadd.f32 %v608_v13, %v232_v21  ;;  %v426_v44 = vmul.f32 -1.442695, %v679_v28 }
  0xef   :  { %v476_v5 = vpop.eup %475  ;;  %v308_v6 = vadd.f32 1.0, %v474_v4  ;;  %495 = vpow2.f32 %v423_v2  ;;  %v416_v47 = vmul.f32 -1.442695, %v682_v33 }
  0xf0   :  { %v478_v7 = vpop.eup %477  ;;  %v316_v8 = vadd.f32 1.0, %v476_v5  ;;  %497 = vpow2.f32 %v418_v3  ;;  %v424_v13 = vmul.f32 -1.442695, %v685_v11 }
  0xf1   :  { %v480_v9 = vpop.eup %479  ;;  %499 = vrcp.f32 %v308_v6  ;;  %v306_v10 = vadd.f32 1.0, %v478_v7 }
  0xf2   :  { %v482_v12 = vpop.eup %481  ;;  %501 = vrcp.f32 %v316_v8  ;;  %v314_v14 = vadd.f32 1.0, %v480_v9 }
  0xf3   :  { %v484_v16 = vpop.eup %483  ;;  %503 = vrcp.f32 %v306_v10  ;;  %v309_v17 = vadd.f32 1.0, %v482_v12 }
  0xf4   :  { %v486_v19 = vpop.eup %485  ;;  %505 = vrcp.f32 %v314_v14  ;;  %v317_v20 = vadd.f32 1.0, %v484_v16 }
  0xf5   :  { %v488_v22 = vpop.eup %487  ;;  %507 = vrcp.f32 %v309_v17  ;;  %v307_v25 = vadd.f32 1.0, %v486_v19 }
  0xf6   :  { %v490_v26 = vpop.eup %489  ;;  %509 = vrcp.f32 %v317_v20  ;;  %v315_v27 = vadd.f32 1.0, %v488_v22 }
  0xf7   :  { %v492_v31 = vpop.eup %491  ;;  %511 = vrcp.f32 %v307_v25  ;;  %v312_v32 = vadd.f32 1.0, %v490_v26 }
  0xf8   :  { %v494_v34 = vpop.eup %493  ;;  %513 = vrcp.f32 %v315_v27  ;;  %v320_v37 = vadd.f32 1.0, %v492_v31 }
  0xf9   :  { %v496_v38 = vpop.eup %495  ;;  %515 = vrcp.f32 %v312_v32  ;;  %v310_v41 = vadd.f32 1.0, %v494_v34 }
  0xfa   :  { %v498_v42 = vpop.eup %497  ;;  %517 = vrcp.f32 %v320_v37  ;;  %v318_v43 = vadd.f32 1.0, %v496_v38 }
  0xfb   :  { %v500_v45 = vpop.eup %499  ;;  %519 = vrcp.f32 %v310_v41  ;;  %v313_v46 = vadd.f32 1.0, %v498_v42 }
  0xfc   :  { %v502_v48 = vpop.eup %501  ;;  %v356_v49 = vmul.f32 %v500_v45, %v615_v23  ;;  %521 = vrcp.f32 %v318_v43 }
  0xfd   :  { %v504_v50 = vpop.eup %503  ;;  %v364_v51 = vmul.f32 %v502_v48, %v618_v24  ;;  %523 = vrcp.f32 %v313_v46 }
  0xfe   :  { %v506_v52 = vpop.eup %505  ;;  %373 = vst.msk [vmem:[%s774_s4 + $0x10] sm:$0xff] %vm370_vm2, %v356_v49  ;;  %v354_v53 = vmul.f32 %v504_v50, %v623_v29  ;;  %525 = vpow2.f32 %v426_v44 }
  0xff   :  { %v508_v54 = vpop.eup %507  ;;  %381 = vst.msk [vmem:[%s774_s4 + $0x50] sm:$0xff] %vm370_vm2, %v364_v51  ;;  %v362_v23 = vmul.f32 %v506_v52, %v626_v30  ;;  %527 = vpow2.f32 %v416_v47 }
 0x100   :  { %v510_v24 = vpop.eup %509  ;;  %371 = vst.msk [vmem:[%s774_s4] sm:$0xff] %vm370_vm2, %v354_v53  ;;  %v357_v57 = vmul.f32 %v508_v54, %v633_v35  ;;  %529 = vpow2.f32 %v424_v13 }
 0x101   :  { %v512_v29 = vpop.eup %511  ;;  %379 = vst.msk [vmem:[%s774_s4 + $0x40] sm:$0xff] %vm370_vm2, %v362_v23  ;;  %v365_v58 = vmul.f32 %v510_v24, %v636_v36 }
 0x102   :  { %v514_v59 = vpop.eup %513  ;;  %374 = vst.msk [vmem:[%s774_s4 + $0x18] sm:$0xff] %vm370_vm2, %v357_v57  ;;  %v355_v30 = vmul.f32 %v512_v29, %v641_v39 }
 0x103   :  { %v516_v62 = vpop.eup %515  ;;  %382 = vst.msk [vmem:[%s774_s4 + $0x58] sm:$0xff] %vm370_vm2, %v365_v58  ;;  %v363_v35 = vmul.f32 %v514_v59, %v644_v40 }
 0x104   :  { %v518_v63 = vpop.eup %517  ;;  %372 = vst.msk [vmem:[%s774_s4 + $0x8] sm:$0xff] %vm370_vm2, %v355_v30  ;;  %v360_v36 = vmul.f32 %v516_v62, %v655_v55 }
 0x105   :  { %v520_v1 = vpop.eup %519  ;;  %380 = vst.msk [vmem:[%s774_s4 + $0x48] sm:$0xff] %vm370_vm2, %v363_v35  ;;  %v368_v39 = vmul.f32 %v518_v63, %v658_v56 }
 0x106   :  { %v522_v2 = vpop.eup %521  ;;  %377 = vst.msk [vmem:[%s774_s4 + $0x30] sm:$0xff] %vm370_vm2, %v360_v36  ;;  %v358_v40 = vmul.f32 %v520_v1, %v662_v60 }
 0x107   :  { %v524_v3 = vpop.eup %523  ;;  %385 = vst.msk [vmem:[%s774_s4 + $0x70] sm:$0xff] %vm370_vm2, %v368_v39  ;;  %v366_v55 = vmul.f32 %v522_v2, %v665_v61 }
 0x108   :  { %v526_v4 = vpop.eup %525  ;;  %375 = vst.msk [vmem:[%s774_s4 + $0x20] sm:$0xff] %vm370_vm2, %v358_v40  ;;  %v361_v56 = vmul.f32 %v524_v3, %v670_v0 }
 0x109   :  { %v528_v5 = vpop.eup %527  ;;  %383 = vst.msk [vmem:[%s774_s4 + $0x60] sm:$0xff] %vm370_vm2, %v366_v55  ;;  %v321_v60 = vadd.f32 1.0, %v526_v4 }
 0x10a   :  { %v530_v6 = vpop.eup %529  ;;  %378 = vst.msk [vmem:[%s774_s4 + $0x38] sm:$0xff] %vm370_vm2, %v361_v56  ;;  %v311_v61 = vadd.f32 1.0, %v528_v5 }
 0x10b   :  { %531 = vrcp.f32 %v321_v60  ;;  %v319_v7 = vadd.f32 1.0, %v530_v6 }
 0x10c   :  { %533 = vrcp.f32 %v311_v61 }
 0x10d   :  { %535 = vrcp.f32 %v319_v7 }
 0x115   :  { %v532_v8 = vpop.eup %531 }
 0x116   :  { %v534_v0 = vpop.eup %533  ;;  %v369_v9 = vmul.f32 %v532_v8, %v679_v28 }
 0x117   :  { %v536_v10 = vpop.eup %535  ;;  %v359_v12 = vmul.f32 %v534_v0, %v682_v33 }
 0x118   :  { %386 = vst.msk [vmem:[%s774_s4 + $0x78] sm:$0xff] %vm370_vm2, %v369_v9  ;;  %v367_v14 = vmul.f32 %v536_v10, %v685_v11 }
 0x119   :  { %376 = vst.msk [vmem:[%s774_s4 + $0x28] sm:$0xff] %vm370_vm2, %v359_v12 }
 0x11a   :  { %384 = vst.msk [vmem:[%s774_s4 + $0x68] sm:$0xff] %vm370_vm2, %v367_v14 }

// kernel: serm_forward.8
= control target key start
LH: loop header
LB: loop body
LE: loop exit
PB: predicated region body
PF: predicated region fallthrough
CT: control target
= control target key end

     0   :  { %s1951_s12 = smov 0   ;;  %s2344_s0 = inlined_call_operand.vmem [shape: f32[2,10,10,48], index: 0, kind: input, shape index: {}]   ;;  %s2345_s1 = inlined_call_operand.vmem [shape: bf16[9,48,48], index: 1, kind: input, shape index: {}]   ;;  %s2346_s2 = inlined_call_operand.vmem [shape: f32[2,1,48], index: 2, kind: input, shape index: {}]   ;;  %s2347_s3 = inlined_call_operand.vmem [shape: f32[2,8,8,16], index: 3, kind: output, shape index: {}]  }
   0x1 LB: > { %s1499_s13 = sadd.s32 4294967295, %s1927_s12   ;;  %p1503_p0 = scmp.ge.s32.totalorder %s1927_s12, 1  ;;  %s1927_s12 = sphi %s1951_s12, %s13_s12  }
   0x2   : > { %p137_p1 = scmp.lt.s32.totalorder %s1927_s12, 3 }
   0x4   : > { %p138_p2 = pnand %p1503_p0, %p137_p1 }
   0x5   : > { %v1894_v0 = vld [vmem:[%s2345_s1 + $0x18] sm:$0xff] (!%p138_p2)   ;;  %p161_p3 = scmp.lt.s32.totalorder (!%p138_p2), %s1499_s13, 1  ;;  %v1895_v1 = vld [vmem:[%s2345_s1 + $0x60] sm:$0xff] (!%p138_p2)   ;;  %v1897_v3 = vld [vmem:[%s2345_s1 + $0x68] sm:$0xff] (!%p138_p2)   ;;  %vm218_vm0 = vcmask (!%p138_p2), 1046528   ;;  %vm280_vm1 = vcmask (!%p138_p2), 392192  }
   0x6   : > { %141 = sbr.rel (%p138_p2) target bundleno = 465 (0x1d1), region = 32  ;;  %1687 = vmatprep.subr.bf16.mxu1 (!%p138_p2), %v1894_v0  ;;  %v1896_v2 = vld [vmem:[%s2345_s1 + $0x20] sm:$0xff] (!%p138_p2)   ;;  %1743 = vmatprep.subr.bf16.mxu0 (!%p138_p2), %v1895_v1  ;;  %v1898_v4 = vld [vmem:[%s2345_s1 + $0x28] sm:$0xff] (!%p138_p2)   ;;  %v1899_v5 = vld [vmem:[%s2345_s1 + $0x70] sm:$0xff] (!%p138_p2)   ;;  %vm453_vm2 = vcmask (!%p138_p2), 1045504   ;;  %s1929_s26 = smov (!%p138_p2), 112  }
   0x7   : > { %1688 = vmatpush3.bf16.msra.mxu1 (!%p138_p2), %v1894_v0  ;;  %1744 = vmatpush3.bf16.msra.mxu0 (!%p138_p2), %v1895_v1  ;;  %v1900_v13 = vld [vmem:[%s2345_s1] sm:$0xff] (!%p138_p2)   ;;  %v1901_v27 = vld [vmem:[%s2345_s1 + $0x78] sm:$0xff] (!%p138_p2)   ;;  %v1902_v37 = vld [vmem:[%s2345_s1 + $0x8] sm:$0xff] (!%p138_p2)   ;;  %s1930_s27 = smov (!%p138_p2), 96   ;;  %vm1435_vm11 = vcmask (!%p138_p2), 130048  }
   0x8   : > { %1689 = vmatprep.subr.bf16.mxu1 (!%p138_p2), %v1896_v2  ;;  %1745 = vmatprep.subr.bf16.mxu0 (!%p138_p2), %v1897_v3  ;;  %v1903_v39 = vld [vmem:[%s2345_s1 + $0x80] sm:$0xff] (!%p138_p2)   ;;  %v1904_v62 = vld [vmem:[%s2345_s1 + $0x10] sm:$0xff] (!%p138_p2)  }
   0xb   : > { %1690 = vmatpush3.bf16.msra.mxu1 (!%p138_p2), %v1896_v2  ;;  %1746 = vmatpush3.bf16.msra.mxu0 (!%p138_p2), %v1897_v3  ;;  %v1905_v2 = vld [vmem:[%s2345_s1 + $0x88] sm:$0xff] (!%p138_p2)  }
   0xc   : > { %1691 = vmatprep.subr.bf16.mxu1 (!%p138_p2), %v1898_v4  ;;  %1747 = vmatprep.subr.bf16.mxu0 (!%p138_p2), %v1899_v5 }
   0xd   : > { %s2349_s13 = smov (!%p161_p3, %s1499_s13), 1 }
   0xe   : > { %s1883_s24 = smul.u32 160, %s2349_s13  ;;  %s1623_s28 = sshll.u32 %s2349_s13, 6 }
   0xf   : > { %1692 = vmatpush3.bf16.msra.mxu1 %v1898_v4  ;;  %1748 = vmatpush3.bf16.msra.mxu0 %v1899_v5  ;;  %s2313_s5 = scalar_lea.vmem %s2347_s3, %s1623_s28 }
  0x10   : > { %s1983_s29 = scalar_lea.vmem %s2344_s0, %s1883_s24  ;;  %1701 = vmatprep.subr.bf16.mxu1 %v1900_v13  ;;  %1757 = vmatprep.subr.bf16.mxu0 %v1901_v27 }
  0x11   : > { %v1986_v6 = vld [vmem:[%s1983_s29] sm:$0xff]  ;;  %v1989_v7 = vld [vmem:[%s1983_s29 + $0x8] sm:$0x3]  ;;  %v1992_v8 = vld [vmem:[%s1983_s29 + $0x10] sm:$0xff] }
  0x12   : > { %v1995_v9 = vld [vmem:[%s1983_s29 + $0x18] sm:$0x3]  ;;  %v219_v10 = vrot.slane %v1986_v6, 1  ;;  %v220_v11 = vrot.slane %v1989_v7, 1  ;;  %v222_v12 = vrot.slane %v1992_v8, 1  ;;  %v2005_v15 = vld [vmem:[%s1983_s29 + $0x20] sm:$0xff]  ;;  %v192_v63 = vpack.c.bf16 %v1992_v8, %v1986_v6 }
  0x13   : > { %v223_v14 = vrot.slane %v1995_v9, 1  ;;  %v2008_v16 = vld [vmem:[%s1983_s29 + $0x28] sm:$0x3]  ;;  %v2012_v18 = vld [vmem:[%s1983_s29 + $0x30] sm:$0xff]  ;;  %v2015_v19 = vld [vmem:[%s1983_s29 + $0x38] sm:$0x3] }
  0x14   : > { %v221_v17 = vsel %vm218_vm0, %v219_v10, %v220_v11  ;;  %v225_v20 = vrot.slane %v2005_v15, 1  ;;  %v226_v21 = vrot.slane %v2008_v16, 1  ;;  %v228_v23 = vrot.slane %v2012_v18, 1  ;;  %v2025_v25 = vld [vmem:[%s1983_s29 + $0x40] sm:$0xff]  ;;  %v2028_v26 = vld [vmem:[%s1983_s29 + $0x48] sm:$0x3] }
  0x15   : > { %v2020_v22 = vsel %vm218_vm0, %v222_v12, %v223_v14  ;;  %v229_v24 = vrot.slane %v2015_v19, 1  ;;  %v231_v30 = vrot.slane %v2025_v25, 1  ;;  %v458_v31 = vrot.slane %v1995_v9, 2  ;;  %v2062_v40 = vld [vmem:[%s1983_s29 + $0x50] sm:$0xff]  ;;  %v2065_v41 = vld [vmem:[%s1983_s29 + $0x58] sm:$0x3] }
  0x16   : > { %v251_v28 = vpack.c.bf16 %v2020_v22, %v221_v17  ;;  %v2035_v29 = vsel %vm218_vm0, %v225_v20, %v226_v21  ;;  %v232_v34 = vrot.slane %v2028_v26, 1  ;;  %v461_v36 = vrot.slane %v2008_v16, 2  ;;  %v2076_v47 = vld [vmem:[%s1983_s29 + $0x60] sm:$0xff]  ;;  %v185_v48 = vld [vmem:[%s1983_s29 + $0x68] sm:$0x3]  ;;  %v2080_v49 = vld [vmem:[%s1983_s29 + $0x70] sm:$0xff] }
  0x17   : > { %v2040_v32 = vsel %vm218_vm0, %v228_v23, %v229_v24  ;;  %v720_v33 = vpack.c.bf16 %v2035_v29, %v2020_v22  ;;  %v457_v42 = vrot.slane %v1992_v8, 2  ;;  %v460_v43 = vrot.slane %v2005_v15, 2  ;;  %v2084_v52 = vld [vmem:[%s1983_s29 + $0x78] sm:$0x3]  ;;  %v2088_v54 = vld [vmem:[%s1983_s29 + $0x80] sm:$0xff]  ;;  %v1906_v14 = vld [vmem:[%s2345_s1 + $0x30] sm:$0xff]  }
  0x18   : > { %1693 = vmatprep.mubr.msk.bf16.mxu1 %vm280_vm1, %v251_v28  ;;  %v2048_v35 = vpack.c.bf16 %v2040_v32, %v2035_v29  ;;  %v2056_v38 = vsel %vm218_vm0, %v231_v30, %v232_v34  ;;  %v234_v45 = vrot.slane %v2062_v40, 1  ;;  %v235_v46 = vrot.slane %v2065_v41, 1  ;;  %v2096_v57 = vld [vmem:[%s1983_s29 + $0x88] sm:$0x3]  ;;  %v1907_v20 = vld [vmem:[%s2345_s1 + $0x90] sm:$0xff]  }
  0x19   : > { %1749 = vmatprep.mubr.msk.bf16.mxu0 %vm280_vm1, %v720_v33  ;;  %v721_v44 = vpack.c.bf16 %v2056_v38, %v2040_v32  ;;  %v237_v50 = vrot.slane %v2076_v47, 1  ;;  %v238_v51 = vrot.slane %v185_v48, 1  ;;  %v240_v53 = vrot.slane %v2080_v49, 1 }
  0x1a   : > { %1694 = vmatmul.mubr.msk.bf16.vlgmr.msra.gmra.mrb[0].mxu1 %vm280_vm1, %v2048_v35  ;;  %v2092_v55 = vsel %vm218_vm0, %v234_v45, %v235_v46  ;;  %v241_v56 = vrot.slane %v2084_v52, 1  ;;  %v716_v58 = vrot.slane %v2088_v54, 1  ;;  %v717_v61 = vrot.slane %v2096_v57, 1  ;;  %v1910_v45 = vld [vmem:[%s2345_s1 + $0x40] sm:$0xff]  }
  0x1b   : > { %1702 = vmatpush3.bf16.msra.mxu1 %v1900_v13  ;;  %1750 = vmatmul.mubr.msk.bf16.vlgmr.msra.gmra.mrb[0].mxu0 %vm280_vm1, %v721_v44  ;;  %v2101_v59 = vpack.c.bf16 %v2092_v55, %v2056_v38  ;;  %v2104_v60 = vsel %vm218_vm0, %v237_v50, %v238_v51  ;;  %v2121_v3 = vsel %vm453_vm2, %v457_v42, %v458_v31  ;;  %v464_v5 = vrot.slane %v2015_v19, 2 }
  0x1c   : > { %1703 = vmatprep.subr.bf16.mxu1 %v1902_v37  ;;  %1758 = vmatpush3.bf16.msra.mxu0 %v1901_v27  ;;  %v722_v0 = vpack.c.bf16 %v2104_v60, %v2092_v55  ;;  %v2115_v1 = vsel %vm218_vm0, %v240_v53, %v241_v56  ;;  %v2124_v4 = vsel %vm453_vm2, %v460_v43, %v461_v36  ;;  %v467_v9 = vrot.slane %v2028_v26, 2  ;;  %v1908_v36 = vld [vmem:[%s2345_s1 + $0x38] sm:$0xff]  }
  0x1d   : > { %1759 = vmatprep.subr.bf16.mxu0 %v1903_v39  ;;  %1697 = vmatprep.mubr.msk.bf16.mxu1 %vm280_vm1, %v2101_v59  ;;  %v2132_v10 = vpack.c.bf16 %v2115_v1, %v2104_v60  ;;  %v2135_v11 = vsel %vm218_vm0, %v716_v58, %v717_v61  ;;  %v463_v13 = vrot.slane %v2012_v18, 2  ;;  %v466_v16 = vrot.slane %v2025_v25, 2  ;;  %v1913_v58 = vld [vmem:[%s2345_s1 + $0xa8] sm:$0xff]  }
  0x1e   : > { %1753 = vmatprep.mubr.msk.bf16.mxu0 %vm280_vm1, %v722_v0  ;;  %v723_v12 = vpack.c.bf16 %v2135_v11, %v2115_v1  ;;  %v838_v17 = vpack.c.bf16 %v2124_v4, %v2121_v3  ;;  %v469_v19 = vrot.slane %v2062_v40, 2  ;;  %v470_v21 = vrot.slane %v2065_v41, 2  ;;  %v1915_v0 = vld [vmem:[%s2345_s1 + $0xb0] sm:$0xff]  }
  0x1f   : > { %1704 = vmatpush3.bf16.msra.mxu1 %v1902_v37  ;;  %v472_v23 = vrot.slane %v2076_v47, 2  ;;  %v473_v24 = vrot.slane %v185_v48, 2  ;;  %v465_v26 = vsel %vm453_vm2, %v463_v13, %v464_v5  ;;  %v468_v27 = vsel %vm453_vm2, %v466_v16, %v467_v9  ;;  %v1917_v5 = vld [vmem:[%s2345_s1 + $0xb8] sm:$0xff]   ;;  %v1918_v13 = vld [vmem:[%s2345_s1 + $0xc0] sm:$0xff]   ;;  %v1919_v16 = vld [vmem:[%s2345_s1 + $0xc8] sm:$0xff]  }
  0x20   : > { %1705 = vmatprep.subr.bf16.mxu1 %v1904_v62  ;;  %1760 = vmatpush3.bf16.msra.mxu0 %v1903_v39  ;;  %v454_v28 = vrot.slane %v1986_v6, 2  ;;  %v193_v30 = vpack.c.bf16 %v2012_v18, %v2005_v15  ;;  %v471_v31 = vsel %vm453_vm2, %v469_v19, %v470_v21  ;;  %v455_v34 = vrot.slane %v1989_v7, 2  ;;  %v1909_v7 = vld [vmem:[%s2345_s1 + $0x98] sm:$0xff]  }
  0x21   : > { %1761 = vmatprep.subr.bf16.mxu0 %v1905_v2  ;;  %v474_v33 = vsel %vm453_vm2, %v472_v23, %v473_v24  ;;  %v194_v37 = vpack.c.bf16 %v2062_v40, %v2025_v25  ;;  %v839_v39 = vpack.c.bf16 %v468_v27, %v465_v26  ;;  %v475_v6 = vrot.slane %v2080_v49, 2 }
  0x22   : > { %1698 = vmatmul.mubr.msk.bf16.gmra.mrb[4].mxu1 %vm280_vm1, %v2132_v10  ;;  %v476_v41 = vrot.slane %v2084_v52, 2  ;;  %v840_v42 = vpack.c.bf16 %v474_v33, %v471_v31  ;;  %v834_v43 = vrot.slane %v2088_v54, 2  ;;  %v835_v44 = vrot.slane %v2096_v57, 2  ;;  %v1911_v52 = vld [vmem:[%s2345_s1 + $0xa0] sm:$0xff]   ;;  %v1912_v57 = vld [vmem:[%s2345_s1 + $0x48] sm:$0xff]  }
  0x23   : > { %1706 = vmatpush3.bf16.msra.mxu1 %v1904_v62  ;;  %1707 = vmatprep.mubr.msk.bf16.mxu1 %vm280_vm1, %v192_v63  ;;  %v456_v46 = vsel %vm453_vm2, %v454_v28, %v455_v34  ;;  %v195_v51 = vpack.c.bf16 %v2080_v49, %v2076_v47  ;;  %v487_v61 = vpack.c.bf16 %v465_v26, %v2124_v4  ;;  %v1914_v63 = vld [vmem:[%s2345_s1 + $0x50] sm:$0xff]  }
  0x24   : > { %1754 = vmatmul.mubr.msk.bf16.gmra.mrb[4].mxu0 %vm280_vm1, %v723_v12  ;;  %1715 = vmatprep.subr.bf16.mxu1 %v1906_v14  ;;  %v477_v48 = vsel %vm453_vm2, %v475_v6, %v476_v41  ;;  %v2188_v50 = vsel %vm453_vm2, %v834_v43, %v835_v44  ;;  %v486_v53 = vpack.c.bf16 %v2121_v3, %v456_v46  ;;  %v190_v3 = vld [vmem:[%s1983_s29 + $0x90] sm:$0xff]  ;;  %v1618_v41 = vld [vmem:[%s2346_s2] ss:$0 sm:$0xff] }
  0x25   : > { %1762 = vmatpush3.bf16.msra.mxu0 %v1905_v2  ;;  %1763 = vmatprep.mubr.msk.bf16.mxu0 %vm280_vm1, %v838_v17  ;;  %v841_v56 = vpack.c.bf16 %v2188_v50, %v477_v48  ;;  %v2208_v62 = vpack.c.bf16 %v471_v31, %v468_v27  ;;  %v1916_v2 = vld [vmem:[%s2345_s1 + $0x58] sm:$0xff]   ;;  %v489_v4 = vpack.c.bf16 %v477_v48, %v474_v33  ;;  %v1056_v17 = vrot.slane %v190_v3, 1 }
  0x26   : > { %1771 = vmatprep.subr.bf16.mxu0 %v1907_v20  ;;  %v600_v9 = vpack.c.bf16 %v2005_v15, %v1992_v8  ;;  %v952_v12 = vpack.c.bf16 %v190_v3, %v2088_v54  ;;  %v191_v8 = vld [vmem:[%s1983_s29 + $0x98] sm:$0x3]  ;;  %v601_v15 = vpack.c.bf16 %v2025_v25, %v2012_v18  ;;  %v1920_v18 = vld [vmem:[%s2345_s1 + $0xd0] sm:$0xff]  }
  0x27   : > { %v1057_v19 = vrot.slane %v191_v8, 1 }
  0x29   : > { %v1058_v25 = vsel %vm218_vm0, %v1056_v17, %v1057_v19 }
  0x2a   : > { %1708 = vmatmul.mubr.msk.bf16.vlgmr.msra.gmra.mrb[0].mxu1 %vm280_vm1, %v193_v30 }
  0x2b   : > { %1716 = vmatpush3.bf16.msra.mxu1 %v1906_v14  ;;  %1711 = vmatprep.mubr.msk.bf16.mxu1 %vm280_vm1, %v194_v37  ;;  %v602_v14 = vpack.c.bf16 %v2076_v47, %v2062_v40  ;;  %v1162_v40 = vrot.slane %v190_v3, 2  ;;  %v1163_v47 = vrot.slane %v191_v8, 2 }
  0x2c   : > { %1764 = vmatmul.mubr.msk.bf16.vlgmr.msra.gmra.mrb[0].mxu0 %vm280_vm1, %v839_v39  ;;  %1717 = vmatprep.subr.bf16.mxu1 %v1908_v36 }
  0x2d   : > { %1772 = vmatpush3.bf16.msra.mxu0 %v1907_v20  ;;  %1767 = vmatprep.mubr.msk.bf16.mxu0 %vm280_vm1, %v840_v42  ;;  %v1164_v20 = vsel %vm453_vm2, %v1162_v40, %v1163_v47 }
  0x2e   : > { %1773 = vmatprep.subr.bf16.mxu0 %v1909_v7 }
  0x2f   : > { %1718 = vmatpush3.bf16.msra.mxu1 %v1908_v36 }
  0x30   : > { %1719 = vmatprep.subr.bf16.mxu1 %v1910_v45 }
  0x31   : > { %1774 = vmatpush3.bf16.msra.mxu0 %v1909_v7 }
  0x32   : > { %1712 = vmatmul.mubr.msk.bf16.gmra.mrb[4].mxu1 %vm280_vm1, %v195_v51  ;;  %1775 = vmatprep.subr.bf16.mxu0 %v1911_v52 }
  0x33   : > { %1720 = vmatpush3.bf16.msra.mxu1 %v1910_v45  ;;  %1721 = vmatprep.mubr.msk.bf16.mxu1 %vm280_vm1, %v486_v53  ;;  %v1620_v45 = vld [vmem:[%s2346_s2 + $0x1] ss:$0 sm:$0xff] }
  0x34   : > { %1768 = vmatmul.mubr.msk.bf16.gmra.mrb[4].mxu0 %vm280_vm1, %v841_v56  ;;  %1729 = vmatprep.subr.bf16.mxu1 %v1912_v57 }
  0x35   : > { %1776 = vmatpush3.bf16.msra.mxu0 %v1911_v52  ;;  %1777 = vmatprep.mubr.msk.bf16.mxu0 %vm280_vm1, %v193_v30 }
  0x36   : > { %1785 = vmatprep.subr.bf16.mxu0 %v1913_v58 }
  0x3a   : > { %1722 = vmatmul.mubr.msk.bf16.vlgmr.msra.gmra.mrb[0].mxu1 %vm280_vm1, %v487_v61 }
  0x3b   : > { %1730 = vmatpush3.bf16.msra.mxu1 %v1912_v57  ;;  %1725 = vmatprep.mubr.msk.bf16.mxu1 %vm280_vm1, %v2208_v62 }
  0x3c   : > { %1778 = vmatmul.mubr.msk.bf16.vlgmr.msra.gmra.mrb[0].mxu0 %vm280_vm1, %v194_v37  ;;  %1731 = vmatprep.subr.bf16.mxu1 %v1914_v63 }
  0x3d   : > { %1786 = vmatpush3.bf16.msra.mxu0 %v1913_v58  ;;  %1781 = vmatprep.mubr.msk.bf16.mxu0 %vm280_vm1, %v195_v51 }
  0x3e   : > { %1787 = vmatprep.subr.bf16.mxu0 %v1915_v0 }
  0x3f   : > { %1732 = vmatpush3.bf16.msra.mxu1 %v1914_v63 }
  0x40   : > { %1733 = vmatprep.subr.bf16.mxu1 %v1916_v2 }
  0x41   : > { %1788 = vmatpush3.bf16.msra.mxu0 %v1915_v0 }
  0x42   : > { %1726 = vmatmul.mubr.msk.bf16.gmra.mrb[4].mxu1 %vm280_vm1, %v489_v4  ;;  %1789 = vmatprep.subr.bf16.mxu0 %v1917_v5 }
  0x43   : > { %1734 = vmatpush3.bf16.msra.mxu1 %v1916_v2  ;;  %1735 = vmatprep.mubr.msk.bf16.mxu1 %vm280_vm1, %v600_v9 }
  0x44   : > { %1782 = vmatmul.mubr.msk.bf16.gmra.mrb[4].mxu0 %vm280_vm1, %v952_v12  ;;  %1813 = vmatprep.subr.bf16.mxu1 %v1918_v13 }
  0x45   : > { %1790 = vmatpush3.bf16.msra.mxu0 %v1917_v5  ;;  %1791 = vmatprep.mubr.msk.bf16.mxu0 %vm280_vm1, %v2048_v35  ;;  %v603_v35 = vpack.c.bf16 %v2088_v54, %v2080_v49  ;;  %v1166_v49 = vpack.c.bf16 %v1164_v20, %v2188_v50 }
  0x46   : > { %1799 = vmatprep.subr.bf16.mxu0 %v1918_v13 }
  0x4a   : > { %1736 = vmatmul.mubr.msk.bf16.vlgmr.msra.gmra.mrb[0].mxu1 %vm280_vm1, %v601_v15 }
  0x4b   : > { %1816 = vmatpush3.bf16.msra.mxu1 %v1918_v13  ;;  %1739 = vmatprep.mubr.msk.bf16.mxu1 %vm280_vm1, %v602_v14 }
  0x4c   : > { %1792 = vmatmul.mubr.msk.bf16.vlgmr.msra.gmra.mrb[0].mxu0 %vm280_vm1, %v2101_v59  ;;  %1814 = vmatprep.subr.bf16.mxu1 %v1919_v16  ;;  %v1060_v59 = vpack.c.bf16 %v1058_v25, %v2135_v11 }
  0x4d   : > { %1800 = vmatpush3.bf16.msra.mxu0 %v1918_v13  ;;  %1795 = vmatprep.mubr.msk.bf16.mxu0 %vm280_vm1, %v2132_v10 }
  0x4e   : > { %1801 = vmatprep.subr.bf16.mxu0 %v1919_v16 }
  0x4f   : > { %1817 = vmatpush3.bf16.msra.mxu1 %v1919_v16 }
  0x50   : > { %1815 = vmatprep.subr.bf16.mxu1 %v1920_v18 }
  0x51   : > { %1802 = vmatpush3.bf16.msra.mxu0 %v1919_v16 }
  0x52   : > { %1740 = vmatmul.mubr.msk.bf16.gmra.mrb[4].mxu1 %vm280_vm1, %v603_v35  ;;  %1803 = vmatprep.subr.bf16.mxu0 %v1920_v18 }
  0x53   : > { %1818 = vmatpush3.bf16.msra.mxu1 %v1920_v18  ;;  %1809 = vmatprep.mubr.msk.bf16.mxu1 %vm280_vm1, %v489_v4 }
  0x54   : > { %1796 = vmatmul.mubr.msk.bf16.gmra.mrb[4].mxu0 %vm280_vm1, %v1060_v59 }
  0x55   : > { %1804 = vmatpush3.bf16.msra.mxu0 %v1920_v18  ;;  %1805 = vmatprep.mubr.msk.bf16.mxu0 %vm280_vm1, %v487_v61 }
  0x5a   : > { %1810 = vmatmul.mubr.msk.bf16.vlgmr.msra.gmra.mrb[8].mxu1 %vm280_vm1, %v1166_v49 }
  0x5c   : > { %1806 = vmatmul.mubr.msk.bf16.vlgmr.msra.gmra.mrb[0].mxu0 %vm280_vm1, %v2208_v62 }
 0x11d   : > { %v1737_v54 = vpop.f32.mrb[0].mxu1 }
 0x11e   : > { %v675_v10 = vpop.f32.mrb[1].mxu1 }
 0x11f   : > { %v1738_v21 = vpop.f32.mrb[2].mxu1 }
 0x120   : > { %v678_v23 = vpop.f32.mrb[3].mxu1 }
 0x125   : > { %v1741_v24 = vpop.f32.mrb[4].mxu1 }
 0x126   : > { %v691_v26 = vpop.f32.mrb[5].mxu1 }
 0x127   : > { %v1797_v27 = vpop.f32.mrb[4].mxu0  ;;  %v1742_v28 = vpop.f32.mrb[6].mxu1 }
 0x128   : > { %v1823_v30 = vadd.f32 %v1797_v27, %v1741_v24  ;;  %v1139_v31 = vpop.f32.mrb[5].mxu0  ;;  %v694_v33 = vpop.f32.mrb[7].mxu1 }
 0x129   : > { %v1825_v34 = vadd.f32 %v1139_v31, %v691_v26  ;;  %v1798_v36 = vpop.f32.mrb[6].mxu0 }
 0x12a   : > { %v1827_v37 = vadd.f32 %v1798_v36, %v1742_v28  ;;  %v1142_v39 = vpop.f32.mrb[7].mxu0 }
 0x12b   : > { %v1829_v6 = vadd.f32 %v1142_v39, %v694_v33 }
 0x12d   : > { %v1811_v42 = vpop.f32.mrb[8].mxu1 }
 0x12e   : > { %v1824_v43 = vadd.f32 %v1823_v30, %v1811_v42  ;;  %v1245_v44 = vpop.f32.mrb[9].mxu1 }
 0x12f   : > { %v1807_v7 = vpop.f32.mrb[0].mxu0  ;;  %v1826_v46 = vadd.f32 %v1825_v34, %v1245_v44  ;;  %v1812_v48 = vpop.f32.mrb[10].mxu1 }
 0x130   : > { %v1819_v50 = vadd.f32 %v1807_v7, %v1737_v54  ;;  %v1281_v51 = vmul.f32 %v1824_v43, %v1618_v41  ;;  %v1229_v52 = vpop.f32.mrb[1].mxu0  ;;  %v1828_v53 = vadd.f32 %v1827_v37, %v1812_v48  ;;  %v1248_v56 = vpop.f32.mrb[11].mxu1 }
 0x131   : > { %v1820_v57 = vadd.f32 %v1229_v52, %v675_v10  ;;  %v1808_v58 = vpop.f32.mrb[2].mxu0  ;;  %v1830_v61 = vadd.f32 %v1829_v6, %v1248_v56  ;;  %v1279_v14 = vmul.f32 %v1826_v46, %v1618_v41 }
 0x132   : > { %v1277_v62 = vmul.f32 %v1819_v50, %v1618_v41  ;;  %v1297_v63 = vadd.f32 %v1620_v45, %v1281_v51  ;;  %v1821_v0 = vadd.f32 %v1808_v58, %v1738_v21  ;;  %v1232_v2 = vpop.f32.mrb[3].mxu0  ;;  %v1282_v12 = vmul.f32 %v1828_v53, %v1618_v41 }
 0x133   : > { %v1822_v3 = vadd.f32 %v1232_v2, %v678_v23  ;;  %v1275_v5 = vmul.f32 %v1820_v57, %v1618_v41  ;;  %v1295_v35 = vadd.f32 %v1620_v45, %v1279_v14  ;;  %v1280_v49 = vmul.f32 %v1830_v61, %v1618_v41 }
 0x134   : > { %v1293_v4 = vadd.f32 %v1620_v45, %v1277_v62  ;;  %v1278_v9 = vmul.f32 %v1821_v0, %v1618_v41  ;;  %v1313_v13 = vmul.f32 0.1, %v1297_v63  ;;  %vm1305_vm4 = vcmp.gt.f32.partialorder %v1297_v63, 0.0 }
 0x135   : > { %v1291_v16 = vadd.f32 %v1620_v45, %v1275_v5  ;;  %v1298_v19 = vadd.f32 %v1620_v45, %v1282_v12  ;;  %v1311_v10 = vmul.f32 0.1, %v1295_v35  ;;  %v1276_v23 = vmul.f32 %v1822_v3, %v1618_v41 }
 0x136   : > { %vm1301_vm3 = vcmp.gt.f32.partialorder %v1293_v4, 0.0  ;;  %v1309_v8 = vmul.f32 0.1, %v1293_v4  ;;  %v1294_v15 = vadd.f32 %v1620_v45, %v1278_v9  ;;  %v1321_v25 = vsel %vm1305_vm4, %v1297_v63, %v1313_v13 }
 0x137   : > { %v2277_v47 = vadd.f32 %v1321_v25, %v2115_v1  ;;  %v1307_v59 = vmul.f32 0.1, %v1291_v16  ;;  %v1314_v20 = vmul.f32 0.1, %v1298_v19  ;;  %vm1299_vm6 = vcmp.gt.f32.partialorder %v1291_v16, 0.0 }
 0x138   : > { %v1310_v17 = vmul.f32 0.1, %v1294_v15  ;;  %vm1302_vm5 = vcmp.gt.f32.partialorder %v1294_v15, 0.0  ;;  %v1317_v18 = vsel %vm1301_vm3, %v1293_v4, %v1309_v8  ;;  %vm1306_vm7 = vcmp.gt.f32.partialorder %v1298_v19, 0.0 }
 0x139   : > { %v1325_v40 = vadd.f32 %v1317_v18, %v2040_v32  ;;  %1351 = vrot.lane.b32.xlu0 %v2277_v47, %s1929_s26  ;;  %v1296_v32 = vadd.f32 %v1620_v45, %v1280_v49  ;;  %v1315_v24 = vsel %vm1299_vm6, %v1291_v16, %v1307_v59  ;;  %v1322_v1 = vsel %vm1306_vm7, %v1298_v19, %v1314_v20 }
 0x13a   : > { %v1318_v54 = vsel %vm1302_vm5, %v1294_v15, %v1310_v17  ;;  %vm1303_vm8 = vcmp.gt.f32.partialorder %v1295_v35, 0.0  ;;  %v1323_v26 = vadd.f32 %v1315_v24, %v2020_v22  ;;  %v2286_v27 = vadd.f32 %v1322_v1, %v2135_v11 }
 0x13b   : > { %1343 = vrot.lane.b32.xlu1 %v1325_v40, %s1929_s26  ;;  %v1326_v21 = vadd.f32 %v1318_v54, %v2056_v38  ;;  %v1292_v28 = vadd.f32 %v1620_v45, %v1276_v23  ;;  %v1312_v30 = vmul.f32 0.1, %v1296_v32  ;;  %v1319_v31 = vsel %vm1303_vm8, %v1295_v35, %v1311_v10 }
 0x13c   : > { %vm1304_vm9 = vcmp.gt.f32.partialorder %v1296_v32, 0.0  ;;  %v1327_v38 = vadd.f32 %v1319_v31, %v2092_v55 }
 0x13d   : > { %1375 = vrot.lane.b32.xlu0 %v1325_v40, %s1930_s27  ;;  %v1308_v33 = vmul.f32 0.1, %v1292_v28  ;;  %v1320_v34 = vsel %vm1304_vm9, %v1296_v32, %v1312_v30  ;;  %vm1300_vm10 = vcmp.gt.f32.partialorder %v1292_v28, 0.0 }
 0x13e   : > { %v2294_v22 = vadd.f32 %v1320_v34, %v2104_v60 }
 0x13f   : > { %1345 = vrot.lane.b32.xlu1 %v1326_v21, %s1929_s26  ;;  %v1316_v11 = vsel %vm1300_vm10, %v1292_v28, %v1308_v33 }
 0x140   : > { %v2299_v36 = vadd.f32 %v1316_v11, %v2035_v29 }
 0x141   : > { %1339 = vrot.lane.b32.xlu0 %v1323_v26, %s1929_s26 }
 0x143   : > { %1353 = vrot.lane.b32.xlu1 %v2286_v27, %s1929_s26 }
 0x145   : > { %1347 = vrot.lane.b32.xlu0 %v1327_v38, %s1929_s26 }
 0x147   : > { %1377 = vrot.lane.b32.xlu1 %v1326_v21, %s1930_s27 }
 0x149   : > { %1371 = vrot.lane.b32.xlu0 %v1323_v26, %s1930_s27 }
 0x14b   : > { %1349 = vrot.lane.b32.xlu1 %v2294_v22, %s1929_s26 }
 0x14d   : > { %1379 = vrot.lane.b32.xlu0 %v1327_v38, %s1930_s27 }
 0x14f   : > { %1373 = vrot.lane.b32.xlu1 %v2299_v36, %s1930_s27 }
 0x151   : > { %1341 = vrot.lane.b32.xlu0 %v2299_v36, %s1929_s26 }
 0x153   : > { %1381 = vrot.lane.b32.xlu1 %v2294_v22, %s1930_s27 }
 0x155   : > { %1383 = vrot.lane.b32.xlu0 %v2277_v47, %s1930_s27 }
 0x157   : > { %1385 = vrot.lane.b32.xlu1 %v2286_v27, %s1930_s27 }
 0x1ab   : > { %v2307_v60 = vpop.permute.xlu0 %1351 }
 0x1ac   : > { %v1409_v20 = vadd.f32 %v2307_v60, %v2277_v47  ;;  %v1369_v24 = vmax.f32 %v2277_v47, %v2307_v60 }
 0x1ad   : > { %v1344_v55 = vpop.permute.xlu1 %1343 }
 0x1ae   : > { %v1405_v37 = vadd.f32 %v1344_v55, %v1325_v40  ;;  %v1365_v29 = vmax.f32 %v1325_v40, %v1344_v55 }
 0x1af   : > { %v1376_v6 = vpop.permute.xlu0 %1375 }
 0x1b0   : > { %v1413_v41 = vadd.f32 %v1405_v37, %v1376_v6  ;;  %v1397_v42 = vmax.f32 %v1365_v29, %v1376_v6 }
 0x1b1   : > { %v1346_v39 = vpop.permute.xlu1 %1345 }
 0x1b2   : > { %v1421_v43 = vmul.f32 0.33333334, %v1413_v41  ;;  %v1406_v46 = vadd.f32 %v1346_v39, %v1326_v21  ;;  %v1366_v51 = vmax.f32 %v1326_v21, %v1346_v39 }
 0x1b3   : > { %v1340_v44 = vpop.permute.xlu0 %1339 }
 0x1b4   : > { %v1429_v45 = vadd.f32 %v1421_v43, %v1397_v42  ;;  %v1403_v53 = vadd.f32 %v1340_v44, %v1323_v26  ;;  %v1363_v62 = vmax.f32 %v1323_v26, %v1340_v44 }
 0x1b5   : > { %v1354_v7 = vpop.permute.xlu1 %1353 }
 0x1b6   : > { %1438 = vst.msk [vmem:[%s2313_s5 + $0x10] sm:$0xff] %vm1435_vm11, %v1429_v45  ;;  %v1410_v54 = vadd.f32 %v1354_v7, %v2286_v27  ;;  %v1370_v30 = vmax.f32 %v2286_v27, %v1354_v7 }
 0x1b7   : > { %v1348_v48 = vpop.permute.xlu0 %1347 }
 0x1b8   : > { %v1407_v2 = vadd.f32 %v1348_v48, %v1327_v38  ;;  %v1367_v12 = vmax.f32 %v1327_v38, %v1348_v48 }
 0x1b9   : > { %v1378_v50 = vpop.permute.xlu1 %1377 }
 0x1ba   : > { %v1414_v52 = vadd.f32 %v1406_v46, %v1378_v50  ;;  %v1398_v56 = vmax.f32 %v1366_v51, %v1378_v50 }
 0x1bb   : > { %v1372_v58 = vpop.permute.xlu0 %1371 }
 0x1bc   : > { %v1422_v57 = vmul.f32 0.33333334, %v1414_v52  ;;  %v1411_v0 = vadd.f32 %v1403_v53, %v1372_v58  ;;  %v1395_v3 = vmax.f32 %v1363_v62, %v1372_v58 }
 0x1bd   : > { %v1350_v61 = vpop.permute.xlu1 %1349 }
 0x1be   : > { %v1430_v63 = vadd.f32 %v1422_v57, %v1398_v56  ;;  %v1419_v4 = vmul.f32 0.33333334, %v1411_v0  ;;  %v1408_v16 = vadd.f32 %v1350_v61, %v2294_v22  ;;  %v1368_v40 = vmax.f32 %v2294_v22, %v1350_v61 }
 0x1bf   : > { %v1380_v5 = vpop.permute.xlu0 %1379 }
 0x1c0   : > { %1439 = vst.msk [vmem:[%s2313_s5 + $0x18] sm:$0xff] %vm1435_vm11, %v1430_v63  ;;  %v1427_v13 = vadd.f32 %v1419_v4, %v1395_v3  ;;  %v1415_v8 = vadd.f32 %v1407_v2, %v1380_v5  ;;  %v1399_v15 = vmax.f32 %v1367_v12, %v1380_v5 }
 0x1c1   : > { %v1374_v9 = vpop.permute.xlu1 %1373 }
 0x1c2   : > { %1436 = vst.msk [vmem:[%s2313_s5] sm:$0xff] %vm1435_vm11, %v1427_v13  ;;  %v1423_v14 = vmul.f32 0.33333334, %v1415_v8 }
 0x1c3   : > { %v1342_v17 = vpop.permute.xlu0 %1341 }
 0x1c4   : > { %v1431_v18 = vadd.f32 %v1423_v14, %v1399_v15  ;;  %v1364_v25 = vmax.f32 %v2299_v36, %v1342_v17  ;;  %v1404_v35 = vadd.f32 %v1342_v17, %v2299_v36 }
 0x1c5   : > { %v1382_v19 = vpop.permute.xlu1 %1381 }
 0x1c6   : > { %v1416_v59 = vadd.f32 %v1408_v16, %v1382_v19  ;;  %1440 = vst.msk [vmem:[%s2313_s5 + $0x20] sm:$0xff] %vm1435_vm11, %v1431_v18  ;;  %v1412_v49 = vadd.f32 %v1404_v35, %v1374_v9  ;;  %v1400_v10 = vmax.f32 %v1368_v40, %v1382_v19  ;;  %v1396_v1 = vmax.f32 %v1364_v25, %v1374_v9 }
 0x1c7   : > { %v1384_v23 = vpop.permute.xlu0 %1383 }
 0x1c8   : > { %v1424_v21 = vmul.f32 0.33333334, %v1416_v59  ;;  %v1420_v26 = vmul.f32 0.33333334, %v1412_v49  ;;  %v1417_v28 = vadd.f32 %v1409_v20, %v1384_v23  ;;  %v1401_v34 = vmax.f32 %v1369_v24, %v1384_v23 }
 0x1c9   : > { %v1386_v32 = vpop.permute.xlu1 %1385 }
 0x1ca   : > { %v1432_v31 = vadd.f32 %v1424_v21, %v1400_v10  ;;  %v1418_v38 = vadd.f32 %v1410_v54, %v1386_v32  ;;  %v1428_v33 = vadd.f32 %v1420_v26, %v1396_v1  ;;  %v1425_v22 = vmul.f32 0.33333334, %v1417_v28 }
 0x1cb   : > { %v1402_v11 = vmax.f32 %v1370_v30, %v1386_v32 }
 0x1cc   : > { %1441 = vst.msk [vmem:[%s2313_s5 + $0x28] sm:$0xff] %vm1435_vm11, %v1432_v31  ;;  %v1426_v36 = vmul.f32 0.33333334, %v1418_v38  ;;  %1437 = vst.msk [vmem:[%s2313_s5 + $0x8] sm:$0xff] %vm1435_vm11, %v1428_v33  ;;  %v1433_v55 = vadd.f32 %v1425_v22, %v1401_v34 }
 0x1ce   : > { %v1434_v47 = vadd.f32 %v1426_v36, %v1402_v11  ;;  %1442 = vst.msk [vmem:[%s2313_s5 + $0x30] sm:$0xff] %vm1435_vm11, %v1433_v55 }
 0x1d0   : > { %1443 = vst.msk [vmem:[%s2313_s5 + $0x38] sm:$0xff] %vm1435_vm11, %v1434_v47 }
 0x1d1 PF: > { %s13_s12 = sadd.s32 1, %s1927_s12  }
 0x1d2   : > { %p10_p4 = scmp.ge.s32.totalorder %s13_s12, 4  }
 0x1d4   :  { %12 = sbr.rel (!%p10_p4) target bundleno = 1 (0x1), region = 71 }

// kernel: serm_forward.9
= control target key start
LH: loop header
LB: loop body
LE: loop exit
PB: predicated region body
PF: predicated region fallthrough
CT: control target
= control target key end

     0   :  { %11 = vsyncpa [#allocation3], 0  ;;  %s5697_s21 = smov 0   ;;  %s8840_s0 = inlined_call_operand.vmem [shape: bf16[2,256,16], index: 0, kind: input, shape index: {}]   ;;  %s8841_s1 = inlined_call_operand.vmem [shape: bf16[2,256,16], index: 1, kind: input, shape index: {}]   ;;  %s8842_s2 = inlined_call_operand.vmem [shape: bf16[2,16,8], index: 2, kind: input, shape index: {}]   ;;  %s8843_s3 = inlined_call_operand.vmem [shape: bf16[7,8,8], index: 3, kind: input, shape index: {}]   ;;  %s8844_s4 = inlined_call_operand.vmem [shape: f32[8,1,8], index: 4, kind: input, shape index: {}]   ;;  %s8845_s5 = inlined_call_operand.vmem [shape: f32[2,3], index: 5, kind: input, shape index: {}]   ;;  %s8846_s6 = inlined_call_operand.vmem [shape: f32[2,256,8], index: 6, kind: output, shape index: {}]  }
   0x1 LB: > { %s5703_s22 = sadd.s32 4294967295, %s5657_s21   ;;  %p4348_p0 = scmp.ge.s32.totalorder %s5657_s21, 1  ;;  %s5657_s21 = sphi %s5697_s21, %s17_s21  }
   0x2   : > { %p184_p1 = scmp.lt.s32.totalorder %s5657_s21, 3  ;;  %s206_s25 = sshll.u32 %s8845_s5, 4  ;;  %s207_s25 = int_to_ptr.vmem [resolvable:$true] %s206_s25 }
   0x3   : > { %p5058_p3 = scmp.eq.s32.totalorder %s5703_s22, 0  ;;  %s5632_s27 = scalar_lea.vmem %s207_s25, 32 }
   0x4   : > { %p5710_p2 = pnand %p4348_p0, %p184_p1  ;;  %p5633_p6 = scmp.ne.s32.totalorder %s207_s25, %s5632_s27 }
   0x5   : > { %p5640_p10 = scmp.lt.s32.totalorder %s207_s25, %s207_s25  ;;  %p5641_p11 = scmp.lt.s32.totalorder %s5632_s27, %s5632_s27 }
   0x6   : > { %p5054_p4 = pneg %p5710_p2 }
   0x7   : > { %p5642_p12 = por %p5641_p11, %p5640_p10 }
   0x8   : > { %p5055_p5 = pnand %p5058_p3, %p5054_p4 }
   0xa   : > { %p5634_p7 = pneg %p5055_p5 }
   0xc   : > { %p5635_p8 = pnand %p5634_p7, %p5633_p6 }
   0xe   : > { %p5636_p9 = pneg %p5635_p8 }
  0x10   : > { %p5643_p13 = pnand %p5642_p12, %p5636_p9 }
  0x12   : > { %5646 = shalt.err (!%p5643_p13)
}
  0x13   : > { %s5659_s28 = smov [#allocation2]   ;;  %235 = sbr.rel (%p5710_p2) target bundleno = 1796 (0x704), region = 44 }
  0x14   : > { %5057 = dma.vmem_to_smem (!%p5055_p5), %s207_s25, 32, %s5659_s28, [#allocation3]  }
  0x1a   : > { %5652 = dma.done.wait (%p5058_p3), [#allocation3], 32  }
  0x1b   : > { %5654 = vsyncadd (%p5058_p3), [#allocation3], 4294967264 }
  0x1c   : > { %241 = sfence }
  0x1d   : > { %v5071_v0 = vld [vmem:[%s8842_s2] sm:$0xff]   ;;  %p271_p0 = scmp.lt.s32.totalorder %s5703_s22, 1  ;;  %v5074_v1 = vld [vmem:[%s8842_s2 + $0x8] sm:$0xff]   ;;  %vm470_vm0 = vcmask 130048   ;;  %vm1424_vm1 = vcmask 1043456   ;;  %vm1375_vm2 = vcmask 64512  }
  0x1e   : > { %5043 = vmatprep.subr.bf16.mxu1 %v5071_v0  ;;  %4793 = vmatprep.subr.bf16.mxu0 %v5071_v0  ;;  %v4361_v5 = vld [vmem:[%s8843_s3 + $0x4] sm:$0xf]  ;;  %v356_v36 = vld [vmem:[%s8843_s3] sm:$0xf]  ;;  %s6269_s28 = sld [smem:[#allocation2]]  ;;  %s6280_s29 = sld [smem:[#allocation2 + $0x1]] }
  0x1f   : > { %s9618_s22 = smov (!%p271_p0, %s5703_s22), 1  ;;  %5044 = vmatpush3.bf16.msra.mxu1 %v5071_v0  ;;  %4794 = vmatpush3.bf16.msra.mxu0 %v5071_v0  ;;  %v1762_v22 = vsel %vm1424_vm1, %v4361_v5, 0  ;;  %v1426_v37 = vsel %vm1424_vm1, %v356_v36, 0  ;;  %s6311_s8 = sld [smem:[#allocation2 + $0x2]]  ;;  %vm5661_vm3 = vmmov 0  }
  0x20   : > { %s4667_s9 = sshll.u32 %s9618_s22, 7  ;;  %4827 = vmatprep.subr.bf16.mxu1 %v5074_v1  ;;  %5045 = vmatprep.subr.msk.bf16.mxu0 %vm1424_vm1, %v356_v36  ;;  %s7402_s15 = sld [smem:[#allocation2 + $0x81]] }
  0x21   : > { %s5739_s12 = scalar_lea.vmem %s8840_s0, %s4667_s9  ;;  %s5768_s17 = scalar_lea.vmem %s8841_s1, %s4667_s9 }
  0x22   : > { %v5072_v2 = vld [vmem:[%s5739_s12] sm:$0xff]   ;;  %v5075_v4 = vld [vmem:[%s5739_s12 + $0x8] sm:$0xff]   ;;  %v5077_v7 = vld [vmem:[%s5739_s12 + $0x10] sm:$0xff]   ;;  %s7416_s16 = sld [smem:[#allocation2 + $0x80]]  ;;  %s7599_s19 = sld [smem:[#allocation2 + $0x82]] }
  0x23   : > { %v5073_v3 = vld [vmem:[%s5739_s12 + $0x40] sm:$0xff]   ;;  %4795 = vmatprep.mubr.msk.bf16.mxu0 %vm470_vm0, %v5072_v2  ;;  %v5076_v6 = vld [vmem:[%s5739_s12 + $0x48] sm:$0xff]   ;;  %v5078_v8 = vld [vmem:[%s5739_s12 + $0x50] sm:$0xff]   ;;  %s4669_s10 = sshll.u32 %s9618_s22, 8 }
  0x24   : > { %4811 = vmatprep.mubr.msk.bf16.mxu1 %vm470_vm0, %v5073_v3  ;;  %4796 = vmatmul.mubr.msk.bf16.vlgmr.msra.gmra.mrb[0].mxu0 %vm470_vm0, %v5075_v4  ;;  %v5079_v9 = vld [vmem:[%s5739_s12 + $0x18] sm:$0xff]   ;;  %v5081_v11 = vld [vmem:[%s5739_s12 + $0x20] sm:$0xff]   ;;  %v5083_v13 = vld [vmem:[%s5739_s12 + $0x28] sm:$0xff]   ;;  %s8711_s13 = scalar_lea.vmem %s8846_s6, %s4669_s10 }
  0x25   : > { %4812 = vmatmul.mubr.msk.bf16.vlgmr.msra.gmra.mrb[0].mxu1 %vm470_vm0, %v5076_v6  ;;  %4799 = vmatprep.mubr.msk.bf16.mxu0 %vm470_vm0, %v5077_v7  ;;  %v5080_v10 = vld [vmem:[%s5739_s12 + $0x58] sm:$0xff]   ;;  %v5082_v12 = vld [vmem:[%s5739_s12 + $0x60] sm:$0xff]   ;;  %v5084_v14 = vld [vmem:[%s5739_s12 + $0x68] sm:$0xff]  }
  0x26   : > { %4828 = vmatpush3.bf16.msra.mxu1 %v5074_v1  ;;  %4815 = vmatprep.mubr.msk.bf16.mxu1 %vm470_vm0, %v5078_v8  ;;  %v5085_v15 = vld [vmem:[%s5739_s12 + $0x30] sm:$0xff]   ;;  %v5087_v17 = vld [vmem:[%s5739_s12 + $0x38] sm:$0xff]   ;;  %v5089_v19 = vld [vmem:[%s5768_s17] sm:$0xff]  }
  0x27   : > { %5046 = vmatprep.subr.msk.bf16.mxu1 %vm1424_vm1, %v4361_v5  ;;  %v5086_v16 = vld [vmem:[%s5739_s12 + $0x70] sm:$0xff]   ;;  %v5088_v18 = vld [vmem:[%s5739_s12 + $0x78] sm:$0xff]   ;;  %v5090_v20 = vld [vmem:[%s5768_s17 + $0x8] sm:$0xff]   ;;  %4862 = vmatpush3.bf16.msra.mxu0 %v1426_v37 }
  0x28   : > { %v5091_v21 = vld [vmem:[%s5768_s17 + $0x10] sm:$0xff]   ;;  %v5092_v23 = vld [vmem:[%s5768_s17 + $0x18] sm:$0xff]   ;;  %v5093_v24 = vld [vmem:[%s5768_s17 + $0x20] sm:$0xff]  }
  0x29   : > { %v5094_v25 = vld [vmem:[%s5768_s17 + $0x28] sm:$0xff]   ;;  %v5095_v26 = vld [vmem:[%s5768_s17 + $0x30] sm:$0xff]   ;;  %v5096_v27 = vld [vmem:[%s5768_s17 + $0x38] sm:$0xff]  }
  0x2a   : > { %v5097_v28 = vld [vmem:[%s5768_s17 + $0x40] sm:$0xff]   ;;  %v5098_v29 = vld [vmem:[%s5768_s17 + $0x48] sm:$0xff]   ;;  %v5099_v30 = vld [vmem:[%s5768_s17 + $0x50] sm:$0xff]  }
  0x2b   : > { %v5100_v31 = vld [vmem:[%s5768_s17 + $0x58] sm:$0xff]   ;;  %v5101_v32 = vld [vmem:[%s5768_s17 + $0x60] sm:$0xff]   ;;  %v5102_v33 = vld [vmem:[%s5768_s17 + $0x68] sm:$0xff]  }
  0x2c   : > { %4800 = vmatmul.mubr.msk.bf16.gmra.mrb[4].mxu0 %vm470_vm0, %v5079_v9  ;;  %v5103_v34 = vld [vmem:[%s5768_s17 + $0x70] sm:$0xff]   ;;  %v5104_v35 = vld [vmem:[%s5768_s17 + $0x78] sm:$0xff]  }
  0x2d   : > { %4816 = vmatmul.mubr.msk.bf16.gmra.mrb[4].mxu1 %vm470_vm0, %v5080_v10  ;;  %4803 = vmatprep.mubr.msk.bf16.mxu0 %vm470_vm0, %v5081_v11 }
  0x2e   : > { %4819 = vmatprep.mubr.msk.bf16.mxu1 %vm470_vm0, %v5082_v12 }
  0x34   : > { %4804 = vmatmul.mubr.msk.bf16.gmra.mrb[8].mxu0 %vm470_vm0, %v5083_v13 }
  0x35   : > { %4820 = vmatmul.mubr.msk.bf16.gmra.mrb[8].mxu1 %vm470_vm0, %v5084_v14  ;;  %4807 = vmatprep.mubr.msk.bf16.mxu0 %vm470_vm0, %v5085_v15 }
  0x36   : > { %4823 = vmatprep.mubr.msk.bf16.mxu1 %vm470_vm0, %v5086_v16 }
  0x3c   : > { %4808 = vmatmul.mubr.msk.bf16.gmra.mrb[12].mxu0 %vm470_vm0, %v5087_v17 }
  0x3d   : > { %4824 = vmatmul.mubr.msk.bf16.gmra.mrb[12].mxu1 %vm470_vm0, %v5088_v18 }
  0x3e   : > { %4829 = vmatprep.mubr.msk.bf16.mxu1 %vm470_vm0, %v5089_v19 }
  0x45   : > { %4830 = vmatmul.mubr.msk.bf16.vlgmr.msra.gmra.mrb[16].mxu1 %vm470_vm0, %v5090_v20 }
  0x46   : > { %4833 = vmatprep.mubr.msk.bf16.mxu1 %vm470_vm0, %v5091_v21  ;;  %4896 = vmatpush3.bf16.msra.mxu1 %v1762_v22 }
  0x4d   : > { %4834 = vmatmul.mubr.msk.bf16.gmra.mrb[20].mxu1 %vm470_vm0, %v5092_v23 }
  0x4e   : > { %4837 = vmatprep.mubr.msk.bf16.mxu1 %vm470_vm0, %v5093_v24 }
  0x55   : > { %4838 = vmatmul.mubr.msk.bf16.gmra.mrb[24].mxu1 %vm470_vm0, %v5094_v25 }
  0x56   : > { %4841 = vmatprep.mubr.msk.bf16.mxu1 %vm470_vm0, %v5095_v26 }
  0x5d   : > { %4842 = vmatmul.mubr.msk.bf16.gmra.mrb[28].mxu1 %vm470_vm0, %v5096_v27 }
  0x5e   : > { %4845 = vmatprep.mubr.msk.bf16.mxu1 %vm470_vm0, %v5097_v28 }
  0x65   : > { %4846 = vmatmul.mubr.msk.bf16.gmra.mrb[32].mxu1 %vm470_vm0, %v5098_v29 }
  0x66   : > { %4849 = vmatprep.mubr.msk.bf16.mxu1 %vm470_vm0, %v5099_v30 }
  0x6d   : > { %4850 = vmatmul.mubr.msk.bf16.gmra.mrb[36].mxu1 %vm470_vm0, %v5100_v31 }
  0x6e   : > { %4853 = vmatprep.mubr.msk.bf16.mxu1 %vm470_vm0, %v5101_v32 }
  0x75   : > { %4854 = vmatmul.mubr.msk.bf16.gmra.mrb[40].mxu1 %vm470_vm0, %v5102_v33 }
  0x76   : > { %4857 = vmatprep.mubr.msk.bf16.mxu1 %vm470_vm0, %v5103_v34 }
  0x7d   : > { %4858 = vmatmul.mubr.msk.bf16.gmra.mrb[44].mxu1 %vm470_vm0, %v5104_v35 }
  0xf7   : > { %v5820_v38 = vpop.f32.mrb[0].mxu0 }
  0xf8   : > { %v5822_v39 = vpop.f32.mrb[0].mxu1  ;;  %v5824_v40 = vpop.f32.mrb[1].mxu0 }
  0xf9   : > { %v5826_v41 = vpop.f32.mrb[1].mxu1  ;;  %v5828_v42 = vpop.f32.mrb[2].mxu0 }
  0xfa   : > { %v1360_v43 = vpack.c.bf16 %v5828_v42, %v5820_v38  ;;  %v5832_v44 = vpop.f32.mrb[2].mxu1  ;;  %v5834_v45 = vpop.f32.mrb[3].mxu0 }
  0xfb   : > { %v1368_v46 = vpack.c.bf16 %v5832_v44, %v5822_v39  ;;  %v5838_v47 = vpop.f32.mrb[3].mxu1  ;;  %v1359_v48 = vpack.c.bf16 %v5834_v45, %v5824_v40 }
  0xfc   : > { %v1367_v49 = vpack.c.bf16 %v5838_v47, %v5826_v41 }
  0xfd   : > { %4863 = vmatprep.mubr.msk.bf16.mxu0 %vm1375_vm2, %v1359_v48 }
  0xfe   : > { %4864 = vmatmul.mubr.msk.bf16.vlgmr.msra.gmra.mrb[16].mxu0 %vm1375_vm2, %v1360_v43 }
  0xff   : > { %v5846_v50 = vpop.f32.mrb[4].mxu0 }
 0x100   : > { %v5848_v51 = vpop.f32.mrb[4].mxu1  ;;  %v5850_v52 = vpop.f32.mrb[5].mxu0 }
 0x101   : > { %v5852_v53 = vpop.f32.mrb[5].mxu1  ;;  %v5854_v54 = vpop.f32.mrb[6].mxu0 }
 0x102   : > { %v1362_v55 = vpack.c.bf16 %v5854_v54, %v5846_v50  ;;  %v5858_v56 = vpop.f32.mrb[6].mxu1  ;;  %v5860_v57 = vpop.f32.mrb[7].mxu0 }
 0x103   : > { %v1370_v58 = vpack.c.bf16 %v5858_v56, %v5848_v51  ;;  %v5864_v59 = vpop.f32.mrb[7].mxu1  ;;  %v1361_v60 = vpack.c.bf16 %v5860_v57, %v5850_v52 }
 0x104   : > { %v1369_v61 = vpack.c.bf16 %v5864_v59, %v5852_v53 }
 0x105   : > { %4867 = vmatprep.mubr.msk.bf16.mxu0 %vm1375_vm2, %v1361_v60 }
 0x106   : > { %4868 = vmatmul.mubr.msk.bf16.gmra.mrb[20].mxu0 %vm1375_vm2, %v1362_v55 }
 0x107   : > { %v5872_v62 = vpop.f32.mrb[8].mxu0 }
 0x108   : > { %v5874_v63 = vpop.f32.mrb[8].mxu1  ;;  %v5876_v0 = vpop.f32.mrb[9].mxu0 }
 0x109   : > { %v5878_v1 = vpop.f32.mrb[9].mxu1  ;;  %v5880_v2 = vpop.f32.mrb[10].mxu0 }
 0x10a   : > { %v5882_v3 = vpop.f32.mrb[10].mxu1  ;;  %v1364_v4 = vpack.c.bf16 %v5880_v2, %v5872_v62  ;;  %v5886_v5 = vpop.f32.mrb[11].mxu0 }
 0x10b   : > { %v5888_v6 = vpop.f32.mrb[11].mxu1  ;;  %v1372_v7 = vpack.c.bf16 %v5882_v3, %v5874_v63  ;;  %v1363_v8 = vpack.c.bf16 %v5886_v5, %v5876_v0 }
 0x10c   : > { %v1371_v9 = vpack.c.bf16 %v5888_v6, %v5878_v1 }
 0x10d   : > { %4871 = vmatprep.mubr.msk.bf16.mxu0 %vm1375_vm2, %v1363_v8 }
 0x10e   : > { %4872 = vmatmul.mubr.msk.bf16.gmra.mrb[24].mxu0 %vm1375_vm2, %v1364_v4 }
 0x10f   : > { %v5897_v10 = vpop.f32.mrb[12].mxu0 }
 0x110   : > { %v5900_v11 = vpop.f32.mrb[12].mxu1  ;;  %v5902_v12 = vpop.f32.mrb[13].mxu0 }
 0x111   : > { %v5904_v13 = vpop.f32.mrb[13].mxu1  ;;  %v5906_v14 = vpop.f32.mrb[14].mxu0 }
 0x112   : > { %v5908_v15 = vpop.f32.mrb[14].mxu1  ;;  %v1366_v16 = vpack.c.bf16 %v5906_v14, %v5897_v10  ;;  %v5912_v17 = vpop.f32.mrb[15].mxu0 }
 0x113   : > { %v5914_v18 = vpop.f32.mrb[15].mxu1  ;;  %v1374_v19 = vpack.c.bf16 %v5908_v15, %v5900_v11  ;;  %v1365_v20 = vpack.c.bf16 %v5912_v17, %v5902_v12 }
 0x114   : > { %v1373_v21 = vpack.c.bf16 %v5914_v18, %v5904_v13 }
 0x115   : > { %4875 = vmatprep.mubr.msk.bf16.mxu0 %vm1375_vm2, %v1365_v20 }
 0x116   : > { %4876 = vmatmul.mubr.msk.bf16.gmra.mrb[28].mxu0 %vm1375_vm2, %v1366_v16 }
 0x117   : > { %4879 = vmatprep.mubr.msk.bf16.mxu0 %vm1375_vm2, %v1367_v49 }
 0x118   : > { %v5924_v22 = vpop.f32.mrb[16].mxu1 }
 0x119   : > { %v5927_v23 = vpop.f32.mrb[17].mxu1 }
 0x11a   : > { %v5929_v24 = vpop.f32.mrb[18].mxu1 }
 0x11b   : > { %v1698_v25 = vpack.c.bf16 %v5929_v24, %v5924_v22  ;;  %v5933_v26 = vpop.f32.mrb[19].mxu1 }
 0x11c   : > { %v1697_v27 = vpack.c.bf16 %v5933_v26, %v5927_v23 }
 0x11e   : > { %4897 = vmatprep.mubr.msk.bf16.mxu1 %vm1375_vm2, %v1697_v27  ;;  %4880 = vmatmul.mubr.msk.bf16.gmra.mrb[32].mxu0 %vm1375_vm2, %v1368_v46 }
 0x11f   : > { %4898 = vmatmul.mubr.msk.bf16.vlgmr.msra.gmra.mrb[48].mxu1 %vm1375_vm2, %v1698_v25  ;;  %4883 = vmatprep.mubr.msk.bf16.mxu0 %vm1375_vm2, %v1369_v61 }
 0x120   : > { %v5940_v28 = vpop.f32.mrb[20].mxu1 }
 0x121   : > { %v5943_v29 = vpop.f32.mrb[21].mxu1 }
 0x122   : > { %v5945_v30 = vpop.f32.mrb[22].mxu1 }
 0x123   : > { %v1700_v31 = vpack.c.bf16 %v5945_v30, %v5940_v28  ;;  %v5949_v32 = vpop.f32.mrb[23].mxu1 }
 0x124   : > { %v1699_v33 = vpack.c.bf16 %v5949_v32, %v5943_v29 }
 0x126   : > { %4901 = vmatprep.mubr.msk.bf16.mxu1 %vm1375_vm2, %v1699_v33  ;;  %4884 = vmatmul.mubr.msk.bf16.gmra.mrb[36].mxu0 %vm1375_vm2, %v1370_v58 }
 0x127   : > { %4902 = vmatmul.mubr.msk.bf16.gmra.mrb[52].mxu1 %vm1375_vm2, %v1700_v31  ;;  %4887 = vmatprep.mubr.msk.bf16.mxu0 %vm1375_vm2, %v1371_v9 }
 0x128   : > { %v5956_v34 = vpop.f32.mrb[24].mxu1 }
 0x129   : > { %v5959_v35 = vpop.f32.mrb[25].mxu1 }
 0x12a   : > { %v5961_v36 = vpop.f32.mrb[26].mxu1 }
 0x12b   : > { %v1702_v37 = vpack.c.bf16 %v5961_v36, %v5956_v34  ;;  %v5965_v43 = vpop.f32.mrb[27].mxu1 }
 0x12c   : > { %v1701_v46 = vpack.c.bf16 %v5965_v43, %v5959_v35 }
 0x12e   : > { %4905 = vmatprep.mubr.msk.bf16.mxu1 %vm1375_vm2, %v1701_v46  ;;  %4888 = vmatmul.mubr.msk.bf16.gmra.mrb[40].mxu0 %vm1375_vm2, %v1372_v7 }
 0x12f   : > { %4906 = vmatmul.mubr.msk.bf16.gmra.mrb[56].mxu1 %vm1375_vm2, %v1702_v37  ;;  %4891 = vmatprep.mubr.msk.bf16.mxu0 %vm1375_vm2, %v1373_v21 }
 0x130   : > { %v5972_v48 = vpop.f32.mrb[28].mxu1 }
 0x131   : > { %v5975_v49 = vpop.f32.mrb[29].mxu1 }
 0x132   : > { %v5977_v55 = vpop.f32.mrb[30].mxu1 }
 0x133   : > { %v1704_v58 = vpack.c.bf16 %v5977_v55, %v5972_v48  ;;  %v5981_v60 = vpop.f32.mrb[31].mxu1 }
 0x134   : > { %v1703_v61 = vpack.c.bf16 %v5981_v60, %v5975_v49 }
 0x136   : > { %4909 = vmatprep.mubr.msk.bf16.mxu1 %vm1375_vm2, %v1703_v61  ;;  %4892 = vmatmul.mubr.msk.bf16.gmra.mrb[44].mxu0 %vm1375_vm2, %v1374_v19 }
 0x137   : > { %4910 = vmatmul.mubr.msk.bf16.gmra.mrb[60].mxu1 %vm1375_vm2, %v1704_v58 }
 0x138   : > { %v5988_v4 = vpop.f32.mrb[32].mxu1 }
 0x139   : > { %v5990_v7 = vpop.f32.mrb[33].mxu1 }
 0x13a   : > { %v5992_v8 = vpop.f32.mrb[34].mxu1 }
 0x13b   : > { %v1706_v9 = vpack.c.bf16 %v5992_v8, %v5988_v4  ;;  %v5996_v16 = vpop.f32.mrb[35].mxu1 }
 0x13c   : > { %v1705_v20 = vpack.c.bf16 %v5996_v16, %v5990_v7 }
 0x13e   : > { %4913 = vmatprep.mubr.msk.bf16.mxu1 %vm1375_vm2, %v1705_v20 }
 0x13f   : > { %4914 = vmatmul.mubr.msk.bf16.gmra.mrb[64].mxu1 %vm1375_vm2, %v1706_v9 }
 0x140   : > { %v6002_v21 = vpop.f32.mrb[36].mxu1 }
 0x141   : > { %v6004_v19 = vpop.f32.mrb[37].mxu1 }
 0x142   : > { %9061 = vst [vmem:[#allocation5_spill] sm:$0xff] %v6004_v19  ;;  %v6006_v25 = vpop.f32.mrb[38].mxu1 }
 0x143   : > { %9062 = vst [vmem:[#allocation6_spill] sm:$0xff] %v6006_v25  ;;  %v1708_v27 = vpack.c.bf16 %v6006_v25, %v6002_v21  ;;  %v6010_v31 = vpop.f32.mrb[39].mxu1 }
 0x144   : > { %9063 = vst [vmem:[#allocation7_spill] sm:$0xff] %v6010_v31  ;;  %v1707_v33 = vpack.c.bf16 %v6010_v31, %v6004_v19 }
 0x146   : > { %4917 = vmatprep.mubr.msk.bf16.mxu1 %vm1375_vm2, %v1707_v33 }
 0x147   : > { %4918 = vmatmul.mubr.msk.bf16.gmra.mrb[68].mxu1 %vm1375_vm2, %v1708_v27 }
 0x148   : > { %v6016_v37 = vpop.f32.mrb[40].mxu1 }
 0x149   : > { %v6018_v46 = vpop.f32.mrb[41].mxu1 }
 0x14a   : > { %v6020_v58 = vpop.f32.mrb[42].mxu1 }
 0x14b   : > { %9064 = vst [vmem:[#allocation8_spill] sm:$0xff] %v6020_v58  ;;  %v1710_v61 = vpack.c.bf16 %v6020_v58, %v6016_v37  ;;  %v6024_v9 = vpop.f32.mrb[43].mxu1 }
 0x14c   : > { %9065 = vst [vmem:[#allocation9_spill] sm:$0xff] %v6024_v9  ;;  %v1709_v20 = vpack.c.bf16 %v6024_v9, %v6018_v46  ;;  %v4440_v9 = vmul.f32 -1.442695, %v5824_v40 }
 0x14e   : > { %4921 = vmatprep.mubr.msk.bf16.mxu1 %vm1375_vm2, %v1709_v20 }
 0x14f   : > { %4922 = vmatmul.mubr.msk.bf16.gmra.mrb[72].mxu1 %vm1375_vm2, %v1710_v61  ;;  %v4362_v61 = vld [vmem:[%s8843_s3 + $0x8] sm:$0xf] }
 0x150   : > { %v6030_v33 = vpop.f32.mrb[44].mxu1  ;;  %5047 = vmatprep.subr.msk.bf16.mxu0 %vm1424_vm1, %v4362_v61  ;;  %v2625_v20 = vsel %vm1424_vm1, %v4362_v61, 0  ;;  %v4457_v61 = vmul.f32 -1.442695, %v5838_v47 }
 0x151   : > { %9066 = vst [vmem:[#allocation10_spill] sm:$0xff] %v6030_v33  ;;  %v6032_v27 = vpop.f32.mrb[45].mxu1  ;;  %4930 = vmatpush3.bf16.msra.mxu0 %v2625_v20 }
 0x152   : > { %9067 = vst [vmem:[#allocation11_spill] sm:$0xff] %v6032_v27  ;;  %v6034_v31 = vpop.f32.mrb[46].mxu1 }
 0x153   : > { %9068 = vst [vmem:[#allocation12_spill] sm:$0xff] %v6034_v31  ;;  %v1712_v25 = vpack.c.bf16 %v6034_v31, %v6030_v33  ;;  %v6038_v19 = vpop.f32.mrb[47].mxu1  ;;  %v4442_v31 = vmul.f32 -1.442695, %v5820_v38  ;;  %v4458_v33 = vmul.f32 -1.442695, %v5822_v39 }
 0x154   : > { %9069 = vst [vmem:[#allocation13_spill] sm:$0xff] %v6038_v19  ;;  %v1711_v58 = vpack.c.bf16 %v6038_v19, %v6032_v27  ;;  %v4456_v19 = vmul.f32 -1.442695, %v5826_v41  ;;  %v4441_v27 = vmul.f32 -1.442695, %v5834_v45 }
 0x155   : > { %5105 = vpow2.f32 %v4442_v31  ;;  %v4446_v38 = vmul.f32 -1.442695, %v5846_v50  ;;  %v4462_v39 = vmul.f32 -1.442695, %v5848_v51  ;;  %v4444_v41 = vmul.f32 -1.442695, %v5850_v52 }
 0x156   : > { %4925 = vmatprep.mubr.msk.bf16.mxu1 %vm1375_vm2, %v1711_v58  ;;  %5107 = vpow2.f32 %v4458_v33  ;;  %v4459_v58 = vmul.f32 -1.442695, %v5832_v44  ;;  %v4460_v44 = vmul.f32 -1.442695, %v5852_v53  ;;  %v4447_v45 = vmul.f32 -1.442695, %v5854_v54 }
 0x157   : > { %4926 = vmatmul.mubr.msk.bf16.gmra.mrb[76].mxu1 %vm1375_vm2, %v1712_v25  ;;  %v4443_v25 = vmul.f32 -1.442695, %v5828_v42  ;;  %5109 = vpow2.f32 %v4440_v9 }
 0x158   : > { %5111 = vpow2.f32 %v4456_v19 }
 0x159   : > { %5113 = vpow2.f32 %v4443_v25 }
 0x15a   : > { %5115 = vpow2.f32 %v4459_v58 }
 0x15b   : > { %5117 = vpow2.f32 %v4441_v27 }
 0x15c   : > { %5119 = vpow2.f32 %v4457_v61 }
 0x15d   : > { %5121 = vpow2.f32 %v4446_v38 }
 0x15e   : > { %5123 = vpow2.f32 %v4462_v39  ;;  %v4463_v39 = vmul.f32 -1.442695, %v5858_v56  ;;  %v4448_v56 = vmul.f32 -1.442695, %v5876_v0 }
 0x15f   : > { %v5106_v40 = vpop.eup %5105  ;;  %5125 = vpow2.f32 %v4444_v41  ;;  %v4445_v41 = vmul.f32 -1.442695, %v5860_v57  ;;  %v4464_v57 = vmul.f32 -1.442695, %v5878_v1 }
 0x160   : > { %v5108_v42 = vpop.eup %5107  ;;  %v1073_v47 = vadd.f32 1.0, %v5106_v40  ;;  %5127 = vpow2.f32 %v4460_v44  ;;  %v4461_v44 = vmul.f32 -1.442695, %v5864_v59  ;;  %v4451_v59 = vmul.f32 -1.442695, %v5880_v2 }
 0x161   : > { %v5110_v31 = vpop.eup %5109  ;;  %v1089_v50 = vadd.f32 1.0, %v5108_v42  ;;  %5129 = vpow2.f32 %v4447_v45  ;;  %v4450_v45 = vmul.f32 -1.442695, %v5872_v62 }
 0x162   : > { %v5112_v19 = vpop.eup %5111  ;;  %v1071_v27 = vadd.f32 1.0, %v5110_v31  ;;  %5131 = vrcp.f32 %v1073_v47  ;;  %v4466_v47 = vmul.f32 -1.442695, %v5874_v63  ;;  %v4467_v63 = vmul.f32 -1.442695, %v5882_v3 }
 0x163   : > { %v5114_v9 = vpop.eup %5113  ;;  %v1087_v51 = vadd.f32 1.0, %v5112_v19  ;;  %5133 = vrcp.f32 %v1089_v50  ;;  %v4449_v3 = vmul.f32 -1.442695, %v5886_v5 }
 0x164   : > { %v5116_v33 = vpop.eup %5115  ;;  %v1074_v52 = vadd.f32 1.0, %v5114_v9  ;;  %5135 = vrcp.f32 %v1071_v27 }
 0x165   : > { %v5118_v20 = vpop.eup %5117  ;;  %v1090_v53 = vadd.f32 1.0, %v5116_v33  ;;  %5137 = vrcp.f32 %v1087_v51 }
 0x166   : > { %v5120_v25 = vpop.eup %5119  ;;  %v1072_v54 = vadd.f32 1.0, %v5118_v20  ;;  %5139 = vrcp.f32 %v1074_v52 }
 0x167   : > { %v5122_v58 = vpop.eup %5121  ;;  %v1088_v61 = vadd.f32 1.0, %v5120_v25  ;;  %5141 = vrcp.f32 %v1090_v53 }
 0x168   : > { %v1077_v38 = vadd.f32 1.0, %v5122_v58  ;;  %v5124_v40 = vpop.eup %5123  ;;  %5143 = vrcp.f32 %v1072_v54  ;;  %v4465_v54 = vmul.f32 -1.442695, %v5888_v6 }
 0x169   : > { %v5126_v42 = vpop.eup %5125  ;;  %5145 = vrcp.f32 %v1088_v61  ;;  %v1093_v20 = vadd.f32 1.0, %v5124_v40  ;;  %v4470_v40 = vmul.f32 -1.442695, %v5900_v11 }
 0x16a   : > { %v5128_v31 = vpop.eup %5127  ;;  %5147 = vrcp.f32 %v1077_v38  ;;  %v1075_v51 = vadd.f32 1.0, %v5126_v42  ;;  %v4454_v38 = vmul.f32 -1.442695, %v5897_v10 }
 0x16b   : > { %v5130_v19 = vpop.eup %5129  ;;  %5149 = vpow2.f32 %v4463_v39  ;;  %v1091_v1 = vadd.f32 1.0, %v5128_v31 }
 0x16c   : > { %v6067_v9 = vpop.eup %5131  ;;  %5151 = vpow2.f32 %v4445_v41  ;;  %v1078_v2 = vadd.f32 1.0, %v5130_v19 }
 0x16d   : > { %9070 = vst [vmem:[#allocation14_spill] sm:$0xff] %v6067_v9  ;;  %v6070_v50 = vpop.eup %5133  ;;  %5153 = vpow2.f32 %v4461_v44 }
 0x16e   : > { %9071 = vst [vmem:[#allocation15_spill] sm:$0xff] %v6070_v50  ;;  %v6073_v33 = vpop.eup %5135  ;;  %5155 = vpow2.f32 %v4450_v45 }
 0x16f   : > { %9072 = vst [vmem:[#allocation16_spill] sm:$0xff] %v6073_v33  ;;  %v6076_v62 = vpop.eup %5137  ;;  %5157 = vpow2.f32 %v4466_v47 }
 0x170   : > { %9073 = vst [vmem:[#allocation17_spill] sm:$0xff] %v6076_v62  ;;  %v6079_v27 = vpop.eup %5139  ;;  %5159 = vpow2.f32 %v4448_v56 }
 0x171   : > { %9074 = vst [vmem:[#allocation18_spill] sm:$0xff] %v6079_v27  ;;  %v6081_v0 = vpop.eup %5141  ;;  %5161 = vpow2.f32 %v4464_v57 }
 0x172   : > { %9075 = vst [vmem:[#allocation19_spill] sm:$0xff] %v6081_v0  ;;  %v6083_v25 = vpop.eup %5143  ;;  %5163 = vpow2.f32 %v4451_v59  ;;  %v9123_v0 = vld [vmem:[#allocation11_spill] sm:$0xff] }
 0x173   : > { %9076 = vst [vmem:[#allocation20_spill] sm:$0xff] %v6083_v25  ;;  %v6085_v52 = vpop.eup %5145  ;;  %5165 = vpow2.f32 %v4467_v63  ;;  %v4500_v62 = vmul.f32 -1.442695, %v9123_v0 }
 0x174   : > { %9077 = vst [vmem:[#allocation21_spill] sm:$0xff] %v6085_v52  ;;  %v6087_v58 = vpop.eup %5147  ;;  %5167 = vrcp.f32 %v1093_v20 }
 0x175   : > { %9078 = vst [vmem:[#allocation22_spill] sm:$0xff] %v6087_v58  ;;  %v5150_v53 = vpop.eup %5149  ;;  %5169 = vrcp.f32 %v1075_v51 }
 0x176   : > { %v5152_v61 = vpop.eup %5151  ;;  %5171 = vrcp.f32 %v1091_v1  ;;  %v1094_v42 = vadd.f32 1.0, %v5150_v53 }
 0x177   : > { %v5154_v39 = vpop.eup %5153  ;;  %5173 = vrcp.f32 %v1078_v2  ;;  %v1076_v31 = vadd.f32 1.0, %v5152_v61 }
 0x178   : > { %v5156_v41 = vpop.eup %5155  ;;  %5175 = vpow2.f32 %v4449_v3  ;;  %v1092_v5 = vadd.f32 1.0, %v5154_v39  ;;  %v4452_v3 = vmul.f32 -1.442695, %v5902_v12  ;;  %v4469_v12 = vmul.f32 -1.442695, %v5914_v18 }
 0x179   : > { %v5158_v44 = vpop.eup %5157  ;;  %5177 = vpow2.f32 %v4465_v54  ;;  %v1081_v47 = vadd.f32 1.0, %v5156_v41  ;;  %v4468_v54 = vmul.f32 -1.442695, %v5904_v13  ;;  %v4474_v13 = vmul.f32 -1.442695, %v5924_v22 }
 0x17a   : > { %v5160_v45 = vpop.eup %5159  ;;  %5179 = vpow2.f32 %v4454_v38  ;;  %v1097_v56 = vadd.f32 1.0, %v5158_v44  ;;  %v4455_v38 = vmul.f32 -1.442695, %v5906_v14  ;;  %v4472_v14 = vmul.f32 -1.442695, %v5927_v23 }
 0x17b   : > { %v5162_v19 = vpop.eup %5161  ;;  %5181 = vpow2.f32 %v4470_v40  ;;  %v1079_v57 = vadd.f32 1.0, %v5160_v45  ;;  %v4471_v40 = vmul.f32 -1.442695, %v5908_v15 }
 0x17c   : > { %v5164_v6 = vpop.eup %5163  ;;  %5183 = vrcp.f32 %v1094_v42  ;;  %v1095_v11 = vadd.f32 1.0, %v5162_v19  ;;  %v4453_v42 = vmul.f32 -1.442695, %v5912_v17  ;;  %v4475_v17 = vmul.f32 -1.442695, %v5929_v24 }
 0x17d   : > { %v5166_v10 = vpop.eup %5165  ;;  %5185 = vrcp.f32 %v1076_v31  ;;  %v1082_v20 = vadd.f32 1.0, %v5164_v6  ;;  %v4473_v24 = vmul.f32 -1.442695, %v5933_v26 }
 0x17e   : > { %v6093_v59 = vpop.eup %5167  ;;  %5187 = vrcp.f32 %v1092_v5  ;;  %v1098_v1 = vadd.f32 1.0, %v5166_v10 }
 0x17f   : > { %9079 = vst [vmem:[#allocation23_spill] sm:$0xff] %v6093_v59  ;;  %v6095_v63 = vpop.eup %5169  ;;  %5189 = vrcp.f32 %v1081_v47 }
 0x180   : > { %9080 = vst [vmem:[#allocation24_spill] sm:$0xff] %v6095_v63  ;;  %v6097_v51 = vpop.eup %5171  ;;  %5191 = vrcp.f32 %v1097_v56 }
 0x181   : > { %9081 = vst [vmem:[#allocation25_spill] sm:$0xff] %v6097_v51  ;;  %v6099_v2 = vpop.eup %5173  ;;  %5193 = vrcp.f32 %v1079_v57 }
 0x182   : > { %9082 = vst [vmem:[#allocation26_spill] sm:$0xff] %v6099_v2  ;;  %v5176_v53 = vpop.eup %5175  ;;  %5195 = vrcp.f32 %v1095_v11  ;;  %v4478_v11 = vmul.f32 -1.442695, %v5940_v28 }
 0x183   : > { %v5178_v61 = vpop.eup %5177  ;;  %5197 = vrcp.f32 %v1082_v20  ;;  %v1080_v19 = vadd.f32 1.0, %v5176_v53  ;;  %v4479_v53 = vmul.f32 -1.442695, %v5945_v30 }
 0x184   : > { %v5180_v39 = vpop.eup %5179  ;;  %5199 = vrcp.f32 %v1098_v1  ;;  %v1096_v47 = vadd.f32 1.0, %v5178_v61  ;;  %v4476_v1 = vmul.f32 -1.442695, %v5943_v29 }
 0x185   : > { %v5182_v41 = vpop.eup %5181  ;;  %5201 = vpow2.f32 %v4452_v3  ;;  %v1085_v22 = vadd.f32 1.0, %v5180_v39 }
 0x186   : > { %v6106_v44 = vpop.eup %5183  ;;  %5203 = vpow2.f32 %v4468_v54  ;;  %v1101_v23 = vadd.f32 1.0, %v5182_v41 }
 0x187   : > { %9083 = vst [vmem:[#allocation27_spill] sm:$0xff] %v6106_v44  ;;  %v6109_v31 = vpop.eup %5185  ;;  %5205 = vpow2.f32 %v4455_v38 }
 0x188   : > { %9084 = vst [vmem:[#allocation28_spill] sm:$0xff] %v6109_v31  ;;  %v6112_v45 = vpop.eup %5187  ;;  %5207 = vpow2.f32 %v4471_v40 }
 0x189   : > { %9085 = vst [vmem:[#allocation29_spill] sm:$0xff] %v6112_v45  ;;  %v6115_v15 = vpop.eup %5189  ;;  %5209 = vpow2.f32 %v4453_v42 }
 0x18a   : > { %9086 = vst [vmem:[#allocation30_spill] sm:$0xff] %v6115_v15  ;;  %v6118_v5 = vpop.eup %5191  ;;  %5211 = vpow2.f32 %v4469_v12 }
 0x18b   : > { %9087 = vst [vmem:[#allocation31_spill] sm:$0xff] %v6118_v5  ;;  %v6120_v18 = vpop.eup %5193  ;;  %5213 = vpow2.f32 %v4474_v13 }
 0x18c   : > { %9088 = vst [vmem:[#allocation32_spill] sm:$0xff] %v6120_v18  ;;  %v6122_v6 = vpop.eup %5195  ;;  %5215 = vpow2.f32 %v4472_v14 }
 0x18d   : > { %9089 = vst [vmem:[#allocation33_spill] sm:$0xff] %v6122_v6  ;;  %v6124_v56 = vpop.eup %5197  ;;  %5217 = vpow2.f32 %v4475_v17 }
 0x18e   : > { %9090 = vst [vmem:[#allocation34_spill] sm:$0xff] %v6124_v56  ;;  %v6126_v10 = vpop.eup %5199  ;;  %5219 = vrcp.f32 %v1080_v19 }
 0x18f   : > { %9091 = vst [vmem:[#allocation35_spill] sm:$0xff] %v6126_v10  ;;  %v5202_v57 = vpop.eup %5201  ;;  %5221 = vrcp.f32 %v1096_v47 }
 0x190   : > { %v5204_v20 = vpop.eup %5203  ;;  %5223 = vrcp.f32 %v1085_v22  ;;  %v1083_v61 = vadd.f32 1.0, %v5202_v57 }
 0x191   : > { %v5206_v3 = vpop.eup %5205  ;;  %5225 = vrcp.f32 %v1101_v23  ;;  %v1099_v39 = vadd.f32 1.0, %v5204_v20 }
 0x192   : > { %v5208_v54 = vpop.eup %5207  ;;  %5227 = vpow2.f32 %v4473_v24  ;;  %v1086_v26 = vadd.f32 1.0, %v5206_v3  ;;  %v4477_v24 = vmul.f32 -1.442695, %v5949_v32  ;;  %v4486_v32 = vmul.f32 -1.442695, %v5972_v48 }
 0x193   : > { %v5210_v38 = vpop.eup %5209  ;;  %5229 = vpow2.f32 %v4478_v11  ;;  %v1102_v42 = vadd.f32 1.0, %v5208_v54  ;;  %v4482_v11 = vmul.f32 -1.442695, %v5956_v34  ;;  %v4484_v34 = vmul.f32 -1.442695, %v5975_v49 }
 0x194   : > { %v5212_v40 = vpop.eup %5211  ;;  %5231 = vpow2.f32 %v4476_v1  ;;  %v1084_v12 = vadd.f32 1.0, %v5210_v38  ;;  %v4480_v1 = vmul.f32 -1.442695, %v5959_v35  ;;  %v4487_v35 = vmul.f32 -1.442695, %v5977_v55 }
 0x195   : > { %v5214_v41 = vpop.eup %5213  ;;  %5233 = vpow2.f32 %v4479_v53  ;;  %v1100_v13 = vadd.f32 1.0, %v5212_v40  ;;  %v4483_v53 = vmul.f32 -1.442695, %v5961_v36  ;;  %v4485_v55 = vmul.f32 -1.442695, %v5981_v60 }
 0x196   : > { %v5216_v28 = vpop.eup %5215  ;;  %5235 = vrcp.f32 %v1083_v61  ;;  %v1265_v30 = vadd.f32 1.0, %v5214_v41  ;;  %v4481_v61 = vmul.f32 -1.442695, %v5965_v43 }
 0x197   : > { %v5218_v29 = vpop.eup %5217  ;;  %5237 = vrcp.f32 %v1099_v39  ;;  %v1263_v19 = vadd.f32 1.0, %v5216_v28 }
 0x198   : > { %v6132_v14 = vpop.eup %5219  ;;  %5239 = vrcp.f32 %v1086_v26  ;;  %v1266_v22 = vadd.f32 1.0, %v5218_v29 }
 0x199   : > { %9092 = vst [vmem:[#allocation36_spill] sm:$0xff] %v6132_v14  ;;  %v6134_v17 = vpop.eup %5221  ;;  %5241 = vrcp.f32 %v1102_v42 }
 0x19a   : > { %9093 = vst [vmem:[#allocation37_spill] sm:$0xff] %v6134_v17  ;;  %v6136_v47 = vpop.eup %5223  ;;  %5243 = vrcp.f32 %v1084_v12 }
 0x19b   : > { %9094 = vst [vmem:[#allocation38_spill] sm:$0xff] %v6136_v47  ;;  %v6138_v23 = vpop.eup %5225  ;;  %5245 = vrcp.f32 %v1100_v13  ;;  %v4490_v13 = vmul.f32 -1.442695, %v5988_v4 }
 0x19c   : > { %9095 = vst [vmem:[#allocation39_spill] sm:$0xff] %v6138_v23  ;;  %v5228_v57 = vpop.eup %5227  ;;  %5247 = vrcp.f32 %v1265_v30 }
 0x19d   : > { %v5230_v20 = vpop.eup %5229  ;;  %5249 = vrcp.f32 %v1263_v19  ;;  %v1264_v26 = vadd.f32 1.0, %v5228_v57  ;;  %v4488_v19 = vmul.f32 -1.442695, %v5990_v7 }
 0x19e   : > { %v5232_v3 = vpop.eup %5231  ;;  %5251 = vrcp.f32 %v1266_v22  ;;  %v1269_v41 = vadd.f32 1.0, %v5230_v20 }
 0x19f   : > { %v5234_v54 = vpop.eup %5233  ;;  %5253 = vpow2.f32 %v4477_v24  ;;  %v1267_v48 = vadd.f32 1.0, %v5232_v3  ;;  %v4491_v24 = vmul.f32 -1.442695, %v5992_v8 }
 0x1a0   : > { %v6145_v38 = vpop.eup %5235  ;;  %5255 = vpow2.f32 %v4482_v11  ;;  %v1270_v49 = vadd.f32 1.0, %v5234_v54  ;;  %v4489_v11 = vmul.f32 -1.442695, %v5996_v16 }
 0x1a1   : > { %9096 = vst [vmem:[#allocation40_spill] sm:$0xff] %v6145_v38  ;;  %v6148_v39 = vpop.eup %5237  ;;  %5257 = vpow2.f32 %v4480_v1 }
 0x1a2   : > { %9097 = vst [vmem:[#allocation41_spill] sm:$0xff] %v6148_v39  ;;  %v6151_v40 = vpop.eup %5239  ;;  %5259 = vpow2.f32 %v4483_v53 }
 0x1a3   : > { %9098 = vst [vmem:[#allocation42_spill] sm:$0xff] %v6151_v40  ;;  %v6154_v36 = vpop.eup %5241  ;;  %5261 = vpow2.f32 %v4481_v61 }
 0x1a4   : > { %9099 = vst [vmem:[#allocation43_spill] sm:$0xff] %v6154_v36  ;;  %v6156_v43 = vpop.eup %5243  ;;  %5263 = vpow2.f32 %v4486_v32 }
 0x1a5   : > { %9100 = vst [vmem:[#allocation44_spill] sm:$0xff] %v6156_v43  ;;  %v6158_v42 = vpop.eup %5245  ;;  %5265 = vpow2.f32 %v4484_v34 }
 0x1a6   : > { %9101 = vst [vmem:[#allocation45_spill] sm:$0xff] %v6158_v42  ;;  %v6160_v28 = vpop.eup %5247  ;;  %5267 = vpow2.f32 %v4487_v35  ;;  %v6350_v42 = vstv %s6280_s29 }
 0x1a7   : > { %9102 = vst [vmem:[#allocation46_spill] sm:$0xff] %v6160_v28  ;;  %v6162_v12 = vpop.eup %5249  ;;  %5269 = vrcp.f32 %v1264_v26 }
 0x1a8   : > { %9103 = vst [vmem:[#allocation47_spill] sm:$0xff] %v6162_v12  ;;  %v6165_v29 = vpop.eup %5251  ;;  %5271 = vrcp.f32 %v1269_v41 }
 0x1a9   : > { %9104 = vst [vmem:[#allocation48_spill] sm:$0xff] %v6165_v29  ;;  %v5254_v30 = vpop.eup %5253  ;;  %5273 = vrcp.f32 %v1267_v48 }
 0x1aa   : > { %v5256_v22 = vpop.eup %5255  ;;  %5275 = vrcp.f32 %v1270_v49  ;;  %v1268_v1 = vadd.f32 1.0, %v5254_v30 }
 0x1ab   : > { %v5258_v57 = vpop.eup %5257  ;;  %5277 = vpow2.f32 %v4485_v55  ;;  %v1273_v53 = vadd.f32 1.0, %v5256_v22  ;;  %v4494_v22 = vmul.f32 -1.442695, %v6002_v21 }
 0x1ac   : > { %v5260_v60 = vpop.eup %5259  ;;  %5279 = vpow2.f32 %v4490_v13  ;;  %v1271_v61 = vadd.f32 1.0, %v5258_v57 }
 0x1ad   : > { %v5262_v4 = vpop.eup %5261  ;;  %5281 = vpow2.f32 %v4488_v19  ;;  %v1274_v34 = vadd.f32 1.0, %v5260_v60 }
 0x1ae   : > { %v5264_v7 = vpop.eup %5263  ;;  %5283 = vpow2.f32 %v4491_v24  ;;  %v1272_v35 = vadd.f32 1.0, %v5262_v4 }
 0x1af   : > { %v5266_v32 = vpop.eup %5265  ;;  %5285 = vpow2.f32 %v4489_v11  ;;  %v1277_v41 = vadd.f32 1.0, %v5264_v7  ;;  %v9110_v11 = vld [vmem:[#allocation5_spill] sm:$0xff] }
 0x1b0   : > { %v5268_v16 = vpop.eup %5267  ;;  %5287 = vrcp.f32 %v1268_v1  ;;  %v1275_v49 = vadd.f32 1.0, %v5266_v32  ;;  %v4492_v60 = vmul.f32 -1.442695, %v9110_v11  ;;  %v4498_v11 = vmul.f32 -1.442695, %v6016_v37 }
 0x1b1   : > { %v6179_v26 = vpop.eup %5269  ;;  %5289 = vrcp.f32 %v1273_v53  ;;  %v1278_v13 = vadd.f32 1.0, %v5268_v16  ;;  %v9112_v53 = vld [vmem:[#allocation6_spill] sm:$0xff]  ;;  %v9114_v16 = vld [vmem:[#allocation7_spill] sm:$0xff]  ;;  %v4496_v32 = vmul.f32 -1.442695, %v6018_v46 }
 0x1b2   : > { %9105 = vst [vmem:[#allocation49_spill] sm:$0xff] %v6179_v26  ;;  %v6181_v48 = vpop.eup %5271  ;;  %5291 = vrcp.f32 %v1271_v61  ;;  %v4495_v7 = vmul.f32 -1.442695, %v9112_v53  ;;  %v4493_v21 = vmul.f32 -1.442695, %v9114_v16  ;;  %v9118_v53 = vld [vmem:[#allocation9_spill] sm:$0xff] }
 0x1b3   : > { %9106 = vst [vmem:[#allocation50_spill] sm:$0xff] %v6181_v48  ;;  %v6183_v55 = vpop.eup %5273  ;;  %5293 = vrcp.f32 %v1274_v34  ;;  %v6221_v46 = vld [vmem:[%s8844_s4] ss:$0 sm:$0xff] }
 0x1b4   : > { %9107 = vst [vmem:[#allocation51_spill] sm:$0xff] %v6183_v55  ;;  %v6187_v19 = vpop.eup %5275  ;;  %5295 = vrcp.f32 %v1272_v35 }
 0x1b5   : > { %9108 = vst [vmem:[#allocation52_spill] sm:$0xff] %v6187_v19  ;;  %v5278_v57 = vpop.eup %5277  ;;  %5297 = vrcp.f32 %v1277_v41  ;;  %v9116_v41 = vld [vmem:[#allocation8_spill] sm:$0xff] }
 0x1b6   : > { %v5280_v4 = vpop.eup %5279  ;;  %5299 = vrcp.f32 %v1275_v49  ;;  %v1276_v0 = vadd.f32 1.0, %v5278_v57  ;;  %v6262_v57 = vld [vmem:[%s8844_s4 + $0x1] ss:$0 sm:$0xff] }
 0x1b7   : > { %v5282_v34 = vpop.eup %5281  ;;  %5301 = vrcp.f32 %v1278_v13 }
 0x1b8   : > { %5303 = vpow2.f32 %v4494_v22  ;;  %v4499_v22 = vmul.f32 -1.442695, %v9116_v41  ;;  %v9120_v41 = vld [vmem:[#allocation10_spill] sm:$0xff] }
 0x1b9   : > { %5305 = vpow2.f32 %v4492_v60  ;;  %v4497_v60 = vmul.f32 -1.442695, %v9118_v53  ;;  %v4502_v37 = vmul.f32 -1.442695, %v9120_v41  ;;  %v9126_v41 = vld [vmem:[#allocation12_spill] sm:$0xff] }
 0x1ba   : > { %5307 = vpow2.f32 %v4495_v7 }
 0x1bb   : > { %5309 = vpow2.f32 %v4493_v21 }
 0x1bc   : > { %5311 = vpow2.f32 %v4498_v11 }
 0x1bd   : > { %5313 = vpow2.f32 %v4496_v32 }
 0x1d1   : > { %v6171_v20 = vpop.f32.mrb[16].mxu0 }
 0x1d2   : > { %v6173_v3 = vpop.f32.mrb[17].mxu0 }
 0x1d3   : > { %v6175_v54 = vpop.f32.mrb[18].mxu0 }
 0x1d4   : > { %v6177_v8 = vpop.f32.mrb[19].mxu0 }
 0x1d9   : > { %v6185_v30 = vpop.f32.mrb[20].mxu0 }
 0x1da   : > { %v6190_v24 = vpop.f32.mrb[21].mxu0 }
 0x1db   : > { %9109 = vst [vmem:[#allocation53_spill] sm:$0xff] %v6190_v24  ;;  %v6193_v1 = vpop.f32.mrb[22].mxu0  ;;  %v5284_v24 = vpop.eup %5283  ;;  %5315 = vpow2.f32 %v4499_v22  ;;  %v1281_v22 = vadd.f32 1.0, %v5280_v4 }
 0x1dc   : > { %9111 = vst [vmem:[#allocation5_spill] sm:$0xff] %v6193_v1  ;;  %v6196_v61 = vpop.f32.mrb[23].mxu0  ;;  %v6205_v1 = vpop.eup %5285  ;;  %5317 = vpow2.f32 %v4497_v60 }
 0x1dd   : > { %9113 = vst [vmem:[#allocation6_spill] sm:$0xff] %v6196_v61  ;;  %v6210_v35 = vpop.eup %5287  ;;  %5319 = vpow2.f32 %v4502_v37  ;;  %v9132_v37 = vld [vmem:[#allocation13_spill] sm:$0xff]  ;;  %v1280_v16 = vadd.f32 1.0, %v6205_v1 }
 0x1de   : > { %9115 = vst [vmem:[#allocation7_spill] sm:$0xff] %v6210_v35  ;;  %v6215_v61 = vpop.eup %5289  ;;  %5321 = vpow2.f32 %v4500_v62  ;;  %v4501_v7 = vmul.f32 -1.442695, %v9132_v37  ;;  %v1282_v62 = vadd.f32 1.0, %v5284_v24 }
 0x1df   : > { %9117 = vst [vmem:[#allocation8_spill] sm:$0xff] %v6215_v61  ;;  %v6225_v13 = vpop.eup %5291 }
 0x1e0   : > { %9119 = vst [vmem:[#allocation9_spill] sm:$0xff] %v6225_v13  ;;  %v6232_v52 = vpop.eup %5293 }
 0x1e1   : > { %v6228_v49 = vpop.f32.mrb[24].mxu0  ;;  %9122 = vst [vmem:[#allocation54_spill] sm:$0xff] %v6232_v52  ;;  %v6239_v11 = vpop.eup %5295 }
 0x1e2   : > { %9121 = vst [vmem:[#allocation10_spill] sm:$0xff] %v6228_v49  ;;  %v6235_v50 = vpop.f32.mrb[25].mxu0  ;;  %9125 = vst [vmem:[#allocation55_spill] sm:$0xff] %v6239_v11  ;;  %v4503_v49 = vmul.f32 -1.442695, %v9126_v41  ;;  %v6246_v32 = vpop.eup %5297  ;;  %v1597_v41 = vmul.f32 %v6171_v20, %v6221_v46 }
 0x1e3   : > { %9124 = vst [vmem:[#allocation11_spill] sm:$0xff] %v6235_v50  ;;  %v6242_v59 = vpop.f32.mrb[26].mxu0  ;;  %9128 = vst [vmem:[#allocation56_spill] sm:$0xff] %v6246_v32  ;;  %v6252_v44 = vpop.eup %5299 }
 0x1e4   : > { %9127 = vst [vmem:[#allocation12_spill] sm:$0xff] %v6242_v59  ;;  %v6248_v50 = vpop.f32.mrb[27].mxu0  ;;  %9130 = vst [vmem:[#allocation58_spill] sm:$0xff] %v6252_v44  ;;  %v6257_v21 = vpop.eup %5301  ;;  %v1279_v59 = vadd.f32 1.0, %v5282_v34  ;;  %5323 = vpow2.f32 %v4503_v49  ;;  %v6275_v49 = vadd.f32 %v6262_v57, %v1597_v41 }
 0x1e5   : > { %9129 = vst [vmem:[#allocation57_spill] sm:$0xff] %v6248_v50  ;;  %9131 = vst [vmem:[#allocation59_spill] sm:$0xff] %v6257_v21  ;;  %v5304_v4 = vpop.eup %5303  ;;  %5325 = vrcp.f32 %v1276_v0 }
 0x1e6   : > { %v5306_v50 = vpop.eup %5305  ;;  %5327 = vrcp.f32 %v1281_v22  ;;  %v1285_v24 = vadd.f32 1.0, %v5304_v4  ;;  %v6309_v22 = vld [vmem:[%s8844_s4 + $0x2] ss:$0 sm:$0xff] }
 0x1e7   : > { %v5308_v60 = vpop.eup %5307  ;;  %5329 = vrcp.f32 %v1279_v59  ;;  %v1283_v1 = vadd.f32 1.0, %v5306_v50 }
 0x1e8   : > { %v5310_v20 = vpop.eup %5309  ;;  %5331 = vpow2.f32 %v4501_v7  ;;  %v1286_v59 = vadd.f32 1.0, %v5308_v60 }
 0x1e9   : > { %v6277_v37 = vpop.f32.mrb[28].mxu0  ;;  %v5312_v34 = vpop.eup %5311  ;;  %5333 = vrcp.f32 %v1282_v62  ;;  %v1284_v7 = vadd.f32 1.0, %v5310_v20 }
 0x1ea   : > { %9133 = vst [vmem:[#allocation13_spill] sm:$0xff] %v6277_v37  ;;  %v6282_v0 = vpop.f32.mrb[29].mxu0  ;;  %v5314_v23 = vpop.eup %5313  ;;  %5335 = vrcp.f32 %v1280_v16  ;;  %v9138_v37 = vsub.f32 1.0, %v6073_v33  ;;  %v1289_v62 = vadd.f32 1.0, %v5312_v34  ;;  %v9140_v16 = vsub.f32 1.0, %v6079_v27 }
 0x1eb   : > { %9134 = vst [vmem:[#allocation60_spill] sm:$0xff] %v6282_v0  ;;  %v6286_v41 = vpop.f32.mrb[30].mxu0  ;;  %v9137_v0 = vsub.f32 1.0, %v6067_v9  ;;  %v5316_v50 = vpop.eup %5315  ;;  %5337 = vrcp.f32 %v1285_v24  ;;  %v9141_v34 = vsub.f32 1.0, %v6083_v25 }
 0x1ec   : > { %9135 = vst [vmem:[#allocation61_spill] sm:$0xff] %v6286_v41  ;;  %v6290_v4 = vpop.f32.mrb[31].mxu0  ;;  %v1667_v41 = vmax.f32 %v6275_v49, 0.0  ;;  %v6302_v53 = vmul.f32 %v6162_v12, %v9138_v37  ;;  %v5318_v60 = vpop.eup %5317  ;;  %v6316_v20 = vmul.f32 %v6165_v29, %v9140_v16  ;;  %5339 = vrcp.f32 %v1283_v1 }
 0x1ed   : > { %9136 = vst [vmem:[#allocation62_spill] sm:$0xff] %v6290_v4  ;;  %v6295_v6 = vmul.f32 %v6160_v28, %v9137_v0  ;;  %v1598_v0 = vmul.f32 %v6175_v54, %v6221_v46  ;;  %v5320_v49 = vpop.eup %5319  ;;  %v1287_v37 = vadd.f32 1.0, %v5314_v23  ;;  %v6321_v24 = vmul.f32 %v6179_v26, %v9141_v34  ;;  %v6334_v23 = vld [vmem:[%s8844_s4 + $0x3] ss:$0 sm:$0xff] }
 0x1ee   : > { %9139 = vst [vmem:[#allocation63_spill] sm:$0xff] %v6302_v53  ;;  %v9143_v54 = vsub.f32 1.0, %v6087_v58  ;;  %v5322_v28 = vpop.eup %5321  ;;  %5341 = vrcp.f32 %v1286_v59  ;;  %v1290_v53 = vadd.f32 1.0, %v5316_v50  ;;  %v6329_v4 = vstv %s6269_s28 }
 0x1ef   : > { %9142 = vst [vmem:[#allocation64_spill] sm:$0xff] %v6321_v24  ;;  %v9145_v16 = vsub.f32 1.0, %v6095_v63  ;;  %v5324_v26 = vpop.eup %5323  ;;  %5343 = vrcp.f32 %v1284_v7  ;;  %v2074_v59 = vmul.f32 %v6067_v9, %v1667_v41  ;;  %v1293_v24 = vadd.f32 1.0, %v5320_v49 }
 0x1f0   : > { %v6326_v12 = vmul.f32 %v6181_v48, %v9143_v54  ;;  %v1288_v54 = vadd.f32 1.0, %v5318_v60  ;;  %5345 = vrcp.f32 %v1289_v62  ;;  %v1291_v9 = vadd.f32 1.0, %v5322_v28 }
 0x1f1   : > { %v6339_v34 = vmul.f32 %v6183_v55, %v9145_v16  ;;  %v6342_v48 = vpop.f32.mrb[32].mxu0  ;;  %v6353_v16 = vadd.f32 %v6262_v57, %v1598_v0  ;;  %5347 = vrcp.f32 %v1287_v37  ;;  %v9154_v62 = vsub.f32 1.0, %v6099_v2 }
 0x1f2   : > { %9144 = vst [vmem:[#allocation65_spill] sm:$0xff] %v6326_v12  ;;  %v4899_v1 = vpop.f32.mrb[48].mxu1  ;;  %9147 = vst [vmem:[#allocation67_spill] sm:$0xff] %v6342_v48  ;;  %v6347_v12 = vpop.eup %5325  ;;  %5349 = vrcp.f32 %v1290_v53  ;;  %v9157_v28 = vsub.f32 1.0, %v6109_v31 }
 0x1f3   : > { %9146 = vst [vmem:[#allocation66_spill] sm:$0xff] %v6339_v34  ;;  %v1933_v50 = vmul.f32 %v4899_v1, %v6309_v22  ;;  %v6345_v29 = vpop.f32.mrb[49].mxu1  ;;  %9149 = vst [vmem:[#allocation69_spill] sm:$0xff] %v6347_v12  ;;  %v6355_v55 = vpop.f32.mrb[33].mxu0  ;;  %v6367_v49 = vmul.f32 %v6187_v19, %v9154_v62  ;;  %5351 = vrcp.f32 %v1288_v54  ;;  %v2042_v62 = vmul.f32 %v6329_v4, %v1667_v41 }
 0x1f4   : > { %9148 = vst [vmem:[#allocation68_spill] sm:$0xff] %v6345_v29  ;;  %9150 = vst [vmem:[#allocation70_spill] sm:$0xff] %v6355_v55  ;;  %v4900_v7 = vpop.f32.mrb[50].mxu1  ;;  %v6357_v60 = vpop.eup %5327  ;;  %v1294_v55 = vadd.f32 1.0, %v5324_v26  ;;  %v6376_v37 = vmul.f32 %v6210_v35, %v9157_v28  ;;  %v2107_v19 = vmul.f32 %v6350_v42, %v2074_v59  ;;  %5353 = vrcp.f32 %v1293_v24 }
 0x1f5   : > { %9151 = vst [vmem:[#allocation71_spill] sm:$0xff] %v6357_v60  ;;  %v1971_v1 = vadd.f32 %v6334_v23, %v1933_v50  ;;  %v6360_v34 = vpop.f32.mrb[34].mxu0  ;;  %v6362_v29 = vpop.f32.mrb[51].mxu1  ;;  %9155 = vst [vmem:[#allocation74_spill] sm:$0xff] %v6367_v49  ;;  %v9159_v50 = vsub.f32 1.0, %v6115_v15  ;;  %v1595_v28 = vmul.f32 %v6221_v46, %v6173_v3  ;;  %v1668_v35 = vmax.f32 %v6353_v16, 0.0 }
 0x1f6   : > { %9152 = vst [vmem:[#allocation72_spill] sm:$0xff] %v6360_v34  ;;  %9153 = vst [vmem:[#allocation73_spill] sm:$0xff] %v6362_v29  ;;  %v6369_v0 = vpop.eup %5329  ;;  %v6371_v48 = vpop.f32.mrb[35].mxu0  ;;  %5355 = vrcp.f32 %v1291_v9  ;;  %v9164_v54 = vsub.f32 1.0, %v6120_v18  ;;  %v9166_v24 = vsub.f32 1.0, %v6124_v56  ;;  %v9169_v9 = vsub.f32 1.0, %v6132_v14 }
 0x1f7   : > { %9156 = vst [vmem:[#allocation75_spill] sm:$0xff] %v6369_v0  ;;  %9158 = vst [vmem:[#allocation76_spill] sm:$0xff] %v6376_v37  ;;  %v6381_v29 = vmul.f32 %v6215_v61, %v9159_v50  ;;  %v5332_v34 = vpop.eup %5331  ;;  %v6385_v53 = vmax.f32 %v1971_v1, 0.0  ;;  %v6393_v37 = vstv %s6311_s8  ;;  %5357 = vrcp.f32 %v1294_v55 }
 0x1f8   : > { %v6387_v26 = vpop.eup %5333  ;;  %v6402_v59 = vmul.f32 %v6225_v13, %v9164_v54  ;;  %v6407_v1 = vmul.f32 %v6232_v52, %v9166_v24  ;;  %v1292_v16 = vadd.f32 1.0, %v5332_v34  ;;  %v2139_v24 = vadd.f32 %v2107_v19, %v2042_v62 }
 0x1f9   : > { %9160 = vst [vmem:[#allocation77_spill] sm:$0xff] %v6381_v29  ;;  %9161 = vst [vmem:[#allocation78_spill] sm:$0xff] %v6385_v53  ;;  %v6395_v50 = vpop.eup %5335  ;;  %v2235_v41 = vmul.f32 %v6295_v6, %v6385_v53  ;;  %v6416_v6 = vmul.f32 %v6239_v11, %v9169_v9  ;;  %v9171_v53 = vsub.f32 1.0, %v6136_v47  ;;  %v1596_v52 = vmul.f32 %v6221_v46, %v6177_v8 }
 0x1fa   : > { %9162 = vst [vmem:[#allocation79_spill] sm:$0xff] %v6387_v26  ;;  %9163 = vst [vmem:[#allocation80_spill] sm:$0xff] %v6395_v50  ;;  %v6409_v3 = vpop.eup %5337  ;;  %v6411_v61 = vpop.f32.mrb[52].mxu1  ;;  %v1934_v34 = vmul.f32 %v4900_v7, %v6309_v22  ;;  %v6436_v11 = vadd.f32 %v6262_v57, %v1595_v28  ;;  %v9177_v8 = vsub.f32 1.0, %v6145_v38  ;;  %v9179_v7 = vsub.f32 1.0, %v6151_v40 }
 0x1fb   : > { %9165 = vst [vmem:[#allocation81_spill] sm:$0xff] %v6402_v59  ;;  %9167 = vst [vmem:[#allocation82_spill] sm:$0xff] %v6407_v1  ;;  %v6421_v54 = vmul.f32 %v6246_v32, %v9171_v53  ;;  %v6423_v13 = vpop.eup %5339  ;;  %v2268_v55 = vmul.f32 %v6393_v37, %v2235_v41  ;;  %v6429_v1 = vpop.f32.mrb[36].mxu0  ;;  %v2075_v53 = vmul.f32 %v6079_v27, %v1668_v35  ;;  %v9182_v27 = vld [vmem:[#allocation53_spill] sm:$0xff]  ;;  %5359 = vrcp.f32 %v1292_v16 }
 0x1fc   : > { %9168 = vst [vmem:[#allocation83_spill] sm:$0xff] %v6409_v3  ;;  %9170 = vst [vmem:[#allocation84_spill] sm:$0xff] %v6416_v6  ;;  %v6431_v59 = vpop.f32.mrb[53].mxu1  ;;  %v6433_v9 = vpop.eup %5341  ;;  %v6446_v62 = vmul.f32 %v6252_v44, %v9177_v8  ;;  %v6451_v41 = vmul.f32 %v6257_v21, %v9179_v7  ;;  %v1601_v28 = vmul.f32 %v6185_v30, %v6221_v46  ;;  %v9187_v21 = vsub.f32 1.0, %v6156_v43 }
 0x1fd   : > { %9172 = vst [vmem:[#allocation85_spill] sm:$0xff] %v6421_v54  ;;  %9173 = vst [vmem:[#allocation86_spill] sm:$0xff] %v6423_v13  ;;  %v6439_v32 = vpop.f32.mrb[37].mxu0  ;;  %v6441_v19 = vpop.f32.mrb[54].mxu1  ;;  %v1599_v6 = vmul.f32 %v6221_v46, %v9182_v27  ;;  %v6459_v29 = vadd.f32 %v2268_v55, %v2139_v24  ;;  %v1972_v49 = vadd.f32 %v6334_v23, %v1934_v34  ;;  %v9192_v55 = vld [vmem:[#allocation17_spill] sm:$0xff] }
 0x1fe   : > { %9174 = vst [vmem:[#allocation87_spill] sm:$0xff] %v6431_v59  ;;  %9175 = vst [vmem:[#allocation88_spill] sm:$0xff] %v6433_v9  ;;  %v6453_v54 = vpop.eup %5343  ;;  %v6464_v8 = vpop.f32.mrb[55].mxu1  ;;  %v6473_v30 = vmul.f32 %v6347_v12, %v9187_v21  ;;  %v9193_v34 = vsub.f32 1.0, %v9192_v55  ;;  %v6488_v16 = vadd.f32 %v6262_v57, %v1596_v52  ;;  %v9197_v21 = vld [vmem:[#allocation19_spill] sm:$0xff]  ;;  %v2108_v52 = vmul.f32 %v6350_v42, %v2075_v53 }
 0x1ff   : > { %9176 = vst [vmem:[#allocation89_spill] sm:$0xff] %v6441_v19  ;;  %9178 = vst [vmem:[#allocation90_spill] sm:$0xff] %v6446_v62  ;;  %v6462_v19 = vpop.f32.mrb[38].mxu0  ;;  %v6466_v44 = vpop.eup %5345  ;;  %v9198_v12 = vsub.f32 1.0, %v9197_v21 }
 0x200   : > { %9180 = vst [vmem:[#allocation91_spill] sm:$0xff] %v6451_v41  ;;  %9181 = vst [vmem:[#allocation92_spill] sm:$0xff] %v6453_v54  ;;  %v6468_v7 = vpop.f32.mrb[39].mxu0  ;;  %v9189_v41 = vld [vmem:[#allocation15_spill] sm:$0xff]  ;;  %v6483_v62 = vmul.f32 %v6369_v0, %v9193_v34  ;;  %v2043_v0 = vmul.f32 %v6329_v4, %v1668_v35 }
 0x201   : > { %9183 = vst [vmem:[#allocation53_spill] sm:$0xff] %v6462_v19  ;;  %9184 = vst [vmem:[#allocation93_spill] sm:$0xff] %v6464_v8  ;;  %v9190_v27 = vsub.f32 1.0, %v9189_v41  ;;  %v6485_v8 = vpop.eup %5347  ;;  %v6507_v19 = vmax.f32 %v1972_v49, 0.0 }
 0x202   : > { %9185 = vst [vmem:[#allocation94_spill] sm:$0xff] %v6466_v44  ;;  %9186 = vst [vmem:[#allocation95_spill] sm:$0xff] %v6468_v7  ;;  %v9196_v7 = vld [vmem:[#allocation5_spill] sm:$0xff]  ;;  %v6502_v34 = vpop.eup %5349 }
 0x203   : > { %9188 = vst [vmem:[#allocation96_spill] sm:$0xff] %v6473_v30  ;;  %v6478_v24 = vmul.f32 %v6357_v60, %v9190_v27  ;;  %9194 = vst [vmem:[#allocation98_spill] sm:$0xff] %v6483_v62  ;;  %v1602_v59 = vmul.f32 %v9196_v7, %v6221_v46  ;;  %v6495_v30 = vmul.f32 %v6387_v26, %v9198_v12  ;;  %v9200_v27 = vld [vmem:[#allocation21_spill] sm:$0xff]  ;;  %v4547_v62 = vmul.f32 -1.442695, %v6459_v29  ;;  %v6509_v7 = vpop.eup %5351 }
 0x204   : > { %9195 = vst [vmem:[#allocation99_spill] sm:$0xff] %v6485_v8  ;;  %v9201_v60 = vsub.f32 1.0, %v9200_v27  ;;  %9203 = vst [vmem:[#allocation101_spill] sm:$0xff] %v6502_v34  ;;  %v1665_v12 = vmax.f32 %v6436_v11, 0.0  ;;  %v6513_v26 = vadd.f32 %v6262_v57, %v1601_v28  ;;  %v6523_v53 = vpop.eup %5353  ;;  %v2236_v49 = vmul.f32 %v6316_v20, %v6507_v19  ;;  %v9213_v27 = vld [vmem:[#allocation27_spill] sm:$0xff] }
 0x205   : > { %9191 = vst [vmem:[#allocation97_spill] sm:$0xff] %v6478_v24  ;;  %9199 = vst [vmem:[#allocation5_spill] sm:$0xff] %v6495_v30  ;;  %v6527_v30 = vpop.f32.mrb[56].mxu1  ;;  %v9211_v11 = vsub.f32 1.0, %v6097_v51  ;;  %v1666_v20 = vmax.f32 %v6488_v16, 0.0  ;;  %v9224_v16 = vld [vmem:[#allocation10_spill] sm:$0xff]  ;;  %5361 = vpow2.f32 %v4547_v62 }
 0x206   : > { %v6500_v24 = vmul.f32 %v6395_v50, %v9201_v60  ;;  %9204 = vst [vmem:[#allocation102_spill] sm:$0xff] %v6507_v19  ;;  %9205 = vst [vmem:[#allocation103_spill] sm:$0xff] %v6509_v7  ;;  %v6516_v60 = vadd.f32 %v6262_v57, %v1599_v6  ;;  %v9206_v50 = vld [vmem:[#allocation23_spill] sm:$0xff]  ;;  %v9214_v6 = vsub.f32 1.0, %v9213_v27  ;;  %v6548_v19 = vadd.f32 %v6262_v57, %v1602_v59 }
 0x207   : > { %9209 = vst [vmem:[#allocation105_spill] sm:$0xff] %v6523_v53  ;;  %9210 = vst [vmem:[#allocation106_spill] sm:$0xff] %v6527_v30  ;;  %v6532_v28 = vmul.f32 %v6423_v13, %v9211_v11  ;;  %v9219_v30 = vld [vmem:[#allocation6_spill] sm:$0xff]  ;;  %v6552_v13 = vpop.f32.mrb[40].mxu0  ;;  %v2269_v59 = vmul.f32 %v6393_v37, %v2236_v49  ;;  %v9230_v49 = vld [vmem:[#allocation11_spill] sm:$0xff] }
 0x208   : > { %9202 = vst [vmem:[#allocation100_spill] sm:$0xff] %v6500_v24  ;;  %v9207_v24 = vsub.f32 1.0, %v9206_v50  ;;  %v6537_v21 = vmul.f32 %v6433_v9, %v9214_v6  ;;  %v1600_v11 = vmul.f32 %v6221_v46, %v9219_v30  ;;  %v9221_v6 = vsub.f32 1.0, %v6118_v5 }
 0x209   : > { %9212 = vst [vmem:[#allocation107_spill] sm:$0xff] %v6532_v28  ;;  %v6554_v28 = vpop.f32.mrb[57].mxu1  ;;  %v1671_v5 = vmax.f32 %v6513_v26, 0.0  ;;  %v9231_v26 = vsub.f32 1.0, %v6126_v10 }
 0x20a   : > { %v6521_v35 = vmul.f32 %v6409_v3, %v9207_v24  ;;  %9215 = vst [vmem:[#allocation108_spill] sm:$0xff] %v6537_v21  ;;  %v9216_v24 = vsub.f32 1.0, %v6112_v45  ;;  %9220 = vst [vmem:[#allocation6_spill] sm:$0xff] %v6554_v28  ;;  %v6559_v9 = vmul.f32 %v6466_v44, %v9221_v6  ;;  %v6566_v21 = vpop.f32.mrb[41].mxu0  ;;  %v6568_v30 = vpop.f32.mrb[58].mxu1  ;;  %v2072_v28 = vmul.f32 %v6073_v33, %v1665_v12 }
 0x20b   : > { %9225 = vst [vmem:[#allocation10_spill] sm:$0xff] %v6568_v30  ;;  %v1669_v6 = vmax.f32 %v6516_v60, 0.0  ;;  %v6573_v44 = vpop.f32.mrb[42].mxu0  ;;  %v6591_v60 = vmul.f32 %v6502_v34, %v9231_v26  ;;  %v9233_v33 = vsub.f32 1.0, %v6134_v17  ;;  %v2073_v34 = vmul.f32 %v6083_v25, %v1666_v20 }
 0x20c   : > { %9208 = vst [vmem:[#allocation104_spill] sm:$0xff] %v6521_v35  ;;  %v6542_v3 = vmul.f32 %v6453_v54, %v9216_v24  ;;  %v6544_v35 = vpop.eup %5355  ;;  %9222 = vst [vmem:[#allocation111_spill] sm:$0xff] %v6559_v9  ;;  %v2140_v54 = vadd.f32 %v2108_v52, %v2043_v0  ;;  %v6575_v9 = vpop.f32.mrb[59].mxu1  ;;  %v9227_v0 = vld [vmem:[#allocation33_spill] sm:$0xff] }
 0x20d   : > { %9218 = vst [vmem:[#allocation110_spill] sm:$0xff] %v6544_v35  ;;  %v6561_v24 = vpop.eup %5357  ;;  %9226 = vst [vmem:[#allocation113_spill] sm:$0xff] %v6575_v9  ;;  %v9228_v52 = vsub.f32 1.0, %v9227_v0  ;;  %v6586_v30 = vpop.f32.mrb[43].mxu0  ;;  %v6596_v9 = vmul.f32 %v6509_v7, %v9233_v33 }
 0x20e   : > { %9217 = vst [vmem:[#allocation109_spill] sm:$0xff] %v6542_v3  ;;  %9223 = vst [vmem:[#allocation112_spill] sm:$0xff] %v6561_v24  ;;  %v1605_v3 = vmul.f32 %v9224_v16, %v6221_v46  ;;  %v1603_v16 = vmul.f32 %v6221_v46, %v9230_v49  ;;  %v6584_v45 = vadd.f32 %v2269_v59, %v2140_v54  ;;  %v9238_v59 = vsub.f32 1.0, %v6148_v39  ;;  %v6610_v26 = vpop.eup %5359  ;;  %v9249_v39 = vld [vmem:[#allocation60_spill] sm:$0xff] }
 0x20f   : > { %v6580_v62 = vmul.f32 %v6485_v8, %v9228_v52  ;;  %9232 = vst [vmem:[#allocation11_spill] sm:$0xff] %v6591_v60  ;;  %9234 = vst [vmem:[#allocation115_spill] sm:$0xff] %v6596_v9  ;;  %v1672_v52 = vmax.f32 %v6548_v19, 0.0  ;;  %v1638_v8 = vadd.f32 %v6262_v57, %v1600_v11  ;;  %v9241_v11 = vsub.f32 1.0, %v6154_v36 }
 0x210   : > { %v6608_v10 = vmul.f32 %v6544_v35, %v9238_v59  ;;  %9240 = vst [vmem:[#allocation118_spill] sm:$0xff] %v6610_v26  ;;  %v1643_v33 = vadd.f32 %v6262_v57, %v1605_v3  ;;  %v4548_v19 = vmul.f32 -1.442695, %v6584_v45  ;;  %v2078_v59 = vmul.f32 %v6087_v58, %v1671_v5  ;;  %v9243_v3 = vld [vmem:[#allocation12_spill] sm:$0xff]  ;;  %v6635_v58 = vpop.f32.mrb[44].mxu0 }
 0x211   : > { %9229 = vst [vmem:[#allocation114_spill] sm:$0xff] %v6580_v62  ;;  %v9235_v62 = vld [vmem:[#allocation39_spill] sm:$0xff]  ;;  %v6618_v7 = vmul.f32 %v6561_v24, %v9241_v11  ;;  %v2076_v35 = vmul.f32 %v6095_v63, %v1669_v6  ;;  %v1606_v25 = vmul.f32 %v9243_v3, %v6221_v46  ;;  %v6631_v11 = vpop.f32.mrb[60].mxu1  ;;  %v1670_v24 = vmax.f32 %v1638_v8, 0.0 }
 0x212   : > { %v9236_v49 = vsub.f32 1.0, %v9235_v62  ;;  %9239 = vst [vmem:[#allocation117_spill] sm:$0xff] %v6608_v10  ;;  %v6625_v10 = vadd.f32 %v6262_v57, %v1603_v16  ;;  %5363 = vpow2.f32 %v4548_v19  ;;  %v6637_v63 = vpop.f32.mrb[61].mxu1  ;;  %v9245_v16 = vld [vmem:[#allocation45_spill] sm:$0xff]  ;;  %v2106_v3 = vmul.f32 %v6350_v42, %v2073_v34 }
 0x213   : > { %9242 = vst [vmem:[#allocation119_spill] sm:$0xff] %v6618_v7  ;;  %v9246_v7 = vsub.f32 1.0, %v9245_v16  ;;  %v9248_v19 = vld [vmem:[#allocation13_spill] sm:$0xff]  ;;  %v6651_v8 = vpop.f32.mrb[62].mxu1  ;;  %v2046_v16 = vmul.f32 %v6329_v4, %v1671_v5  ;;  %v1644_v17 = vadd.f32 %v6262_v57, %v1606_v25  ;;  %v2047_v5 = vmul.f32 %v6329_v4, %v1672_v52 }
 0x214   : > { %v6603_v54 = vmul.f32 %v6523_v53, %v9236_v49  ;;  %v2040_v49 = vmul.f32 %v6329_v4, %v1665_v12  ;;  %v2105_v53 = vmul.f32 %v6350_v42, %v2072_v28  ;;  %v2041_v12 = vmul.f32 %v6329_v4, %v1666_v20 }
 0x215   : > { %v2079_v28 = vmul.f32 %v6099_v2, %v1672_v52  ;;  %v6642_v60 = vmul.f32 %v6610_v26, %v9246_v7  ;;  %v1609_v36 = vmul.f32 %v9248_v19, %v6221_v46  ;;  %v1607_v20 = vmul.f32 %v6221_v46, %v9249_v39  ;;  %v6649_v2 = vpop.f32.mrb[45].mxu0  ;;  %v5362_v19 = vpop.eup %5361  ;;  %v9258_v52 = vld [vmem:[#allocation62_spill] sm:$0xff] }
 0x216   : > { %9237 = vst [vmem:[#allocation116_spill] sm:$0xff] %v6603_v54  ;;  %v9244_v54 = vld [vmem:[#allocation57_spill] sm:$0xff]  ;;  %v6653_v62 = vadd.f32 %v2105_v53, %v2040_v49  ;;  %v2111_v7 = vmul.f32 %v6350_v42, %v2078_v59  ;;  %v2044_v26 = vmul.f32 %v6329_v4, %v1669_v6  ;;  %v6658_v34 = vpop.f32.mrb[46].mxu0  ;;  %v1673_v39 = vmax.f32 %v6625_v10, 0.0 }
 0x217   : > { %v1604_v9 = vmul.f32 %v6221_v46, %v9244_v54  ;;  %9247 = vst [vmem:[#allocation12_spill] sm:$0xff] %v6642_v60  ;;  %v1675_v54 = vmax.f32 %v1643_v33, 0.0  ;;  %9250 = vst [vmem:[#allocation57_spill] sm:$0xff] %v6651_v8  ;;  %v6660_v33 = vpop.f32.mrb[63].mxu1  ;;  %v2109_v60 = vmul.f32 %v6350_v42, %v2076_v35  ;;  %v6666_v49 = vpop.f32.mrb[47].mxu0  ;;  %v2112_v59 = vmul.f32 %v6350_v42, %v2079_v28 }
 0x218   : > { %9251 = vst [vmem:[#allocation13_spill] sm:$0xff] %v6653_v62  ;;  %9252 = vst [vmem:[#allocation60_spill] sm:$0xff] %v6658_v34  ;;  %v2077_v6 = vmul.f32 %v6109_v31, %v1670_v24  ;;  %v9255_v62 = vld [vmem:[#allocation61_spill] sm:$0xff]  ;;  %v6673_v8 = vadd.f32 %v2106_v3, %v2041_v12  ;;  %v1647_v10 = vadd.f32 %v6262_v57, %v1609_v36  ;;  %v2428_v34 = vadd.f32 1.0, %v5362_v19 }
 0x219   : > { %9253 = vst [vmem:[#allocation120_spill] sm:$0xff] %v6660_v33  ;;  %v1642_v53 = vadd.f32 %v6262_v57, %v1604_v9  ;;  %9254 = vst [vmem:[#allocation121_spill] sm:$0xff] %v6666_v49  ;;  %v1610_v33 = vmul.f32 %v9255_v62, %v6221_v46  ;;  %v2082_v35 = vmul.f32 %v6115_v15, %v1675_v54  ;;  %v1676_v12 = vmax.f32 %v1644_v17, 0.0  ;;  %v9260_v17 = vld [vmem:[#allocation67_spill] sm:$0xff] }
 0x21a   : > { %9256 = vst [vmem:[#allocation61_spill] sm:$0xff] %v6673_v8  ;;  %v1645_v25 = vadd.f32 %v6262_v57, %v1607_v20  ;;  %v6678_v9 = vadd.f32 %v2111_v7, %v2046_v16  ;;  %v2045_v49 = vmul.f32 %v6329_v4, %v1670_v24  ;;  %v1608_v28 = vmul.f32 %v6221_v46, %v9258_v52  ;;  %v6686_v8 = vpop.f32.mrb[64].mxu1 }
 0x21b   : > { %v6683_v31 = vadd.f32 %v2109_v60, %v2044_v26  ;;  %v2080_v62 = vmul.f32 %v6120_v18, %v1673_v39  ;;  %v1674_v3 = vmax.f32 %v1642_v53, 0.0  ;;  %v6688_v15 = vadd.f32 %v2112_v59, %v2047_v5  ;;  %v6693_v20 = vpop.f32.mrb[65].mxu1  ;;  %v9261_v59 = vld [vmem:[#allocation70_spill] sm:$0xff] }
 0x21c   : > { %9257 = vst [vmem:[#allocation122_spill] sm:$0xff] %v6678_v9  ;;  %v2110_v36 = vmul.f32 %v6350_v42, %v2077_v6  ;;  %v2050_v16 = vmul.f32 %v6329_v4, %v1675_v54  ;;  %v1648_v24 = vadd.f32 %v6262_v57, %v1610_v33  ;;  %v5364_v7 = vpop.eup %5363  ;;  %v2115_v60 = vmul.f32 %v6350_v42, %v2082_v35  ;;  %v6698_v52 = vpop.f32.mrb[66].mxu1 }
 0x21d   : > { %9259 = vst [vmem:[#allocation62_spill] sm:$0xff] %v6688_v15  ;;  %v1679_v26 = vmax.f32 %v1647_v10, 0.0  ;;  %v1677_v19 = vmax.f32 %v1645_v25, 0.0  ;;  %v1613_v53 = vmul.f32 %v9260_v17, %v6221_v46  ;;  %v1646_v5 = vadd.f32 %v6262_v57, %v1608_v28  ;;  %v6703_v33 = vpop.f32.mrb[67].mxu1  ;;  %v9262_v28 = vld [vmem:[#allocation72_spill] sm:$0xff] }
 0x21e   : > { %5365 = vrcp.f32 %v2428_v34  ;;  %v1611_v54 = vmul.f32 %v6221_v46, %v9261_v59  ;;  %v2429_v6 = vadd.f32 1.0, %v5364_v7  ;;  %v2048_v18 = vmul.f32 %v6329_v4, %v1673_v39 }
 0x21f   : > { %v2113_v35 = vmul.f32 %v6350_v42, %v2080_v62  ;;  %v2083_v10 = vmul.f32 %v6124_v56, %v1676_v12  ;;  %v2081_v25 = vmul.f32 %v6132_v14, %v1674_v3  ;;  %v6709_v17 = vadd.f32 %v2110_v36, %v2045_v49 }
 0x220   : > { %v1680_v15 = vmax.f32 %v1648_v24, 0.0  ;;  %v1614_v34 = vmul.f32 %v9262_v28, %v6221_v46  ;;  %5367 = vrcp.f32 %v2429_v6  ;;  %v2051_v59 = vmul.f32 %v6329_v4, %v1676_v12  ;;  %v6728_v28 = vpop.f32.mrb[68].mxu1 }
 0x221   : > { %v2086_v7 = vmul.f32 %v6136_v47, %v1679_v26  ;;  %v2084_v9 = vmul.f32 %v6145_v38, %v1677_v19  ;;  %v1651_v39 = vadd.f32 %v6262_v57, %v1613_v53  ;;  %v6717_v62 = vadd.f32 %v2115_v60, %v2050_v16  ;;  %v9265_v60 = vld [vmem:[#allocation68_spill] sm:$0xff]  ;;  %v9266_v38 = vld [vmem:[#allocation73_spill] sm:$0xff] }
 0x222   : > { %v2049_v56 = vmul.f32 %v6329_v4, %v1674_v3  ;;  %v1678_v14 = vmax.f32 %v1646_v5, 0.0  ;;  %v6721_v49 = vadd.f32 %v6262_v57, %v1611_v54  ;;  %v6723_v36 = vadd.f32 %v2113_v35, %v2048_v18  ;;  %v6735_v54 = vpop.f32.mrb[69].mxu1 }
 0x223   : > { %9263 = vst [vmem:[#allocation67_spill] sm:$0xff] %v6717_v62  ;;  %v2116_v24 = vmul.f32 %v6350_v42, %v2083_v10  ;;  %v2114_v12 = vmul.f32 %v6350_v42, %v2081_v25  ;;  %v2054_v6 = vmul.f32 %v6329_v4, %v1679_v26  ;;  %v2052_v53 = vmul.f32 %v6329_v4, %v1677_v19  ;;  %v6741_v25 = vpop.f32.mrb[70].mxu1 }
 0x224   : > { %9264 = vst [vmem:[#allocation70_spill] sm:$0xff] %v6723_v36  ;;  %v2087_v16 = vmul.f32 %v6151_v40, %v1680_v15  ;;  %v1931_v3 = vmul.f32 %v6309_v22, %v9265_v60  ;;  %v1652_v5 = vadd.f32 %v6262_v57, %v1614_v34  ;;  %v2119_v18 = vmul.f32 %v6350_v42, %v2086_v7  ;;  %v6749_v47 = vpop.f32.mrb[71].mxu1 }
 0x225   : > { %v2117_v35 = vmul.f32 %v6350_v42, %v2084_v9  ;;  %v1683_v10 = vmax.f32 %v1651_v39, 0.0  ;;  %v1612_v26 = vmul.f32 %v6221_v46, %v6371_v48  ;;  %v2085_v19 = vmul.f32 %v6156_v43, %v1678_v14  ;;  %9267 = vst [vmem:[#allocation72_spill] sm:$0xff] %v6749_v47 }
 0x226   : > { %v1681_v40 = vmax.f32 %v6721_v49, 0.0  ;;  %v1932_v60 = vmul.f32 %v6309_v22, %v9266_v38  ;;  %v1617_v34 = vmul.f32 %v6429_v1, %v6221_v46  ;;  %v6751_v7 = vadd.f32 %v2116_v24, %v2051_v59 }
 0x227   : > { %v6753_v9 = vadd.f32 %v2114_v12, %v2049_v56  ;;  %v2055_v48 = vmul.f32 %v6329_v4, %v1680_v15  ;;  %v1615_v39 = vmul.f32 %v6221_v46, %v6439_v32  ;;  %v2120_v49 = vmul.f32 %v6350_v42, %v2087_v16 }
 0x228   : > { %v5366_v43 = vpop.eup %5365  ;;  %v2053_v62 = vmul.f32 %v6329_v4, %v1678_v14  ;;  %v1969_v38 = vadd.f32 %v6334_v23, %v1931_v3  ;;  %v1684_v36 = vmax.f32 %v1652_v5, 0.0  ;;  %v6761_v1 = vadd.f32 %v2119_v18, %v2054_v6  ;;  %v6780_v5 = vpop.f32.mrb[72].mxu1 }
 0x229   : > { %v6763_v47 = vadd.f32 %v2117_v35, %v2052_v53  ;;  %v2090_v56 = vmul.f32 %v9189_v41, %v1683_v10  ;;  %v1650_v59 = vadd.f32 %v6262_v57, %v1612_v26  ;;  %v2118_v24 = vmul.f32 %v6350_v42, %v2085_v19  ;;  %v9273_v26 = vld [vmem:[#allocation19_spill] sm:$0xff] }
 0x22a   : > { %9268 = vst [vmem:[#allocation68_spill] sm:$0xff] %v6761_v1  ;;  %v5368_v15 = vpop.eup %5367  ;;  %v2088_v32 = vmul.f32 %v9192_v55, %v1681_v40  ;;  %v1970_v12 = vadd.f32 %v6334_v23, %v1932_v60  ;;  %v1655_v14 = vadd.f32 %v6262_v57, %v1617_v34  ;;  %v6772_v16 = vmul.f32 %v5366_v43, %v6459_v29  ;;  %v9274_v60 = vld [vmem:[#allocation53_spill] sm:$0xff]  ;;  %v6789_v29 = vpop.f32.mrb[73].mxu1 }
 0x22b   : > { %v6775_v6 = vmul.f32 %v5368_v15, %v6584_v45  ;;  %v1937_v53 = vmul.f32 %v6411_v61, %v6309_v22  ;;  %v1653_v3 = vadd.f32 %v6262_v57, %v1615_v39  ;;  %v6782_v18 = vadd.f32 %v2120_v49, %v2055_v48  ;;  %v9275_v39 = vld [vmem:[#allocation87_spill] sm:$0xff]  ;;  %v6796_v48 = vpop.f32.mrb[74].mxu1 }
 0x22c   : > { %9269 = vst [vmem:[#allocation73_spill] sm:$0xff] %v6772_v16  ;;  %v6784_v35 = vmax.f32 %v1969_v38, 0.0  ;;  %v2091_v19 = vmul.f32 %v9273_v26, %v1684_v36  ;;  %v1618_v43 = vmul.f32 %v9274_v60, %v6221_v46  ;;  %v2123_v45 = vmul.f32 %v6350_v42, %v2090_v56  ;;  %v6803_v55 = vpop.f32.mrb[75].mxu1 }
 0x22d   : > { %9270 = vst [vmem:[#allocation123_spill] sm:$0xff] %v6775_v6  ;;  %9271 = vst [vmem:[#allocation124_spill] sm:$0xff] %v6782_v18  ;;  %v1682_v34 = vmax.f32 %v1650_v59, 0.0  ;;  %v1935_v15 = vmul.f32 %v6309_v22, %v9275_v39  ;;  %v6798_v49 = vadd.f32 %v2118_v24, %v2053_v62  ;;  %v2058_v38 = vmul.f32 %v6329_v4, %v1683_v10  ;;  %v9278_v59 = vld [vmem:[#allocation95_spill] sm:$0xff]  ;;  %v9283_v6 = vld [vmem:[#allocation89_spill] sm:$0xff] }
 0x22e   : > { %9272 = vst [vmem:[#allocation125_spill] sm:$0xff] %v6784_v35  ;;  %v6801_v26 = vmax.f32 %v1970_v12, 0.0  ;;  %v1687_v60 = vmax.f32 %v1655_v14, 0.0  ;;  %v2121_v56 = vmul.f32 %v6350_v42, %v2088_v32  ;;  %v1975_v41 = vadd.f32 %v6334_v23, %v1937_v53  ;;  %v9279_v62 = vld [vmem:[#allocation63_spill] sm:$0xff]  ;;  %v9281_v32 = vld [vmem:[#allocation21_spill] sm:$0xff] }
 0x22f   : > { %9276 = vst [vmem:[#allocation53_spill] sm:$0xff] %v6798_v49  ;;  %v1685_v61 = vmax.f32 %v1653_v3, 0.0  ;;  %v1616_v18 = vmul.f32 %v6221_v46, %v9278_v59  ;;  %v2056_v39 = vmul.f32 %v6329_v4, %v1681_v40  ;;  %v2233_v24 = vmul.f32 %v9279_v62, %v6784_v35  ;;  %v9282_v3 = vld [vmem:[#allocation64_spill] sm:$0xff]  ;;  %v9284_v35 = vld [vmem:[#allocation93_spill] sm:$0xff] }
 0x230   : > { %9277 = vst [vmem:[#allocation87_spill] sm:$0xff] %v6801_v26  ;;  %v2124_v10 = vmul.f32 %v6350_v42, %v2091_v19  ;;  %v1656_v12 = vadd.f32 %v6262_v57, %v1618_v43  ;;  %v6814_v14 = vadd.f32 %v2123_v45, %v2058_v38  ;;  %v2059_v1 = vmul.f32 %v6329_v4, %v1684_v36 }
 0x231   : > { %v2089_v16 = vmul.f32 %v9281_v32, %v1682_v34  ;;  %v1973_v53 = vadd.f32 %v6334_v23, %v1935_v15  ;;  %v2234_v59 = vmul.f32 %v9282_v3, %v6801_v26  ;;  %v2094_v40 = vmul.f32 %v9206_v50, %v1687_v60  ;;  %v6832_v15 = vpop.f32.mrb[76].mxu1 }
 0x232   : > { %9280 = vst [vmem:[#allocation95_spill] sm:$0xff] %v6814_v14  ;;  %v1938_v62 = vmul.f32 %v9283_v6, %v6309_v22  ;;  %v1936_v19 = vmul.f32 %v6309_v22, %v9284_v35  ;;  %v6826_v43 = vadd.f32 %v2121_v56, %v2056_v39  ;;  %v6828_v45 = vmax.f32 %v1975_v41, 0.0  ;;  %v6841_v35 = vpop.f32.mrb[77].mxu1 }
 0x233   : > { %v2092_v36 = vmul.f32 %v6097_v51, %v1685_v61  ;;  %v1654_v38 = vadd.f32 %v6262_v57, %v1616_v18  ;;  %v6835_v3 = vmul.f32 %v6393_v37, %v2233_v24  ;;  %v6837_v26 = vadd.f32 %v2124_v10, %v2059_v1  ;;  %v6849_v51 = vpop.f32.mrb[78].mxu1 }
 0x234   : > { %9285 = vst [vmem:[#allocation63_spill] sm:$0xff] %v6826_v43  ;;  %9286 = vst [vmem:[#allocation64_spill] sm:$0xff] %v6828_v45  ;;  %v1688_v50 = vmax.f32 %v1656_v12, 0.0  ;;  %v1621_v6 = vmul.f32 %v6552_v13, %v6221_v46  ;;  %v2057_v41 = vmul.f32 %v6329_v4, %v1682_v34  ;;  %v2122_v56 = vmul.f32 %v6350_v42, %v2089_v16  ;;  %v6857_v12 = vpop.f32.mrb[79].mxu1  ;;  %v9289_v16 = vld [vmem:[#allocation65_spill] sm:$0xff] }
 0x235   : > { %9287 = vst [vmem:[#allocation89_spill] sm:$0xff] %v6837_v26  ;;  %v6845_v39 = vmax.f32 %v1973_v53, 0.0  ;;  %v1619_v18 = vmul.f32 %v6221_v46, %v6566_v21  ;;  %v6852_v1 = vmul.f32 %v6393_v37, %v2234_v59  ;;  %v2127_v24 = vmul.f32 %v6350_v42, %v2094_v40  ;;  %v9290_v21 = vld [vmem:[#allocation106_spill] sm:$0xff] }
 0x236   : > { %v1976_v13 = vadd.f32 %v6334_v23, %v1938_v62  ;;  %v1974_v10 = vadd.f32 %v6334_v23, %v1936_v19  ;;  %v2239_v34 = vmul.f32 %v9289_v16, %v6828_v45  ;;  %v2125_v53 = vmul.f32 %v6350_v42, %v2092_v36  ;;  %v9291_v19 = vld [vmem:[#allocation66_spill] sm:$0xff] }
 0x237   : > { %9288 = vst [vmem:[#allocation93_spill] sm:$0xff] %v6845_v39  ;;  %v1686_v32 = vmax.f32 %v1654_v38, 0.0  ;;  %v1941_v26 = vmul.f32 %v9290_v21, %v6309_v22  ;;  %v2062_v59 = vmul.f32 %v6329_v4, %v1687_v60  ;;  %v2060_v14 = vmul.f32 %v6329_v4, %v1685_v61 }
 0x238   : > { %v2095_v40 = vmul.f32 %v9213_v27, %v1688_v50  ;;  %v1659_v62 = vadd.f32 %v6262_v57, %v1621_v6  ;;  %v2237_v43 = vmul.f32 %v9291_v19, %v6845_v39  ;;  %v1657_v49 = vadd.f32 %v6262_v57, %v1619_v18  ;;  %v6886_v6 = vld [vmem:[%s8843_s3 + $0xc] sm:$0xf]  ;;  %v9297_v19 = vld [vmem:[#allocation29_spill] sm:$0xff] }
 0x239   : > { %v1622_v36 = vmul.f32 %v6573_v44, %v6221_v46  ;;  %v1620_v38 = vmul.f32 %v6221_v46, %v6586_v30  ;;  %v6875_v16 = vadd.f32 %v2122_v56, %v2057_v41  ;;  %v6877_v60 = vadd.f32 %v2127_v24, %v2062_v59  ;;  %9295 = vst [vmem:[#allocation126_spill] sm:$0xff] %v6886_v6  ;;  %v9299_v59 = vld [vmem:[#allocation10_spill] sm:$0xff] }
 0x23a   : > { %v6879_v61 = vmax.f32 %v1976_v13, 0.0  ;;  %v6881_v21 = vmax.f32 %v1974_v10, 0.0  ;;  %v6889_v18 = vmul.f32 %v6393_v37, %v2239_v34  ;;  %v6891_v44 = vadd.f32 %v2125_v53, %v2060_v14  ;;  %5048 = vmatprep.subr.msk.bf16.mxu1 %vm1424_vm1, %v6886_v6  ;;  %v9298_v13 = vld [vmem:[#allocation6_spill] sm:$0xff] }
 0x23b   : > { %9292 = vst [vmem:[#allocation65_spill] sm:$0xff] %v6877_v60  ;;  %v2093_v30 = vmul.f32 %v9297_v19, %v1686_v32  ;;  %v1979_v41 = vadd.f32 %v6334_v23, %v1941_v26  ;;  %v2128_v56 = vmul.f32 %v6350_v42, %v2095_v40  ;;  %v1691_v24 = vmax.f32 %v1659_v62, 0.0  ;;  %v9300_v19 = vld [vmem:[#allocation74_spill] sm:$0xff]  ;;  %v9301_v62 = vld [vmem:[#allocation76_spill] sm:$0xff] }
 0x23c   : > { %9293 = vst [vmem:[#allocation106_spill] sm:$0xff] %v6879_v61  ;;  %9294 = vst [vmem:[#allocation66_spill] sm:$0xff] %v6881_v21  ;;  %v1939_v10 = vmul.f32 %v6309_v22, %v9298_v13  ;;  %v1942_v39 = vmul.f32 %v9299_v59, %v6309_v22  ;;  %v6903_v34 = vmul.f32 %v6393_v37, %v2237_v43  ;;  %v1689_v14 = vmax.f32 %v1657_v49, 0.0  ;;  %v9302_v13 = vld [vmem:[#allocation113_spill] sm:$0xff] }
 0x23d   : > { %9296 = vst [vmem:[#allocation127_spill] sm:$0xff] %v6891_v44  ;;  %v1660_v53 = vadd.f32 %v6262_v57, %v1622_v36  ;;  %v1658_v26 = vadd.f32 %v6262_v57, %v1620_v38  ;;  %v2063_v45 = vmul.f32 %v6329_v4, %v1688_v50  ;;  %v2240_v40 = vmul.f32 %v9300_v19, %v6879_v61  ;;  %v9305_v38 = vld [vmem:[#allocation31_spill] sm:$0xff] }
 0x23e   : > { %v2238_v27 = vmul.f32 %v9301_v62, %v6881_v21  ;;  %v1940_v6 = vmul.f32 %v6309_v22, %v9302_v13  ;;  %v2126_v59 = vmul.f32 %v6350_v42, %v2093_v30  ;;  %v6915_v43 = vmax.f32 %v1979_v41, 0.0 }
 0x23f   : > { %v1625_v49 = vmul.f32 %v6635_v58, %v6221_v46  ;;  %v1623_v36 = vmul.f32 %v6221_v46, %v6649_v2  ;;  %v6921_v50 = vadd.f32 %v2128_v56, %v2063_v45  ;;  %v2098_v19 = vmul.f32 %v9305_v38, %v1691_v24 }
 0x240   : > { %9303 = vst [vmem:[#allocation6_spill] sm:$0xff] %v6915_v43  ;;  %v1977_v61 = vadd.f32 %v6334_v23, %v1939_v10  ;;  %v1980_v62 = vadd.f32 %v6334_v23, %v1942_v39  ;;  %v2061_v13 = vmul.f32 %v6329_v4, %v1686_v32  ;;  %v2096_v30 = vmul.f32 %v9227_v0, %v1689_v14  ;;  %v9307_v39 = vld [vmem:[#allocation77_spill] sm:$0xff] }
 0x241   : > { %9304 = vst [vmem:[#allocation10_spill] sm:$0xff] %v6921_v50  ;;  %v1692_v41 = vmax.f32 %v1660_v53, 0.0  ;;  %v1690_v21 = vmax.f32 %v1658_v26, 0.0  ;;  %v6929_v60 = vmul.f32 %v6393_v37, %v2240_v40  ;;  %v6932_v58 = vmul.f32 %v6393_v37, %v2238_v27 }
 0x242   : > { %v1978_v2 = vadd.f32 %v6334_v23, %v1940_v6  ;;  %v1945_v45 = vmul.f32 %v6631_v11, %v6309_v22  ;;  %v6937_v56 = vadd.f32 %v2126_v59, %v2061_v13  ;;  %v2243_v32 = vmul.f32 %v9307_v39, %v6915_v43  ;;  %v9310_v13 = vld [vmem:[#allocation35_spill] sm:$0xff]  ;;  %v9311_v39 = vld [vmem:[#allocation37_spill] sm:$0xff] }
 0x243   : > { %v1663_v10 = vadd.f32 %v6262_v57, %v1625_v49  ;;  %v1661_v53 = vadd.f32 %v6262_v57, %v1623_v36  ;;  %v2131_v26 = vmul.f32 %v6350_v42, %v2098_v19  ;;  %v6944_v40 = vmax.f32 %v1977_v61, 0.0  ;;  %v9313_v61 = vld [vmem:[#allocation60_spill] sm:$0xff] }
 0x244   : > { %9306 = vst [vmem:[#allocation74_spill] sm:$0xff] %v6937_v56  ;;  %v6946_v27 = vmax.f32 %v1980_v62, 0.0  ;;  %v1943_v6 = vmul.f32 %v6309_v22, %v6637_v63  ;;  %v2066_v11 = vmul.f32 %v6329_v4, %v1691_v24  ;;  %v2129_v59 = vmul.f32 %v6350_v42, %v2096_v30  ;;  %v9314_v62 = vld [vmem:[#allocation57_spill] sm:$0xff] }
 0x245   : > { %9308 = vst [vmem:[#allocation76_spill] sm:$0xff] %v6944_v40  ;;  %v2099_v0 = vmul.f32 %v9310_v13, %v1692_v41  ;;  %v2097_v43 = vmul.f32 %v9311_v39, %v1690_v21  ;;  %v6954_v49 = vmax.f32 %v1978_v2, 0.0  ;;  %v1983_v36 = vadd.f32 %v6334_v23, %v1945_v45  ;;  %v9315_v2 = vld [vmem:[#allocation81_spill] sm:$0xff]  ;;  %v9316_v45 = vld [vmem:[#allocation82_spill] sm:$0xff] }
 0x246   : > { %9309 = vst [vmem:[#allocation113_spill] sm:$0xff] %v6946_v27  ;;  %v1626_v19 = vmul.f32 %v9313_v61, %v6221_v46  ;;  %v1946_v38 = vmul.f32 %v9314_v62, %v6309_v22  ;;  %v6962_v63 = vmul.f32 %v6393_v37, %v2243_v32  ;;  %v2064_v24 = vmul.f32 %v6329_v4, %v1689_v14 }
 0x247   : > { %9312 = vst [vmem:[#allocation77_spill] sm:$0xff] %v6954_v49  ;;  %v1695_v30 = vmax.f32 %v1663_v10, 0.0  ;;  %v1693_v50 = vmax.f32 %v1661_v53, 0.0  ;;  %v6965_v13 = vadd.f32 %v2131_v26, %v2066_v11  ;;  %v2241_v39 = vmul.f32 %v9315_v2, %v6944_v40  ;;  %v9317_v10 = vld [vmem:[#allocation84_spill] sm:$0xff] }
 0x248   : > { %v2244_v56 = vmul.f32 %v9316_v45, %v6946_v27  ;;  %v1981_v61 = vadd.f32 %v6334_v23, %v1943_v6  ;;  %v6972_v44 = vadd.f32 %v2129_v59, %v2064_v24  ;;  %v2067_v62 = vmul.f32 %v6329_v4, %v1692_v41  ;;  %v9318_v6 = vld [vmem:[#allocation39_spill] sm:$0xff]  ;;  %v9319_v24 = vld [vmem:[#allocation41_spill] sm:$0xff] }
 0x249   : > { %v2132_v32 = vmul.f32 %v6350_v42, %v2099_v0  ;;  %v2130_v14 = vmul.f32 %v6350_v42, %v2097_v43  ;;  %v2242_v53 = vmul.f32 %v9317_v10, %v6954_v49  ;;  %v6979_v26 = vmax.f32 %v1983_v36, 0.0  ;;  %v9320_v41 = vld [vmem:[#allocation121_spill] sm:$0xff] }
 0x24a   : > { %v1664_v11 = vadd.f32 %v6262_v57, %v1626_v19  ;;  %v1984_v2 = vadd.f32 %v6334_v23, %v1946_v38  ;;  %v2065_v45 = vmul.f32 %v6329_v4, %v1690_v21  ;;  %v2102_v59 = vmul.f32 %v9318_v6, %v1695_v30  ;;  %v9322_v19 = vld [vmem:[#allocation120_spill] sm:$0xff] }
 0x24b   : > { %v2100_v27 = vmul.f32 %v9319_v24, %v1693_v50  ;;  %v1624_v0 = vmul.f32 %v6221_v46, %v9320_v41  ;;  %v6989_v43 = vmul.f32 %v6393_v37, %v2241_v39  ;;  %v6992_v10 = vmul.f32 %v6393_v37, %v2244_v56  ;;  %v9323_v24 = vld [vmem:[#allocation13_spill] sm:$0xff] }
 0x24c   : > { %v6994_v36 = vmax.f32 %v1981_v61, 0.0  ;;  %v1944_v38 = vmul.f32 %v6309_v22, %v9322_v19  ;;  %v6998_v49 = vadd.f32 %v2132_v32, %v2067_v62  ;;  %v7000_v21 = vadd.f32 %v2130_v14, %v2065_v45  ;;  %v9324_v56 = vld [vmem:[#allocation85_spill] sm:$0xff] }
 0x24d   : > { %v1949_v40 = vmul.f32 %v6686_v8, %v6309_v22  ;;  %v7006_v46 = vadd.f32 %v6835_v3, %v9323_v24  ;;  %v7009_v39 = vmul.f32 %v6393_v37, %v2242_v53  ;;  %v2247_v61 = vmul.f32 %v9324_v56, %v6979_v26  ;;  %v9325_v8 = vld [vmem:[#allocation61_spill] sm:$0xff]  ;;  %v9326_v53 = vld [vmem:[#allocation90_spill] sm:$0xff] }
 0x24e   : > { %9321 = vst [vmem:[#allocation60_spill] sm:$0xff] %v6994_v36  ;;  %v1696_v41 = vmax.f32 %v1664_v11, 0.0  ;;  %v7013_v6 = vmax.f32 %v1984_v2, 0.0  ;;  %v2135_v62 = vmul.f32 %v6350_v42, %v2102_v59  ;;  %v2133_v32 = vmul.f32 %v6350_v42, %v2100_v27  ;;  %v9327_v59 = vld [vmem:[#allocation43_spill] sm:$0xff] }
 0x24f   : > { %v1662_v14 = vadd.f32 %v6262_v57, %v1624_v0  ;;  %v7020_v45 = vadd.f32 %v6852_v1, %v9325_v8  ;;  %v2070_v3 = vmul.f32 %v6329_v4, %v1695_v30  ;;  %v2245_v24 = vmul.f32 %v9326_v53, %v6994_v36 }
 0x250   : > { %v1982_v19 = vadd.f32 %v6334_v23, %v1944_v38  ;;  %v1947_v11 = vmul.f32 %v6309_v22, %v6693_v20  ;;  %v2068_v2 = vmul.f32 %v6329_v4, %v1693_v50  ;;  %v1987_v27 = vadd.f32 %v6334_v23, %v1949_v40  ;;  %v9328_v38 = vld [vmem:[#allocation91_spill] sm:$0xff] }
 0x251   : > { %v1950_v57 = vmul.f32 %v6698_v52, %v6309_v22  ;;  %v1948_v1 = vmul.f32 %v6309_v22, %v6703_v33  ;;  %v7035_v30 = vmul.f32 %v6393_v37, %v2247_v61  ;;  %v2103_v0 = vmul.f32 %v9327_v59, %v1696_v41 }
 0x252   : > { %v2248_v56 = vmul.f32 %v9328_v38, %v7013_v6  ;;  %v4545_v20 = vmul.f32 -1.442695, %v7006_v46  ;;  %v7041_v8 = vadd.f32 %v2135_v62, %v2070_v3  ;;  %v7043_v50 = vadd.f32 %v2133_v32, %v2068_v2 }
 0x253   : > { %v1694_v40 = vmax.f32 %v1662_v14, 0.0  ;;  %v4546_v52 = vmul.f32 -1.442695, %v7020_v45  ;;  %v7047_v53 = vmul.f32 %v6393_v37, %v2245_v24  ;;  %v7049_v33 = vmax.f32 %v1982_v19, 0.0  ;;  %v9331_v19 = vld [vmem:[#allocation45_spill] sm:$0xff] }
 0x254   : > { %v1985_v61 = vadd.f32 %v6334_v23, %v1947_v11  ;;  %5369 = vpow2.f32 %v4545_v20  ;;  %v7052_v36 = vmax.f32 %v1987_v27, 0.0  ;;  %v1988_v38 = vadd.f32 %v6334_v23, %v1950_v57  ;;  %v9332_v57 = vld [vmem:[#allocation96_spill] sm:$0xff] }
 0x255   : > { %9329 = vst [vmem:[#allocation57_spill] sm:$0xff] %v7049_v33  ;;  %v1986_v62 = vadd.f32 %v6334_v23, %v1948_v1  ;;  %5371 = vpow2.f32 %v4546_v52  ;;  %v2071_v32 = vmul.f32 %v6329_v4, %v1696_v41  ;;  %v2136_v14 = vmul.f32 %v6350_v42, %v2103_v0 }
 0x256   : > { %9330 = vst [vmem:[#allocation81_spill] sm:$0xff] %v7052_v36  ;;  %v7059_v3 = vmul.f32 %v6393_v37, %v2248_v56  ;;  %v1953_v24 = vmul.f32 %v6728_v28, %v6309_v22  ;;  %v2101_v11 = vmul.f32 %v9331_v19, %v1694_v40  ;;  %v1951_v2 = vmul.f32 %v6309_v22, %v6735_v54  ;;  %v9334_v56 = vld [vmem:[#allocation122_spill] sm:$0xff]  ;;  %v9335_v54 = vld [vmem:[#allocation97_spill] sm:$0xff] }
 0x257   : > { %v7068_v27 = vadd.f32 %v6903_v34, %v6683_v31  ;;  %v7072_v41 = vadd.f32 %v6932_v58, %v6709_v17  ;;  %v2246_v1 = vmul.f32 %v9332_v57, %v7049_v33  ;;  %v7076_v0 = vmax.f32 %v1985_v61, 0.0  ;;  %v9337_v17 = vld [vmem:[#allocation72_spill] sm:$0xff] }
 0x258   : > { %v1954_v28 = vmul.f32 %v6741_v25, %v6309_v22  ;;  %v7082_v20 = vadd.f32 %v6889_v18, %v9334_v56  ;;  %v2251_v31 = vmul.f32 %v9335_v54, %v7052_v36  ;;  %v7086_v34 = vmax.f32 %v1988_v38, 0.0  ;;  %v9338_v18 = vld [vmem:[#allocation62_spill] sm:$0xff] }
 0x259   : > { %9333 = vst [vmem:[#allocation82_spill] sm:$0xff] %v7076_v0  ;;  %v7088_v52 = vmax.f32 %v1986_v62, 0.0  ;;  %v1952_v58 = vmul.f32 %v6309_v22, %v9337_v17  ;;  %v1991_v61 = vadd.f32 %v6334_v23, %v1953_v24  ;;  %v1957_v57 = vmul.f32 %v6780_v5, %v6309_v22 }
 0x25a   : > { %9336 = vst [vmem:[#allocation84_spill] sm:$0xff] %v7086_v34  ;;  %v1955_v25 = vmul.f32 %v6309_v22, %v6789_v29  ;;  %v7099_v56 = vadd.f32 %v6929_v60, %v9338_v18  ;;  %v7101_v54 = vadd.f32 %v2136_v14, %v2071_v32  ;;  %v7104_v38 = vmul.f32 %v6329_v4, %v1694_v40  ;;  %v9339_v4 = vld [vmem:[#allocation98_spill] sm:$0xff]  ;;  %v9340_v14 = vld [vmem:[#allocation5_spill] sm:$0xff] }
 0x25b   : > { %v1989_v62 = vadd.f32 %v6334_v23, %v1951_v2  ;;  %v1958_v24 = vmul.f32 %v6796_v48, %v6309_v22  ;;  %v7110_v17 = vmul.f32 %v6350_v42, %v2101_v11  ;;  %v7113_v5 = vmul.f32 %v6393_v37, %v2246_v1  ;;  %v9341_v2 = vld [vmem:[#allocation100_spill] sm:$0xff] }
 0x25c   : > { %v1992_v29 = vadd.f32 %v6334_v23, %v1954_v28  ;;  %v1956_v60 = vmul.f32 %v6309_v22, %v6803_v55  ;;  %v7119_v32 = vmul.f32 %v6393_v37, %v2251_v31  ;;  %v2249_v40 = vmul.f32 %v9339_v4, %v7076_v0 }
 0x25d   : > { %v2252_v48 = vmul.f32 %v9340_v14, %v7086_v34  ;;  %v1990_v42 = vadd.f32 %v6334_v23, %v1952_v58  ;;  %v2250_v1 = vmul.f32 %v9341_v2, %v7088_v52  ;;  %v7128_v18 = vmax.f32 %v1991_v61, 0.0 }
 0x25e   : > { %v5370_v11 = vpop.eup %5369  ;;  %v1995_v28 = vadd.f32 %v6334_v23, %v1957_v57  ;;  %v1993_v55 = vadd.f32 %v6334_v23, %v1955_v25  ;;  %v7132_v36 = vmax.f32 %v1989_v62, 0.0  ;;  %v1996_v4 = vadd.f32 %v6334_v23, %v1958_v24 }
 0x25f   : > { %9342 = vst [vmem:[#allocation121_spill] sm:$0xff] %v7128_v18  ;;  %v5372_v31 = vpop.eup %5371  ;;  %v2426_v33 = vadd.f32 1.0, %v5370_v11  ;;  %v4549_v14 = vmul.f32 -1.442695, %v7068_v27  ;;  %v7136_v34 = vmax.f32 %v1992_v29, 0.0  ;;  %v1994_v0 = vadd.f32 %v6334_v23, %v1956_v60 }
 0x260   : > { %9343 = vst [vmem:[#allocation120_spill] sm:$0xff] %v7132_v36  ;;  %v2427_v58 = vadd.f32 1.0, %v5372_v31  ;;  %v4550_v61 = vmul.f32 -1.442695, %v7072_v41  ;;  %v7140_v2 = vmax.f32 %v1990_v42, 0.0  ;;  %v1961_v25 = vmul.f32 %v6832_v15, %v6309_v22  ;;  %v9348_v42 = vld [vmem:[#allocation70_spill] sm:$0xff] }
 0x261   : > { %5373 = vrcp.f32 %v2426_v33  ;;  %v4551_v57 = vmul.f32 -1.442695, %v7082_v20  ;;  %v7145_v62 = vmax.f32 %v1995_v28, 0.0  ;;  %v7147_v24 = vmax.f32 %v1993_v55, 0.0  ;;  %v9350_v55 = vld [vmem:[#allocation104_spill] sm:$0xff] }
 0x262   : > { %9344 = vst [vmem:[#allocation13_spill] sm:$0xff] %v7140_v2  ;;  %5375 = vrcp.f32 %v2427_v58  ;;  %v4552_v29 = vmul.f32 -1.442695, %v7099_v56  ;;  %v7150_v11 = vmax.f32 %v1996_v4, 0.0  ;;  %v1959_v60 = vmul.f32 %v6309_v22, %v6841_v35  ;;  %v9352_v58 = vld [vmem:[#allocation108_spill] sm:$0xff] }
 0x263   : > { %9345 = vst [vmem:[#allocation85_spill] sm:$0xff] %v7145_v62  ;;  %9346 = vst [vmem:[#allocation61_spill] sm:$0xff] %v7147_v24  ;;  %5377 = vpow2.f32 %v4549_v14  ;;  %v7156_v33 = vadd.f32 %v6989_v43, %v9348_v42  ;;  %v7158_v31 = vmax.f32 %v1994_v0, 0.0  ;;  %v1999_v15 = vadd.f32 %v6334_v23, %v1961_v25  ;;  %v9351_v43 = vld [vmem:[#allocation107_spill] sm:$0xff]  ;;  %v9353_v25 = vld [vmem:[#allocation109_spill] sm:$0xff] }
 0x264   : > { %9347 = vst [vmem:[#allocation90_spill] sm:$0xff] %v7150_v11  ;;  %5379 = vpow2.f32 %v4550_v61  ;;  %v1962_v28 = vmul.f32 %v6849_v51, %v6309_v22  ;;  %v2255_v4 = vmul.f32 %v9350_v55, %v7128_v18  ;;  %v1960_v14 = vmul.f32 %v6309_v22, %v6857_v12  ;;  %v9354_v42 = vld [vmem:[#allocation111_spill] sm:$0xff]  ;;  %v9355_v55 = vld [vmem:[#allocation114_spill] sm:$0xff] }
 0x265   : > { %9349 = vst [vmem:[#allocation43_spill] sm:$0xff] %v7158_v31  ;;  %5381 = vpow2.f32 %v4551_v57  ;;  %v7169_v35 = vadd.f32 %v7009_v39, %v6753_v9  ;;  %v2253_v0 = vmul.f32 %v9351_v43, %v7132_v36  ;;  %v2256_v61 = vmul.f32 %v9352_v58, %v7136_v34  ;;  %v9356_v12 = vld [vmem:[#allocation11_spill] sm:$0xff] }
 0x266   : > { %v2254_v51 = vmul.f32 %v9353_v25, %v7140_v2  ;;  %5383 = vpow2.f32 %v4552_v29  ;;  %v2259_v57 = vmul.f32 %v9354_v42, %v7145_v62  ;;  %v2257_v22 = vmul.f32 %v9355_v55, %v7147_v24  ;;  %v9357_v43 = vld [vmem:[#allocation115_spill] sm:$0xff] }
 0x267   : > { %v2260_v9 = vmul.f32 %v9356_v12, %v7150_v11  ;;  %v1997_v39 = vadd.f32 %v6334_v23, %v1959_v60  ;;  %v2258_v36 = vmul.f32 %v9357_v43, %v7158_v31  ;;  %v7186_v18 = vmax.f32 %v1999_v15, 0.0  ;;  %v5631_v12 = vld [vmem:[%s8844_s4 + $0x3] ss:$0 sm:$0xff]  ;;  %v9363_v2 = vld [vmem:[#allocation67_spill] sm:$0xff] }
 0x268   : > { %v2000_v58 = vadd.f32 %v6334_v23, %v1962_v28  ;;  %v4553_v29 = vmul.f32 -1.442695, %v7156_v33  ;;  %v2282_v25 = vmul.f32 %v6393_v37, %v2249_v40  ;;  %v2285_v42 = vmul.f32 %v6393_v37, %v2252_v48 }
 0x269   : > { %9358 = vst [vmem:[#allocation91_spill] sm:$0xff] %v7186_v18  ;;  %v2283_v55 = vmul.f32 %v6393_v37, %v2250_v1  ;;  %v1998_v60 = vadd.f32 %v5631_v12, %v1960_v14  ;;  %v2288_v11 = vmul.f32 %v6393_v37, %v2255_v4  ;;  %v2286_v15 = vmul.f32 %v6393_v37, %v2253_v0  ;;  %v9360_v0 = vld [vmem:[#allocation116_spill] sm:$0xff] }
 0x26a   : > { %v2289_v43 = vmul.f32 %v6393_v37, %v2256_v61  ;;  %v2287_v23 = vmul.f32 %v6393_v37, %v2254_v51  ;;  %v7201_v40 = vmul.f32 %v6393_v37, %v2259_v57  ;;  %v7204_v48 = vmul.f32 %v6393_v37, %v2257_v22 }
 0x26b   : > { %v5374_v28 = vpop.eup %5373  ;;  %v7207_v1 = vmul.f32 %v6393_v37, %v2260_v9  ;;  %v7209_v31 = vmax.f32 %v1997_v39, 0.0  ;;  %v7212_v4 = vmul.f32 %v6393_v37, %v2258_v36  ;;  %v2263_v61 = vmul.f32 %v9360_v0, %v7186_v18  ;;  %v9454_v18 = vld [vmem:[#allocation118_spill] sm:$0xff] }
 0x26c   : > { %v5376_v14 = vpop.eup %5375  ;;  %v7216_v51 = vmax.f32 %v2000_v58, 0.0  ;;  %5385 = vpow2.f32 %v4553_v29  ;;  %v2522_v12 = vmul.f32 %v5374_v28, %v7006_v46  ;;  %v7220_v24 = vmax.f32 %v1998_v60, 0.0  ;;  %v9364_v28 = vld [vmem:[#allocation117_spill] sm:$0xff] }
 0x26d   : > { %9359 = vst [vmem:[#allocation45_spill] sm:$0xff] %v7209_v31  ;;  %v5378_v57 = vpop.eup %5377  ;;  %v2523_v22 = vmul.f32 %v5376_v14, %v7020_v45  ;;  %v4554_v9 = vmul.f32 -1.442695, %v7169_v35  ;;  %v7225_v36 = vadd.f32 %v6962_v63, %v9363_v2  ;;  %v7229_v58 = vadd.f32 %v6992_v10, %v6751_v7 }
 0x26e   : > { %9361 = vst [vmem:[#allocation96_spill] sm:$0xff] %v7216_v51  ;;  %9362 = vst [vmem:[#allocation122_spill] sm:$0xff] %v7220_v24  ;;  %v5380_v39 = vpop.eup %5379  ;;  %v2430_v62 = vadd.f32 1.0, %v5378_v57  ;;  %v7233_v29 = vadd.f32 %v7047_v53, %v6763_v47  ;;  %v2261_v14 = vmul.f32 %v9364_v28, %v7209_v31  ;;  %v9365_v47 = vld [vmem:[#allocation53_spill] sm:$0xff] }
 0x26f   : > { %v5382_v46 = vpop.eup %5381  ;;  %v2554_v45 = vpack.c.bf16 %v2523_v22, %v2522_v12  ;;  %v2431_v60 = vadd.f32 1.0, %v5380_v39  ;;  %5387 = vpow2.f32 %v4554_v9  ;;  %v4555_v63 = vmul.f32 -1.442695, %v7225_v36  ;;  %v9366_v12 = vld [vmem:[#allocation123_spill] sm:$0xff]  ;;  %v9367_v22 = vld [vmem:[#allocation73_spill] sm:$0xff] }
 0x270   : > { %v5384_v0 = vpop.eup %5383  ;;  %5389 = vrcp.f32 %v2430_v62  ;;  %v2432_v57 = vadd.f32 1.0, %v5382_v46  ;;  %v4556_v2 = vmul.f32 -1.442695, %v7229_v58  ;;  %v7242_v10 = vadd.f32 %v7113_v5, %v9365_v47  ;;  %v9369_v62 = vld [vmem:[#allocation68_spill] sm:$0xff]  ;;  %v9372_v47 = vld [vmem:[#allocation95_spill] sm:$0xff] }
 0x271   : > { %4931 = vmatprep.mubr.msk.bf16.mxu0 %vm1375_vm2, %v2554_v45  ;;  %5391 = vrcp.f32 %v2431_v60  ;;  %v2433_v7 = vadd.f32 1.0, %v5384_v0  ;;  %v4557_v53 = vmul.f32 -1.442695, %v7233_v29  ;;  %v9368_v9 = vpack.c.bf16 %v9366_v12, %v9367_v22  ;;  %v9370_v46 = vld [vmem:[#allocation124_spill] sm:$0xff]  ;;  %v9371_v60 = vld [vmem:[#allocation63_spill] sm:$0xff] }
 0x272   : > { %5393 = vrcp.f32 %v2432_v57  ;;  %v7251_v39 = vadd.f32 %v7035_v30, %v9369_v62  ;;  %v7255_v45 = vadd.f32 %v7059_v3, %v9370_v46  ;;  %v7258_v28 = vadd.f32 %v2282_v25, %v9371_v60  ;;  %v9373_v30 = vld [vmem:[#allocation119_spill] sm:$0xff]  ;;  %v9374_v22 = vld [vmem:[#allocation12_spill] sm:$0xff]  ;;  %v9377_v60 = vld [vmem:[#allocation74_spill] sm:$0xff] }
 0x273   : > { %4932 = vmatmul.mubr.msk.bf16.vlgmr.msra.gmra.mrb[48].mxu0 %vm1375_vm2, %v9368_v9  ;;  %5395 = vrcp.f32 %v2433_v7  ;;  %v4558_v5 = vmul.f32 -1.442695, %v7242_v10  ;;  %v7262_v0 = vadd.f32 %v2283_v55, %v6875_v16  ;;  %v7266_v57 = vadd.f32 %v7119_v32, %v9372_v47  ;;  %v9375_v16 = vld [vmem:[#allocation89_spill] sm:$0xff]  ;;  %v9376_v32 = vld [vmem:[#allocation127_spill] sm:$0xff] }
 0x274   : > { %v2264_v12 = vmul.f32 %v9373_v30, %v7216_v51  ;;  %v2262_v3 = vmul.f32 %v9374_v22, %v7220_v24  ;;  %5397 = vpow2.f32 %v4555_v63  ;;  %v4559_v25 = vmul.f32 -1.442695, %v7251_v39  ;;  %v9378_v30 = vld [vmem:[#allocation65_spill] sm:$0xff] }
 0x275   : > { %v2296_v7 = vmul.f32 %v6393_v37, %v2263_v61  ;;  %5399 = vpow2.f32 %v4556_v2  ;;  %v4560_v9 = vmul.f32 -1.442695, %v7255_v45  ;;  %v7276_v55 = vadd.f32 %v2285_v42, %v9375_v16  ;;  %v9379_v2 = vld [vmem:[#allocation10_spill] sm:$0xff] }
 0x276   : > { %v5386_v62 = vpop.eup %5385  ;;  %5401 = vpow2.f32 %v4557_v53  ;;  %v7279_v46 = vadd.f32 %v2286_v15, %v9376_v32  ;;  %v7282_v47 = vadd.f32 %v2287_v23, %v9377_v60  ;;  %v7285_v63 = vadd.f32 %v2288_v11, %v9378_v30 }
 0x277   : > { %v2434_v22 = vadd.f32 1.0, %v5386_v62  ;;  %5403 = vpow2.f32 %v4558_v5  ;;  %v4561_v61 = vmul.f32 -1.442695, %v7258_v28  ;;  %v7289_v24 = vadd.f32 %v2289_v43, %v9379_v2 }
 0x278   : > { %v2294_v42 = vmul.f32 %v6393_v37, %v2261_v14  ;;  %v2295_v53 = vmul.f32 %v6393_v37, %v2262_v3  ;;  %5405 = vpow2.f32 %v4559_v25  ;;  %v4562_v15 = vmul.f32 -1.442695, %v7262_v0 }
 0x279   : > { %v5388_v16 = vpop.eup %5387  ;;  %5407 = vrcp.f32 %v2434_v22  ;;  %v4563_v23 = vmul.f32 -1.442695, %v7266_v57  ;;  %v7297_v11 = vadd.f32 %v7204_v48, %v6972_v44  ;;  %v7301_v5 = vadd.f32 %v7212_v4, %v7000_v21 }
 0x27a   : > { %v5390_v43 = vpop.eup %5389  ;;  %v2435_v62 = vadd.f32 1.0, %v5388_v16  ;;  %5409 = vpow2.f32 %v4560_v9  ;;  %v7305_v14 = vadd.f32 %v7201_v40, %v6965_v13  ;;  %v7309_v3 = vadd.f32 %v7207_v1, %v6998_v49 }
 0x27b   : > { %v5392_v25 = vpop.eup %5391  ;;  %v2166_v44 = vadd.f32 %v7110_v17, %v7104_v38  ;;  %v2297_v48 = vmul.f32 %v6393_v37, %v2264_v12  ;;  %5411 = vpow2.f32 %v4561_v61  ;;  %v4564_v21 = vmul.f32 -1.442695, %v7276_v55 }
 0x27c   : > { %v5394_v4 = vpop.eup %5393  ;;  %v2526_v9 = vmul.f32 %v5390_v43, %v7068_v27  ;;  %v2527_v32 = vmul.f32 %v5392_v25, %v7072_v41  ;;  %5413 = vrcp.f32 %v2435_v62  ;;  %v4565_v13 = vmul.f32 -1.442695, %v7279_v46 }
 0x27d   : > { %v5396_v40 = vpop.eup %5395  ;;  %v2528_v49 = vmul.f32 %v5394_v4, %v7082_v20  ;;  %5415 = vpow2.f32 %v4562_v15  ;;  %v7320_v1 = vadd.f32 %v2294_v42, %v7043_v50  ;;  %v7322_v38 = vadd.f32 %v2295_v53, %v2166_v44 }
 0x27e   : > { %v5398_v37 = vpop.eup %5397  ;;  %v2556_v17 = vpack.c.bf16 %v2527_v32, %v2526_v9  ;;  %v2529_v12 = vmul.f32 %v5396_v40, %v7099_v56  ;;  %5417 = vpow2.f32 %v4563_v23  ;;  %v7326_v27 = vadd.f32 %v2296_v7, %v7041_v8  ;;  %v9380_v56 = vld [vmem:[#allocation126_spill] sm:$0xff] }
 0x27f   : > { %v5400_v41 = vpop.eup %5399  ;;  %v2436_v60 = vadd.f32 1.0, %v5398_v37  ;;  %5419 = vpow2.f32 %v4564_v21  ;;  %v7330_v50 = vadd.f32 %v2297_v48, %v7101_v54  ;;  %v3374_v42 = vsel %vm1424_vm1, %v9380_v56, 0 }
 0x280   : > { %v5402_v30 = vpop.eup %5401  ;;  %4935 = vmatprep.mubr.msk.bf16.mxu0 %vm1375_vm2, %v2556_v17  ;;  %v2557_v20 = vpack.c.bf16 %v2529_v12, %v2528_v49  ;;  %v2437_v22 = vadd.f32 1.0, %v5400_v41  ;;  %5421 = vpow2.f32 %v4565_v13  ;;  %v4566_v53 = vmul.f32 -1.442695, %v7282_v47  ;;  %4964 = vmatpush3.bf16.msra.mxu1 %v3374_v42 }
 0x281   : > { %v5404_v61 = vpop.eup %5403  ;;  %5423 = vrcp.f32 %v2436_v60  ;;  %v2438_v2 = vadd.f32 1.0, %v5402_v30  ;;  %v4567_v62 = vmul.f32 -1.442695, %v7285_v63  ;;  %v4568_v12 = vmul.f32 -1.442695, %v7289_v24 }
 0x282   : > { %v5406_v8 = vpop.eup %5405  ;;  %4936 = vmatmul.mubr.msk.bf16.gmra.mrb[52].mxu0 %vm1375_vm2, %v2557_v20  ;;  %5425 = vrcp.f32 %v2437_v22  ;;  %v2439_v7 = vadd.f32 1.0, %v5404_v61  ;;  %v4570_v30 = vmul.f32 -1.442695, %v7301_v5  ;;  %v4572_v42 = vmul.f32 -1.442695, %v7309_v3 }
 0x283   : > { %v5408_v15 = vpop.eup %5407  ;;  %5427 = vrcp.f32 %v2438_v2  ;;  %v2440_v16 = vadd.f32 1.0, %v5406_v8  ;;  %v4571_v2 = vmul.f32 -1.442695, %v7305_v14  ;;  %v7487_v51 = vstv %s7416_s16 }
 0x284   : > { %v5410_v23 = vpop.eup %5409  ;;  %5429 = vrcp.f32 %v2439_v7  ;;  %v2530_v21 = vmul.f32 %v5408_v15, %v7156_v33 }
 0x285   : > { %v5412_v54 = vpop.eup %5411  ;;  %v2441_v43 = vadd.f32 1.0, %v5410_v23  ;;  %5431 = vrcp.f32 %v2440_v16 }
 0x286   : > { %v5414_v25 = vpop.eup %5413  ;;  %v2442_v44 = vadd.f32 1.0, %v5412_v54  ;;  %5433 = vpow2.f32 %v4566_v53 }
 0x287   : > { %v5416_v48 = vpop.eup %5415  ;;  %v2531_v4 = vmul.f32 %v5414_v25, %v7169_v35  ;;  %5435 = vrcp.f32 %v2441_v43  ;;  %v4569_v35 = vmul.f32 -1.442695, %v7297_v11  ;;  %v4574_v43 = vmul.f32 -1.442695, %v7322_v38 }
 0x288   : > { %v5418_v9 = vpop.eup %5417  ;;  %v2443_v32 = vadd.f32 1.0, %v5416_v48  ;;  %5437 = vrcp.f32 %v2442_v44  ;;  %v4575_v44 = vmul.f32 -1.442695, %v7326_v27 }
 0x289   : > { %v5420_v13 = vpop.eup %5419  ;;  %v2558_v40 = vpack.c.bf16 %v2531_v4, %v2530_v21  ;;  %v2444_v49 = vadd.f32 1.0, %v5418_v9  ;;  %5439 = vpow2.f32 %v4567_v62  ;;  %v4576_v4 = vmul.f32 -1.442695, %v7330_v50 }
 0x28a   : > { %v5422_v37 = vpop.eup %5421  ;;  %5441 = vrcp.f32 %v2443_v32  ;;  %v2445_v17 = vadd.f32 1.0, %v5420_v13 }
 0x28b   : > { %v5424_v41 = vpop.eup %5423  ;;  %4939 = vmatprep.mubr.msk.bf16.mxu0 %vm1375_vm2, %v2558_v40  ;;  %5443 = vrcp.f32 %v2444_v49  ;;  %v2446_v33 = vadd.f32 1.0, %v5422_v37 }
 0x28c   : > { %v5426_v60 = vpop.eup %5425  ;;  %5445 = vrcp.f32 %v2445_v17  ;;  %v2532_v22 = vmul.f32 %v5424_v41, %v7225_v36  ;;  %v4573_v36 = vmul.f32 -1.442695, %v7320_v1 }
 0x28d   : > { %v5428_v20 = vpop.eup %5427  ;;  %v2533_v61 = vmul.f32 %v5426_v60, %v7229_v58  ;;  %5447 = vrcp.f32 %v2446_v33 }
 0x28e   : > { %v5430_v56 = vpop.eup %5429  ;;  %5449 = vpow2.f32 %v4568_v12  ;;  %v2534_v53 = vmul.f32 %v5428_v20, %v7233_v29 }
 0x28f   : > { %v5432_v8 = vpop.eup %5431  ;;  %v2559_v7 = vpack.c.bf16 %v2533_v61, %v2532_v22  ;;  %v2535_v15 = vmul.f32 %v5430_v56, %v7242_v10  ;;  %5451 = vpow2.f32 %v4569_v35 }
 0x290   : > { %v5434_v16 = vpop.eup %5433  ;;  %5453 = vpow2.f32 %v4570_v30  ;;  %v2536_v25 = vmul.f32 %v5432_v8, %v7251_v39 }
 0x291   : > { %v5436_v23 = vpop.eup %5435  ;;  %4940 = vmatmul.mubr.msk.bf16.gmra.mrb[56].mxu0 %vm1375_vm2, %v2559_v7  ;;  %v2560_v58 = vpack.c.bf16 %v2535_v15, %v2534_v53  ;;  %v2447_v54 = vadd.f32 1.0, %v5434_v16  ;;  %5455 = vpow2.f32 %v4571_v2 }
 0x292   : > { %v5438_v62 = vpop.eup %5437  ;;  %v2537_v29 = vmul.f32 %v5436_v23, %v7255_v45  ;;  %5457 = vpow2.f32 %v4572_v42 }
 0x293   : > { %v5440_v10 = vpop.eup %5439  ;;  %4943 = vmatprep.mubr.msk.bf16.mxu0 %vm1375_vm2, %v2560_v58  ;;  %5459 = vrcp.f32 %v2447_v54  ;;  %v2538_v32 = vmul.f32 %v5438_v62, %v7258_v28 }
 0x294   : > { %v5442_v48 = vpop.eup %5441  ;;  %v2561_v21 = vpack.c.bf16 %v2537_v29, %v2536_v25  ;;  %5461 = vpow2.f32 %v4573_v36  ;;  %v2448_v39 = vadd.f32 1.0, %v5440_v10 }
 0x295   : > { %v5444_v9 = vpop.eup %5443  ;;  %v2539_v13 = vmul.f32 %v5442_v48, %v7262_v0  ;;  %5463 = vpow2.f32 %v4574_v43 }
 0x296   : > { %v5446_v45 = vpop.eup %5445  ;;  %v2540_v37 = vmul.f32 %v5444_v9, %v7266_v57  ;;  %5465 = vpow2.f32 %v4575_v44 }
 0x297   : > { %v5448_v40 = vpop.eup %5447  ;;  %v2562_v49 = vpack.c.bf16 %v2539_v13, %v2538_v32  ;;  %v2541_v17 = vmul.f32 %v5446_v45, %v7276_v55  ;;  %5467 = vpow2.f32 %v4576_v4 }
 0x298   : > { %v5450_v12 = vpop.eup %5449  ;;  %5469 = vrcp.f32 %v2448_v39  ;;  %v2542_v2 = vmul.f32 %v5448_v40, %v7279_v46 }
 0x299   : > { %v5452_v41 = vpop.eup %5451  ;;  %4944 = vmatmul.mubr.msk.bf16.gmra.mrb[60].mxu0 %vm1375_vm2, %v2561_v21  ;;  %v2563_v33 = vpack.c.bf16 %v2541_v17, %v2540_v37  ;;  %v2449_v35 = vadd.f32 1.0, %v5450_v12  ;;  %v9382_v17 = vld [vmem:[#allocation47_spill] sm:$0xff]  ;;  %v9383_v12 = vld [vmem:[#allocation48_spill] sm:$0xff] }
 0x29a   : > { %v5454_v28 = vpop.eup %5453  ;;  %4947 = vmatprep.mubr.msk.bf16.mxu0 %vm1375_vm2, %v2562_v49  ;;  %v2450_v0 = vadd.f32 1.0, %v5452_v41  ;;  %v9384_v41 = vld [vmem:[#allocation14_spill] sm:$0xff] }
 0x29b   : > { %v5456_v60 = vpop.eup %5455  ;;  %5471 = vrcp.f32 %v2449_v35  ;;  %v2451_v30 = vadd.f32 1.0, %v5454_v28  ;;  %v9385_v35 = vld [vmem:[#allocation49_spill] sm:$0xff]  ;;  %v9386_v28 = vld [vmem:[#allocation50_spill] sm:$0xff] }
 0x29c   : > { %v5458_v20 = vpop.eup %5457  ;;  %5473 = vrcp.f32 %v2450_v0  ;;  %v2452_v57 = vadd.f32 1.0, %v5456_v60  ;;  %v9387_v0 = vld [vmem:[#allocation16_spill] sm:$0xff] }
 0x29d   : > { %v5460_v55 = vpop.eup %5459  ;;  %5475 = vrcp.f32 %v2451_v30  ;;  %v2453_v22 = vadd.f32 1.0, %v5458_v20  ;;  %v9388_v30 = vld [vmem:[#allocation18_spill] sm:$0xff] }
 0x29e   : > { %v5462_v61 = vpop.eup %5461  ;;  %v2543_v56 = vmul.f32 %v5460_v55, %v7282_v47  ;;  %5477 = vrcp.f32 %v2452_v57  ;;  %v9389_v57 = vld [vmem:[#allocation51_spill] sm:$0xff] }
 0x29f   : > { %v5464_v42 = vpop.eup %5463  ;;  %5479 = vrcp.f32 %v2453_v22  ;;  %v2454_v8 = vadd.f32 1.0, %v5462_v61  ;;  %v2922_v55 = vsub.f32 1.0, %v9389_v57  ;;  %v9390_v22 = vld [vmem:[#allocation52_spill] sm:$0xff] }
 0x2a0   : > { %v2564_v7 = vpack.c.bf16 %v2543_v56, %v2542_v2  ;;  %v2455_v53 = vadd.f32 1.0, %v5464_v42  ;;  %v5466_v15 = vpop.eup %5465  ;;  %v2925_v61 = vsub.f32 1.0, %v9390_v22  ;;  %v9391_v2 = vld [vmem:[#allocation7_spill] sm:$0xff]  ;;  %v9392_v42 = vld [vmem:[#allocation8_spill] sm:$0xff] }
 0x2a1   : > { %4948 = vmatmul.mubr.msk.bf16.gmra.mrb[64].mxu0 %vm1375_vm2, %v2563_v33  ;;  %5481 = vrcp.f32 %v2454_v8  ;;  %v5468_v16 = vpop.eup %5467  ;;  %v2456_v36 = vadd.f32 1.0, %v5466_v15  ;;  %v2923_v56 = vsub.f32 1.0, %v9391_v2  ;;  %v2928_v8 = vsub.f32 1.0, %v9392_v42  ;;  %v9394_v15 = vld [vmem:[#allocation54_spill] sm:$0xff] }
 0x2a2   : > { %4951 = vmatprep.mubr.msk.bf16.mxu0 %vm1375_vm2, %v2564_v7  ;;  %5483 = vrcp.f32 %v2455_v53  ;;  %v5470_v23 = vpop.eup %5469  ;;  %v2457_v58 = vadd.f32 1.0, %v5468_v16  ;;  %v9393_v7 = vld [vmem:[#allocation9_spill] sm:$0xff]  ;;  %v2929_v16 = vsub.f32 1.0, %v9394_v15 }
 0x2a3   : > { %5485 = vrcp.f32 %v2456_v36  ;;  %v2544_v54 = vmul.f32 %v5470_v23, %v7285_v63  ;;  %v2926_v53 = vsub.f32 1.0, %v9393_v7  ;;  %v9395_v36 = vld [vmem:[#allocation55_spill] sm:$0xff] }
 0x2a4   : > { %5487 = vrcp.f32 %v2457_v58  ;;  %v2927_v23 = vsub.f32 1.0, %v9395_v36  ;;  %v9396_v58 = vld [vmem:[#allocation56_spill] sm:$0xff] }
 0x2a5   : > { %v5472_v46 = vpop.eup %5471 }
 0x2a6   : > { %v5474_v47 = vpop.eup %5473  ;;  %v2545_v43 = vmul.f32 %v5472_v46, %v7289_v24  ;;  %v2932_v46 = vsub.f32 1.0, %v9396_v58 }
 0x2a7   : > { %v5476_v62 = vpop.eup %5475  ;;  %v2546_v10 = vmul.f32 %v5474_v47, %v7297_v11  ;;  %v9397_v47 = vld [vmem:[#allocation58_spill] sm:$0xff] }
 0x2a8   : > { %v5478_v25 = vpop.eup %5477  ;;  %v2565_v29 = vpack.c.bf16 %v2545_v43, %v2544_v54  ;;  %v2547_v44 = vmul.f32 %v5476_v62, %v7301_v5  ;;  %v2930_v54 = vsub.f32 1.0, %v9397_v47  ;;  %v9398_v43 = vld [vmem:[#allocation59_spill] sm:$0xff] }
 0x2a9   : > { %v5480_v48 = vpop.eup %5479  ;;  %v2548_v4 = vmul.f32 %v5478_v25, %v7305_v14  ;;  %v2933_v62 = vsub.f32 1.0, %v9398_v43  ;;  %v9399_v25 = vld [vmem:[#allocation20_spill] sm:$0xff] }
 0x2aa   : > { %4952 = vmatmul.mubr.msk.bf16.gmra.mrb[68].mxu0 %vm1375_vm2, %v2565_v29  ;;  %v2566_v21 = vpack.c.bf16 %v2547_v44, %v2546_v10  ;;  %v2549_v9 = vmul.f32 %v5480_v48, %v7309_v3  ;;  %v9381_v3 = vld [vmem:[#allocation46_spill] sm:$0xff]  ;;  %v9402_v48 = vld [vmem:[#allocation69_spill] sm:$0xff] }
 0x2ab   : > { %v5482_v32 = vpop.eup %5481  ;;  %v2920_v37 = vsub.f32 1.0, %v9381_v3  ;;  %v9400_v10 = vld [vmem:[#allocation22_spill] sm:$0xff] }
 0x2ac   : > { %v5484_v13 = vpop.eup %5483  ;;  %4955 = vmatprep.mubr.msk.bf16.mxu0 %vm1375_vm2, %v2566_v21  ;;  %v2567_v24 = vpack.c.bf16 %v2549_v9, %v2548_v4  ;;  %v2550_v63 = vmul.f32 %v5482_v32, %v7320_v1  ;;  %v2918_v1 = vsub.f32 1.0, %v9382_v17  ;;  %v2931_v21 = vsub.f32 1.0, %v9402_v48  ;;  %v9403_v4 = vld [vmem:[#allocation71_spill] sm:$0xff]  ;;  %v9404_v32 = vld [vmem:[#allocation24_spill] sm:$0xff] }
 0x2ad   : > { %v2551_v39 = vmul.f32 %v5484_v13, %v7322_v38  ;;  %v5486_v11 = vpop.eup %5485  ;;  %v2921_v38 = vsub.f32 1.0, %v9383_v12  ;;  %v7386_v33 = vmul.f32 %v9384_v41, %v2920_v37  ;;  %v2936_v9 = vsub.f32 1.0, %v9403_v4  ;;  %v9416_v41 = vld [vmem:[#allocation34_spill] sm:$0xff] }
 0x2ae   : > { %v5488_v45 = vpop.eup %5487  ;;  %v2552_v40 = vmul.f32 %v5486_v11, %v7326_v27  ;;  %v2919_v27 = vsub.f32 1.0, %v9385_v35  ;;  %v7391_v60 = vmul.f32 %v9387_v0, %v2918_v1  ;;  %v7419_v13 = vmul.f32 %v9404_v32, %v2922_v55  ;;  %v9414_v1 = vld [vmem:[#allocation32_spill] sm:$0xff] }
 0x2af   : > { %v2568_v5 = vpack.c.bf16 %v2551_v39, %v2550_v63  ;;  %v2553_v49 = vmul.f32 %v5488_v45, %v7330_v50  ;;  %v2924_v50 = vsub.f32 1.0, %v9386_v28  ;;  %v7394_v20 = vmul.f32 %v9388_v30, %v2921_v38  ;;  %v9408_v39 = vld [vmem:[#allocation75_spill] sm:$0xff]  ;;  %v9420_v30 = vld [vmem:[#allocation38_spill] sm:$0xff] }
 0x2b0   : > { %v7409_v29 = vmul.f32 %v9399_v25, %v2919_v27  ;;  %9405 = vst [vmem:[#allocation72_spill] sm:$0xff] %v7419_v13  ;;  %v2934_v11 = vsub.f32 1.0, %v9408_v39  ;;  %v9409_v45 = vld [vmem:[#allocation79_spill] sm:$0xff]  ;;  %v7433_v38 = vmul.f32 %v9414_v1, %v2926_v53  ;;  %v7436_v27 = vmul.f32 %v9416_v41, %v2929_v16  ;;  %v9430_v16 = vld [vmem:[#allocation80_spill] sm:$0xff]  ;;  %v9432_v1 = vld [vmem:[#allocation17_spill] sm:$0xff] }
 0x2b1   : > { %v2569_v14 = vpack.c.bf16 %v2553_v49, %v2552_v40  ;;  %v7412_v44 = vmul.f32 %v9400_v10, %v2924_v50  ;;  %v9410_v40 = vld [vmem:[#allocation28_spill] sm:$0xff]  ;;  %v7442_v55 = vmul.f32 %v9420_v30, %v2932_v46  ;;  %v9428_v53 = vld [vmem:[#allocation15_spill] sm:$0xff]  ;;  %v9451_v13 = vld [vmem:[#allocation25_spill] sm:$0xff] }
 0x2b2   : > { %4956 = vmatmul.mubr.msk.bf16.gmra.mrb[72].mxu0 %vm1375_vm2, %v2567_v24  ;;  %v9406_v24 = vld [vmem:[#allocation26_spill] sm:$0xff]  ;;  %v7427_v49 = vmul.f32 %v9410_v40, %v2923_v56  ;;  %9415 = vst [vmem:[#allocation100_spill] sm:$0xff] %v7433_v38  ;;  %9417 = vst [vmem:[#allocation70_spill] sm:$0xff] %v7436_v27  ;;  %v9418_v50 = vld [vmem:[#allocation36_spill] sm:$0xff]  ;;  %v2935_v40 = vsub.f32 1.0, %v9430_v16  ;;  %v7459_v41 = vmul.f32 %v9432_v1, %v2934_v11 }
 0x2b3   : > { %4959 = vmatprep.mubr.msk.bf16.mxu0 %vm1375_vm2, %v2568_v5  ;;  %9401 = vst [vmem:[#allocation97_spill] sm:$0xff] %v7412_v44  ;;  %v7422_v63 = vmul.f32 %v9406_v24, %v2925_v61  ;;  %v2937_v5 = vsub.f32 1.0, %v9409_v45  ;;  %v7439_v0 = vmul.f32 %v9418_v50, %v2927_v23  ;;  %9421 = vst [vmem:[#allocation107_spill] sm:$0xff] %v7442_v55  ;;  %v9422_v61 = vld [vmem:[#allocation40_spill] sm:$0xff]  ;;  %v9424_v56 = vld [vmem:[#allocation42_spill] sm:$0xff] }
 0x2b4   : > { %9411 = vst [vmem:[#allocation98_spill] sm:$0xff] %v7427_v49  ;;  %v7445_v25 = vmul.f32 %v9422_v61, %v2930_v54  ;;  %v7448_v10 = vmul.f32 %v9424_v56, %v2933_v62  ;;  %v7454_v24 = vmul.f32 %v9428_v53, %v2936_v9  ;;  %v9431_v23 = vld [vmem:[#allocation83_spill] sm:$0xff]  ;;  %9433 = vst [vmem:[#allocation11_spill] sm:$0xff] %v7459_v41  ;;  %v9436_v50 = vld [vmem:[#allocation86_spill] sm:$0xff] }
 0x2b5   : > { %9407 = vst [vmem:[#allocation62_spill] sm:$0xff] %v7422_v63  ;;  %9419 = vst [vmem:[#allocation104_spill] sm:$0xff] %v7439_v0  ;;  %v9434_v46 = vld [vmem:[#allocation19_spill] sm:$0xff]  ;;  %v2938_v62 = vsub.f32 1.0, %v9436_v50  ;;  %v9437_v30 = vld [vmem:[#allocation88_spill] sm:$0xff] }
 0x2b6   : > { %9423 = vst [vmem:[#allocation108_spill] sm:$0xff] %v7445_v25  ;;  %9425 = vst [vmem:[#allocation109_spill] sm:$0xff] %v7448_v10  ;;  %v7462_v54 = vmul.f32 %v9434_v46, %v2937_v5  ;;  %v2941_v61 = vsub.f32 1.0, %v9437_v30  ;;  %v9439_v9 = vld [vmem:[#allocation92_spill] sm:$0xff]  ;;  %v9440_v53 = vld [vmem:[#allocation94_spill] sm:$0xff]  ;;  %v7472_v25 = vstv %s7402_s15 }
 0x2b7   : > { %9429 = vst [vmem:[#allocation114_spill] sm:$0xff] %v7454_v24  ;;  %v2944_v24 = vsub.f32 1.0, %v9440_v53  ;;  %v9442_v11 = vld [vmem:[#allocation125_spill] sm:$0xff]  ;;  %v9447_v27 = vld [vmem:[#allocation23_spill] sm:$0xff]  ;;  %v9450_v49 = vld [vmem:[#allocation110_spill] sm:$0xff]  ;;  %v7490_v44 = vmul.f32 %v9451_v13, %v2938_v62 }
 0x2b8   : > { %9435 = vst [vmem:[#allocation115_spill] sm:$0xff] %v7462_v54  ;;  %v2821_v1 = vmul.f32 %v9382_v17, %v9442_v11  ;;  %v9443_v5 = vld [vmem:[#allocation101_spill] sm:$0xff]  ;;  %v9444_v54 = vld [vmem:[#allocation103_spill] sm:$0xff]  ;;  %v2946_v63 = vsub.f32 1.0, %v9450_v49  ;;  %v9453_v17 = vld [vmem:[#allocation112_spill] sm:$0xff] }
 0x2b9   : > { %v2945_v46 = vsub.f32 1.0, %v9443_v5  ;;  %v2943_v41 = vsub.f32 1.0, %v9444_v54  ;;  %v9445_v55 = vld [vmem:[#allocation21_spill] sm:$0xff]  ;;  %9452 = vst [vmem:[#allocation117_spill] sm:$0xff] %v7490_v44  ;;  %v2949_v31 = vsub.f32 1.0, %v9453_v17  ;;  %v2947_v5 = vsub.f32 1.0, %v9454_v18 }
 0x2ba   : > { %4960 = vmatmul.mubr.msk.bf16.gmra.mrb[76].mxu0 %vm1375_vm2, %v2569_v14  ;;  %v9412_v14 = vld [vmem:[#allocation30_spill] sm:$0xff]  ;;  %v7479_v0 = vmul.f32 %v9445_v55, %v2935_v40  ;;  %v9449_v38 = vld [vmem:[#allocation105_spill] sm:$0xff]  ;;  %v9455_v55 = vld [vmem:[#allocation27_spill] sm:$0xff]  ;;  %v2854_v49 = vmul.f32 %v7472_v25, %v2821_v1 }
 0x2bb   : > { %v7430_v37 = vmul.f32 %v9412_v14, %v2928_v8  ;;  %v9426_v8 = vld [vmem:[#allocation44_spill] sm:$0xff]  ;;  %v2940_v14 = vsub.f32 1.0, %v9431_v23  ;;  %v7496_v40 = vmul.f32 %v9455_v55, %v2941_v61  ;;  %v9461_v62 = vld [vmem:[#allocation35_spill] sm:$0xff]  ;;  %v9463_v18 = vld [vmem:[#allocation37_spill] sm:$0xff] }
 0x2bc   : > { %v7451_v32 = vmul.f32 %v9426_v8, %v2931_v21  ;;  %v9438_v21 = vld [vmem:[#allocation78_spill] sm:$0xff]  ;;  %v2939_v8 = vsub.f32 1.0, %v9439_v9  ;;  %9446 = vst [vmem:[#allocation116_spill] sm:$0xff] %v7479_v0  ;;  %v7509_v44 = vmul.f32 %v9461_v62, %v2945_v46  ;;  %v7512_v17 = vmul.f32 %v9463_v18, %v2943_v41  ;;  %v9466_v55 = vld [vmem:[#allocation39_spill] sm:$0xff] }
 0x2bd   : > { %9413 = vst [vmem:[#allocation5_spill] sm:$0xff] %v7430_v37  ;;  %v2823_v56 = vmul.f32 %v9381_v3, %v9438_v21  ;;  %v7482_v3 = vmul.f32 %v9447_v27, %v2940_v14  ;;  %v2948_v37 = vsub.f32 1.0, %v9449_v38  ;;  %v9456_v27 = vld [vmem:[#allocation29_spill] sm:$0xff]  ;;  %v2791_v61 = vmul.f32 %v7487_v51, %v9438_v21  ;;  %v9475_v62 = vld [vmem:[#allocation106_spill] sm:$0xff] }
 0x2be   : > { %9427 = vst [vmem:[#allocation111_spill] sm:$0xff] %v7451_v32  ;;  %v9441_v32 = vld [vmem:[#allocation99_spill] sm:$0xff]  ;;  %v7499_v14 = vmul.f32 %v9456_v27, %v2939_v8  ;;  %v9459_v38 = vld [vmem:[#allocation33_spill] sm:$0xff]  ;;  %9462 = vst [vmem:[#allocation73_spill] sm:$0xff] %v7509_v44  ;;  %v7529_v18 = vmul.f32 %v9327_v59, %v2949_v31  ;;  %v7532_v41 = vmul.f32 %v9331_v19, %v2947_v5  ;;  %v9031_v5 = vmov 0.0  }
 0x2bf   : > { %v2942_v10 = vsub.f32 1.0, %v9441_v32  ;;  %9448 = vst [vmem:[#allocation67_spill] sm:$0xff] %v7482_v3  ;;  %v2856_v54 = vmul.f32 %v7472_v25, %v2823_v56  ;;  %v9457_v3 = vld [vmem:[#allocation31_spill] sm:$0xff]  ;;  %9464 = vst [vmem:[#allocation68_spill] sm:$0xff] %v7512_v17  ;;  %v9465_v56 = vld [vmem:[#allocation102_spill] sm:$0xff]  ;;  %4997 = vmatprep.subr.bf16.mxu0 %v9031_v5  ;;  %5003 = vmatprep.subr.bf16.mxu1 %v9031_v5 }
 0x2c0   : > { %v7502_v0 = vmul.f32 %v9457_v3, %v2944_v24  ;;  %v2824_v8 = vmul.f32 %v9383_v12, %v9465_v56  ;;  %v7519_v24 = vmul.f32 %v9466_v55, %v2948_v37  ;;  %v9468_v3 = vld [vmem:[#allocation41_spill] sm:$0xff]  ;;  %9471 = vst [vmem:[#allocation95_spill] sm:$0xff] %v7529_v18  ;;  %9472 = vst [vmem:[#allocation119_spill] sm:$0xff] %v7532_v41  ;;  %v9473_v12 = vld [vmem:[#allocation64_spill] sm:$0xff]  ;;  %4999 = vmatprep.mubr.msk.bf16.mxu0 %vm5661_vm3, %v9031_v5 }
 0x2c1   : > { %v7506_v13 = vmul.f32 %v9459_v38, %v2942_v10  ;;  %v7522_v1 = vmul.f32 %v9468_v3, %v2946_v63  ;;  %v2789_v38 = vmul.f32 %v7487_v51, %v9442_v11  ;;  %v9470_v10 = vld [vmem:[#allocation87_spill] sm:$0xff]  ;;  %v7534_v21 = vadd.f32 %v2856_v54, %v2791_v61  ;;  %v9474_v27 = vld [vmem:[#allocation93_spill] sm:$0xff]  ;;  %v9476_v31 = vld [vmem:[#allocation66_spill] sm:$0xff] }
 0x2c2   : > { %9458 = vst [vmem:[#allocation53_spill] sm:$0xff] %v7502_v0  ;;  %9467 = vst [vmem:[#allocation124_spill] sm:$0xff] %v7519_v24  ;;  %v2822_v46 = vmul.f32 %v9385_v35, %v9470_v10  ;;  %v2827_v37 = vmul.f32 %v9386_v28, %v9473_v12  ;;  %v2825_v63 = vmul.f32 %v9389_v57, %v9474_v27  ;;  %v4364_v35 = vld [vmem:[%s8843_s3 + $0x10] sm:$0xf]  ;;  %v9477_v54 = vld [vmem:[#allocation6_spill] sm:$0xff] }
 0x2c3   : > { %9460 = vst [vmem:[#allocation123_spill] sm:$0xff] %v7506_v13  ;;  %9469 = vst [vmem:[#allocation63_spill] sm:$0xff] %v7522_v1  ;;  %v2828_v11 = vmul.f32 %v9390_v22, %v9475_v62  ;;  %v7542_v55 = vadd.f32 %v2854_v49, %v2789_v38  ;;  %v2792_v59 = vmul.f32 %v7487_v51, %v9465_v56  ;;  %v3682_v22 = vsel %vm1424_vm1, %v4364_v35, 0  ;;  %v9479_v35 = vld [vmem:[#allocation113_spill] sm:$0xff]  ;;  %v9513_v1 = vld [vmem:[#allocation96_spill] sm:$0xff] }
 0x2c4   : > { %v2826_v19 = vmul.f32 %v9391_v2, %v9476_v31  ;;  %v2857_v28 = vmul.f32 %v7472_v25, %v2824_v8  ;;  %v2831_v57 = vmul.f32 %v9392_v42, %v9477_v54  ;;  %v2790_v49 = vmul.f32 %v7487_v51, %v9470_v10  ;;  %4998 = vmatpush3.bf16.msra.mxu0 %v3682_v22  ;;  %v9480_v5 = vld [vmem:[#allocation77_spill] sm:$0xff]  ;;  %v9514_v24 = vld [vmem:[#allocation112_spill] sm:$0xff]  ;;  %v9515_v17 = vld [vmem:[#allocation62_spill] sm:$0xff] }
 0x2c5   : > { %v2855_v2 = vmul.f32 %v7472_v25, %v2822_v46  ;;  %v2795_v61 = vmul.f32 %v7487_v51, %v9473_v12  ;;  %v2860_v42 = vmul.f32 %v7472_v25, %v2827_v37  ;;  %v2793_v56 = vmul.f32 %v7487_v51, %v9474_v27  ;;  %v9478_v46 = vld [vmem:[#allocation76_spill] sm:$0xff] }
 0x2c6   : > { %v2858_v8 = vmul.f32 %v7472_v25, %v2825_v63  ;;  %v2861_v3 = vmul.f32 %v7472_v25, %v2828_v11  ;;  %v2796_v38 = vmul.f32 %v7487_v51, %v9475_v62  ;;  %v2859_v10 = vmul.f32 %v7472_v25, %v2826_v19  ;;  %v9481_v11 = vld [vmem:[#allocation60_spill] sm:$0xff] }
 0x2c7   : > { %v2829_v12 = vmul.f32 %v9393_v7, %v9478_v46  ;;  %v2832_v22 = vmul.f32 %v9394_v15, %v9479_v35  ;;  %v2864_v37 = vmul.f32 %v7472_v25, %v2831_v57  ;;  %v2830_v27 = vmul.f32 %v9395_v36, %v9480_v5 }
 0x2c8   : > { %v2835_v63 = vmul.f32 %v9396_v58, %v6979_v26  ;;  %v2833_v41 = vmul.f32 %v9397_v47, %v9481_v11  ;;  %v7583_v62 = vadd.f32 %v2857_v28, %v2792_v59  ;;  %v7585_v19 = vadd.f32 %v2855_v2, %v2790_v49  ;;  %v9482_v28 = vld [vmem:[#allocation57_spill] sm:$0xff] }
 0x2c9   : > { %v2794_v7 = vmul.f32 %v7487_v51, %v9476_v31  ;;  %v2836_v15 = vmul.f32 %v9398_v43, %v7013_v6  ;;  %v7591_v57 = vadd.f32 %v2860_v42, %v2795_v61  ;;  %v7593_v18 = vadd.f32 %v2858_v8, %v2793_v56 }
 0x2ca   : > { %v7595_v36 = vadd.f32 %v2861_v3, %v2796_v38  ;;  %v2799_v58 = vmul.f32 %v7487_v51, %v9477_v54  ;;  %v2862_v59 = vmul.f32 %v7472_v25, %v2829_v12  ;;  %v2865_v31 = vmul.f32 %v7472_v25, %v2832_v22  ;;  %v9483_v3 = vld [vmem:[#allocation81_spill] sm:$0xff]  ;;  %v9484_v12 = vld [vmem:[#allocation82_spill] sm:$0xff] }
 0x2cb   : > { %v7601_v47 = vadd.f32 %v2859_v10, %v2794_v7  ;;  %v2834_v43 = vmul.f32 %v9402_v48, %v9482_v28  ;;  %v2863_v2 = vmul.f32 %v7472_v25, %v2830_v27  ;;  %v2868_v61 = vmul.f32 %v7472_v25, %v2835_v63  ;;  %v9485_v63 = vld [vmem:[#allocation84_spill] sm:$0xff] }
 0x2cc   : > { %v7607_v49 = vadd.f32 %v2864_v37, %v2799_v58  ;;  %v2866_v42 = vmul.f32 %v7472_v25, %v2833_v41  ;;  %v2797_v54 = vmul.f32 %v7487_v51, %v9478_v46  ;;  %v2800_v56 = vmul.f32 %v7487_v51, %v9479_v35  ;;  %v7630_v35 = vld [vmem:[%s8844_s4 + $0x4] ss:$0 sm:$0xff] }
 0x2cd   : > { %v2869_v8 = vmul.f32 %v7472_v25, %v2836_v15  ;;  %v2839_v38 = vmul.f32 %v9403_v4, %v9483_v3  ;;  %v2798_v48 = vmul.f32 %v7487_v51, %v9480_v5  ;;  %v2803_v10 = vmul.f32 %v7487_v51, %v6979_v26 }
 0x2ce   : > { %v2801_v41 = vmul.f32 %v7487_v51, %v9481_v11  ;;  %v2837_v46 = vmul.f32 %v9408_v39, %v9484_v12  ;;  %v7632_v22 = vadd.f32 %v2862_v59, %v2797_v54  ;;  %v7634_v4 = vadd.f32 %v2865_v31, %v2800_v56 }
 0x2cf   : > { %v2804_v5 = vmul.f32 %v7487_v51, %v7013_v6  ;;  %v2867_v26 = vmul.f32 %v7472_v25, %v2834_v43  ;;  %v7639_v37 = vadd.f32 %v2863_v2, %v2798_v48  ;;  %v7641_v27 = vadd.f32 %v2868_v61, %v2803_v10 }
 0x2d0   : > { %v7643_v39 = vadd.f32 %v2866_v42, %v2801_v41  ;;  %v2840_v11 = vmul.f32 %v9409_v45, %v9485_v63  ;;  %v2802_v58 = vmul.f32 %v7487_v51, %v9482_v28  ;;  %v2872_v59 = vmul.f32 %v7472_v25, %v2839_v38 }
 0x2d1   : > { %v7647_v15 = vadd.f32 %v2869_v8, %v2804_v5  ;;  %v2807_v43 = vmul.f32 %v7487_v51, %v9483_v3  ;;  %v2870_v2 = vmul.f32 %v7472_v25, %v2837_v46  ;;  %v7659_v61 = vstv %s7599_s19 }
 0x2d2   : > { %v7664_v54 = vadd.f32 %v2867_v26, %v2802_v58  ;;  %v2805_v28 = vmul.f32 %v7487_v51, %v9484_v12  ;;  %v2808_v38 = vmul.f32 %v7487_v51, %v9485_v63  ;;  %v2873_v48 = vmul.f32 %v7472_v25, %v2840_v11  ;;  %v9490_v63 = vld [vmem:[#allocation121_spill] sm:$0xff] }
 0x2d3   : > { %v7681_v46 = vadd.f32 %v2872_v59, %v2807_v43  ;;  %v2843_v11 = vmul.f32 %v9431_v23, %v9490_v63  ;;  %v2806_v58 = vmul.f32 %v7487_v51, %v7088_v52  ;;  %v9491_v59 = vld [vmem:[#allocation120_spill] sm:$0xff]  ;;  %v2844_v23 = vmul.f32 %v9437_v30, %v7136_v34 }
 0x2d4   : > { %v7688_v26 = vadd.f32 %v2870_v2, %v2805_v28  ;;  %v7703_v43 = vadd.f32 %v2873_v48, %v2808_v38 }
 0x346   : > { %v4933_v7 = vpop.f32.mrb[48].mxu0 }
 0x347   : > { %v7653_v6 = vadd.f32 %v4933_v7, %v7630_v35  ;;  %v2661_v31 = vpop.f32.mrb[49].mxu0 }
 0x348   : > { %v7662_v45 = vadd.f32 %v7630_v35, %v2661_v31  ;;  %v4934_v42 = vpop.f32.mrb[50].mxu0 }
 0x349   : > { %9486 = vst [vmem:[#allocation12_spill] sm:$0xff] %v7653_v6  ;;  %v2984_v56 = vmul.f32 %v7386_v33, %v7653_v6  ;;  %v7671_v8 = vadd.f32 %v4934_v42, %v7630_v35  ;;  %v2664_v3 = vpop.f32.mrb[51].mxu0  ;;  %v2838_v33 = vmul.f32 %v9430_v16, %v7088_v52  ;;  %v2841_v16 = vmul.f32 %v9436_v50, %v9491_v59  ;;  %v9492_v42 = vld [vmem:[#allocation13_spill] sm:$0xff] }
 0x34a   : > { %9487 = vst [vmem:[#allocation89_spill] sm:$0xff] %v7662_v45  ;;  %v2982_v10 = vmul.f32 %v7391_v60, %v7662_v45  ;;  %v7679_v41 = vadd.f32 %v7630_v35, %v2664_v3  ;;  %v2842_v50 = vmul.f32 %v9439_v9, %v9492_v42  ;;  %v9493_v3 = vld [vmem:[#allocation85_spill] sm:$0xff] }
 0x34b   : > { %9488 = vst [vmem:[#allocation127_spill] sm:$0xff] %v7671_v8  ;;  %v3017_v12 = vmul.f32 %v7659_v61, %v2984_v56  ;;  %v2985_v5 = vmul.f32 %v7394_v20, %v7671_v8  ;;  %v2871_v52 = vmul.f32 %v7472_v25, %v2838_v33  ;;  %v2876_v56 = vmul.f32 %v7472_v25, %v2843_v11 }
 0x34c   : > { %9489 = vst [vmem:[#allocation74_spill] sm:$0xff] %v7679_v41  ;;  %v3015_v60 = vmul.f32 %v7659_v61, %v2982_v10  ;;  %v2983_v7 = vmul.f32 %v7409_v29, %v7679_v41  ;;  %v2847_v30 = vmul.f32 %v9440_v53, %v9493_v3  ;;  %v2874_v48 = vmul.f32 %v7472_v25, %v2841_v16  ;;  %v9494_v10 = vld [vmem:[#allocation61_spill] sm:$0xff] }
 0x34d   : > { %v7700_v31 = vadd.f32 %v3017_v12, %v7534_v21  ;;  %v3018_v20 = vmul.f32 %v7659_v61, %v2985_v5  ;;  %v2845_v9 = vmul.f32 %v9441_v32, %v9494_v10  ;;  %v9495_v12 = vld [vmem:[#allocation90_spill] sm:$0xff]  ;;  %v9496_v5 = vld [vmem:[#allocation101_spill] sm:$0xff]  ;;  %v7738_v32 = vadd.f32 %v2871_v52, %v2806_v58 }
 0x34e   : > { %v7708_v2 = vadd.f32 %v3015_v60, %v7542_v55  ;;  %v3016_v29 = vmul.f32 %v7659_v61, %v2983_v7  ;;  %v2848_v11 = vmul.f32 %v9496_v5, %v9495_v12  ;;  %v2809_v60 = vmul.f32 %v7487_v51, %v9491_v59 }
 0x34f   : > { %v4596_v21 = vmul.f32 -1.442695, %v7700_v31  ;;  %v7716_v28 = vadd.f32 %v3018_v20, %v7583_v62  ;;  %v2877_v62 = vmul.f32 %v7472_v25, %v2844_v23  ;;  %v2875_v7 = vmul.f32 %v7472_v25, %v2842_v50  ;;  %v9498_v50 = vld [vmem:[#allocation103_spill] sm:$0xff] }
 0x350   : > { %v4594_v55 = vmul.f32 -1.442695, %v7708_v2  ;;  %v7723_v38 = vadd.f32 %v3016_v29, %v7585_v19  ;;  %v2811_v19 = vmul.f32 %v7487_v51, %v9490_v63  ;;  %v2812_v16 = vmul.f32 %v7487_v51, %v7136_v34  ;;  %v9497_v34 = vld [vmem:[#allocation43_spill] sm:$0xff] }
 0x351   : > { %5489 = vpow2.f32 %v4596_v21  ;;  %v4597_v33 = vmul.f32 -1.442695, %v7716_v28  ;;  %v2880_v20 = vmul.f32 %v7472_v25, %v2847_v30  ;;  %v7745_v29 = vadd.f32 %v2874_v48, %v2809_v60 }
 0x352   : > { %5491 = vpow2.f32 %v4594_v55  ;;  %v4595_v53 = vmul.f32 -1.442695, %v7723_v38  ;;  %v7743_v23 = vadd.f32 %v2876_v56, %v2811_v19  ;;  %v2810_v63 = vmul.f32 %v7487_v51, %v9492_v42  ;;  %v9501_v42 = vld [vmem:[#allocation105_spill] sm:$0xff]  ;;  %v9505_v19 = vld [vmem:[#allocation110_spill] sm:$0xff] }
 0x353   : > { %5493 = vpow2.f32 %v4597_v33  ;;  %v2878_v59 = vmul.f32 %v7472_v25, %v2845_v9  ;;  %v7750_v21 = vadd.f32 %v2877_v62, %v2812_v16  ;;  %v2815_v58 = vmul.f32 %v7487_v51, %v9493_v3  ;;  %v9500_v33 = vld [vmem:[#allocation91_spill] sm:$0xff] }
 0x354   : > { %5495 = vpow2.f32 %v4595_v53  ;;  %v2881_v52 = vmul.f32 %v7472_v25, %v2848_v11  ;;  %v2846_v30 = vmul.f32 %v9498_v50, %v9497_v34  ;;  %v7757_v56 = vadd.f32 %v2875_v7, %v2810_v63  ;;  %v9504_v11 = vld [vmem:[#allocation45_spill] sm:$0xff] }
 0x355   : > { %v4937_v55 = vpop.f32.mrb[52].mxu0  ;;  %v2813_v48 = vmul.f32 %v7487_v51, %v9494_v10  ;;  %v2851_v5 = vmul.f32 %v9501_v42, %v9500_v33  ;;  %v7766_v53 = vadd.f32 %v2880_v20, %v2815_v58  ;;  %v2816_v3 = vmul.f32 %v7487_v51, %v9495_v12  ;;  %v9508_v50 = vld [vmem:[#allocation97_spill] sm:$0xff] }
 0x356   : > { %9499 = vst [vmem:[#allocation65_spill] sm:$0xff] %v7757_v56  ;;  %v7764_v9 = vadd.f32 %v4937_v55, %v7630_v35  ;;  %v2677_v62 = vpop.f32.mrb[53].mxu0  ;;  %v2849_v60 = vmul.f32 %v9505_v19, %v9504_v11  ;;  %v2814_v63 = vmul.f32 %v7487_v51, %v9497_v34  ;;  %v2879_v42 = vmul.f32 %v7472_v25, %v2846_v30 }
 0x357   : > { %9503 = vst [vmem:[#allocation126_spill] sm:$0xff] %v7766_v53  ;;  %v7773_v7 = vadd.f32 %v7630_v35, %v2677_v62  ;;  %v4938_v16 = vpop.f32.mrb[54].mxu0  ;;  %v7775_v10 = vadd.f32 %v2878_v59, %v2813_v48  ;;  %v7784_v12 = vadd.f32 %v2881_v52, %v2816_v3  ;;  %v9511_v62 = vld [vmem:[#allocation72_spill] sm:$0xff]  ;;  %v2884_v34 = vmul.f32 %v7472_v25, %v2851_v5  ;;  %v9517_v53 = vld [vmem:[#allocation122_spill] sm:$0xff] }
 0x358   : > { %9502 = vst [vmem:[#allocation10_spill] sm:$0xff] %v7764_v9  ;;  %v2988_v55 = vmul.f32 %v9508_v50, %v7764_v9  ;;  %v7782_v20 = vadd.f32 %v4938_v16, %v7630_v35  ;;  %v2680_v58 = vpop.f32.mrb[55].mxu0  ;;  %v2852_v50 = vmul.f32 %v9514_v24, %v9513_v1  ;;  %v2882_v30 = vmul.f32 %v7472_v25, %v2849_v60  ;;  %v9518_v5 = vld [vmem:[#allocation118_spill] sm:$0xff] }
 0x359   : > { %9506 = vst [vmem:[#allocation46_spill] sm:$0xff] %v7773_v7  ;;  %9507 = vst [vmem:[#allocation47_spill] sm:$0xff] %v7775_v10  ;;  %v2986_v19 = vmul.f32 %v9511_v62, %v7773_v7  ;;  %v7790_v59 = vadd.f32 %v7630_v35, %v2680_v58  ;;  %v9516_v58 = vld [vmem:[#allocation98_spill] sm:$0xff]  ;;  %v2850_v56 = vmul.f32 %v9518_v5, %v9517_v53 }
 0x35a   : > { %9509 = vst [vmem:[#allocation48_spill] sm:$0xff] %v7782_v20  ;;  %9510 = vst [vmem:[#allocation14_spill] sm:$0xff] %v7784_v12  ;;  %v3021_v16 = vmul.f32 %v7659_v61, %v2988_v55  ;;  %v2989_v52 = vmul.f32 %v9515_v17, %v7782_v20 }
 0x35b   : > { %9512 = vst [vmem:[#allocation49_spill] sm:$0xff] %v7790_v59  ;;  %v5490_v48 = vpop.eup %5489  ;;  %v3019_v62 = vmul.f32 %v7659_v61, %v2986_v19  ;;  %v2987_v44 = vmul.f32 %v9516_v58, %v7790_v59 }
 0x35c   : > { %v5492_v3 = vpop.eup %5491  ;;  %v3177_v12 = vadd.f32 1.0, %v5490_v48  ;;  %v7805_v24 = vadd.f32 %v3021_v16, %v7591_v57  ;;  %v3022_v55 = vmul.f32 %v7659_v61, %v2989_v52  ;;  %v2885_v57 = vmul.f32 %v7472_v25, %v2852_v50 }
 0x35d   : > { %v5494_v10 = vpop.eup %5493  ;;  %v3175_v13 = vadd.f32 1.0, %v5492_v3  ;;  %v7809_v60 = vadd.f32 %v3019_v62, %v7593_v18  ;;  %v3020_v19 = vmul.f32 %v7659_v61, %v2987_v44  ;;  %v2819_v18 = vmul.f32 %v7487_v51, %v9500_v33 }
 0x35e   : > { %v5496_v17 = vpop.eup %5495  ;;  %5497 = vrcp.f32 %v3177_v12  ;;  %v3178_v0 = vadd.f32 1.0, %v5494_v10  ;;  %v4600_v58 = vmul.f32 -1.442695, %v7805_v24  ;;  %v7814_v5 = vadd.f32 %v3022_v55, %v7595_v36 }
 0x35f   : > { %5499 = vrcp.f32 %v3175_v13  ;;  %v3176_v48 = vadd.f32 1.0, %v5496_v17  ;;  %v4598_v16 = vmul.f32 -1.442695, %v7809_v60  ;;  %v7819_v12 = vadd.f32 %v3020_v19, %v7601_v47 }
 0x360   : > { %5501 = vrcp.f32 %v3178_v0  ;;  %v2883_v44 = vmul.f32 %v7472_v25, %v2850_v56  ;;  %v4601_v13 = vmul.f32 -1.442695, %v7814_v5  ;;  %v2817_v36 = vmul.f32 %v7487_v51, %v9504_v11 }
 0x361   : > { %5503 = vrcp.f32 %v3176_v48  ;;  %v2820_v10 = vmul.f32 %v7487_v51, %v9513_v1  ;;  %v4599_v0 = vmul.f32 -1.442695, %v7819_v12  ;;  %v7830_v50 = vadd.f32 %v2879_v42, %v2814_v63 }
 0x362   : > { %5505 = vpow2.f32 %v4600_v58  ;;  %v7832_v47 = vadd.f32 %v2884_v34, %v2819_v18  ;;  %v2818_v33 = vmul.f32 %v7487_v51, %v9517_v53  ;;  %v7836_v25 = vadd.f32 %v2882_v30, %v2817_v36 }
 0x363   : > { %5507 = vpow2.f32 %v4598_v16  ;;  %v7838_v56 = vadd.f32 %v2885_v57, %v2820_v10  ;;  %v3545_v11 = vsel %vm1375_vm2, %v7764_v9, -inf  ;;  %v3539_v63 = vsel %vm1375_vm2, %v7653_v6, -inf  ;;  %v9521_v16 = vld [vmem:[#allocation5_spill] sm:$0xff] }
 0x364   : > { %5509 = vpow2.f32 %v4601_v13  ;;  %v7842_v1 = vadd.f32 %v2883_v44, %v2818_v33  ;;  %v3541_v42 = vsel %vm1375_vm2, %v7773_v7, -inf  ;;  %v4941_v34 = vpop.f32.mrb[56].mxu0  ;;  %v3537_v51 = vsel %vm1375_vm2, %v7662_v45, -inf  ;;  %v9553_v7 = vld [vmem:[#allocation65_spill] sm:$0xff] }
 0x365   : > { %5511 = vpow2.f32 %v4599_v0  ;;  %v7852_v53 = vsel %vm1375_vm2, %v7782_v20, -inf  ;;  %v7856_v52 = vsel %vm1375_vm2, %v7790_v59, -inf  ;;  %v7859_v3 = vadd.f32 %v4941_v34, %v7630_v35  ;;  %v2693_v30 = vpop.f32.mrb[57].mxu0 }
 0x366   : > { %v7863_v62 = vsel %vm1375_vm2, %v7671_v8, -inf  ;;  %v7867_v55 = vsel %vm1375_vm2, %v7679_v41, -inf  ;;  %v3546_v17 = vmax.f32 %v3539_v63, %v3545_v11  ;;  %v7870_v19 = vadd.f32 %v7630_v35, %v2693_v30  ;;  %v4942_v48 = vpop.f32.mrb[58].mxu0  ;;  %v9523_v11 = vld [vmem:[#allocation100_spill] sm:$0xff] }
 0x367   : > { %9519 = vst [vmem:[#allocation50_spill] sm:$0xff] %v7859_v3  ;;  %v3542_v57 = vmax.f32 %v3537_v51, %v3541_v42  ;;  %v2992_v18 = vmul.f32 %v9521_v16, %v7859_v3  ;;  %v3553_v44 = vsel %vm1375_vm2, %v7859_v3, -inf  ;;  %v7877_v13 = vadd.f32 %v4942_v48, %v7630_v35  ;;  %v2696_v36 = vpop.f32.mrb[59].mxu0  ;;  %v9524_v16 = vld [vmem:[#allocation70_spill] sm:$0xff] }
 0x368   : > { %9520 = vst [vmem:[#allocation16_spill] sm:$0xff] %v7870_v19  ;;  %v5498_v58 = vpop.eup %5497  ;;  %v3548_v0 = vmax.f32 %v7863_v62, %v7852_v53  ;;  %v3544_v33 = vmax.f32 %v7867_v55, %v7856_v52  ;;  %v2990_v63 = vmul.f32 %v9523_v11, %v7870_v19  ;;  %v3549_v42 = vsel %vm1375_vm2, %v7870_v19, -inf }
 0x369   : > { %9522 = vst [vmem:[#allocation18_spill] sm:$0xff] %v7877_v13  ;;  %v5500_v10 = vpop.eup %5499  ;;  %v3273_v51 = vmul.f32 %v5498_v58, %v7700_v31  ;;  %v3025_v30 = vmul.f32 %v7659_v61, %v2992_v18  ;;  %v7889_v48 = vmax.f32 %v3546_v17, %v3553_v44  ;;  %v2993_v3 = vmul.f32 %v9524_v16, %v7877_v13 }
 0x36a   : > { %v5502_v34 = vpop.eup %5501  ;;  %v3023_v52 = vmul.f32 %v7659_v61, %v2990_v63  ;;  %v7895_v55 = vmax.f32 %v3542_v57, %v3549_v42  ;;  %v7898_v11 = vadd.f32 %v7630_v35, %v2696_v36  ;;  %v3555_v58 = vsel %vm1375_vm2, %v7877_v13, -inf  ;;  %v9526_v36 = vld [vmem:[#allocation104_spill] sm:$0xff] }
 0x36b   : > { %v5504_v53 = vpop.eup %5503  ;;  %v3274_v62 = vmul.f32 %v5502_v34, %v7716_v28  ;;  %v7901_v31 = vadd.f32 %v3025_v30, %v7607_v49  ;;  %v3026_v17 = vmul.f32 %v7659_v61, %v2993_v3  ;;  %v3271_v18 = vmul.f32 %v5500_v10, %v7708_v2 }
 0x36c   : > { %9525 = vst [vmem:[#allocation51_spill] sm:$0xff] %v7898_v11  ;;  %v5506_v19 = vpop.eup %5505  ;;  %v7908_v57 = vadd.f32 %v3023_v52, %v7632_v22  ;;  %v2991_v63 = vmul.f32 %v9526_v36, %v7898_v11  ;;  %v4945_v42 = vpop.f32.mrb[60].mxu0  ;;  %v3272_v2 = vmul.f32 %v5504_v53, %v7723_v38 }
 0x36d   : > { %v5508_v44 = vpop.eup %5507  ;;  %v3304_v28 = vpack.c.bf16 %v3274_v62, %v3273_v51  ;;  %v3181_v34 = vadd.f32 1.0, %v5506_v19  ;;  %v4604_v30 = vmul.f32 -1.442695, %v7901_v31  ;;  %v7914_v3 = vadd.f32 %v3026_v17, %v7634_v4  ;;  %v2709_v13 = vpop.f32.mrb[61].mxu0 }
 0x36e   : > { %v5510_v16 = vpop.eup %5509  ;;  %v3179_v49 = vadd.f32 1.0, %v5508_v44  ;;  %v3024_v22 = vmul.f32 %v7659_v61, %v2991_v63  ;;  %v3551_v51 = vsel %vm1375_vm2, %v7898_v11, -inf  ;;  %v4946_v62 = vpop.f32.mrb[62].mxu0  ;;  %v4602_v44 = vmul.f32 -1.442695, %v7908_v57 }
 0x36f   : > { %v5512_v10 = vpop.eup %5511  ;;  %5513 = vrcp.f32 %v3181_v34  ;;  %v3182_v19 = vadd.f32 1.0, %v5510_v16  ;;  %v4605_v36 = vmul.f32 -1.442695, %v7914_v3  ;;  %v2712_v4 = vpop.f32.mrb[63].mxu0  ;;  %v7926_v38 = vadd.f32 %v4945_v42, %v7630_v35 }
 0x370   : > { %5515 = vrcp.f32 %v3179_v49  ;;  %v3180_v52 = vadd.f32 1.0, %v5512_v10  ;;  %v7923_v17 = vadd.f32 %v3024_v22, %v7639_v37  ;;  %v7929_v53 = vadd.f32 %v7630_v35, %v2709_v13  ;;  %v9531_v37 = vld [vmem:[#allocation107_spill] sm:$0xff] }
 0x371   : > { %5517 = vrcp.f32 %v3182_v19  ;;  %9527 = vst [vmem:[#allocation52_spill] sm:$0xff] %v7926_v38  ;;  %v7932_v34 = vadd.f32 %v4946_v62, %v7630_v35  ;;  %v7935_v63 = vadd.f32 %v7630_v35, %v2712_v4  ;;  %v3303_v16 = vpack.c.bf16 %v3272_v2, %v3271_v18  ;;  %v9532_v19 = vld [vmem:[#allocation108_spill] sm:$0xff]  ;;  %v9533_v2 = vld [vmem:[#allocation109_spill] sm:$0xff]  ;;  %v9534_v4 = vld [vmem:[#allocation111_spill] sm:$0xff] }
 0x372   : > { %9528 = vst [vmem:[#allocation7_spill] sm:$0xff] %v7929_v53  ;;  %5519 = vrcp.f32 %v3180_v52  ;;  %v4603_v49 = vmul.f32 -1.442695, %v7923_v17  ;;  %v2996_v10 = vmul.f32 %v9531_v37, %v7926_v38  ;;  %v3561_v42 = vsel %vm1375_vm2, %v7926_v38, -inf }
 0x373   : > { %9529 = vst [vmem:[#allocation8_spill] sm:$0xff] %v7932_v34  ;;  %9530 = vst [vmem:[#allocation9_spill] sm:$0xff] %v7935_v63  ;;  %5521 = vpow2.f32 %v4604_v30  ;;  %v7942_v13 = vmax.f32 %v3548_v0, %v3555_v58  ;;  %v2994_v22 = vmul.f32 %v9532_v19, %v7929_v53  ;;  %v7948_v62 = vsel %vm1375_vm2, %v7929_v53, -inf  ;;  %4965 = vmatprep.mubr.msk.bf16.mxu1 %vm1375_vm2, %v3303_v16 }
 0x374   : > { %5523 = vpow2.f32 %v4602_v44  ;;  %v7951_v18 = vmax.f32 %v3544_v33, %v3551_v51  ;;  %v3029_v30 = vmul.f32 %v7659_v61, %v2996_v10  ;;  %v2997_v52 = vmul.f32 %v9533_v2, %v7932_v34  ;;  %v4949_v44 = vpop.f32.mrb[64].mxu0  ;;  %4966 = vmatmul.mubr.msk.bf16.vlgmr.msra.gmra.mrb[80].mxu1 %vm1375_vm2, %v3304_v28 }
 0x375   : > { %5525 = vpow2.f32 %v4605_v36  ;;  %v3562_v0 = vmax.f32 %v7889_v48, %v3561_v42  ;;  %v3027_v58 = vmul.f32 %v7659_v61, %v2994_v22  ;;  %v2995_v37 = vmul.f32 %v9534_v4, %v7935_v63  ;;  %v2725_v16 = vpop.f32.mrb[65].mxu0 }
 0x376   : > { %5527 = vpow2.f32 %v4603_v49  ;;  %v7962_v33 = vadd.f32 %v3029_v30, %v7641_v27  ;;  %v3558_v51 = vmax.f32 %v7895_v55, %v7948_v62  ;;  %v3030_v36 = vmul.f32 %v7659_v61, %v2997_v52  ;;  %v4950_v49 = vpop.f32.mrb[66].mxu0 }
 0x377   : > { %v7969_v28 = vsel %vm1375_vm2, %v7932_v34, -inf  ;;  %v7972_v48 = vadd.f32 %v3027_v58, %v7643_v39  ;;  %v3028_v10 = vmul.f32 %v7659_v61, %v2995_v37  ;;  %v7977_v42 = vsel %vm1375_vm2, %v7935_v63, -inf  ;;  %v2728_v55 = vpop.f32.mrb[67].mxu0  ;;  %v9538_v58 = vld [vmem:[#allocation114_spill] sm:$0xff] }
 0x378   : > { %v7980_v27 = vadd.f32 %v4949_v44, %v7630_v35  ;;  %v4608_v22 = vmul.f32 -1.442695, %v7962_v33  ;;  %v7986_v62 = vadd.f32 %v3030_v36, %v7647_v15  ;;  %v7989_v39 = vadd.f32 %v7630_v35, %v2725_v16 }
 0x379   : > { %v7982_v19 = vpop.eup %5513  ;;  %v7992_v30 = vadd.f32 %v4950_v49, %v7630_v35  ;;  %v4606_v52 = vmul.f32 -1.442695, %v7972_v48  ;;  %v7998_v44 = vadd.f32 %v3028_v10, %v7664_v54  ;;  %v3564_v36 = vmax.f32 %v7942_v13, %v7969_v28  ;;  %v9539_v49 = vld [vmem:[#allocation11_spill] sm:$0xff] }
 0x37a   : > { %9535 = vst [vmem:[#allocation54_spill] sm:$0xff] %v7980_v27  ;;  %9536 = vst [vmem:[#allocation55_spill] sm:$0xff] %v7989_v39  ;;  %v7994_v2 = vpop.eup %5515  ;;  %v3000_v4 = vmul.f32 %v9538_v58, %v7980_v27  ;;  %v3569_v15 = vsel %vm1375_vm2, %v7980_v27, -inf  ;;  %5529 = vpow2.f32 %v4608_v22  ;;  %v4609_v16 = vmul.f32 -1.442695, %v7986_v62  ;;  %v9540_v13 = vld [vmem:[#allocation115_spill] sm:$0xff] }
 0x37b   : > { %9537 = vst [vmem:[#allocation56_spill] sm:$0xff] %v7992_v30  ;;  %v8004_v37 = vpop.eup %5517  ;;  %v2998_v34 = vmul.f32 %v9539_v49, %v7989_v39  ;;  %5531 = vpow2.f32 %v4606_v52  ;;  %v4607_v54 = vmul.f32 -1.442695, %v7998_v44  ;;  %v3560_v10 = vmax.f32 %v7951_v18, %v7977_v42 }
 0x37c   : > { %v8011_v38 = vpop.eup %5519  ;;  %v3033_v58 = vmul.f32 %v7659_v61, %v3000_v4  ;;  %5533 = vpow2.f32 %v4609_v16  ;;  %v8017_v22 = vmax.f32 %v3562_v0, %v3569_v15  ;;  %v3001_v28 = vmul.f32 %v9540_v13, %v7992_v30 }
 0x37d   : > { %v5522_v27 = vpop.eup %5521  ;;  %v3031_v63 = vmul.f32 %v7659_v61, %v2998_v34  ;;  %5535 = vpow2.f32 %v4607_v54  ;;  %v3565_v18 = vsel %vm1375_vm2, %v7989_v39, -inf  ;;  %v4953_v42 = vpop.f32.mrb[68].mxu0  ;;  %v3571_v15 = vsel %vm1375_vm2, %v7992_v30, -inf  ;;  %v9542_v30 = vld [vmem:[#allocation116_spill] sm:$0xff] }
 0x37e   : > { %v5524_v49 = vpop.eup %5523  ;;  %v3185_v53 = vadd.f32 1.0, %v5522_v27  ;;  %v8023_v52 = vadd.f32 %v3033_v58, %v7681_v46  ;;  %v3034_v34 = vmul.f32 %v7659_v61, %v3001_v28  ;;  %v2741_v16 = vpop.f32.mrb[69].mxu0  ;;  %v8035_v58 = vadd.f32 %v7630_v35, %v2728_v55 }
 0x37f   : > { %v5526_v4 = vpop.eup %5525  ;;  %v3183_v11 = vadd.f32 1.0, %v5524_v49  ;;  %v8028_v0 = vadd.f32 %v3031_v63, %v7688_v26  ;;  %v4954_v13 = vpop.f32.mrb[70].mxu0  ;;  %v8048_v55 = vmax.f32 %v3558_v51, %v3565_v18  ;;  %v9546_v18 = vld [vmem:[#allocation117_spill] sm:$0xff] }
 0x380   : > { %v5528_v27 = vpop.eup %5527  ;;  %5537 = vrcp.f32 %v3185_v53  ;;  %v3186_v54 = vadd.f32 1.0, %v5526_v4  ;;  %v4612_v46 = vmul.f32 -1.442695, %v8023_v52  ;;  %9541 = vst [vmem:[#allocation58_spill] sm:$0xff] %v8035_v58  ;;  %v8039_v63 = vadd.f32 %v3034_v34, %v7703_v43  ;;  %v2744_v28 = vpop.f32.mrb[71].mxu0  ;;  %v9545_v34 = vld [vmem:[#allocation67_spill] sm:$0xff] }
 0x381   : > { %5539 = vrcp.f32 %v3183_v11  ;;  %v3184_v49 = vadd.f32 1.0, %v5528_v27  ;;  %v4610_v26 = vmul.f32 -1.442695, %v8028_v0  ;;  %v2999_v39 = vmul.f32 %v9542_v30, %v8035_v58 }
 0x382   : > { %5541 = vrcp.f32 %v3186_v54  ;;  %v3567_v53 = vsel %vm1375_vm2, %v8035_v58, -inf  ;;  %v8046_v4 = vadd.f32 %v4953_v42, %v7630_v35  ;;  %v4613_v11 = vmul.f32 -1.442695, %v8039_v63 }
 0x383   : > { %5543 = vrcp.f32 %v3184_v49  ;;  %v8052_v27 = vadd.f32 %v7630_v35, %v2741_v16  ;;  %v3032_v43 = vmul.f32 %v7659_v61, %v2999_v39  ;;  %v8061_v49 = vmax.f32 %v3564_v36, %v3571_v15 }
 0x384   : > { %9543 = vst [vmem:[#allocation59_spill] sm:$0xff] %v8046_v4  ;;  %5545 = vpow2.f32 %v4612_v46  ;;  %v3004_v30 = vmul.f32 %v9545_v34, %v8046_v4  ;;  %v8059_v54 = vsel %vm1375_vm2, %v8046_v4, -inf  ;;  %v5530_v42 = vpop.eup %5529  ;;  %v8063_v51 = vmax.f32 %v3560_v10, %v3567_v53 }
 0x385   : > { %9544 = vst [vmem:[#allocation20_spill] sm:$0xff] %v8052_v27  ;;  %5547 = vpow2.f32 %v4610_v26  ;;  %v3002_v16 = vmul.f32 %v9546_v18, %v8052_v27  ;;  %v5532_v58 = vpop.eup %5531  ;;  %v3189_v46 = vadd.f32 1.0, %v5530_v42  ;;  %v8068_v39 = vadd.f32 %v3032_v43, %v7738_v32  ;;  %v4957_v20 = vpop.f32.mrb[72].mxu0 }
 0x386   : > { %5549 = vpow2.f32 %v4613_v11  ;;  %v3037_v34 = vmul.f32 %v7659_v61, %v3004_v30  ;;  %v5534_v4 = vpop.eup %5533  ;;  %v3187_v9 = vadd.f32 1.0, %v5532_v58  ;;  %v3578_v36 = vmax.f32 %v8017_v22, %v8059_v54  ;;  %v2757_v26 = vpop.f32.mrb[73].mxu0 }
 0x387   : > { %v3035_v10 = vmul.f32 %v7659_v61, %v3002_v16  ;;  %v8075_v15 = vadd.f32 %v4954_v13, %v7630_v35  ;;  %v5536_v53 = vpop.eup %5535  ;;  %5551 = vrcp.f32 %v3189_v46  ;;  %v3190_v11 = vadd.f32 1.0, %v5534_v4  ;;  %v4958_v30 = vpop.f32.mrb[74].mxu0 }
 0x388   : > { %v4611_v32 = vmul.f32 -1.442695, %v8068_v39  ;;  %v8079_v43 = vadd.f32 %v3037_v34, %v7743_v23  ;;  %5553 = vrcp.f32 %v3187_v9  ;;  %v3188_v58 = vadd.f32 1.0, %v5536_v53  ;;  %v8086_v13 = vpop.f32.mrb[75].mxu0 }
 0x389   : > { %9547 = vst [vmem:[#allocation22_spill] sm:$0xff] %v8075_v15  ;;  %v8082_v42 = vadd.f32 %v3035_v10, %v7745_v29  ;;  %v3005_v22 = vmul.f32 %v7496_v40, %v8075_v15  ;;  %5555 = vrcp.f32 %v3190_v11  ;;  %v3573_v23 = vsel %vm1375_vm2, %v8052_v27, -inf }
 0x38a   : > { %v8088_v54 = vpop.eup %5537  ;;  %v4616_v4 = vmul.f32 -1.442695, %v8079_v43  ;;  %v8094_v18 = vadd.f32 %v7630_v35, %v2744_v28  ;;  %5557 = vrcp.f32 %v3188_v58  ;;  %v8102_v16 = vsel %vm1375_vm2, %v8075_v15, -inf  ;;  %v9551_v15 = vld [vmem:[#allocation53_spill] sm:$0xff] }
 0x38b   : > { %v8096_v9 = vpop.eup %5539  ;;  %v4614_v29 = vmul.f32 -1.442695, %v8082_v42  ;;  %v3038_v40 = vmul.f32 %v7659_v61, %v3005_v22  ;;  %5559 = vpow2.f32 %v4611_v32  ;;  %v8113_v10 = vadd.f32 %v4957_v20, %v7630_v35 }
 0x38c   : > { %9548 = vst [vmem:[#allocation69_spill] sm:$0xff] %v8094_v18  ;;  %v8104_v46 = vpop.eup %5541  ;;  %v3003_v34 = vmul.f32 %v7499_v14, %v8094_v18  ;;  %v8110_v28 = vsel %vm1375_vm2, %v8094_v18, -inf  ;;  %5561 = vpow2.f32 %v4616_v4  ;;  %v3574_v11 = vmax.f32 %v8048_v55, %v3573_v23 }
 0x38d   : > { %9549 = vst [vmem:[#allocation71_spill] sm:$0xff] %v8113_v10  ;;  %v8115_v53 = vpop.eup %5543  ;;  %v8119_v58 = vadd.f32 %v3038_v40, %v7750_v21  ;;  %v8122_v32 = vadd.f32 %v7630_v35, %v2757_v26  ;;  %5563 = vpow2.f32 %v4614_v29  ;;  %v3008_v18 = vmul.f32 %v9551_v15, %v8113_v10  ;;  %v4961_v27 = vpop.f32.mrb[76].mxu0  ;;  %v9552_v26 = vld [vmem:[#allocation123_spill] sm:$0xff] }
 0x38e   : > { %v5546_v22 = vpop.eup %5545  ;;  %v3036_v14 = vmul.f32 %v7659_v61, %v3003_v34  ;;  %v3585_v20 = vsel %vm1375_vm2, %v8113_v10, -inf  ;;  %v3580_v21 = vmax.f32 %v8061_v49, %v8102_v16  ;;  %v2773_v29 = vpop.f32.mrb[77].mxu0 }
 0x38f   : > { %9550 = vst [vmem:[#allocation24_spill] sm:$0xff] %v8122_v32  ;;  %v5548_v4 = vpop.eup %5547  ;;  %v3193_v59 = vadd.f32 1.0, %v5546_v22  ;;  %v3006_v23 = vmul.f32 %v9552_v26, %v8122_v32  ;;  %v4617_v15 = vmul.f32 -1.442695, %v8119_v58  ;;  %v3041_v10 = vmul.f32 %v7659_v61, %v3008_v18  ;;  %v4962_v22 = vpop.f32.mrb[78].mxu0 }
 0x390   : > { %v5550_v40 = vpop.eup %5549  ;;  %v3191_v34 = vadd.f32 1.0, %v5548_v4  ;;  %v8137_v8 = vadd.f32 %v3036_v14, %v9553_v7  ;;  %v8140_v6 = vmax.f32 %v3578_v36, %v3585_v20  ;;  %v3581_v16 = vsel %vm1375_vm2, %v8122_v32, -inf  ;;  %v8145_v26 = vpop.f32.mrb[79].mxu0  ;;  %v9554_v7 = vld [vmem:[#allocation126_spill] sm:$0xff]  ;;  %v9555_v36 = vld [vmem:[#allocation47_spill] sm:$0xff] }
 0x391   : > { %5565 = vrcp.f32 %v3193_v59  ;;  %v3039_v49 = vmul.f32 %v7659_v61, %v3006_v23  ;;  %v8147_v55 = vpop.eup %5551  ;;  %v3194_v4 = vadd.f32 1.0, %v5550_v40  ;;  %v8151_v14 = vadd.f32 %v3041_v10, %v9554_v7 }
 0x392   : > { %v4615_v41 = vmul.f32 -1.442695, %v8137_v8  ;;  %v8154_v18 = vadd.f32 %v4958_v30, %v7630_v35  ;;  %v8156_v59 = vpop.eup %5553  ;;  %5567 = vrcp.f32 %v3191_v34  ;;  %v3275_v23 = vmul.f32 %v7994_v2, %v7809_v60  ;;  %v9556_v30 = vld [vmem:[#allocation73_spill] sm:$0xff] }
 0x393   : > { %v8159_v20 = vadd.f32 %v3039_v49, %v9555_v36  ;;  %v3276_v40 = vmul.f32 %v8011_v38, %v7819_v12  ;;  %v8165_v32 = vpop.eup %5555  ;;  %5569 = vpow2.f32 %v4617_v15  ;;  %v4620_v10 = vmul.f32 -1.442695, %v8151_v14 }
 0x394   : > { %v8168_v7 = vmax.f32 %v3574_v11, %v3581_v16  ;;  %v3009_v45 = vmul.f32 %v9556_v30, %v8154_v18  ;;  %v8172_v34 = vpop.eup %5557  ;;  %5571 = vpow2.f32 %v4615_v41  ;;  %v3587_v60 = vsel %vm1375_vm2, %v8154_v18, -inf  ;;  %v9559_v30 = vld [vmem:[#allocation68_spill] sm:$0xff] }
 0x395   : > { %v4618_v49 = vmul.f32 -1.442695, %v8159_v20  ;;  %v3305_v2 = vpack.c.bf16 %v3276_v40, %v3275_v23  ;;  %v5560_v12 = vpop.eup %5559  ;;  %5573 = vpow2.f32 %v4620_v10  ;;  %v8180_v11 = vadd.f32 %v7630_v35, %v8086_v13  ;;  %v9558_v10 = vld [vmem:[#allocation14_spill] sm:$0xff] }
 0x396   : > { %v3042_v38 = vmul.f32 %v7659_v61, %v3009_v45  ;;  %v3277_v15 = vmul.f32 %v7982_v19, %v7805_v24  ;;  %v5562_v16 = vpop.eup %5561  ;;  %v3192_v36 = vadd.f32 1.0, %v5560_v12  ;;  %v3278_v41 = vmul.f32 %v8004_v37, %v7814_v5 }
 0x397   : > { %5575 = vpow2.f32 %v4618_v49  ;;  %4969 = vmatprep.mubr.msk.bf16.mxu1 %vm1375_vm2, %v3305_v2  ;;  %v8188_v23 = vadd.f32 %v4961_v27, %v7630_v35  ;;  %v5564_v40 = vpop.eup %5563  ;;  %v3197_v45 = vadd.f32 1.0, %v5562_v16  ;;  %v3007_v24 = vmul.f32 %v9559_v30, %v8180_v11  ;;  %v9560_v27 = vld [vmem:[#allocation124_spill] sm:$0xff] }
 0x398   : > { %5577 = vrcp.f32 %v3194_v4  ;;  %v8191_v13 = vadd.f32 %v3042_v38, %v9558_v10  ;;  %v3588_v19 = vmax.f32 %v3580_v21, %v3587_v60  ;;  %v3583_v49 = vsel %vm1375_vm2, %v8180_v11, -inf  ;;  %v9563_v10 = vld [vmem:[#allocation63_spill] sm:$0xff] }
 0x399   : > { %9557 = vst [vmem:[#allocation26_spill] sm:$0xff] %v8188_v23  ;;  %5579 = vrcp.f32 %v3192_v36  ;;  %v3306_v2 = vpack.c.bf16 %v3278_v41, %v3277_v15  ;;  %v3195_v12 = vadd.f32 1.0, %v5564_v40  ;;  %v3040_v37 = vmul.f32 %v7659_v61, %v3007_v24 }
 0x39a   : > { %v4621_v5 = vmul.f32 -1.442695, %v8191_v13  ;;  %v3012_v4 = vmul.f32 %v9560_v27, %v8188_v23  ;;  %5581 = vrcp.f32 %v3197_v45  ;;  %v3593_v21 = vsel %vm1375_vm2, %v8188_v23, -inf }
 0x39b   : > { %v8201_v16 = vpop.eup %5565  ;;  %4970 = vmatmul.mubr.msk.bf16.gmra.mrb[84].mxu1 %vm1375_vm2, %v3306_v2  ;;  %v8207_v60 = vadd.f32 %v7630_v35, %v2773_v29  ;;  %v8210_v38 = vadd.f32 %v4962_v22, %v7630_v35  ;;  %v8213_v15 = vadd.f32 %v3040_v37, %v7830_v50  ;;  %v9562_v36 = vmax.f32 %v8063_v51, %v8110_v28  ;;  %v9564_v22 = vld [vmem:[#allocation95_spill] sm:$0xff] }
 0x39c   : > { %5583 = vpow2.f32 %v4621_v5  ;;  %v3045_v40 = vmul.f32 %v7659_v61, %v3012_v4  ;;  %v5568_v45 = vpop.eup %5567 }
 0x39d   : > { %9561 = vst [vmem:[#allocation75_spill] sm:$0xff] %v8210_v38  ;;  %v3584_v41 = vmax.f32 %v9562_v36, %v3583_v49  ;;  %v3010_v30 = vmul.f32 %v9563_v10, %v8207_v60  ;;  %v3589_v29 = vsel %vm1375_vm2, %v8207_v60, -inf  ;;  %v3013_v24 = vmul.f32 %v9564_v22, %v8210_v38  ;;  %v5570_v2 = vpop.eup %5569 }
 0x39e   : > { %v3595_v50 = vsel %vm1375_vm2, %v8210_v38, -inf  ;;  %5585 = vrcp.f32 %v3195_v12  ;;  %v4619_v51 = vmul.f32 -1.442695, %v8213_v15  ;;  %v8229_v28 = vadd.f32 %v3045_v40, %v7832_v47  ;;  %v5572_v5 = vpop.eup %5571 }
 0x39f   : > { %v3594_v49 = vmax.f32 %v8140_v6, %v3593_v21  ;;  %v3198_v37 = vadd.f32 1.0, %v5570_v2  ;;  %v3043_v27 = vmul.f32 %v7659_v61, %v3010_v30  ;;  %v3046_v4 = vmul.f32 %v7659_v61, %v3013_v24  ;;  %v5574_v10 = vpop.eup %5573 }
 0x3a0   : > { %v3596_v36 = vmax.f32 %v3588_v19, %v3595_v50  ;;  %v3196_v22 = vadd.f32 1.0, %v5572_v5  ;;  %5587 = vpow2.f32 %v4619_v51  ;;  %v4624_v38 = vmul.f32 -1.442695, %v8229_v28  ;;  %v9565_v51 = vld [vmem:[#allocation119_spill] sm:$0xff] }
 0x3a1   : > { %v3590_v12 = vmax.f32 %v8168_v7, %v3589_v29  ;;  %v5576_v23 = vpop.eup %5575  ;;  %5589 = vrcp.f32 %v3198_v37  ;;  %v3201_v47 = vadd.f32 1.0, %v5574_v10  ;;  %v8237_v40 = vadd.f32 %v3043_v27, %v7836_v25 }
 0x3a2   : > { %v8240_v6 = vadd.f32 %v3046_v4, %v7838_v56  ;;  %v5578_v21 = vpop.eup %5577  ;;  %5591 = vrcp.f32 %v3196_v22  ;;  %v3279_v19 = vmul.f32 %v8096_v9, %v7908_v57  ;;  %v3280_v30 = vmul.f32 %v8115_v53, %v7923_v17 }
 0x3a3   : > { %v8248_v7 = vadd.f32 %v7630_v35, %v8145_v26  ;;  %v5580_v29 = vpop.eup %5579  ;;  %v3199_v24 = vadd.f32 1.0, %v5576_v23  ;;  %v4622_v25 = vmul.f32 -1.442695, %v8237_v40  ;;  %v3598_v56 = vmax.f32 %v3594_v49, %v3596_v36 }
 0x3a4   : > { %v4625_v50 = vmul.f32 -1.442695, %v8240_v6  ;;  %5593 = vrcp.f32 %v3201_v47  ;;  %v3307_v2 = vpack.c.bf16 %v3280_v30, %v3279_v19  ;;  %v5582_v17 = vpop.eup %5581  ;;  %v3281_v35 = vmul.f32 %v8088_v54, %v7901_v31 }
 0x3a5   : > { %v3011_v5 = vmul.f32 %v9565_v51, %v8248_v7  ;;  %v3591_v57 = vsel %vm1375_vm2, %v8248_v7, -inf  ;;  %5595 = vpow2.f32 %v4624_v38  ;;  %v3282_v53 = vmul.f32 %v8104_v46, %v7914_v3 }
 0x3a6   : > { %v3592_v9 = vmax.f32 %v3584_v41, %v3591_v57  ;;  %v5584_v26 = vpop.eup %5583  ;;  %5597 = vpow2.f32 %v4622_v25  ;;  %4973 = vmatprep.mubr.msk.bf16.mxu1 %vm1375_vm2, %v3307_v2  ;;  %v3283_v49 = vmul.f32 %v8156_v59, %v7972_v48  ;;  %v3284_v37 = vmul.f32 %v8172_v34, %v7998_v44 }
 0x3a7   : > { %v3044_v23 = vmul.f32 %v7659_v61, %v3011_v5  ;;  %v3202_v38 = vadd.f32 1.0, %v5584_v26  ;;  %5599 = vpow2.f32 %v4625_v50  ;;  %v3308_v27 = vpack.c.bf16 %v3282_v53, %v3281_v35 }
 0x3a8   : > { %v3597_v41 = vmax.f32 %v3590_v12, %v3592_v9  ;;  %v5586_v31 = vpop.eup %5585  ;;  %v3309_v3 = vpack.c.bf16 %v3284_v37, %v3283_v49  ;;  %v3285_v46 = vmul.f32 %v8147_v55, %v7962_v33  ;;  %v3286_v61 = vmul.f32 %v8165_v32, %v7986_v62 }
 0x3a9   : > { %v8267_v54 = vadd.f32 %v3044_v23, %v7842_v1  ;;  %5601 = vrcp.f32 %v3202_v38  ;;  %4974 = vmatmul.mubr.msk.bf16.gmra.mrb[88].mxu1 %vm1375_vm2, %v3308_v27  ;;  %v3287_v44 = vmul.f32 %v5568_v45, %v8028_v0  ;;  %v3288_v59 = vmul.f32 %v5580_v29, %v8068_v39 }
 0x3aa   : > { %v3599_v48 = vmax.f32 %v3597_v41, %v3598_v56  ;;  %v5588_v34 = vpop.eup %5587  ;;  %4977 = vmatprep.mubr.msk.bf16.mxu1 %vm1375_vm2, %v3309_v3  ;;  %v3310_v1 = vpack.c.bf16 %v3286_v61, %v3285_v46  ;;  %v3289_v33 = vmul.f32 %v8201_v16, %v8023_v52  ;;  %v3290_v55 = vmul.f32 %v5578_v21, %v8039_v63 }
 0x3ab   : > { %v4623_v4 = vmul.f32 -1.442695, %v8267_v54  ;;  %v5590_v62 = vpop.eup %5589  ;;  %5603 = vrcp.f32 %v3199_v24  ;;  %v3200_v32 = vadd.f32 1.0, %v5588_v34  ;;  %v3311_v10 = vpack.c.bf16 %v3288_v59, %v3287_v44  ;;  %v8312_v44 = vld [vmem:[%s8844_s4 + $0x5] ss:$0 sm:$0xff] }
 0x3ac   : > { %v3600_v36 = vrot.slane %v3599_v48, 4  ;;  %v5592_v22 = vpop.eup %5591  ;;  %v3312_v0 = vpack.c.bf16 %v3290_v55, %v3289_v33  ;;  %v3293_v39 = vmul.f32 %v5582_v17, %v8079_v43  ;;  %v3294_v45 = vmul.f32 %v5590_v62, %v8119_v58 }
 0x3ad   : > { %5605 = vpow2.f32 %v4623_v4  ;;  %v3291_v47 = vmul.f32 %v5586_v31, %v8082_v42  ;;  %v3292_v52 = vmul.f32 %v5592_v22, %v8137_v8 }
 0x3ae   : > { %5607 = vrcp.f32 %v3200_v32  ;;  %v3601_v12 = vmax.f32 %v3599_v48, %v3600_v36  ;;  %v5594_v16 = vpop.eup %5593  ;;  %v3314_v63 = vpack.c.bf16 %v3294_v45, %v3293_v39 }
 0x3af   : > { %v5596_v21 = vpop.eup %5595  ;;  %v3313_v30 = vpack.c.bf16 %v3292_v52, %v3291_v47  ;;  %v3297_v8 = vmul.f32 %v5594_v16, %v8151_v14 }
 0x3b0   : > { %v3602_v19 = vrot.slane %v3601_v12, 2  ;;  %v5598_v29 = vpop.eup %5597  ;;  %v3205_v24 = vadd.f32 1.0, %v5596_v21 }
 0x3b1   : > { %v5600_v25 = vpop.eup %5599  ;;  %4978 = vmatmul.mubr.msk.bf16.gmra.mrb[92].mxu1 %vm1375_vm2, %v3310_v1  ;;  %v3203_v56 = vadd.f32 1.0, %v5598_v29 }
 0x3b2   : > { %v3603_v50 = vmax.f32 %v3601_v12, %v3602_v19  ;;  %5609 = vrcp.f32 %v3205_v24  ;;  %v3206_v43 = vadd.f32 1.0, %v5600_v25  ;;  %4981 = vmatprep.mubr.msk.bf16.mxu1 %vm1375_vm2, %v3311_v10 }
 0x3b3   : > { %v5602_v58 = vpop.eup %5601 }
 0x3b4   : > { %v3604_v42 = vrot.slane %v3603_v50, 1  ;;  %5611 = vrcp.f32 %v3206_v43  ;;  %v3298_v2 = vmul.f32 %v5602_v58, %v8191_v13 }
 0x3b5   : > { %v5604_v51 = vpop.eup %5603  ;;  %5613 = vrcp.f32 %v3203_v56 }
 0x3b6   : > { %v3605_v5 = vmax.f32 %v3603_v50, %v3604_v42  ;;  %v3316_v17 = vpack.c.bf16 %v3298_v2, %v3297_v8  ;;  %v3295_v26 = vmul.f32 %v5604_v51, %v8159_v20 }
 0x3b7   : > { %v5606_v57 = vpop.eup %5605 }
 0x3b8   : > { %v5608_v9 = vpop.eup %5607  ;;  %v3204_v35 = vadd.f32 1.0, %v5606_v57  ;;  %v3677_v53 = vpack.c.bf16 %v3605_v5, %v3605_v5 }
 0x3b9   : > { %v3296_v23 = vmul.f32 %v5608_v9, %v8213_v15  ;;  %4982 = vmatmul.mubr.msk.bf16.gmra.mrb[96].mxu1 %vm1375_vm2, %v3312_v0 }
 0x3ba   : > { %5615 = vrcp.f32 %v3204_v35  ;;  %5000 = vmatmul.mubr.msk.bf16.vlgmr.msra.gmra.mrb[80].mxu0 %vm1375_vm2, %v3677_v53  ;;  %4985 = vmatprep.mubr.msk.bf16.mxu1 %vm1375_vm2, %v3313_v30 }
 0x3bb   : > { %v3315_v14 = vpack.c.bf16 %v3296_v23, %v3295_v26 }
 0x3bc   : > { %v5610_v13 = vpop.eup %5609 }
 0x3bd   : > { %v3301_v37 = vmul.f32 %v5610_v13, %v8229_v28  ;;  %v9566_v28 = vmov 0.0  }
 0x3be   : > { %v5612_v49 = vpop.eup %5611 }
 0x3bf   : > { %v3302_v38 = vmul.f32 %v5612_v49, %v8240_v6  ;;  %v5614_v41 = vpop.eup %5613  ;;  %v4365_v6 = vld [vmem:[%s8843_s3 + $0x14] sm:$0xf] }
 0x3c0   : > { %v3299_v27 = vmul.f32 %v5614_v41, %v8237_v40  ;;  %v3735_v46 = vsel %vm1424_vm1, %v4365_v6, 0 }
 0x3c1   : > { %4986 = vmatmul.mubr.msk.bf16.gmra.mrb[100].mxu1 %vm1375_vm2, %v3314_v63  ;;  %v3318_v20 = vpack.c.bf16 %v3302_v38, %v3301_v37 }
 0x3c2   : > { %4989 = vmatprep.mubr.msk.bf16.mxu1 %vm1375_vm2, %v3315_v14  ;;  %5004 = vmatpush3.bf16.msra.mxu1 %v3735_v46 }
 0x3c4   : > { %v5616_v15 = vpop.eup %5615 }
 0x3c5   : > { %v3300_v31 = vmul.f32 %v5616_v15, %v8267_v54 }
 0x3c7   : > { %v3317_v3 = vpack.c.bf16 %v3300_v31, %v3299_v27 }
 0x3c9   : > { %4990 = vmatmul.mubr.msk.bf16.gmra.mrb[104].mxu1 %vm1375_vm2, %v3316_v17 }
 0x3ca   : > { %4993 = vmatprep.mubr.msk.bf16.mxu1 %vm1375_vm2, %v3317_v3 }
 0x3d1   : > { %4994 = vmatmul.mubr.msk.bf16.gmra.mrb[108].mxu1 %vm1375_vm2, %v3318_v20 }
 0x3d2   : > { %5005 = vmatprep.mubr.msk.bf16.mxu1 %vm5661_vm3, %v9566_v28 }
 0x447   : > { %v4967_v40 = vpop.f32.mrb[80].mxu1 }
 0x448   : > { %v3410_v61 = vpop.f32.mrb[81].mxu1  ;;  %v8323_v1 = vadd.f32 %v4967_v40, %v8312_v44 }
 0x449   : > { %v4968_v54 = vpop.f32.mrb[82].mxu1  ;;  %v8318_v34 = vadd.f32 %v8312_v44, %v3410_v61 }
 0x44a   : > { %v3413_v48 = vpop.f32.mrb[83].mxu1  ;;  %v3609_v62 = vsel %vm1375_vm2, %v8323_v1, 0.0  ;;  %v8330_v32 = vadd.f32 %v4968_v54, %v8312_v44 }
 0x44b   : > { %v8315_v59 = vadd.f32 %v8312_v44, %v3413_v48  ;;  %v3606_v33 = vsel %vm1375_vm2, %v8318_v34, 0.0 }
 0x44c   : > { %v3611_v10 = vsel %vm1375_vm2, %v8330_v32, 0.0 }
 0x44d   : > { %v3607_v4 = vsel %vm1375_vm2, %v8315_v59, 0.0 }
 0x44e   : > { %v3608_v55 = vadd.f32 %v3607_v4, %v3606_v33 }
 0x450   : > { %v3610_v36 = vadd.f32 %v3609_v62, %v3608_v55 }
 0x452   : > { %v3612_v39 = vadd.f32 %v3611_v10, %v3610_v36 }
 0x46e   : > { %v4971_v22 = vpop.f32.mrb[84].mxu1 }
 0x46f   : > { %v3426_v0 = vpop.f32.mrb[85].mxu1  ;;  %v8343_v21 = vadd.f32 %v4971_v22, %v8312_v44 }
 0x470   : > { %v8335_v45 = vadd.f32 %v8312_v44, %v3426_v0  ;;  %v4972_v12 = vpop.f32.mrb[86].mxu1 }
 0x471   : > { %v3429_v47 = vpop.f32.mrb[87].mxu1  ;;  %v3617_v29 = vsel %vm1375_vm2, %v8343_v21, 0.0  ;;  %v8350_v24 = vadd.f32 %v4972_v12, %v8312_v44 }
 0x472   : > { %v3613_v52 = vsel %vm1375_vm2, %v8335_v45, 0.0  ;;  %v8340_v16 = vadd.f32 %v8312_v44, %v3429_v47 }
 0x473   : > { %v3614_v63 = vadd.f32 %v3613_v52, %v3612_v39  ;;  %v3619_v50 = vsel %vm1375_vm2, %v8350_v24, 0.0 }
 0x474   : > { %v3615_v19 = vsel %vm1375_vm2, %v8340_v16, 0.0 }
 0x475   : > { %v3616_v30 = vadd.f32 %v3615_v19, %v3614_v63 }
 0x477   : > { %v3618_v25 = vadd.f32 %v3617_v29, %v3616_v30 }
 0x479   : > { %v3620_v56 = vadd.f32 %v3619_v50, %v3618_v25 }
 0x47c   : > { %v4975_v43 = vpop.f32.mrb[88].mxu1 }
 0x47d   : > { %v3442_v58 = vpop.f32.mrb[89].mxu1  ;;  %v8358_v51 = vadd.f32 %v4975_v43, %v8312_v44 }
 0x47e   : > { %v8355_v42 = vadd.f32 %v8312_v44, %v3442_v58  ;;  %v4976_v8 = vpop.f32.mrb[90].mxu1 }
 0x47f   : > { %v3445_v2 = vpop.f32.mrb[91].mxu1  ;;  %v8366_v9 = vadd.f32 %v4976_v8, %v8312_v44  ;;  %v3625_v26 = vsel %vm1375_vm2, %v8358_v51, 0.0 }
 0x480   : > { %v3621_v5 = vsel %vm1375_vm2, %v8355_v42, 0.0  ;;  %v8363_v57 = vadd.f32 %v8312_v44, %v3445_v2 }
 0x481   : > { %v3622_v17 = vadd.f32 %v3621_v5, %v3620_v56  ;;  %v3627_v49 = vsel %vm1375_vm2, %v8366_v9, 0.0 }
 0x482   : > { %v3623_v35 = vsel %vm1375_vm2, %v8363_v57, 0.0 }
 0x483   : > { %v3624_v53 = vadd.f32 %v3623_v35, %v3622_v17 }
 0x484   : > { %v4979_v23 = vpop.f32.mrb[92].mxu1 }
 0x485   : > { %v3626_v14 = vadd.f32 %v3625_v26, %v3624_v53  ;;  %v3458_v13 = vpop.f32.mrb[93].mxu1  ;;  %v8378_v15 = vadd.f32 %v4979_v23, %v8312_v44 }
 0x486   : > { %v8375_v37 = vadd.f32 %v8312_v44, %v3458_v13  ;;  %v4980_v38 = vpop.f32.mrb[94].mxu1 }
 0x487   : > { %v3628_v41 = vadd.f32 %v3627_v49, %v3626_v14  ;;  %v3461_v20 = vpop.f32.mrb[95].mxu1  ;;  %v8386_v28 = vadd.f32 %v4980_v38, %v8312_v44  ;;  %v3633_v40 = vsel %vm1375_vm2, %v8378_v15, 0.0 }
 0x488   : > { %v3629_v27 = vsel %vm1375_vm2, %v8375_v37, 0.0  ;;  %v8383_v31 = vadd.f32 %v8312_v44, %v3461_v20 }
 0x489   : > { %v3630_v3 = vadd.f32 %v3629_v27, %v3628_v41  ;;  %v3635_v55 = vsel %vm1375_vm2, %v8386_v28, 0.0 }
 0x48a   : > { %v3631_v6 = vsel %vm1375_vm2, %v8383_v31, 0.0 }
 0x48b   : > { %v3632_v46 = vadd.f32 %v3631_v6, %v3630_v3 }
 0x48c   : > { %v4983_v61 = vpop.f32.mrb[96].mxu1 }
 0x48d   : > { %v8392_v54 = vpop.f32.mrb[80].mxu0  ;;  %v3634_v48 = vadd.f32 %v3633_v40, %v3632_v46  ;;  %v3474_v4 = vpop.f32.mrb[97].mxu1  ;;  %v8400_v12 = vadd.f32 %v4983_v61, %v8312_v44 }
 0x48e   : > { %v5001_v33 = vpop.f32.mrb[81].mxu0  ;;  %v8397_v62 = vadd.f32 %v8312_v44, %v3474_v4  ;;  %v4984_v36 = vpop.f32.mrb[98].mxu1 }
 0x48f   : > { %v3721_v10 = vpop.f32.mrb[82].mxu0  ;;  %v3636_v22 = vadd.f32 %v3635_v55, %v3634_v48  ;;  %v3477_v0 = vpop.f32.mrb[99].mxu1  ;;  %v8408_v19 = vadd.f32 %v4984_v36, %v8312_v44  ;;  %v3641_v25 = vsel %vm1375_vm2, %v8400_v12, 0.0 }
 0x490   : > { %v5002_v39 = vpop.f32.mrb[83].mxu0  ;;  %v3637_v47 = vsel %vm1375_vm2, %v8397_v62, 0.0  ;;  %v8405_v52 = vadd.f32 %v8312_v44, %v3477_v0 }
 0x491   : > { %v3638_v63 = vadd.f32 %v3637_v47, %v3636_v22  ;;  %v3643_v56 = vsel %vm1375_vm2, %v8408_v19, 0.0 }
 0x492   : > { %v3639_v30 = vsel %vm1375_vm2, %v8405_v52, 0.0 }
 0x493   : > { %v3640_v29 = vadd.f32 %v3639_v30, %v3638_v63 }
 0x494   : > { %v4987_v50 = vpop.f32.mrb[100].mxu1 }
 0x495   : > { %v3642_v43 = vadd.f32 %v3641_v25, %v3640_v29  ;;  %v3490_v58 = vpop.f32.mrb[101].mxu1  ;;  %v8420_v35 = vadd.f32 %v4987_v50, %v8312_v44 }
 0x496   : > { %v8417_v8 = vadd.f32 %v8312_v44, %v3490_v58  ;;  %v4988_v2 = vpop.f32.mrb[102].mxu1 }
 0x497   : > { %v3644_v5 = vadd.f32 %v3643_v56, %v3642_v43  ;;  %v3493_v17 = vpop.f32.mrb[103].mxu1  ;;  %v8428_v14 = vadd.f32 %v4988_v2, %v8312_v44  ;;  %v3649_v38 = vsel %vm1375_vm2, %v8420_v35, 0.0 }
 0x498   : > { %v3645_v53 = vsel %vm1375_vm2, %v8417_v8, 0.0  ;;  %v8425_v26 = vadd.f32 %v8312_v44, %v3493_v17 }
 0x499   : > { %v3646_v23 = vadd.f32 %v3645_v53, %v3644_v5  ;;  %v3651_v3 = vsel %vm1375_vm2, %v8428_v14, 0.0 }
 0x49a   : > { %v3647_v13 = vsel %vm1375_vm2, %v8425_v26, 0.0 }
 0x49b   : > { %v3648_v49 = vadd.f32 %v3647_v13, %v3646_v23 }
 0x49c   : > { %v4991_v41 = vpop.f32.mrb[104].mxu1 }
 0x49d   : > { %v3650_v20 = vadd.f32 %v3649_v38, %v3648_v49  ;;  %v3506_v27 = vpop.f32.mrb[105].mxu1  ;;  %v8440_v48 = vadd.f32 %v4991_v41, %v8312_v44 }
 0x49e   : > { %v8437_v6 = vadd.f32 %v8312_v44, %v3506_v27  ;;  %v4992_v46 = vpop.f32.mrb[106].mxu1 }
 0x49f   : > { %v3652_v40 = vadd.f32 %v3651_v3, %v3650_v20  ;;  %v3509_v61 = vpop.f32.mrb[107].mxu1  ;;  %v8448_v36 = vadd.f32 %v4992_v46, %v8312_v44  ;;  %v3657_v0 = vsel %vm1375_vm2, %v8440_v48, 0.0 }
 0x4a0   : > { %v3653_v4 = vsel %vm1375_vm2, %v8437_v6, 0.0  ;;  %v8445_v33 = vadd.f32 %v8312_v44, %v3509_v61 }
 0x4a1   : > { %v3654_v55 = vadd.f32 %v3653_v4, %v3652_v40  ;;  %v3659_v30 = vsel %vm1375_vm2, %v8448_v36, 0.0 }
 0x4a2   : > { %v3655_v10 = vsel %vm1375_vm2, %v8445_v33, 0.0 }
 0x4a3   : > { %v3656_v22 = vadd.f32 %v3655_v10, %v3654_v55  ;;  %v4366_v55 = vld [vmem:[%s8843_s3 + $0x18] sm:$0xf] }
 0x4a4   : > { %v4995_v39 = vpop.f32.mrb[108].mxu1  ;;  %5049 = vmatprep.subr.msk.bf16.mxu0 %vm1424_vm1, %v4366_v55  ;;  %v3964_v10 = vsel %vm1424_vm1, %v4366_v55, 0 }
 0x4a5   : > { %v3658_v47 = vadd.f32 %v3657_v0, %v3656_v22  ;;  %v3522_v63 = vpop.f32.mrb[109].mxu1  ;;  %v8460_v58 = vadd.f32 %v4995_v39, %v8312_v44  ;;  %5010 = vmatpush3.bf16.msra.mxu0 %v3964_v10  ;;  %v4644_v22 = vmul.f32 -1.442695, %v8392_v54 }
 0x4a6   : > { %v8457_v29 = vadd.f32 %v8312_v44, %v3522_v63  ;;  %v4996_v25 = vpop.f32.mrb[110].mxu1 }
 0x4a7   : > { %v3660_v50 = vadd.f32 %v3659_v30, %v3658_v47  ;;  %v3525_v43 = vpop.f32.mrb[111].mxu1  ;;  %v8468_v17 = vadd.f32 %v4996_v25, %v8312_v44  ;;  %v3665_v13 = vsel %vm1375_vm2, %v8460_v58, 0.0  ;;  %5617 = vpow2.f32 %v4644_v22  ;;  %v9567_v22 = vld [vmem:[#allocation89_spill] sm:$0xff] }
 0x4a8   : > { %v3661_v56 = vsel %vm1375_vm2, %v8457_v29, 0.0  ;;  %v8465_v2 = vadd.f32 %v8312_v44, %v3525_v43 }
 0x4a9   : > { %v3662_v5 = vadd.f32 %v3661_v56, %v3660_v50  ;;  %v3667_v38 = vsel %vm1375_vm2, %v8468_v17, 0.0 }
 0x4aa   : > { %v3663_v53 = vsel %vm1375_vm2, %v8465_v2, 0.0 }
 0x4ab   : > { %v3664_v23 = vadd.f32 %v3663_v53, %v3662_v5 }
 0x4ad   : > { %v3666_v49 = vadd.f32 %v3665_v13, %v3664_v23 }
 0x4af   : > { %v3668_v41 = vadd.f32 %v3667_v38, %v3666_v49 }
 0x4b1   : > { %v3669_v20 = vrot.slane %v3668_v41, 4  ;;  %v5618_v25 = vpop.eup %5617 }
 0x4b2   : > { %v3727_v50 = vadd.f32 1.0, %v5618_v25  ;;  %v9570_v25 = vld [vmem:[#allocation127_spill] sm:$0xff] }
 0x4b3   : > { %v3670_v27 = vadd.f32 %v3669_v20, %v3668_v41 }
 0x4b5   : > { %v3671_v3 = vrot.slane %v3670_v27, 2 }
 0x4b7   : > { %v3672_v46 = vadd.f32 %v3671_v3, %v3670_v27  ;;  %v3794_v3 = vlaneseq }
 0x4b9   : > { %v3673_v40 = vrot.slane %v3672_v46, 1 }
 0x4bb   : > { %v3674_v61 = vadd.f32 %v3673_v40, %v3672_v46  ;;  %v3795_v46 = vshrl.u32 %v3794_v3, 7  ;;  %v9577_v3 = vld [vmem:[#allocation50_spill] sm:$0xff] }
 0x4bd   : > { %v3676_v44 = vmul.f32 0.00390625, %v3674_v61  ;;  %v3796_v40 = vsub.s32 0, %v3795_v46 }
 0x4bf   : > { %v3730_v4 = vpack.c.bf16 %v3676_v44, %v3676_v44 }
 0x4c1   : > { %5006 = vmatmul.mubr.msk.bf16.vlgmr.msra.gmra.mrb[112].mxu1 %vm1375_vm2, %v3730_v4 }
 0x594   : > { %v3771_v0 = vpop.f32.mrb[112].mxu1 }
 0x595   : > { %v4646_v39 = vmul.f32 -1.442695, %v3771_v0  ;;  %v5007_v47 = vpop.f32.mrb[113].mxu1 }
 0x596   : > { %v3774_v63 = vpop.f32.mrb[114].mxu1 }
 0x597   : > { %5619 = vpow2.f32 %v4646_v39  ;;  %v5008_v30 = vpop.f32.mrb[115].mxu1  ;;  %v9568_v39 = vld [vmem:[#allocation74_spill] sm:$0xff]  ;;  %v9569_v63 = vld [vmem:[#allocation12_spill] sm:$0xff] }
 0x598   : > { %5621 = vrcp.f32 %v3727_v50 }
 0x5a1   : > { %v5620_v43 = vpop.eup %5619 }
 0x5a2   : > { %v3780_v56 = vadd.f32 1.0, %v5620_v43  ;;  %v5622_v5 = vpop.eup %5621  ;;  %v9571_v43 = vld [vmem:[#allocation46_spill] sm:$0xff] }
 0x5a4   : > { %5623 = vrcp.f32 %v3780_v56 }
 0x5ae   : > { %v5624_v53 = vpop.eup %5623 }
 0x5af   : > { %v3783_v23 = vmax.f32 %v5622_v5, %v5624_v53 }
 0x5b1   : > { %v3784_v13 = vsub.f32 %v5622_v5, %v3783_v23  ;;  %v3787_v49 = vsub.f32 %v5624_v53, %v3783_v23  ;;  %v9572_v5 = vld [vmem:[#allocation49_spill] sm:$0xff]  ;;  %v9573_v23 = vld [vmem:[#allocation10_spill] sm:$0xff] }
 0x5b3   : > { %v3785_v38 = vmul.f32 1.442695, %v3784_v13  ;;  %v3788_v54 = vmul.f32 1.442695, %v3787_v49  ;;  %v9574_v49 = vld [vmem:[#allocation48_spill] sm:$0xff] }
 0x5b5   : > { %5625 = vpow2.f32 %v3785_v38 }
 0x5b6   : > { %5627 = vpow2.f32 %v3788_v54  ;;  %v9575_v54 = vld [vmem:[#allocation16_spill] sm:$0xff] }
 0x5bf   : > { %v5626_v41 = vpop.eup %5625 }
 0x5c0   : > { %v5628_v20 = vpop.eup %5627 }
 0x5c1   : > { %v3790_v27 = vadd.f32 %v5628_v20, %v5626_v41 }
 0x5c3   : > { %5629 = vrcp.f32 %v3790_v27 }
 0x5cd   : > { %v5630_v61 = vpop.eup %5629 }
 0x5ce   : > { %v3793_v44 = vmul.f32 %v5630_v61, %v5626_v41  ;;  %v3830_v4 = vmul.f32 %v5630_v61, %v5628_v20  ;;  %v9576_v20 = vld [vmem:[#allocation51_spill] sm:$0xff] }
 0x5d0   : > { %v3797_v55 = vrot.slane %v3793_v44, %v3796_v40  ;;  %v8483_v10 = vrot.slane %v3830_v4, %v3796_v40  ;;  %v9578_v40 = vld [vmem:[#allocation18_spill] sm:$0xff]  ;;  %v9579_v44 = vld [vmem:[#allocation7_spill] sm:$0xff] }
 0x5d2   : > { %v8486_v0 = vmul.f32 %v3797_v55, %v9567_v22  ;;  %v8489_v47 = vmul.f32 %v3797_v55, %v9568_v39  ;;  %v8492_v30 = vmul.f32 %v3797_v55, %v9569_v63  ;;  %v8495_v50 = vmul.f32 %v3797_v55, %v9570_v25  ;;  %v9581_v22 = vld [vmem:[#allocation9_spill] sm:$0xff]  ;;  %v9583_v63 = vld [vmem:[#allocation52_spill] sm:$0xff] }
 0x5d3   : > { %v8498_v56 = vmul.f32 %v3797_v55, %v9571_v43  ;;  %v8501_v53 = vmul.f32 %v3797_v55, %v9572_v5  ;;  %v8504_v13 = vmul.f32 %v3797_v55, %v9573_v23  ;;  %v8507_v38 = vmul.f32 %v3797_v55, %v9574_v49  ;;  %v9585_v43 = vld [vmem:[#allocation8_spill] sm:$0xff]  ;;  %v9587_v23 = vld [vmem:[#allocation55_spill] sm:$0xff] }
 0x5d4   : > { %v8510_v41 = vmul.f32 %v3797_v55, %v9575_v54  ;;  %v8513_v27 = vmul.f32 %v3797_v55, %v9576_v20  ;;  %v8516_v46 = vmul.f32 %v3797_v55, %v9577_v3  ;;  %v8519_v61 = vmul.f32 %v3797_v55, %v9578_v40  ;;  %v9589_v54 = vld [vmem:[#allocation58_spill] sm:$0xff] }
 0x5d5   : > { %v8522_v4 = vmul.f32 %v3797_v55, %v9579_v44  ;;  %v8525_v39 = vmul.f32 %v3797_v55, %v9581_v22  ;;  %v8528_v25 = vmul.f32 %v3797_v55, %v9583_v63  ;;  %v8531_v5 = vmul.f32 %v3797_v55, %v9585_v43  ;;  %v9591_v3 = vld [vmem:[#allocation54_spill] sm:$0xff]  ;;  %v9592_v44 = vld [vmem:[#allocation56_spill] sm:$0xff]  ;;  %v9595_v63 = vld [vmem:[#allocation69_spill] sm:$0xff] }
 0x5d6   : > { %v8534_v49 = vmul.f32 %v3797_v55, %v9587_v23  ;;  %v8537_v20 = vmul.f32 %v3797_v55, %v9589_v54  ;;  %v8540_v40 = vmul.f32 %v3797_v55, %v9591_v3  ;;  %v9594_v22 = vld [vmem:[#allocation20_spill] sm:$0xff]  ;;  %v9596_v43 = vld [vmem:[#allocation59_spill] sm:$0xff]  ;;  %v9597_v23 = vld [vmem:[#allocation22_spill] sm:$0xff]  ;;  %v8561_v3 = vmul.f32 %v3797_v55, %v8180_v11 }
 0x5d7   : > { %9580 = vst [vmem:[#allocation79_spill] sm:$0xff] %v8522_v4  ;;  %9582 = vst [vmem:[#allocation28_spill] sm:$0xff] %v8525_v39  ;;  %v8543_v4 = vmul.f32 %v3797_v55, %v9592_v44  ;;  %v8546_v39 = vmul.f32 %v3797_v55, %v9594_v22  ;;  %v9599_v54 = vld [vmem:[#allocation24_spill] sm:$0xff]  ;;  %v9601_v44 = vld [vmem:[#allocation71_spill] sm:$0xff]  ;;  %v8567_v22 = vmul.f32 %v3797_v55, %v8154_v18 }
 0x5d8   : > { %9584 = vst [vmem:[#allocation30_spill] sm:$0xff] %v8528_v25  ;;  %9586 = vst [vmem:[#allocation32_spill] sm:$0xff] %v8531_v5  ;;  %v8549_v25 = vmul.f32 %v3797_v55, %v9595_v63  ;;  %v8552_v5 = vmul.f32 %v3797_v55, %v9596_v43  ;;  %v8570_v63 = vmul.f32 %v3797_v55, %v8207_v60 }
 0x5d9   : > { %9588 = vst [vmem:[#allocation34_spill] sm:$0xff] %v8534_v49  ;;  %9590 = vst [vmem:[#allocation36_spill] sm:$0xff] %v8537_v20  ;;  %v8555_v49 = vmul.f32 %v3797_v55, %v9597_v23  ;;  %v8558_v20 = vmul.f32 %v3797_v55, %v9599_v54  ;;  %v8573_v43 = vmul.f32 %v3797_v55, %v8248_v7  ;;  %v9602_v23 = vld [vmem:[#allocation26_spill] sm:$0xff]  ;;  %v9604_v54 = vld [vmem:[#allocation75_spill] sm:$0xff] }
 0x5da   : > { %9593 = vst [vmem:[#allocation38_spill] sm:$0xff] %v8543_v4  ;;  %v8564_v4 = vmul.f32 %v3797_v55, %v9601_v44  ;;  %v3835_v11 = vmul.f32 %v8483_v10, %v8318_v34  ;;  %v3836_v44 = vmul.f32 %v8483_v10, %v8315_v59  ;;  %v3837_v18 = vmul.f32 %v8483_v10, %v8323_v1 }
 0x5db   : > { %9598 = vst [vmem:[#allocation40_spill] sm:$0xff] %v8555_v49  ;;  %9600 = vst [vmem:[#allocation42_spill] sm:$0xff] %v8558_v20  ;;  %v8576_v49 = vmul.f32 %v3797_v55, %v9602_v23  ;;  %v8579_v20 = vmul.f32 %v3797_v55, %v9604_v54  ;;  %v3838_v60 = vmul.f32 %v8483_v10, %v8330_v32 }
 0x5dc   : > { %v3839_v7 = vmul.f32 %v8483_v10, %v8335_v45  ;;  %v3840_v23 = vmul.f32 %v8483_v10, %v8340_v16  ;;  %v3841_v55 = vmul.f32 %v8483_v10, %v8343_v21  ;;  %v3842_v34 = vmul.f32 %v8483_v10, %v8350_v24 }
 0x5dd   : > { %9603 = vst [vmem:[#allocation44_spill] sm:$0xff] %v8576_v49  ;;  %9605 = vst [vmem:[#allocation15_spill] sm:$0xff] %v8579_v20  ;;  %v3843_v59 = vmul.f32 %v8483_v10, %v8355_v42  ;;  %v3844_v1 = vmul.f32 %v8483_v10, %v8363_v57  ;;  %v3845_v32 = vmul.f32 %v8483_v10, %v8358_v51 }
 0x5de   : > { %v3846_v45 = vmul.f32 %v8483_v10, %v8366_v9  ;;  %v3847_v16 = vmul.f32 %v8483_v10, %v8375_v37  ;;  %v3848_v21 = vmul.f32 %v8483_v10, %v8383_v31  ;;  %v3849_v24 = vmul.f32 %v8483_v10, %v8378_v15 }
 0x5df   : > { %v3850_v42 = vmul.f32 %v8483_v10, %v8386_v28  ;;  %v3851_v57 = vmul.f32 %v8483_v10, %v8397_v62  ;;  %v3852_v51 = vmul.f32 %v8483_v10, %v8405_v52  ;;  %v3853_v9 = vmul.f32 %v8483_v10, %v8400_v12 }
 0x5e0   : > { %v3854_v37 = vmul.f32 %v8483_v10, %v8408_v19  ;;  %v3855_v31 = vmul.f32 %v8483_v10, %v8417_v8  ;;  %v3856_v15 = vmul.f32 %v8483_v10, %v8425_v26  ;;  %v3857_v28 = vmul.f32 %v8483_v10, %v8420_v35 }
 0x5e1   : > { %v3858_v62 = vmul.f32 %v8483_v10, %v8428_v14  ;;  %v3859_v52 = vmul.f32 %v8483_v10, %v8437_v6  ;;  %v3860_v12 = vmul.f32 %v8483_v10, %v8445_v33  ;;  %v3861_v19 = vmul.f32 %v8483_v10, %v8440_v48 }
 0x5e2   : > { %v3862_v8 = vmul.f32 %v8483_v10, %v8448_v36  ;;  %v3863_v26 = vmul.f32 %v8483_v10, %v8457_v29  ;;  %v3864_v35 = vmul.f32 %v8483_v10, %v8465_v2  ;;  %v3865_v14 = vmul.f32 %v8483_v10, %v8460_v58 }
 0x5e3   : > { %v3866_v6 = vmul.f32 %v8483_v10, %v8468_v17  ;;  %v3867_v33 = vadd.f32 %v3835_v11, %v8486_v0  ;;  %v3868_v54 = vadd.f32 %v3836_v44, %v8489_v47  ;;  %v3869_v48 = vadd.f32 %v3837_v18, %v8492_v30  ;;  %v9606_v47 = vld [vmem:[#allocation79_spill] sm:$0xff]  ;;  %v9607_v11 = vld [vmem:[#allocation28_spill] sm:$0xff]  ;;  %v9608_v44 = vld [vmem:[#allocation30_spill] sm:$0xff] }
 0x5e4   : > { %v3870_v36 = vadd.f32 %v3838_v60, %v8495_v50  ;;  %v3871_v20 = vadd.f32 %v3839_v7, %v8498_v56  ;;  %v3872_v29 = vadd.f32 %v3840_v23, %v8501_v53  ;;  %v3873_v2 = vadd.f32 %v3841_v55, %v8504_v13  ;;  %v9609_v18 = vld [vmem:[#allocation32_spill] sm:$0xff]  ;;  %v9610_v60 = vld [vmem:[#allocation34_spill] sm:$0xff] }
 0x5e5   : > { %v3874_v49 = vadd.f32 %v3842_v34, %v8507_v38  ;;  %v3875_v58 = vadd.f32 %v3843_v59, %v8510_v41  ;;  %v3876_v17 = vadd.f32 %v3844_v1, %v8513_v27  ;;  %v3877_v10 = vadd.f32 %v3845_v32, %v8516_v46  ;;  %v9611_v7 = vld [vmem:[#allocation36_spill] sm:$0xff]  ;;  %v9612_v23 = vld [vmem:[#allocation38_spill] sm:$0xff] }
 0x5e6   : > { %v3878_v0 = vadd.f32 %v3846_v45, %v8519_v61  ;;  %v3879_v30 = vadd.f32 %v3847_v16, %v9606_v47  ;;  %v3880_v50 = vadd.f32 %v3848_v21, %v9607_v11  ;;  %v3881_v56 = vadd.f32 %v3849_v24, %v9608_v44  ;;  %v9613_v34 = vld [vmem:[#allocation40_spill] sm:$0xff]  ;;  %v9614_v1 = vld [vmem:[#allocation42_spill] sm:$0xff] }
 0x5e7   : > { %v3882_v53 = vadd.f32 %v3850_v42, %v9609_v18  ;;  %v3883_v13 = vadd.f32 %v3851_v57, %v9610_v60  ;;  %v3884_v38 = vadd.f32 %v3852_v51, %v9611_v7  ;;  %v3885_v41 = vadd.f32 %v3853_v9, %v8540_v40  ;;  %v9615_v42 = vld [vmem:[#allocation44_spill] sm:$0xff]  ;;  %v9616_v57 = vld [vmem:[#allocation15_spill] sm:$0xff] }
 0x5e8   : > { %v3886_v27 = vadd.f32 %v3854_v37, %v9612_v23  ;;  %v3887_v46 = vadd.f32 %v3855_v31, %v8546_v39  ;;  %v3888_v61 = vadd.f32 %v3856_v15, %v8549_v25  ;;  %v3889_v55 = vadd.f32 %v3857_v28, %v8552_v5 }
 0x5e9   : > { %v3890_v59 = vadd.f32 %v3858_v62, %v9613_v34  ;;  %v3891_v32 = vadd.f32 %v3859_v52, %v9614_v1  ;;  %v3892_v45 = vadd.f32 %v3860_v12, %v8561_v3  ;;  %v3893_v16 = vadd.f32 %v3861_v19, %v8564_v4 }
 0x5ea   : > { %v3894_v21 = vadd.f32 %v3862_v8, %v8567_v22  ;;  %v3895_v40 = vadd.f32 %v3863_v26, %v8570_v63  ;;  %v3896_v24 = vadd.f32 %v3864_v35, %v8573_v43  ;;  %v3897_v39 = vadd.f32 %v3865_v14, %v9615_v42 }
 0x5eb   : > { %v3898_v25 = vadd.f32 %v3866_v6, %v9616_v57  ;;  %v3899_v51 = vpack.c.bf16 %v3868_v54, %v3867_v33  ;;  %v3900_v5 = vpack.c.bf16 %v3870_v36, %v3869_v48  ;;  %v3901_v9 = vpack.c.bf16 %v3872_v29, %v3871_v20  ;;  %v8701_v20 = vld [vmem:[%s8844_s4 + $0x7] ss:$0 sm:$0xff] }
 0x5ec   : > { %v3902_v37 = vpack.c.bf16 %v3874_v49, %v3873_v2  ;;  %v3903_v31 = vpack.c.bf16 %v3876_v17, %v3875_v58  ;;  %v3904_v15 = vpack.c.bf16 %v3878_v0, %v3877_v10  ;;  %v3905_v28 = vpack.c.bf16 %v3880_v50, %v3879_v30  ;;  %v8696_v49 = vld [vmem:[%s8844_s4 + $0x6] ss:$0 sm:$0xff] }
 0x5ed   : > { %v3906_v3 = vpack.c.bf16 %v3882_v53, %v3881_v56  ;;  %v3907_v62 = vpack.c.bf16 %v3884_v38, %v3883_v13  ;;  %v3908_v4 = vpack.c.bf16 %v3886_v27, %v3885_v41  ;;  %v3909_v52 = vpack.c.bf16 %v3888_v61, %v3887_v46  ;;  %5011 = vmatprep.mubr.msk.bf16.mxu0 %vm1375_vm2, %v3899_v51 }
 0x5ee   : > { %v3910_v22 = vpack.c.bf16 %v3890_v59, %v3889_v55  ;;  %v3911_v63 = vpack.c.bf16 %v3892_v45, %v3891_v32  ;;  %v3912_v43 = vpack.c.bf16 %v3894_v21, %v3893_v16  ;;  %v3913_v12 = vpack.c.bf16 %v3896_v24, %v3895_v40  ;;  %5012 = vmatmul.mubr.msk.bf16.vlgmr.msra.gmra.mrb[84].mxu0 %vm1375_vm2, %v3900_v5 }
 0x5ef   : > { %v3914_v19 = vpack.c.bf16 %v3898_v25, %v3897_v39  ;;  %5015 = vmatprep.mubr.msk.bf16.mxu0 %vm1375_vm2, %v3901_v9 }
 0x5f6   : > { %5016 = vmatmul.mubr.msk.bf16.gmra.mrb[88].mxu0 %vm1375_vm2, %v3902_v37 }
 0x5f7   : > { %5019 = vmatprep.mubr.msk.bf16.mxu0 %vm1375_vm2, %v3903_v31 }
 0x5fe   : > { %5020 = vmatmul.mubr.msk.bf16.gmra.mrb[92].mxu0 %vm1375_vm2, %v3904_v15 }
 0x5ff   : > { %5023 = vmatprep.mubr.msk.bf16.mxu0 %vm1375_vm2, %v3905_v28 }
 0x606   : > { %5024 = vmatmul.mubr.msk.bf16.gmra.mrb[96].mxu0 %vm1375_vm2, %v3906_v3 }
 0x607   : > { %5027 = vmatprep.mubr.msk.bf16.mxu0 %vm1375_vm2, %v3907_v62 }
 0x60e   : > { %5028 = vmatmul.mubr.msk.bf16.gmra.mrb[100].mxu0 %vm1375_vm2, %v3908_v4 }
 0x60f   : > { %5031 = vmatprep.mubr.msk.bf16.mxu0 %vm1375_vm2, %v3909_v52 }
 0x616   : > { %5032 = vmatmul.mubr.msk.bf16.gmra.mrb[104].mxu0 %vm1375_vm2, %v3910_v22 }
 0x617   : > { %5035 = vmatprep.mubr.msk.bf16.mxu0 %vm1375_vm2, %v3911_v63 }
 0x61e   : > { %5036 = vmatmul.mubr.msk.bf16.gmra.mrb[108].mxu0 %vm1375_vm2, %v3912_v43 }
 0x61f   : > { %5039 = vmatprep.mubr.msk.bf16.mxu0 %vm1375_vm2, %v3913_v12 }
 0x626   : > { %5040 = vmatmul.mubr.msk.bf16.gmra.mrb[112].mxu0 %vm1375_vm2, %v3914_v19 }
 0x6c1   : > { %v5013_v8 = vpop.f32.mrb[84].mxu0 }
 0x6c2   : > { %v4135_v26 = vmul.f32 %v5013_v8, %v8696_v49  ;;  %v4000_v35 = vpop.f32.mrb[85].mxu0 }
 0x6c3   : > { %v4133_v14 = vmul.f32 %v8696_v49, %v4000_v35  ;;  %v5014_v6 = vpop.f32.mrb[86].mxu0 }
 0x6c4   : > { %v4173_v33 = vadd.f32 %v8701_v20, %v4135_v26  ;;  %v4136_v54 = vmul.f32 %v5014_v6, %v8696_v49  ;;  %v4003_v48 = vpop.f32.mrb[87].mxu0 }
 0x6c5   : > { %v4171_v36 = vadd.f32 %v8701_v20, %v4133_v14  ;;  %v4134_v29 = vmul.f32 %v8696_v49, %v4003_v48 }
 0x6c6   : > { %v4205_v2 = vmax.f32 %v4173_v33, 0.0  ;;  %v4174_v58 = vadd.f32 %v8701_v20, %v4136_v54 }
 0x6c7   : > { %v4203_v17 = vmax.f32 %v4171_v36, 0.0  ;;  %v4172_v10 = vadd.f32 %v8701_v20, %v4134_v29 }
 0x6c8   : > { %4237 = vst.msk [vmem:[%s8711_s13 + $0x10] sm:$0xff] %vm1375_vm2, %v4205_v2  ;;  %v4206_v0 = vmax.f32 %v4174_v58, 0.0 }
 0x6c9   : > { %4235 = vst.msk [vmem:[%s8711_s13] sm:$0xff] %vm1375_vm2, %v4203_v17  ;;  %v4204_v47 = vmax.f32 %v4172_v10, 0.0  ;;  %v5017_v30 = vpop.f32.mrb[88].mxu0 }
 0x6ca   : > { %4238 = vst.msk [vmem:[%s8711_s13 + $0x18] sm:$0xff] %vm1375_vm2, %v4206_v0  ;;  %v4139_v11 = vmul.f32 %v5017_v30, %v8696_v49  ;;  %v4016_v50 = vpop.f32.mrb[89].mxu0 }
 0x6cb   : > { %4236 = vst.msk [vmem:[%s8711_s13 + $0x8] sm:$0xff] %vm1375_vm2, %v4204_v47  ;;  %v4137_v44 = vmul.f32 %v8696_v49, %v4016_v50  ;;  %v5018_v56 = vpop.f32.mrb[90].mxu0 }
 0x6cc   : > { %v4177_v18 = vadd.f32 %v8701_v20, %v4139_v11  ;;  %v4140_v53 = vmul.f32 %v5018_v56, %v8696_v49  ;;  %v4019_v60 = vpop.f32.mrb[91].mxu0 }
 0x6cd   : > { %v4175_v13 = vadd.f32 %v8701_v20, %v4137_v44  ;;  %v4138_v7 = vmul.f32 %v8696_v49, %v4019_v60 }
 0x6ce   : > { %v4209_v38 = vmax.f32 %v4177_v18, 0.0  ;;  %v4178_v41 = vadd.f32 %v8701_v20, %v4140_v53 }
 0x6cf   : > { %v4207_v23 = vmax.f32 %v4175_v13, 0.0  ;;  %v4176_v27 = vadd.f32 %v8701_v20, %v4138_v7 }
 0x6d0   : > { %4241 = vst.msk [vmem:[%s8711_s13 + $0x30] sm:$0xff] %vm1375_vm2, %v4209_v38  ;;  %v4210_v46 = vmax.f32 %v4178_v41, 0.0 }
 0x6d1   : > { %4239 = vst.msk [vmem:[%s8711_s13 + $0x20] sm:$0xff] %vm1375_vm2, %v4207_v23  ;;  %v4208_v61 = vmax.f32 %v4176_v27, 0.0  ;;  %v5021_v55 = vpop.f32.mrb[92].mxu0 }
 0x6d2   : > { %4242 = vst.msk [vmem:[%s8711_s13 + $0x38] sm:$0xff] %vm1375_vm2, %v4210_v46  ;;  %v4143_v34 = vmul.f32 %v5021_v55, %v8696_v49  ;;  %v4032_v59 = vpop.f32.mrb[93].mxu0 }
 0x6d3   : > { %4240 = vst.msk [vmem:[%s8711_s13 + $0x28] sm:$0xff] %vm1375_vm2, %v4208_v61  ;;  %v4141_v1 = vmul.f32 %v8696_v49, %v4032_v59  ;;  %v5022_v32 = vpop.f32.mrb[94].mxu0 }
 0x6d4   : > { %v4181_v45 = vadd.f32 %v8701_v20, %v4143_v34  ;;  %v4144_v16 = vmul.f32 %v5022_v32, %v8696_v49  ;;  %v4035_v21 = vpop.f32.mrb[95].mxu0 }
 0x6d5   : > { %v4179_v40 = vadd.f32 %v8701_v20, %v4141_v1  ;;  %v4142_v24 = vmul.f32 %v8696_v49, %v4035_v21 }
 0x6d6   : > { %v4213_v42 = vmax.f32 %v4181_v45, 0.0  ;;  %v4182_v39 = vadd.f32 %v8701_v20, %v4144_v16 }
 0x6d7   : > { %v4211_v57 = vmax.f32 %v4179_v40, 0.0  ;;  %v4180_v25 = vadd.f32 %v8701_v20, %v4142_v24 }
 0x6d8   : > { %4245 = vst.msk [vmem:[%s8711_s13 + $0x50] sm:$0xff] %vm1375_vm2, %v4213_v42  ;;  %v4214_v51 = vmax.f32 %v4182_v39, 0.0 }
 0x6d9   : > { %4243 = vst.msk [vmem:[%s8711_s13 + $0x40] sm:$0xff] %vm1375_vm2, %v4211_v57  ;;  %v4212_v5 = vmax.f32 %v4180_v25, 0.0  ;;  %v5025_v9 = vpop.f32.mrb[96].mxu0 }
 0x6da   : > { %4246 = vst.msk [vmem:[%s8711_s13 + $0x58] sm:$0xff] %vm1375_vm2, %v4214_v51  ;;  %v4147_v37 = vmul.f32 %v5025_v9, %v8696_v49  ;;  %v4048_v31 = vpop.f32.mrb[97].mxu0 }
 0x6db   : > { %4244 = vst.msk [vmem:[%s8711_s13 + $0x48] sm:$0xff] %vm1375_vm2, %v4212_v5  ;;  %v4145_v15 = vmul.f32 %v8696_v49, %v4048_v31  ;;  %v5026_v28 = vpop.f32.mrb[98].mxu0 }
 0x6dc   : > { %v4185_v3 = vadd.f32 %v8701_v20, %v4147_v37  ;;  %v4148_v62 = vmul.f32 %v5026_v28, %v8696_v49  ;;  %v4051_v4 = vpop.f32.mrb[99].mxu0 }
 0x6dd   : > { %v4183_v52 = vadd.f32 %v8701_v20, %v4145_v15  ;;  %v4146_v22 = vmul.f32 %v8696_v49, %v4051_v4 }
 0x6de   : > { %v4217_v63 = vmax.f32 %v4185_v3, 0.0  ;;  %v4186_v43 = vadd.f32 %v8701_v20, %v4148_v62 }
 0x6df   : > { %v4215_v12 = vmax.f32 %v4183_v52, 0.0  ;;  %v4184_v19 = vadd.f32 %v8701_v20, %v4146_v22 }
 0x6e0   : > { %4249 = vst.msk [vmem:[%s8711_s13 + $0x70] sm:$0xff] %vm1375_vm2, %v4217_v63  ;;  %v4218_v8 = vmax.f32 %v4186_v43, 0.0 }
 0x6e1   : > { %4247 = vst.msk [vmem:[%s8711_s13 + $0x60] sm:$0xff] %vm1375_vm2, %v4215_v12  ;;  %v4216_v26 = vmax.f32 %v4184_v19, 0.0  ;;  %v5029_v35 = vpop.f32.mrb[100].mxu0 }
 0x6e2   : > { %4250 = vst.msk [vmem:[%s8711_s13 + $0x78] sm:$0xff] %vm1375_vm2, %v4218_v8  ;;  %v4151_v14 = vmul.f32 %v5029_v35, %v8696_v49  ;;  %v4064_v6 = vpop.f32.mrb[101].mxu0 }
 0x6e3   : > { %4248 = vst.msk [vmem:[%s8711_s13 + $0x68] sm:$0xff] %vm1375_vm2, %v4216_v26  ;;  %v4149_v33 = vmul.f32 %v8696_v49, %v4064_v6  ;;  %v5030_v54 = vpop.f32.mrb[102].mxu0 }
 0x6e4   : > { %v4189_v48 = vadd.f32 %v8701_v20, %v4151_v14  ;;  %v4152_v36 = vmul.f32 %v5030_v54, %v8696_v49  ;;  %v4067_v29 = vpop.f32.mrb[103].mxu0 }
 0x6e5   : > { %v4187_v2 = vadd.f32 %v8701_v20, %v4149_v33  ;;  %v4150_v58 = vmul.f32 %v8696_v49, %v4067_v29 }
 0x6e6   : > { %v4221_v17 = vmax.f32 %v4189_v48, 0.0  ;;  %v4190_v10 = vadd.f32 %v8701_v20, %v4152_v36 }
 0x6e7   : > { %v4219_v0 = vmax.f32 %v4187_v2, 0.0  ;;  %v4188_v47 = vadd.f32 %v8701_v20, %v4150_v58 }
 0x6e8   : > { %4253 = vst.msk [vmem:[%s8711_s13 + $0x90] sm:$0xff] %vm1375_vm2, %v4221_v17  ;;  %v4222_v30 = vmax.f32 %v4190_v10, 0.0 }
 0x6e9   : > { %4251 = vst.msk [vmem:[%s8711_s13 + $0x80] sm:$0xff] %vm1375_vm2, %v4219_v0  ;;  %v4220_v11 = vmax.f32 %v4188_v47, 0.0  ;;  %v5033_v50 = vpop.f32.mrb[104].mxu0 }
 0x6ea   : > { %4254 = vst.msk [vmem:[%s8711_s13 + $0x98] sm:$0xff] %vm1375_vm2, %v4222_v30  ;;  %v4155_v44 = vmul.f32 %v5033_v50, %v8696_v49  ;;  %v4080_v56 = vpop.f32.mrb[105].mxu0 }
 0x6eb   : > { %4252 = vst.msk [vmem:[%s8711_s13 + $0x88] sm:$0xff] %vm1375_vm2, %v4220_v11  ;;  %v4153_v18 = vmul.f32 %v8696_v49, %v4080_v56  ;;  %v5034_v53 = vpop.f32.mrb[106].mxu0 }
 0x6ec   : > { %v4193_v60 = vadd.f32 %v8701_v20, %v4155_v44  ;;  %v4156_v13 = vmul.f32 %v5034_v53, %v8696_v49  ;;  %v4083_v7 = vpop.f32.mrb[107].mxu0 }
 0x6ed   : > { %v4191_v38 = vadd.f32 %v8701_v20, %v4153_v18  ;;  %v4154_v41 = vmul.f32 %v8696_v49, %v4083_v7 }
 0x6ee   : > { %v4225_v23 = vmax.f32 %v4193_v60, 0.0  ;;  %v4194_v27 = vadd.f32 %v8701_v20, %v4156_v13 }
 0x6ef   : > { %v4223_v46 = vmax.f32 %v4191_v38, 0.0  ;;  %v4192_v61 = vadd.f32 %v8701_v20, %v4154_v41 }
 0x6f0   : > { %4257 = vst.msk [vmem:[%s8711_s13 + $0xb0] sm:$0xff] %vm1375_vm2, %v4225_v23  ;;  %v4226_v55 = vmax.f32 %v4194_v27, 0.0 }
 0x6f1   : > { %4255 = vst.msk [vmem:[%s8711_s13 + $0xa0] sm:$0xff] %vm1375_vm2, %v4223_v46  ;;  %v4224_v34 = vmax.f32 %v4192_v61, 0.0  ;;  %v5037_v59 = vpop.f32.mrb[108].mxu0 }
 0x6f2   : > { %4258 = vst.msk [vmem:[%s8711_s13 + $0xb8] sm:$0xff] %vm1375_vm2, %v4226_v55  ;;  %v4159_v1 = vmul.f32 %v5037_v59, %v8696_v49  ;;  %v4096_v32 = vpop.f32.mrb[109].mxu0 }
 0x6f3   : > { %4256 = vst.msk [vmem:[%s8711_s13 + $0xa8] sm:$0xff] %vm1375_vm2, %v4224_v34  ;;  %v4157_v45 = vmul.f32 %v8696_v49, %v4096_v32  ;;  %v5038_v16 = vpop.f32.mrb[110].mxu0 }
 0x6f4   : > { %v4197_v21 = vadd.f32 %v8701_v20, %v4159_v1  ;;  %v4160_v40 = vmul.f32 %v5038_v16, %v8696_v49  ;;  %v4099_v24 = vpop.f32.mrb[111].mxu0 }
 0x6f5   : > { %v4195_v42 = vadd.f32 %v8701_v20, %v4157_v45  ;;  %v4158_v39 = vmul.f32 %v8696_v49, %v4099_v24 }
 0x6f6   : > { %v4229_v57 = vmax.f32 %v4197_v21, 0.0  ;;  %v4198_v25 = vadd.f32 %v8701_v20, %v4160_v40 }
 0x6f7   : > { %v4227_v51 = vmax.f32 %v4195_v42, 0.0  ;;  %v4196_v5 = vadd.f32 %v8701_v20, %v4158_v39 }
 0x6f8   : > { %4261 = vst.msk [vmem:[%s8711_s13 + $0xd0] sm:$0xff] %vm1375_vm2, %v4229_v57  ;;  %v4230_v9 = vmax.f32 %v4198_v25, 0.0 }
 0x6f9   : > { %4259 = vst.msk [vmem:[%s8711_s13 + $0xc0] sm:$0xff] %vm1375_vm2, %v4227_v51  ;;  %v4228_v37 = vmax.f32 %v4196_v5, 0.0  ;;  %v5041_v31 = vpop.f32.mrb[112].mxu0 }
 0x6fa   : > { %4262 = vst.msk [vmem:[%s8711_s13 + $0xd8] sm:$0xff] %vm1375_vm2, %v4230_v9  ;;  %v4163_v15 = vmul.f32 %v5041_v31, %v8696_v49  ;;  %v4112_v28 = vpop.f32.mrb[113].mxu0 }
 0x6fb   : > { %4260 = vst.msk [vmem:[%s8711_s13 + $0xc8] sm:$0xff] %vm1375_vm2, %v4228_v37  ;;  %v4161_v3 = vmul.f32 %v8696_v49, %v4112_v28  ;;  %v5042_v62 = vpop.f32.mrb[114].mxu0 }
 0x6fc   : > { %v4201_v4 = vadd.f32 %v8701_v20, %v4163_v15  ;;  %v4164_v52 = vmul.f32 %v5042_v62, %v8696_v49  ;;  %v4115_v22 = vpop.f32.mrb[115].mxu0 }
 0x6fd   : > { %v4199_v63 = vadd.f32 %v8701_v20, %v4161_v3  ;;  %v4162_v43 = vmul.f32 %v8696_v49, %v4115_v22 }
 0x6fe   : > { %v4233_v12 = vmax.f32 %v4201_v4, 0.0  ;;  %v4202_v19 = vadd.f32 %v8701_v20, %v4164_v52 }
 0x6ff   : > { %v4231_v8 = vmax.f32 %v4199_v63, 0.0  ;;  %v4200_v26 = vadd.f32 %v8701_v20, %v4162_v43 }
 0x700   : > { %4265 = vst.msk [vmem:[%s8711_s13 + $0xf0] sm:$0xff] %vm1375_vm2, %v4233_v12  ;;  %v4234_v35 = vmax.f32 %v4202_v19, 0.0 }
 0x701   : > { %4263 = vst.msk [vmem:[%s8711_s13 + $0xe0] sm:$0xff] %vm1375_vm2, %v4231_v8  ;;  %v4232_v14 = vmax.f32 %v4200_v26, 0.0 }
 0x702   : > { %4266 = vst.msk [vmem:[%s8711_s13 + $0xf8] sm:$0xff] %vm1375_vm2, %v4234_v35 }
 0x703   : > { %4264 = vst.msk [vmem:[%s8711_s13 + $0xe8] sm:$0xff] %vm1375_vm2, %v4232_v14 }
 0x704 PF: > { %s17_s21 = sadd.s32 1, %s5657_s21  }
 0x705   : > { %p14_p1 = scmp.ge.s32.totalorder %s17_s21, 4  }
 0x707   :  { %16 = sbr.rel (!%p14_p1) target bundleno = 1 (0x1), region = 96 }
 0x70e   :  { %4288 = vsyncpa [#allocation3], 1 }
 0x70f   :  { %4290 = vsyncpa [#allocation3 + $0x1], 1 }

</bundles_post_ra>
